<compile_context>
chip_gen: v7x
topology: tpu7x:2x2x1
jax: 0.10.0
libtpu: 0.0.40
codegen_flags: <defaults>
</compile_context>

<pallas_src>
import functools
import jax
import jax.numpy as jnp
from jax.experimental import pallas as pl
from jax.experimental.pallas import tpu as pltpu

EPS = 1e-5


def _round_up(x, m):
    return (x + m - 1) // m * m


def _mm_tiles(M, K, C):
    """Per-layer tile sizes: keep weights / K fully resident, big M tiles."""
    if M <= 1024:
        TM = _round_up(max(M, 16), 16)
        Mp = TM
    else:
        TM = 512
        Mp = _round_up(M, 512)
    Kp = _round_up(K, 128)
    if Kp <= 1024:
        TK = Kp
    else:
        Kp = _round_up(K, 512)
        TK = 512
    Cp = _round_up(C, 128)
    if Cp <= 512:
        TN = Cp
    else:
        Cp = _round_up(C, 256)
        TN = 256
    return TM, Mp, TK, Kp, TN, Cp


# ----------------------------------------------------------------------------
# Kernel 1: tiled bf16 matmul (f32 acc) with fused BN-statistics side outputs
# ----------------------------------------------------------------------------
def _mm_stats_kernel(a_ref, b_ref, o_ref, sum_ref, ssq_ref, acc_ref):
    i = pl.program_id(1)
    k = pl.program_id(2)

    @pl.when(k == 0)
    def _():
        acc_ref[...] = jnp.zeros_like(acc_ref)

    acc_ref[...] += jnp.dot(a_ref[...], b_ref[...],
                            preferred_element_type=jnp.float32)

    @pl.when(k == pl.num_programs(2) - 1)
    def _():
        y = acc_ref[...]
        o_ref[...] = y.astype(o_ref.dtype)

        @pl.when(i == 0)
        def _():
            sum_ref[...] = jnp.zeros_like(sum_ref)
            ssq_ref[...] = jnp.zeros_like(ssq_ref)

        sum_ref[...] += jnp.sum(y, axis=0, keepdims=True)
        ssq_ref[...] += jnp.sum(y * y, axis=0, keepdims=True)


def pallas_matmul_stats(A, B):
    """A: (M, K) bf16, B: (K, C) bf16 -> y (M, C) bf16, colsum (C,) f32, colssq (C,) f32."""
    M, K = A.shape
    _, C = B.shape
    TM, Mp, TK, Kp, TN, Cp = _mm_tiles(M, K, C)
    Ap = jnp.pad(A, ((0, Mp - M), (0, Kp - K)))
    Bp = jnp.pad(B, ((0, Kp - K), (0, Cp - C)))

    y, s, ss = pl.pallas_call(
        _mm_stats_kernel,
        out_shape=(jax.ShapeDtypeStruct((Mp, Cp), jnp.bfloat16),
                   jax.ShapeDtypeStruct((1, Cp), jnp.float32),
                   jax.ShapeDtypeStruct((1, Cp), jnp.float32)),
        grid_spec=pltpu.PrefetchScalarGridSpec(
            num_scalar_prefetch=0,
            # grid order (j, i, k): stats block (0, j) stays resident across i & k
            grid=(Cp // TN, Mp // TM, Kp // TK),
            in_specs=[
                pl.BlockSpec((TM, TK), lambda j, i, k: (i, k)),
                pl.BlockSpec((TK, TN), lambda j, i, k: (k, j)),
            ],
            out_specs=[
                pl.BlockSpec((TM, TN), lambda j, i, k: (i, j)),
                pl.BlockSpec((1, TN), lambda j, i, k: (0, j)),
                pl.BlockSpec((1, TN), lambda j, i, k: (0, j)),
            ],
            scratch_shapes=[pltpu.VMEM((TM, TN), jnp.float32)],
        ),
        compiler_params=pltpu.CompilerParams(
            dimension_semantics=("parallel", "arbitrary", "arbitrary")),
    )(Ap, Bp)
    return y[:M, :C], s[0, :C], ss[0, :C]


# ----------------------------------------------------------------------------
# Kernel 2: tiled bf16 matmul with fused per-column bias + activation (final conv)
# ----------------------------------------------------------------------------
def _mm_bias_act_kernel(a_ref, b_ref, bias_ref, o_ref, acc_ref, *, act):
    k = pl.program_id(2)

    @pl.when(k == 0)
    def _():
        acc_ref[...] = jnp.zeros_like(acc_ref)

    acc_ref[...] += jnp.dot(a_ref[...], b_ref[...],
                            preferred_element_type=jnp.float32)

    @pl.when(k == pl.num_programs(2) - 1)
    def _():
        y = acc_ref[...] + bias_ref[...]
        if act == "relu":
            y = jnp.maximum(y, 0.0)
        elif act == "tanh":
            y = jnp.tanh(y)
        o_ref[...] = y.astype(o_ref.dtype)


def pallas_matmul_bias_act(A, B, bias, act="none", out_dtype=jnp.float32):
    M, K = A.shape
    _, C = B.shape
    TM, Mp, TK, Kp, TN, Cp = _mm_tiles(M, K, C)
    Ap = jnp.pad(A, ((0, Mp - M), (0, Kp - K)))
    Bp = jnp.pad(B, ((0, Kp - K), (0, Cp - C)))
    biasp = jnp.pad(bias.reshape(1, C).astype(jnp.float32), ((0, 0), (0, Cp - C)))

    out = pl.pallas_call(
        functools.partial(_mm_bias_act_kernel, act=act),
        out_shape=jax.ShapeDtypeStruct((Mp, Cp), out_dtype),
        grid_spec=pltpu.PrefetchScalarGridSpec(
            num_scalar_prefetch=0,
            grid=(Mp // TM, Cp // TN, Kp // TK),
            in_specs=[
                pl.BlockSpec((TM, TK), lambda i, j, k: (i, k)),
                pl.BlockSpec((TK, TN), lambda i, j, k: (k, j)),
                pl.BlockSpec((1, TN), lambda i, j, k: (0, j)),
            ],
            out_specs=pl.BlockSpec((TM, TN), lambda i, j, k: (i, j)),
            scratch_shapes=[pltpu.VMEM((TM, TN), jnp.float32)],
        ),
        compiler_params=pltpu.CompilerParams(
            dimension_semantics=("parallel", "parallel", "arbitrary")),
    )(Ap, Bp, biasp)
    return out[:M, :C]


# ----------------------------------------------------------------------------
# Kernel 3: fused BN affine + activation (+ optional residual add), bf16 in/out
# ----------------------------------------------------------------------------
def _affine_kernel(x_ref, scale_ref, shift_ref, *rest, act, has_res):
    if has_res:
        res_ref, o_ref = rest
    else:
        (o_ref,) = rest
    y = x_ref[...].astype(jnp.float32) * scale_ref[...] + shift_ref[...]
    if act == "relu":
        y = jnp.maximum(y, 0.0)
    elif act == "tanh":
        y = jnp.tanh(y)
    if has_res:
        y = y + res_ref[...].astype(jnp.float32)
    o_ref[...] = y.astype(o_ref.dtype)


def pallas_affine_act(X, scale, shift, act="none", residual=None):
    """X: (M, C) bf16, scale/shift: (C,) f32. act(X*scale + shift) [+ residual], bf16 out."""
    M, C = X.shape
    if M <= 2048:
        TMa = _round_up(max(M, 16), 16)
        Mp = TMa
    else:
        TMa = 1024
        Mp = _round_up(M, 1024)
    Cp = _round_up(C, 128)

    Xp = jnp.pad(X, ((0, Mp - M), (0, Cp - C)))
    sp = jnp.pad(scale.reshape(1, C).astype(jnp.float32), ((0, 0), (0, Cp - C)))
    bp = jnp.pad(shift.reshape(1, C).astype(jnp.float32), ((0, 0), (0, Cp - C)))

    has_res = residual is not None
    in_specs = [
        pl.BlockSpec((TMa, Cp), lambda i: (i, 0)),
        pl.BlockSpec((1, Cp), lambda i: (0, 0)),
        pl.BlockSpec((1, Cp), lambda i: (0, 0)),
    ]
    args = [Xp, sp, bp]
    if has_res:
        Rp = jnp.pad(residual.astype(jnp.bfloat16), ((0, Mp - M), (0, Cp - C)))
        in_specs.append(pl.BlockSpec((TMa, Cp), lambda i: (i, 0)))
        args.append(Rp)

    out = pl.pallas_call(
        functools.partial(_affine_kernel, act=act, has_res=has_res),
        out_shape=jax.ShapeDtypeStruct((Mp, Cp), jnp.bfloat16),
        grid_spec=pltpu.PrefetchScalarGridSpec(
            num_scalar_prefetch=0,
            grid=(Mp // TMa,),
            in_specs=in_specs,
            out_specs=pl.BlockSpec((TMa, Cp), lambda i: (i, 0)),
        ),
        compiler_params=pltpu.CompilerParams(dimension_semantics=("parallel",)),
    )(*args)
    return out[:M, :C]


# ----------------------------------------------------------------------------
# Conv layers (im2col glue in bf16 JAX, matmuls + BN + act in Pallas)
# ----------------------------------------------------------------------------
def _im2col(x, kh, kw, stride):
    """x: (N, H, W, C) NHWC bf16. Patch ordering (kh, kw, C) matches weight reshape."""
    N, H, W, C = x.shape
    Ho = (H - kh) // stride + 1
    Wo = (W - kw) // stride + 1
    cols = []
    for dy in range(kh):
        for dx in range(kw):
            cols.append(x[:, dy:dy + stride * Ho:stride, dx:dx + stride * Wo:stride, :])
    patches = jnp.concatenate(cols, axis=-1)                 # (N, Ho, Wo, kh*kw*C)
    return patches.reshape(N * Ho * Wo, kh * kw * C), (N, Ho, Wo)


def _bn_scale_shift(colsum, colssq, count, gamma, beta):
    mean = colsum / count
    var = jnp.maximum(colssq / count - mean * mean, 0.0)     # biased var (matches BN)
    scale = gamma * jax.lax.rsqrt(var + EPS)
    shift = beta - mean * scale
    return scale, shift


def conv_bn_act(x, w, gamma, beta, *, stride, pad, pad_mode, act, residual=None):
    """Conv2d(no bias) -> BatchNorm2d (train-mode batch stats) -> act [+ residual]."""
    cout, cin, kh, kw = w.shape
    if pad > 0:
        x = jnp.pad(x, ((0, 0), (pad, pad), (pad, pad), (0, 0)), mode=pad_mode)
    A, (N, Ho, Wo) = _im2col(x, kh, kw, stride)
    Wm = jnp.transpose(w, (2, 3, 1, 0)).reshape(kh * kw * cin, cout).astype(jnp.bfloat16)
    y, colsum, colssq = pallas_matmul_stats(A, Wm)
    count = N * Ho * Wo
    scale, shift = _bn_scale_shift(colsum, colssq, count, gamma, beta)
    r = None if residual is None else residual.reshape(N * Ho * Wo, cout)
    y = pallas_affine_act(y, scale, shift, act=act, residual=r)
    return y.reshape(N, Ho, Wo, cout)


def conv_transpose_bn_relu(x, wt, gamma, beta):
    """ConvTranspose2d(k=3, s=2, p=1, op=1, bias=False) -> BN -> ReLU.

    4-phase sub-pixel decomposition: output pixel (2m+r, 2n+c) comes from a tiny conv of
    the undilated input, so no zero-dilated buffer and no multiplies against zeros.
    """
    cin, cout, kh, kw = wt.shape
    N, H, W, _ = x.shape
    # one zero row/col at the bottom/right for the "+1"-shifted taps
    xp = jnp.pad(x, ((0, 0), (0, 1), (0, 1), (0, 0)))

    def tap(di, dj):
        return xp[:, di:di + H, dj:dj + W, :]

    # phase (row parity r, col parity c) -> list of (input shift (di,dj), kernel tap (ky,kx))
    phases = {
        (0, 0): [((0, 0), (1, 1))],
        (0, 1): [((0, 0), (1, 2)), ((0, 1), (1, 0))],
        (1, 0): [((0, 0), (2, 1)), ((1, 0), (0, 1))],
        (1, 1): [((0, 0), (2, 2)), ((0, 1), (2, 0)), ((1, 0), (0, 2)), ((1, 1), (0, 0))],
    }

    ys = {}
    tot_s = 0.0
    tot_ss = 0.0
    for rc, taps in phases.items():
        A = jnp.concatenate([tap(di, dj) for (di, dj), _ in taps],
                            axis=-1).reshape(N * H * W, len(taps) * cin)
        Wm = jnp.concatenate([wt[:, :, ky, kx] for _, (ky, kx) in taps],
                             axis=0).astype(jnp.bfloat16)
        y, s, ss = pallas_matmul_stats(A, Wm)
        ys[rc] = y
        tot_s = tot_s + s
        tot_ss = tot_ss + ss

    count = N * (2 * H) * (2 * W)
    scale, shift = _bn_scale_shift(tot_s, tot_ss, count, gamma, beta)

    outs = {rc: pallas_affine_act(y, scale, shift, act="relu").reshape(N, H, W, cout)
            for rc, y in ys.items()}
    # interleave the four phases into the 2x upsampled map
    row0 = jnp.stack([outs[(0, 0)], outs[(0, 1)]], axis=3)   # (N, H, W, 2, C)
    row1 = jnp.stack([outs[(1, 0)], outs[(1, 1)]], axis=3)
    arr = jnp.stack([row0, row1], axis=2)                    # (N, H, 2, W, 2, C)
    return arr.reshape(N, 2 * H, 2 * W, cout)


def final_conv_tanh(x, w, b):
    """ReflectionPad2d(3) -> Conv2d(k=7, bias=True) -> Tanh, fused in the matmul kernel."""
    cout, cin, kh, kw = w.shape
    x = jnp.pad(x, ((0, 0), (3, 3), (3, 3), (0, 0)), mode="reflect")
    A, (N, Ho, Wo) = _im2col(x, kh, kw, 1)
    Wm = jnp.transpose(w, (2, 3, 1, 0)).reshape(kh * kw * cin, cout).astype(jnp.bfloat16)
    y = pallas_matmul_bias_act(A, Wm, b, act="tanh", out_dtype=jnp.float32)
    return y.reshape(N, Ho, Wo, cout)


# ----------------------------------------------------------------------------
# Parameters (deterministic synthetic init) and forward pass
# ----------------------------------------------------------------------------
def build_params(key, input_nc, output_nc, ngf, n_blocks):
    def conv_w(k, shape):
        return jax.random.normal(k, shape, jnp.float32) * 0.02

    keys = iter(jax.random.split(key, 64))
    p = {}
    p["c1_w"] = conv_w(next(keys), (ngf, input_nc, 7, 7))
    p["c1_g"], p["c1_b"] = jnp.ones((ngf,)), jnp.zeros((ngf,))
    p["d1_w"] = conv_w(next(keys), (ngf * 2, ngf, 3, 3))
    p["d1_g"], p["d1_b"] = jnp.ones((ngf * 2,)), jnp.zeros((ngf * 2,))
    p["d2_w"] = conv_w(next(keys), (ngf * 4, ngf * 2, 3, 3))
    p["d2_g"], p["d2_b"] = jnp.ones((ngf * 4,)), jnp.zeros((ngf * 4,))
    dim = ngf * 4
    blocks = []
    for _ in range(n_blocks):
        blk = {
            "w1": conv_w(next(keys), (dim, dim, 3, 3)),
            "g1": jnp.ones((dim,)), "b1": jnp.zeros((dim,)),
            "w2": conv_w(next(keys), (dim, dim, 3, 3)),
            "g2": jnp.ones((dim,)), "b2": jnp.zeros((dim,)),
        }
        blocks.append(blk)
    p["blocks"] = blocks
    # ConvTranspose weights have PyTorch shape (C_in, C_out, kh, kw)
    p["u1_w"] = conv_w(next(keys), (ngf * 4, ngf * 2, 3, 3))
    p["u1_g"], p["u1_b"] = jnp.ones((ngf * 2,)), jnp.zeros((ngf * 2,))
    p["u2_w"] = conv_w(next(keys), (ngf * 2, ngf, 3, 3))
    p["u2_g"], p["u2_b"] = jnp.ones((ngf,)), jnp.zeros((ngf,))
    p["f_w"] = conv_w(next(keys), (output_nc, ngf, 7, 7))
    p["f_b"] = jax.random.normal(next(keys), (output_nc,), jnp.float32) * 0.02
    return p


def resnet_generator_forward(params, x_nchw):
    p = params
    x = jnp.transpose(x_nchw, (0, 2, 3, 1)).astype(jnp.bfloat16)   # NCHW -> NHWC, bf16

    # ReflectionPad(3) + Conv7x7 + BN + ReLU
    x = conv_bn_act(x, p["c1_w"], p["c1_g"], p["c1_b"],
                    stride=1, pad=3, pad_mode="reflect", act="relu")
    # two downsampling convs (stride 2, zero pad 1) + BN + ReLU
    x = conv_bn_act(x, p["d1_w"], p["d1_g"], p["d1_b"],
                    stride=2, pad=1, pad_mode="constant", act="relu")
    x = conv_bn_act(x, p["d2_w"], p["d2_g"], p["d2_b"],
                    stride=2, pad=1, pad_mode="constant", act="relu")
    # residual blocks (reflect pad 1); residual add fused into the second conv's epilogue
    for blk in p["blocks"]:
        y = conv_bn_act(x, blk["w1"], blk["g1"], blk["b1"],
                        stride=1, pad=1, pad_mode="reflect", act="relu")
        x = conv_bn_act(y, blk["w2"], blk["g2"], blk["b2"],
                        stride=1, pad=1, pad_mode="reflect", act="none", residual=x)
    # two upsampling transposed convs (4-phase sub-pixel) + BN + ReLU
    x = conv_transpose_bn_relu(x, p["u1_w"], p["u1_g"], p["u1_b"])
    x = conv_transpose_bn_relu(x, p["u2_w"], p["u2_g"], p["u2_b"])
    # ReflectionPad(3) + Conv7x7 (with bias) + Tanh
    x = final_conv_tanh(x, p["f_w"], p["f_b"])

    return jnp.transpose(x, (0, 3, 1, 2))                          # NHWC -> NCHW (f32)


if __name__ == "__main__":
    key = jax.random.PRNGKey(0)
    k_params, k_input = jax.random.split(key)

    N, input_nc, output_nc, ngf, n_blocks = 2, 4, 3, 16, 6
    H = W = 16

    params = build_params(k_params, input_nc, output_nc, ngf, n_blocks)
    x = jax.random.normal(k_input, (N, input_nc, H, W), jnp.float32)

    fwd = jax.jit(resnet_generator_forward)
    out = fwd(params, x)
    out = jax.block_until_ready(out)

    assert out.shape == (N, output_nc, H, W), out.shape
    assert bool(jnp.all(jnp.isfinite(out)))
    assert bool(jnp.all(jnp.abs(out) <= 1.0 + 1e-6))  # tanh range
    print("KERNEL_OK")
</pallas_src>

<mosaic_0001>
module attributes {stable_mosaic.version = 11 : i64} {
  func.func @_mm_stats_kernel(%arg0: i32, %arg1: i32, %arg2: i32, %arg3: memref<512x256xbf16, #tpu.memory_space<vmem>>, %arg4: memref<256x128xbf16, #tpu.memory_space<vmem>>, %arg5: memref<512x128xbf16, #tpu.memory_space<vmem>>, %arg6: memref<1x128xf32, #tpu.memory_space<vmem>>, %arg7: memref<1x128xf32, #tpu.memory_space<vmem>>, %arg8: memref<512x128xf32, #tpu.memory_space<vmem>>) attributes {dimension_semantics = [#tpu.dimension_semantics<parallel>, #tpu.dimension_semantics<arbitrary>, #tpu.dimension_semantics<arbitrary>], iteration_bounds = array<i64: 1, 1, 1>, scalar_prefetch = 0 : i64, scratch_operands = 1 : i64, tpu.core_type = #tpu.core_type<tc>, window_params = [{transform_indices = @transform_0, window_bounds = array<i64: 512, 256>}, {transform_indices = @transform_1, window_bounds = array<i64: 256, 128>}, {transform_indices = @transform_2, window_bounds = array<i64: 512, 128>}, {transform_indices = @transform_3, window_bounds = array<i64: 1, 128>}, {transform_indices = @transform_4, window_bounds = array<i64: 1, 128>}]} {
    %c0_i32 = arith.constant 0 : i32
    %0 = arith.cmpi eq, %arg2, %c0_i32 : i32
    %1 = arith.extui %0 : i1 to i32
    %c0_i32_0 = arith.constant 0 : i32
    %2 = arith.cmpi ne, %1, %c0_i32_0 : i32
    scf.if %2 {
      %cst_10 = arith.constant 0.000000e+00 : f32
      %12 = vector.broadcast %cst_10 : f32 to vector<512x128xf32>
      %c0_11 = arith.constant 0 : index
      %c0_12 = arith.constant 0 : index
      %13 = vector.load %arg8[%c0_11, %c0_12] : memref<512x128xf32, #tpu.memory_space<vmem>>, vector<512x128xf32>
      tpu.vector_store %arg8[%c0_11, %c0_12], %12 {strides = array<i32>} : memref<512x128xf32, #tpu.memory_space<vmem>>, vector<512x128xf32>,
    } else {
    }
    %c0 = arith.constant 0 : index
    %c0_1 = arith.constant 0 : index
    %3 = vector.load %arg8[%c0, %c0_1] : memref<512x128xf32, #tpu.memory_space<vmem>>, vector<512x128xf32>
    %c0_2 = arith.constant 0 : index
    %c0_3 = arith.constant 0 : index
    %4 = vector.load %arg3[%c0_2, %c0_3] : memref<512x256xbf16, #tpu.memory_space<vmem>>, vector<512x256xbf16>
    %c0_4 = arith.constant 0 : index
    %c0_5 = arith.constant 0 : index
    %5 = vector.load %arg4[%c0_4, %c0_5] : memref<256x128xbf16, #tpu.memory_space<vmem>>, vector<256x128xbf16>
    %cst = arith.constant dense<0.000000e+00> : vector<512x128xf32>
    %6 = tpu.matmul %4, %5, %cst {dimension_numbers = #tpu.dot_dimension_numbers<[1], [0], [0], [1], [0, 0, 1, 1], [], []>} : vector<512x256xbf16>, vector<256x128xbf16>, vector<512x128xf32> -> vector<512x128xf32>
    %7 = arith.addf %3, %6 : vector<512x128xf32>
    %c0_6 = arith.constant 0 : index
    %c0_7 = arith.constant 0 : index
    %8 = vector.load %arg8[%c0_6, %c0_7] : memref<512x128xf32, #tpu.memory_space<vmem>>, vector<512x128xf32>
    tpu.vector_store %arg8[%c0_6, %c0_7], %7 {strides = array<i32>} : memref<512x128xf32, #tpu.memory_space<vmem>>, vector<512x128xf32>,
    %c0_i32_8 = arith.constant 0 : i32
    %9 = arith.cmpi eq, %arg2, %c0_i32_8 : i32
    %10 = arith.extui %9 : i1 to i32
    %c0_i32_9 = arith.constant 0 : i32
    %11 = arith.cmpi ne, %10, %c0_i32_9 : i32
    scf.if %11 {
      %c0_10 = arith.constant 0 : index
      %c0_11 = arith.constant 0 : index
      %12 = vector.load %arg8[%c0_10, %c0_11] : memref<512x128xf32, #tpu.memory_space<vmem>>, vector<512x128xf32>
      %13 = arith.truncf %12 : vector<512x128xf32> to vector<512x128xbf16>
      %c0_12 = arith.constant 0 : index
      %c0_13 = arith.constant 0 : index
      %14 = vector.load %arg5[%c0_12, %c0_13] : memref<512x128xbf16, #tpu.memory_space<vmem>>, vector<512x128xbf16>
      tpu.vector_store %arg5[%c0_12, %c0_13], %13 {strides = array<i32>} : memref<512x128xbf16, #tpu.memory_space<vmem>>, vector<512x128xbf16>,
      %c0_i32_14 = arith.constant 0 : i32
      %15 = arith.cmpi eq, %arg1, %c0_i32_14 : i32
      %16 = arith.extui %15 : i1 to i32
      %c0_i32_15 = arith.constant 0 : i32
      %17 = arith.cmpi ne, %16, %c0_i32_15 : i32
      scf.if %17 {
        %cst_26 = arith.constant 0.000000e+00 : f32
        %29 = vector.broadcast %cst_26 : f32 to vector<1x128xf32>
        %c0_27 = arith.constant 0 : index
        %c0_28 = arith.constant 0 : index
        %30 = vector.load %arg6[%c0_27, %c0_28] : memref<1x128xf32, #tpu.memory_space<vmem>>, vector<1x128xf32>
        tpu.vector_store %arg6[%c0_27, %c0_28], %29 {strides = array<i32>} : memref<1x128xf32, #tpu.memory_space<vmem>>, vector<1x128xf32>,
        %cst_29 = arith.constant 0.000000e+00 : f32
        %31 = vector.broadcast %cst_29 : f32 to vector<1x128xf32>
        %c0_30 = arith.constant 0 : index
        %c0_31 = arith.constant 0 : index
        %32 = vector.load %arg7[%c0_30, %c0_31] : memref<1x128xf32, #tpu.memory_space<vmem>>, vector<1x128xf32>
        tpu.vector_store %arg7[%c0_30, %c0_31], %31 {strides = array<i32>} : memref<1x128xf32, #tpu.memory_space<vmem>>, vector<1x128xf32>,
      } else {
      }
      %c0_16 = arith.constant 0 : index
      %c0_17 = arith.constant 0 : index
      %18 = vector.load %arg6[%c0_16, %c0_17] : memref<1x128xf32, #tpu.memory_space<vmem>>, vector<1x128xf32>
      %cst_18 = arith.constant dense<0.000000e+00> : vector<128xf32>
      %19 = vector.multi_reduction <add>, %12, %cst_18 [0] : vector<512x128xf32> to vector<128xf32>
      %20 = vector.shape_cast %19 : vector<128xf32> to vector<1x128xf32>
      %21 = arith.addf %18, %20 : vector<1x128xf32>
      %c0_19 = arith.constant 0 : index
      %c0_20 = arith.constant 0 : index
      %22 = vector.load %arg6[%c0_19, %c0_20] : memref<1x128xf32, #tpu.memory_space<vmem>>, vector<1x128xf32>
      tpu.vector_store %arg6[%c0_19, %c0_20], %21 {strides = array<i32>} : memref<1x128xf32, #tpu.memory_space<vmem>>, vector<1x128xf32>,
      %c0_21 = arith.constant 0 : index
      %c0_22 = arith.constant 0 : index
      %23 = vector.load %arg7[%c0_21, %c0_22] : memref<1x128xf32, #tpu.memory_space<vmem>>, vector<1x128xf32>
      %24 = arith.mulf %12, %12 : vector<512x128xf32>
      %cst_23 = arith.constant dense<0.000000e+00> : vector<128xf32>
      %25 = vector.multi_reduction <add>, %24, %cst_23 [0] : vector<512x128xf32> to vector<128xf32>
      %26 = vector.shape_cast %25 : vector<128xf32> to vector<1x128xf32>
      %27 = arith.addf %23, %26 : vector<1x128xf32>
      %c0_24 = arith.constant 0 : index
      %c0_25 = arith.constant 0 : index
      %28 = vector.load %arg7[%c0_24, %c0_25] : memref<1x128xf32, #tpu.memory_space<vmem>>, vector<1x128xf32>
      tpu.vector_store %arg7[%c0_24, %c0_25], %27 {strides = array<i32>} : memref<1x128xf32, #tpu.memory_space<vmem>>, vector<1x128xf32>,
    } else {
    }
    return
  }
  func.func @transform_0(%arg0: i32, %arg1: i32, %arg2: i32) -> (i32, i32) {
    %c0_i32 = arith.constant 0 : i32
    return %arg1, %arg2 : i32, i32
  }
  func.func @transform_1(%arg0: i32, %arg1: i32, %arg2: i32) -> (i32, i32) {
    %c0_i32 = arith.constant 0 : i32
    return %arg2, %arg0 : i32, i32
  }
  func.func @transform_2(%arg0: i32, %arg1: i32, %arg2: i32) -> (i32, i32) {
    %c0_i32 = arith.constant 0 : i32
    return %arg1, %arg0 : i32, i32
  }
  func.func @transform_3(%arg0: i32, %arg1: i32, %arg2: i32) -> (i32, i32) {
    %c0_i32 = arith.constant 0 : i32
    %c0_i32_0 = arith.constant 0 : i32
    return %c0_i32, %arg0 : i32, i32
  }
  func.func @transform_4(%arg0: i32, %arg1: i32, %arg2: i32) -> (i32, i32) {
    %c0_i32 = arith.constant 0 : i32
    %c0_i32_0 = arith.constant 0 : i32
    return %c0_i32, %arg0 : i32, i32
  }
}

module attributes {stable_mosaic.version = 11 : i64} {
  func.func @_affine_kernel(%arg0: i32, %arg1: memref<512x128xbf16, #tpu.memory_space<vmem>>, %arg2: memref<1x128xf32, #tpu.memory_space<vmem>>, %arg3: memref<1x128xf32, #tpu.memory_space<vmem>>, %arg4: memref<512x128xbf16, #tpu.memory_space<vmem>>) attributes {dimension_semantics = [#tpu.dimension_semantics<parallel>], iteration_bounds = array<i64: 1>, scalar_prefetch = 0 : i64, scratch_operands = 0 : i64, tpu.core_type = #tpu.core_type<tc>, window_params = [{transform_indices = @transform_0, window_bounds = array<i64: 512, 128>}, {pipeline_mode = #tpu.pipeline_mode<synchronous>, transform_indices = @transform_1, window_bounds = array<i64: 1, 128>}, {pipeline_mode = #tpu.pipeline_mode<synchronous>, transform_indices = @transform_2, window_bounds = array<i64: 1, 128>}, {transform_indices = @transform_3, window_bounds = array<i64: 512, 128>}]} {
    %c0 = arith.constant 0 : index
    %c0_0 = arith.constant 0 : index
    %0 = vector.load %arg1[%c0, %c0_0] : memref<512x128xbf16, #tpu.memory_space<vmem>>, vector<512x128xbf16>
    %1 = arith.extf %0 : vector<512x128xbf16> to vector<512x128xf32>
    %c0_1 = arith.constant 0 : index
    %c0_2 = arith.constant 0 : index
    %2 = vector.load %arg2[%c0_1, %c0_2] : memref<1x128xf32, #tpu.memory_space<vmem>>, vector<1x128xf32>
    %3 = vector.broadcast %2 : vector<1x128xf32> to vector<512x128xf32>
    %4 = arith.mulf %1, %3 : vector<512x128xf32>
    %c0_3 = arith.constant 0 : index
    %c0_4 = arith.constant 0 : index
    %5 = vector.load %arg3[%c0_3, %c0_4] : memref<1x128xf32, #tpu.memory_space<vmem>>, vector<1x128xf32>
    %6 = vector.broadcast %5 : vector<1x128xf32> to vector<512x128xf32>
    %7 = arith.addf %4, %6 : vector<512x128xf32>
    %cst = arith.constant 0.000000e+00 : f32
    %8 = vector.broadcast %cst : f32 to vector<512x128xf32>
    %9 = arith.maximumf %7, %8 : vector<512x128xf32>
    %10 = arith.truncf %9 : vector<512x128xf32> to vector<512x128xbf16>
    %c0_5 = arith.constant 0 : index
    %c0_6 = arith.constant 0 : index
    %11 = vector.load %arg4[%c0_5, %c0_6] : memref<512x128xbf16, #tpu.memory_space<vmem>>, vector<512x128xbf16>
    tpu.vector_store %arg4[%c0_5, %c0_6], %10 {strides = array<i32>} : memref<512x128xbf16, #tpu.memory_space<vmem>>, vector<512x128xbf16>,
    return
  }
  func.func @transform_0(%arg0: i32) -> (i32, i32) {
    %c0_i32 = arith.constant 0 : i32
    %c0_i32_0 = arith.constant 0 : i32
    return %arg0, %c0_i32 : i32, i32
  }
  func.func @transform_1(%arg0: i32) -> (i32, i32) {
    %c0_i32 = arith.constant 0 : i32
    %c0_i32_0 = arith.constant 0 : i32
    %c0_i32_1 = arith.constant 0 : i32
    return %c0_i32, %c0_i32_0 : i32, i32
  }
  func.func @transform_2(%arg0: i32) -> (i32, i32) {
    %c0_i32 = arith.constant 0 : i32
    %c0_i32_0 = arith.constant 0 : i32
    %c0_i32_1 = arith.constant 0 : i32
    return %c0_i32, %c0_i32_0 : i32, i32
  }
  func.func @transform_3(%arg0: i32) -> (i32, i32) {
    %c0_i32 = arith.constant 0 : i32
    %c0_i32_0 = arith.constant 0 : i32
    return %arg0, %c0_i32 : i32, i32
  }
}

module attributes {stable_mosaic.version = 11 : i64} {
  func.func @_mm_stats_kernel(%arg0: i32, %arg1: i32, %arg2: i32, %arg3: memref<128x256xbf16, #tpu.memory_space<vmem>>, %arg4: memref<256x128xbf16, #tpu.memory_space<vmem>>, %arg5: memref<128x128xbf16, #tpu.memory_space<vmem>>, %arg6: memref<1x128xf32, #tpu.memory_space<vmem>>, %arg7: memref<1x128xf32, #tpu.memory_space<vmem>>, %arg8: memref<128x128xf32, #tpu.memory_space<vmem>>) attributes {dimension_semantics = [#tpu.dimension_semantics<parallel>, #tpu.dimension_semantics<arbitrary>, #tpu.dimension_semantics<arbitrary>], iteration_bounds = array<i64: 1, 1, 1>, scalar_prefetch = 0 : i64, scratch_operands = 1 : i64, tpu.core_type = #tpu.core_type<tc>, window_params = [{transform_indices = @transform_0, window_bounds = array<i64: 128, 256>}, {transform_indices = @transform_1, window_bounds = array<i64: 256, 128>}, {transform_indices = @transform_2, window_bounds = array<i64: 128, 128>}, {transform_indices = @transform_3, window_bounds = array<i64: 1, 128>}, {transform_indices = @transform_4, window_bounds = array<i64: 1, 128>}]} {
    %c0_i32 = arith.constant 0 : i32
    %0 = arith.cmpi eq, %arg2, %c0_i32 : i32
    %1 = arith.extui %0 : i1 to i32
    %c0_i32_0 = arith.constant 0 : i32
    %2 = arith.cmpi ne, %1, %c0_i32_0 : i32
    scf.if %2 {
      %cst_10 = arith.constant 0.000000e+00 : f32
      %12 = vector.broadcast %cst_10 : f32 to vector<128x128xf32>
      %c0_11 = arith.constant 0 : index
      %c0_12 = arith.constant 0 : index
      %13 = vector.load %arg8[%c0_11, %c0_12] : memref<128x128xf32, #tpu.memory_space<vmem>>, vector<128x128xf32>
      tpu.vector_store %arg8[%c0_11, %c0_12], %12 {strides = array<i32>} : memref<128x128xf32, #tpu.memory_space<vmem>>, vector<128x128xf32>,
    } else {
    }
    %c0 = arith.constant 0 : index
    %c0_1 = arith.constant 0 : index
    %3 = vector.load %arg8[%c0, %c0_1] : memref<128x128xf32, #tpu.memory_space<vmem>>, vector<128x128xf32>
    %c0_2 = arith.constant 0 : index
    %c0_3 = arith.constant 0 : index
    %4 = vector.load %arg3[%c0_2, %c0_3] : memref<128x256xbf16, #tpu.memory_space<vmem>>, vector<128x256xbf16>
    %c0_4 = arith.constant 0 : index
    %c0_5 = arith.constant 0 : index
    %5 = vector.load %arg4[%c0_4, %c0_5] : memref<256x128xbf16, #tpu.memory_space<vmem>>, vector<256x128xbf16>
    %cst = arith.constant dense<0.000000e+00> : vector<128x128xf32>
    %6 = tpu.matmul %4, %5, %cst {dimension_numbers = #tpu.dot_dimension_numbers<[1], [0], [0], [1], [0, 0, 1, 1], [], []>} : vector<128x256xbf16>, vector<256x128xbf16>, vector<128x128xf32> -> vector<128x128xf32>
    %7 = arith.addf %3, %6 : vector<128x128xf32>
    %c0_6 = arith.constant 0 : index
    %c0_7 = arith.constant 0 : index
    %8 = vector.load %arg8[%c0_6, %c0_7] : memref<128x128xf32, #tpu.memory_space<vmem>>, vector<128x128xf32>
    tpu.vector_store %arg8[%c0_6, %c0_7], %7 {strides = array<i32>} : memref<128x128xf32, #tpu.memory_space<vmem>>, vector<128x128xf32>,
    %c0_i32_8 = arith.constant 0 : i32
    %9 = arith.cmpi eq, %arg2, %c0_i32_8 : i32
    %10 = arith.extui %9 : i1 to i32
    %c0_i32_9 = arith.constant 0 : i32
    %11 = arith.cmpi ne, %10, %c0_i32_9 : i32
    scf.if %11 {
      %c0_10 = arith.constant 0 : index
      %c0_11 = arith.constant 0 : index
      %12 = vector.load %arg8[%c0_10, %c0_11] : memref<128x128xf32, #tpu.memory_space<vmem>>, vector<128x128xf32>
      %13 = arith.truncf %12 : vector<128x128xf32> to vector<128x128xbf16>
      %c0_12 = arith.constant 0 : index
      %c0_13 = arith.constant 0 : index
      %14 = vector.load %arg5[%c0_12, %c0_13] : memref<128x128xbf16, #tpu.memory_space<vmem>>, vector<128x128xbf16>
      tpu.vector_store %arg5[%c0_12, %c0_13], %13 {strides = array<i32>} : memref<128x128xbf16, #tpu.memory_space<vmem>>, vector<128x128xbf16>,
      %c0_i32_14 = arith.constant 0 : i32
      %15 = arith.cmpi eq, %arg1, %c0_i32_14 : i32
      %16 = arith.extui %15 : i1 to i32
      %c0_i32_15 = arith.constant 0 : i32
      %17 = arith.cmpi ne, %16, %c0_i32_15 : i32
      scf.if %17 {
        %cst_26 = arith.constant 0.000000e+00 : f32
        %29 = vector.broadcast %cst_26 : f32 to vector<1x128xf32>
        %c0_27 = arith.constant 0 : index
        %c0_28 = arith.constant 0 : index
        %30 = vector.load %arg6[%c0_27, %c0_28] : memref<1x128xf32, #tpu.memory_space<vmem>>, vector<1x128xf32>
        tpu.vector_store %arg6[%c0_27, %c0_28], %29 {strides = array<i32>} : memref<1x128xf32, #tpu.memory_space<vmem>>, vector<1x128xf32>,
        %cst_29 = arith.constant 0.000000e+00 : f32
        %31 = vector.broadcast %cst_29 : f32 to vector<1x128xf32>
        %c0_30 = arith.constant 0 : index
        %c0_31 = arith.constant 0 : index
        %32 = vector.load %arg7[%c0_30, %c0_31] : memref<1x128xf32, #tpu.memory_space<vmem>>, vector<1x128xf32>
        tpu.vector_store %arg7[%c0_30, %c0_31], %31 {strides = array<i32>} : memref<1x128xf32, #tpu.memory_space<vmem>>, vector<1x128xf32>,
      } else {
      }
      %c0_16 = arith.constant 0 : index
      %c0_17 = arith.constant 0 : index
      %18 = vector.load %arg6[%c0_16, %c0_17] : memref<1x128xf32, #tpu.memory_space<vmem>>, vector<1x128xf32>
      %cst_18 = arith.constant dense<0.000000e+00> : vector<128xf32>
      %19 = vector.multi_reduction <add>, %12, %cst_18 [0] : vector<128x128xf32> to vector<128xf32>
      %20 = vector.shape_cast %19 : vector<128xf32> to vector<1x128xf32>
      %21 = arith.addf %18, %20 : vector<1x128xf32>
      %c0_19 = arith.constant 0 : index
      %c0_20 = arith.constant 0 : index
      %22 = vector.load %arg6[%c0_19, %c0_20] : memref<1x128xf32, #tpu.memory_space<vmem>>, vector<1x128xf32>
      tpu.vector_store %arg6[%c0_19, %c0_20], %21 {strides = array<i32>} : memref<1x128xf32, #tpu.memory_space<vmem>>, vector<1x128xf32>,
      %c0_21 = arith.constant 0 : index
      %c0_22 = arith.constant 0 : index
      %23 = vector.load %arg7[%c0_21, %c0_22] : memref<1x128xf32, #tpu.memory_space<vmem>>, vector<1x128xf32>
      %24 = arith.mulf %12, %12 : vector<128x128xf32>
      %cst_23 = arith.constant dense<0.000000e+00> : vector<128xf32>
      %25 = vector.multi_reduction <add>, %24, %cst_23 [0] : vector<128x128xf32> to vector<128xf32>
      %26 = vector.shape_cast %25 : vector<128xf32> to vector<1x128xf32>
      %27 = arith.addf %23, %26 : vector<1x128xf32>
      %c0_24 = arith.constant 0 : index
      %c0_25 = arith.constant 0 : index
      %28 = vector.load %arg7[%c0_24, %c0_25] : memref<1x128xf32, #tpu.memory_space<vmem>>, vector<1x128xf32>
      tpu.vector_store %arg7[%c0_24, %c0_25], %27 {strides = array<i32>} : memref<1x128xf32, #tpu.memory_space<vmem>>, vector<1x128xf32>,
    } else {
    }
    return
  }
  func.func @transform_0(%arg0: i32, %arg1: i32, %arg2: i32) -> (i32, i32) {
    %c0_i32 = arith.constant 0 : i32
    return %arg1, %arg2 : i32, i32
  }
  func.func @transform_1(%arg0: i32, %arg1: i32, %arg2: i32) -> (i32, i32) {
    %c0_i32 = arith.constant 0 : i32
    return %arg2, %arg0 : i32, i32
  }
  func.func @transform_2(%arg0: i32, %arg1: i32, %arg2: i32) -> (i32, i32) {
    %c0_i32 = arith.constant 0 : i32
    return %arg1, %arg0 : i32, i32
  }
  func.func @transform_3(%arg0: i32, %arg1: i32, %arg2: i32) -> (i32, i32) {
    %c0_i32 = arith.constant 0 : i32
    %c0_i32_0 = arith.constant 0 : i32
    return %c0_i32, %arg0 : i32, i32
  }
  func.func @transform_4(%arg0: i32, %arg1: i32, %arg2: i32) -> (i32, i32) {
    %c0_i32 = arith.constant 0 : i32
    %c0_i32_0 = arith.constant 0 : i32
    return %c0_i32, %arg0 : i32, i32
  }
}

module attributes {stable_mosaic.version = 11 : i64} {
  func.func @_affine_kernel(%arg0: i32, %arg1: memref<128x128xbf16, #tpu.memory_space<vmem>>, %arg2: memref<1x128xf32, #tpu.memory_space<vmem>>, %arg3: memref<1x128xf32, #tpu.memory_space<vmem>>, %arg4: memref<128x128xbf16, #tpu.memory_space<vmem>>) attributes {dimension_semantics = [#tpu.dimension_semantics<parallel>], iteration_bounds = array<i64: 1>, scalar_prefetch = 0 : i64, scratch_operands = 0 : i64, tpu.core_type = #tpu.core_type<tc>, window_params = [{transform_indices = @transform_0, window_bounds = array<i64: 128, 128>}, {pipeline_mode = #tpu.pipeline_mode<synchronous>, transform_indices = @transform_1, window_bounds = array<i64: 1, 128>}, {pipeline_mode = #tpu.pipeline_mode<synchronous>, transform_indices = @transform_2, window_bounds = array<i64: 1, 128>}, {transform_indices = @transform_3, window_bounds = array<i64: 128, 128>}]} {
    %c0 = arith.constant 0 : index
    %c0_0 = arith.constant 0 : index
    %0 = vector.load %arg1[%c0, %c0_0] : memref<128x128xbf16, #tpu.memory_space<vmem>>, vector<128x128xbf16>
    %1 = arith.extf %0 : vector<128x128xbf16> to vector<128x128xf32>
    %c0_1 = arith.constant 0 : index
    %c0_2 = arith.constant 0 : index
    %2 = vector.load %arg2[%c0_1, %c0_2] : memref<1x128xf32, #tpu.memory_space<vmem>>, vector<1x128xf32>
    %3 = vector.broadcast %2 : vector<1x128xf32> to vector<128x128xf32>
    %4 = arith.mulf %1, %3 : vector<128x128xf32>
    %c0_3 = arith.constant 0 : index
    %c0_4 = arith.constant 0 : index
    %5 = vector.load %arg3[%c0_3, %c0_4] : memref<1x128xf32, #tpu.memory_space<vmem>>, vector<1x128xf32>
    %6 = vector.broadcast %5 : vector<1x128xf32> to vector<128x128xf32>
    %7 = arith.addf %4, %6 : vector<128x128xf32>
    %cst = arith.constant 0.000000e+00 : f32
    %8 = vector.broadcast %cst : f32 to vector<128x128xf32>
    %9 = arith.maximumf %7, %8 : vector<128x128xf32>
    %10 = arith.truncf %9 : vector<128x128xf32> to vector<128x128xbf16>
    %c0_5 = arith.constant 0 : index
    %c0_6 = arith.constant 0 : index
    %11 = vector.load %arg4[%c0_5, %c0_6] : memref<128x128xbf16, #tpu.memory_space<vmem>>, vector<128x128xbf16>
    tpu.vector_store %arg4[%c0_5, %c0_6], %10 {strides = array<i32>} : memref<128x128xbf16, #tpu.memory_space<vmem>>, vector<128x128xbf16>,
    return
  }
  func.func @transform_0(%arg0: i32) -> (i32, i32) {
    %c0_i32 = arith.constant 0 : i32
    %c0_i32_0 = arith.constant 0 : i32
    return %arg0, %c0_i32 : i32, i32
  }
  func.func @transform_1(%arg0: i32) -> (i32, i32) {
    %c0_i32 = arith.constant 0 : i32
    %c0_i32_0 = arith.constant 0 : i32
    %c0_i32_1 = arith.constant 0 : i32
    return %c0_i32, %c0_i32_0 : i32, i32
  }
  func.func @transform_2(%arg0: i32) -> (i32, i32) {
    %c0_i32 = arith.constant 0 : i32
    %c0_i32_0 = arith.constant 0 : i32
    %c0_i32_1 = arith.constant 0 : i32
    return %c0_i32, %c0_i32_0 : i32, i32
  }
  func.func @transform_3(%arg0: i32) -> (i32, i32) {
    %c0_i32 = arith.constant 0 : i32
    %c0_i32_0 = arith.constant 0 : i32
    return %arg0, %c0_i32 : i32, i32
  }
}

module attributes {stable_mosaic.version = 11 : i64} {
  func.func @_mm_stats_kernel(%arg0: i32, %arg1: i32, %arg2: i32, %arg3: memref<32x384xbf16, #tpu.memory_space<vmem>>, %arg4: memref<384x128xbf16, #tpu.memory_space<vmem>>, %arg5: memref<32x128xbf16, #tpu.memory_space<vmem>>, %arg6: memref<1x128xf32, #tpu.memory_space<vmem>>, %arg7: memref<1x128xf32, #tpu.memory_space<vmem>>, %arg8: memref<32x128xf32, #tpu.memory_space<vmem>>) attributes {dimension_semantics = [#tpu.dimension_semantics<parallel>, #tpu.dimension_semantics<arbitrary>, #tpu.dimension_semantics<arbitrary>], iteration_bounds = array<i64: 1, 1, 1>, scalar_prefetch = 0 : i64, scratch_operands = 1 : i64, tpu.core_type = #tpu.core_type<tc>, window_params = [{transform_indices = @transform_0, window_bounds = array<i64: 32, 384>}, {transform_indices = @transform_1, window_bounds = array<i64: 384, 128>}, {transform_indices = @transform_2, window_bounds = array<i64: 32, 128>}, {transform_indices = @transform_3, window_bounds = array<i64: 1, 128>}, {transform_indices = @transform_4, window_bounds = array<i64: 1, 128>}]} {
    %c0_i32 = arith.constant 0 : i32
    %0 = arith.cmpi eq, %arg2, %c0_i32 : i32
    %1 = arith.extui %0 : i1 to i32
    %c0_i32_0 = arith.constant 0 : i32
    %2 = arith.cmpi ne, %1, %c0_i32_0 : i32
    scf.if %2 {
      %cst_10 = arith.constant 0.000000e+00 : f32
      %12 = vector.broadcast %cst_10 : f32 to vector<32x128xf32>
      %c0_11 = arith.constant 0 : index
      %c0_12 = arith.constant 0 : index
      %13 = vector.load %arg8[%c0_11, %c0_12] : memref<32x128xf32, #tpu.memory_space<vmem>>, vector<32x128xf32>
      tpu.vector_store %arg8[%c0_11, %c0_12], %12 {strides = array<i32>} : memref<32x128xf32, #tpu.memory_space<vmem>>, vector<32x128xf32>,
    } else {
    }
    %c0 = arith.constant 0 : index
    %c0_1 = arith.constant 0 : index
    %3 = vector.load %arg8[%c0, %c0_1] : memref<32x128xf32, #tpu.memory_space<vmem>>, vector<32x128xf32>
    %c0_2 = arith.constant 0 : index
    %c0_3 = arith.constant 0 : index
    %4 = vector.load %arg3[%c0_2, %c0_3] : memref<32x384xbf16, #tpu.memory_space<vmem>>, vector<32x384xbf16>
    %c0_4 = arith.constant 0 : index
    %c0_5 = arith.constant 0 : index
    %5 = vector.load %arg4[%c0_4, %c0_5] : memref<384x128xbf16, #tpu.memory_space<vmem>>, vector<384x128xbf16>
    %cst = arith.constant dense<0.000000e+00> : vector<32x128xf32>
    %6 = tpu.matmul %4, %5, %cst {dimension_numbers = #tpu.dot_dimension_numbers<[1], [0], [0], [1], [0, 0, 1, 1], [], []>} : vector<32x384xbf16>, vector<384x128xbf16>, vector<32x128xf32> -> vector<32x128xf32>
    %7 = arith.addf %3, %6 : vector<32x128xf32>
    %c0_6 = arith.constant 0 : index
    %c0_7 = arith.constant 0 : index
    %8 = vector.load %arg8[%c0_6, %c0_7] : memref<32x128xf32, #tpu.memory_space<vmem>>, vector<32x128xf32>
    tpu.vector_store %arg8[%c0_6, %c0_7], %7 {strides = array<i32>} : memref<32x128xf32, #tpu.memory_space<vmem>>, vector<32x128xf32>,
    %c0_i32_8 = arith.constant 0 : i32
    %9 = arith.cmpi eq, %arg2, %c0_i32_8 : i32
    %10 = arith.extui %9 : i1 to i32
    %c0_i32_9 = arith.constant 0 : i32
    %11 = arith.cmpi ne, %10, %c0_i32_9 : i32
    scf.if %11 {
      %c0_10 = arith.constant 0 : index
      %c0_11 = arith.constant 0 : index
      %12 = vector.load %arg8[%c0_10, %c0_11] : memref<32x128xf32, #tpu.memory_space<vmem>>, vector<32x128xf32>
      %13 = arith.truncf %12 : vector<32x128xf32> to vector<32x128xbf16>
      %c0_12 = arith.constant 0 : index
      %c0_13 = arith.constant 0 : index
      %14 = vector.load %arg5[%c0_12, %c0_13] : memref<32x128xbf16, #tpu.memory_space<vmem>>, vector<32x128xbf16>
      tpu.vector_store %arg5[%c0_12, %c0_13], %13 {strides = array<i32>} : memref<32x128xbf16, #tpu.memory_space<vmem>>, vector<32x128xbf16>,
      %c0_i32_14 = arith.constant 0 : i32
      %15 = arith.cmpi eq, %arg1, %c0_i32_14 : i32
      %16 = arith.extui %15 : i1 to i32
      %c0_i32_15 = arith.constant 0 : i32
      %17 = arith.cmpi ne, %16, %c0_i32_15 : i32
      scf.if %17 {
        %cst_26 = arith.constant 0.000000e+00 : f32
        %29 = vector.broadcast %cst_26 : f32 to vector<1x128xf32>
        %c0_27 = arith.constant 0 : index
        %c0_28 = arith.constant 0 : index
        %30 = vector.load %arg6[%c0_27, %c0_28] : memref<1x128xf32, #tpu.memory_space<vmem>>, vector<1x128xf32>
        tpu.vector_store %arg6[%c0_27, %c0_28], %29 {strides = array<i32>} : memref<1x128xf32, #tpu.memory_space<vmem>>, vector<1x128xf32>,
        %cst_29 = arith.constant 0.000000e+00 : f32
        %31 = vector.broadcast %cst_29 : f32 to vector<1x128xf32>
        %c0_30 = arith.constant 0 : index
        %c0_31 = arith.constant 0 : index
        %32 = vector.load %arg7[%c0_30, %c0_31] : memref<1x128xf32, #tpu.memory_space<vmem>>, vector<1x128xf32>
        tpu.vector_store %arg7[%c0_30, %c0_31], %31 {strides = array<i32>} : memref<1x128xf32, #tpu.memory_space<vmem>>, vector<1x128xf32>,
      } else {
      }
      %c0_16 = arith.constant 0 : index
      %c0_17 = arith.constant 0 : index
      %18 = vector.load %arg6[%c0_16, %c0_17] : memref<1x128xf32, #tpu.memory_space<vmem>>, vector<1x128xf32>
      %cst_18 = arith.constant dense<0.000000e+00> : vector<128xf32>
      %19 = vector.multi_reduction <add>, %12, %cst_18 [0] : vector<32x128xf32> to vector<128xf32>
      %20 = vector.shape_cast %19 : vector<128xf32> to vector<1x128xf32>
      %21 = arith.addf %18, %20 : vector<1x128xf32>
      %c0_19 = arith.constant 0 : index
      %c0_20 = arith.constant 0 : index
      %22 = vector.load %arg6[%c0_19, %c0_20] : memref<1x128xf32, #tpu.memory_space<vmem>>, vector<1x128xf32>
      tpu.vector_store %arg6[%c0_19, %c0_20], %21 {strides = array<i32>} : memref<1x128xf32, #tpu.memory_space<vmem>>, vector<1x128xf32>,
      %c0_21 = arith.constant 0 : index
      %c0_22 = arith.constant 0 : index
      %23 = vector.load %arg7[%c0_21, %c0_22] : memref<1x128xf32, #tpu.memory_space<vmem>>, vector<1x128xf32>
      %24 = arith.mulf %12, %12 : vector<32x128xf32>
      %cst_23 = arith.constant dense<0.000000e+00> : vector<128xf32>
      %25 = vector.multi_reduction <add>, %24, %cst_23 [0] : vector<32x128xf32> to vector<128xf32>
      %26 = vector.shape_cast %25 : vector<128xf32> to vector<1x128xf32>
      %27 = arith.addf %23, %26 : vector<1x128xf32>
      %c0_24 = arith.constant 0 : index
      %c0_25 = arith.constant 0 : index
      %28 = vector.load %arg7[%c0_24, %c0_25] : memref<1x128xf32, #tpu.memory_space<vmem>>, vector<1x128xf32>
      tpu.vector_store %arg7[%c0_24, %c0_25], %27 {strides = array<i32>} : memref<1x128xf32, #tpu.memory_space<vmem>>, vector<1x128xf32>,
    } else {
    }
    return
  }
  func.func @transform_0(%arg0: i32, %arg1: i32, %arg2: i32) -> (i32, i32) {
    %c0_i32 = arith.constant 0 : i32
    return %arg1, %arg2 : i32, i32
  }
  func.func @transform_1(%arg0: i32, %arg1: i32, %arg2: i32) -> (i32, i32) {
    %c0_i32 = arith.constant 0 : i32
    return %arg2, %arg0 : i32, i32
  }
  func.func @transform_2(%arg0: i32, %arg1: i32, %arg2: i32) -> (i32, i32) {
    %c0_i32 = arith.constant 0 : i32
    return %arg1, %arg0 : i32, i32
  }
  func.func @transform_3(%arg0: i32, %arg1: i32, %arg2: i32) -> (i32, i32) {
    %c0_i32 = arith.constant 0 : i32
    %c0_i32_0 = arith.constant 0 : i32
    return %c0_i32, %arg0 : i32, i32
  }
  func.func @transform_4(%arg0: i32, %arg1: i32, %arg2: i32) -> (i32, i32) {
    %c0_i32 = arith.constant 0 : i32
    %c0_i32_0 = arith.constant 0 : i32
    return %c0_i32, %arg0 : i32, i32
  }
}

module attributes {stable_mosaic.version = 11 : i64} {
  func.func @_affine_kernel(%arg0: i32, %arg1: memref<32x128xbf16, #tpu.memory_space<vmem>>, %arg2: memref<1x128xf32, #tpu.memory_space<vmem>>, %arg3: memref<1x128xf32, #tpu.memory_space<vmem>>, %arg4: memref<32x128xbf16, #tpu.memory_space<vmem>>) attributes {dimension_semantics = [#tpu.dimension_semantics<parallel>], iteration_bounds = array<i64: 1>, scalar_prefetch = 0 : i64, scratch_operands = 0 : i64, tpu.core_type = #tpu.core_type<tc>, window_params = [{transform_indices = @transform_0, window_bounds = array<i64: 32, 128>}, {pipeline_mode = #tpu.pipeline_mode<synchronous>, transform_indices = @transform_1, window_bounds = array<i64: 1, 128>}, {pipeline_mode = #tpu.pipeline_mode<synchronous>, transform_indices = @transform_2, window_bounds = array<i64: 1, 128>}, {transform_indices = @transform_3, window_bounds = array<i64: 32, 128>}]} {
    %c0 = arith.constant 0 : index
    %c0_0 = arith.constant 0 : index
    %0 = vector.load %arg1[%c0, %c0_0] : memref<32x128xbf16, #tpu.memory_space<vmem>>, vector<32x128xbf16>
    %1 = arith.extf %0 : vector<32x128xbf16> to vector<32x128xf32>
    %c0_1 = arith.constant 0 : index
    %c0_2 = arith.constant 0 : index
    %2 = vector.load %arg2[%c0_1, %c0_2] : memref<1x128xf32, #tpu.memory_space<vmem>>, vector<1x128xf32>
    %3 = vector.broadcast %2 : vector<1x128xf32> to vector<32x128xf32>
    %4 = arith.mulf %1, %3 : vector<32x128xf32>
    %c0_3 = arith.constant 0 : index
    %c0_4 = arith.constant 0 : index
    %5 = vector.load %arg3[%c0_3, %c0_4] : memref<1x128xf32, #tpu.memory_space<vmem>>, vector<1x128xf32>
    %6 = vector.broadcast %5 : vector<1x128xf32> to vector<32x128xf32>
    %7 = arith.addf %4, %6 : vector<32x128xf32>
    %cst = arith.constant 0.000000e+00 : f32
    %8 = vector.broadcast %cst : f32 to vector<32x128xf32>
    %9 = arith.maximumf %7, %8 : vector<32x128xf32>
    %10 = arith.truncf %9 : vector<32x128xf32> to vector<32x128xbf16>
    %c0_5 = arith.constant 0 : index
    %c0_6 = arith.constant 0 : index
    %11 = vector.load %arg4[%c0_5, %c0_6] : memref<32x128xbf16, #tpu.memory_space<vmem>>, vector<32x128xbf16>
    tpu.vector_store %arg4[%c0_5, %c0_6], %10 {strides = array<i32>} : memref<32x128xbf16, #tpu.memory_space<vmem>>, vector<32x128xbf16>,
    return
  }
  func.func @transform_0(%arg0: i32) -> (i32, i32) {
    %c0_i32 = arith.constant 0 : i32
    %c0_i32_0 = arith.constant 0 : i32
    return %arg0, %c0_i32 : i32, i32
  }
  func.func @transform_1(%arg0: i32) -> (i32, i32) {
    %c0_i32 = arith.constant 0 : i32
    %c0_i32_0 = arith.constant 0 : i32
    %c0_i32_1 = arith.constant 0 : i32
    return %c0_i32, %c0_i32_0 : i32, i32
  }
  func.func @transform_2(%arg0: i32) -> (i32, i32) {
    %c0_i32 = arith.constant 0 : i32
    %c0_i32_0 = arith.constant 0 : i32
    %c0_i32_1 = arith.constant 0 : i32
    return %c0_i32, %c0_i32_0 : i32, i32
  }
  func.func @transform_3(%arg0: i32) -> (i32, i32) {
    %c0_i32 = arith.constant 0 : i32
    %c0_i32_0 = arith.constant 0 : i32
    return %arg0, %c0_i32 : i32, i32
  }
}

module attributes {stable_mosaic.version = 11 : i64} {
  func.func @_mm_stats_kernel(%arg0: i32, %arg1: i32, %arg2: i32, %arg3: memref<32x640xbf16, #tpu.memory_space<vmem>>, %arg4: memref<640x128xbf16, #tpu.memory_space<vmem>>, %arg5: memref<32x128xbf16, #tpu.memory_space<vmem>>, %arg6: memref<1x128xf32, #tpu.memory_space<vmem>>, %arg7: memref<1x128xf32, #tpu.memory_space<vmem>>, %arg8: memref<32x128xf32, #tpu.memory_space<vmem>>) attributes {dimension_semantics = [#tpu.dimension_semantics<parallel>, #tpu.dimension_semantics<arbitrary>, #tpu.dimension_semantics<arbitrary>], iteration_bounds = array<i64: 1, 1, 1>, scalar_prefetch = 0 : i64, scratch_operands = 1 : i64, tpu.core_type = #tpu.core_type<tc>, window_params = [{transform_indices = @transform_0, window_bounds = array<i64: 32, 640>}, {transform_indices = @transform_1, window_bounds = array<i64: 640, 128>}, {transform_indices = @transform_2, window_bounds = array<i64: 32, 128>}, {transform_indices = @transform_3, window_bounds = array<i64: 1, 128>}, {transform_indices = @transform_4, window_bounds = array<i64: 1, 128>}]} {
    %c0_i32 = arith.constant 0 : i32
    %0 = arith.cmpi eq, %arg2, %c0_i32 : i32
    %1 = arith.extui %0 : i1 to i32
    %c0_i32_0 = arith.constant 0 : i32
    %2 = arith.cmpi ne, %1, %c0_i32_0 : i32
    scf.if %2 {
      %cst_10 = arith.constant 0.000000e+00 : f32
      %12 = vector.broadcast %cst_10 : f32 to vector<32x128xf32>
      %c0_11 = arith.constant 0 : index
      %c0_12 = arith.constant 0 : index
      %13 = vector.load %arg8[%c0_11, %c0_12] : memref<32x128xf32, #tpu.memory_space<vmem>>, vector<32x128xf32>
      tpu.vector_store %arg8[%c0_11, %c0_12], %12 {strides = array<i32>} : memref<32x128xf32, #tpu.memory_space<vmem>>, vector<32x128xf32>,
    } else {
    }
    %c0 = arith.constant 0 : index
    %c0_1 = arith.constant 0 : index
    %3 = vector.load %arg8[%c0, %c0_1] : memref<32x128xf32, #tpu.memory_space<vmem>>, vector<32x128xf32>
    %c0_2 = arith.constant 0 : index
    %c0_3 = arith.constant 0 : index
    %4 = vector.load %arg3[%c0_2, %c0_3] : memref<32x640xbf16, #tpu.memory_space<vmem>>, vector<32x640xbf16>
    %c0_4 = arith.constant 0 : index
    %c0_5 = arith.constant 0 : index
    %5 = vector.load %arg4[%c0_4, %c0_5] : memref<640x128xbf16, #tpu.memory_space<vmem>>, vector<640x128xbf16>
    %cst = arith.constant dense<0.000000e+00> : vector<32x128xf32>
    %6 = tpu.matmul %4, %5, %cst {dimension_numbers = #tpu.dot_dimension_numbers<[1], [0], [0], [1], [0, 0, 1, 1], [], []>} : vector<32x640xbf16>, vector<640x128xbf16>, vector<32x128xf32> -> vector<32x128xf32>
    %7 = arith.addf %3, %6 : vector<32x128xf32>
    %c0_6 = arith.constant 0 : index
    %c0_7 = arith.constant 0 : index
    %8 = vector.load %arg8[%c0_6, %c0_7] : memref<32x128xf32, #tpu.memory_space<vmem>>, vector<32x128xf32>
    tpu.vector_store %arg8[%c0_6, %c0_7], %7 {strides = array<i32>} : memref<32x128xf32, #tpu.memory_space<vmem>>, vector<32x128xf32>,
    %c0_i32_8 = arith.constant 0 : i32
    %9 = arith.cmpi eq, %arg2, %c0_i32_8 : i32
    %10 = arith.extui %9 : i1 to i32
    %c0_i32_9 = arith.constant 0 : i32
    %11 = arith.cmpi ne, %10, %c0_i32_9 : i32
    scf.if %11 {
      %c0_10 = arith.constant 0 : index
      %c0_11 = arith.constant 0 : index
      %12 = vector.load %arg8[%c0_10, %c0_11] : memref<32x128xf32, #tpu.memory_space<vmem>>, vector<32x128xf32>
      %13 = arith.truncf %12 : vector<32x128xf32> to vector<32x128xbf16>
      %c0_12 = arith.constant 0 : index
      %c0_13 = arith.constant 0 : index
      %14 = vector.load %arg5[%c0_12, %c0_13] : memref<32x128xbf16, #tpu.memory_space<vmem>>, vector<32x128xbf16>
      tpu.vector_store %arg5[%c0_12, %c0_13], %13 {strides = array<i32>} : memref<32x128xbf16, #tpu.memory_space<vmem>>, vector<32x128xbf16>,
      %c0_i32_14 = arith.constant 0 : i32
      %15 = arith.cmpi eq, %arg1, %c0_i32_14 : i32
      %16 = arith.extui %15 : i1 to i32
      %c0_i32_15 = arith.constant 0 : i32
      %17 = arith.cmpi ne, %16, %c0_i32_15 : i32
      scf.if %17 {
        %cst_26 = arith.constant 0.000000e+00 : f32
        %29 = vector.broadcast %cst_26 : f32 to vector<1x128xf32>
        %c0_27 = arith.constant 0 : index
        %c0_28 = arith.constant 0 : index
        %30 = vector.load %arg6[%c0_27, %c0_28] : memref<1x128xf32, #tpu.memory_space<vmem>>, vector<1x128xf32>
        tpu.vector_store %arg6[%c0_27, %c0_28], %29 {strides = array<i32>} : memref<1x128xf32, #tpu.memory_space<vmem>>, vector<1x128xf32>,
        %cst_29 = arith.constant 0.000000e+00 : f32
        %31 = vector.broadcast %cst_29 : f32 to vector<1x128xf32>
        %c0_30 = arith.constant 0 : index
        %c0_31 = arith.constant 0 : index
        %32 = vector.load %arg7[%c0_30, %c0_31] : memref<1x128xf32, #tpu.memory_space<vmem>>, vector<1x128xf32>
        tpu.vector_store %arg7[%c0_30, %c0_31], %31 {strides = array<i32>} : memref<1x128xf32, #tpu.memory_space<vmem>>, vector<1x128xf32>,
      } else {
      }
      %c0_16 = arith.constant 0 : index
      %c0_17 = arith.constant 0 : index
      %18 = vector.load %arg6[%c0_16, %c0_17] : memref<1x128xf32, #tpu.memory_space<vmem>>, vector<1x128xf32>
      %cst_18 = arith.constant dense<0.000000e+00> : vector<128xf32>
      %19 = vector.multi_reduction <add>, %12, %cst_18 [0] : vector<32x128xf32> to vector<128xf32>
      %20 = vector.shape_cast %19 : vector<128xf32> to vector<1x128xf32>
      %21 = arith.addf %18, %20 : vector<1x128xf32>
      %c0_19 = arith.constant 0 : index
      %c0_20 = arith.constant 0 : index
      %22 = vector.load %arg6[%c0_19, %c0_20] : memref<1x128xf32, #tpu.memory_space<vmem>>, vector<1x128xf32>
      tpu.vector_store %arg6[%c0_19, %c0_20], %21 {strides = array<i32>} : memref<1x128xf32, #tpu.memory_space<vmem>>, vector<1x128xf32>,
      %c0_21 = arith.constant 0 : index
      %c0_22 = arith.constant 0 : index
      %23 = vector.load %arg7[%c0_21, %c0_22] : memref<1x128xf32, #tpu.memory_space<vmem>>, vector<1x128xf32>
      %24 = arith.mulf %12, %12 : vector<32x128xf32>
      %cst_23 = arith.constant dense<0.000000e+00> : vector<128xf32>
      %25 = vector.multi_reduction <add>, %24, %cst_23 [0] : vector<32x128xf32> to vector<128xf32>
      %26 = vector.shape_cast %25 : vector<128xf32> to vector<1x128xf32>
      %27 = arith.addf %23, %26 : vector<1x128xf32>
      %c0_24 = arith.constant 0 : index
      %c0_25 = arith.constant 0 : index
      %28 = vector.load %arg7[%c0_24, %c0_25] : memref<1x128xf32, #tpu.memory_space<vmem>>, vector<1x128xf32>
      tpu.vector_store %arg7[%c0_24, %c0_25], %27 {strides = array<i32>} : memref<1x128xf32, #tpu.memory_space<vmem>>, vector<1x128xf32>,
    } else {
    }
    return
  }
  func.func @transform_0(%arg0: i32, %arg1: i32, %arg2: i32) -> (i32, i32) {
    %c0_i32 = arith.constant 0 : i32
    return %arg1, %arg2 : i32, i32
  }
  func.func @transform_1(%arg0: i32, %arg1: i32, %arg2: i32) -> (i32, i32) {
    %c0_i32 = arith.constant 0 : i32
    return %arg2, %arg0 : i32, i32
  }
  func.func @transform_2(%arg0: i32, %arg1: i32, %arg2: i32) -> (i32, i32) {
    %c0_i32 = arith.constant 0 : i32
    return %arg1, %arg0 : i32, i32
  }
  func.func @transform_3(%arg0: i32, %arg1: i32, %arg2: i32) -> (i32, i32) {
    %c0_i32 = arith.constant 0 : i32
    %c0_i32_0 = arith.constant 0 : i32
    return %c0_i32, %arg0 : i32, i32
  }
  func.func @transform_4(%arg0: i32, %arg1: i32, %arg2: i32) -> (i32, i32) {
    %c0_i32 = arith.constant 0 : i32
    %c0_i32_0 = arith.constant 0 : i32
    return %c0_i32, %arg0 : i32, i32
  }
}

module attributes {stable_mosaic.version = 11 : i64} {
  func.func @_affine_kernel(%arg0: i32, %arg1: memref<32x128xbf16, #tpu.memory_space<vmem>>, %arg2: memref<1x128xf32, #tpu.memory_space<vmem>>, %arg3: memref<1x128xf32, #tpu.memory_space<vmem>>, %arg4: memref<32x128xbf16, #tpu.memory_space<vmem>>, %arg5: memref<32x128xbf16, #tpu.memory_space<vmem>>) attributes {dimension_semantics = [#tpu.dimension_semantics<parallel>], iteration_bounds = array<i64: 1>, scalar_prefetch = 0 : i64, scratch_operands = 0 : i64, tpu.core_type = #tpu.core_type<tc>, window_params = [{transform_indices = @transform_0, window_bounds = array<i64: 32, 128>}, {pipeline_mode = #tpu.pipeline_mode<synchronous>, transform_indices = @transform_1, window_bounds = array<i64: 1, 128>}, {pipeline_mode = #tpu.pipeline_mode<synchronous>, transform_indices = @transform_2, window_bounds = array<i64: 1, 128>}, {transform_indices = @transform_3, window_bounds = array<i64: 32, 128>}, {transform_indices = @transform_4, window_bounds = array<i64: 32, 128>}]} {
    %c0 = arith.constant 0 : index
    %c0_0 = arith.constant 0 : index
    %0 = vector.load %arg1[%c0, %c0_0] : memref<32x128xbf16, #tpu.memory_space<vmem>>, vector<32x128xbf16>
    %1 = arith.extf %0 : vector<32x128xbf16> to vector<32x128xf32>
    %c0_1 = arith.constant 0 : index
    %c0_2 = arith.constant 0 : index
    %2 = vector.load %arg2[%c0_1, %c0_2] : memref<1x128xf32, #tpu.memory_space<vmem>>, vector<1x128xf32>
    %3 = vector.broadcast %2 : vector<1x128xf32> to vector<32x128xf32>
    %4 = arith.mulf %1, %3 : vector<32x128xf32>
    %c0_3 = arith.constant 0 : index
    %c0_4 = arith.constant 0 : index
    %5 = vector.load %arg3[%c0_3, %c0_4] : memref<1x128xf32, #tpu.memory_space<vmem>>, vector<1x128xf32>
    %6 = vector.broadcast %5 : vector<1x128xf32> to vector<32x128xf32>
    %7 = arith.addf %4, %6 : vector<32x128xf32>
    %c0_5 = arith.constant 0 : index
    %c0_6 = arith.constant 0 : index
    %8 = vector.load %arg4[%c0_5, %c0_6] : memref<32x128xbf16, #tpu.memory_space<vmem>>, vector<32x128xbf16>
    %9 = arith.extf %8 : vector<32x128xbf16> to vector<32x128xf32>
    %10 = arith.addf %7, %9 : vector<32x128xf32>
    %11 = arith.truncf %10 : vector<32x128xf32> to vector<32x128xbf16>
    %c0_7 = arith.constant 0 : index
    %c0_8 = arith.constant 0 : index
    %12 = vector.load %arg5[%c0_7, %c0_8] : memref<32x128xbf16, #tpu.memory_space<vmem>>, vector<32x128xbf16>
    tpu.vector_store %arg5[%c0_7, %c0_8], %11 {strides = array<i32>} : memref<32x128xbf16, #tpu.memory_space<vmem>>, vector<32x128xbf16>,
    return
  }
  func.func @transform_0(%arg0: i32) -> (i32, i32) {
    %c0_i32 = arith.constant 0 : i32
    %c0_i32_0 = arith.constant 0 : i32
    return %arg0, %c0_i32 : i32, i32
  }
  func.func @transform_1(%arg0: i32) -> (i32, i32) {
    %c0_i32 = arith.constant 0 : i32
    %c0_i32_0 = arith.constant 0 : i32
    %c0_i32_1 = arith.constant 0 : i32
    return %c0_i32, %c0_i32_0 : i32, i32
  }
  func.func @transform_2(%arg0: i32) -> (i32, i32) {
    %c0_i32 = arith.constant 0 : i32
    %c0_i32_0 = arith.constant 0 : i32
    %c0_i32_1 = arith.constant 0 : i32
    return %c0_i32, %c0_i32_0 : i32, i32
  }
  func.func @transform_3(%arg0: i32) -> (i32, i32) {
    %c0_i32 = arith.constant 0 : i32
    %c0_i32_0 = arith.constant 0 : i32
    return %arg0, %c0_i32 : i32, i32
  }
  func.func @transform_4(%arg0: i32) -> (i32, i32) {
    %c0_i32 = arith.constant 0 : i32
    %c0_i32_0 = arith.constant 0 : i32
    return %arg0, %c0_i32 : i32, i32
  }
}

module attributes {stable_mosaic.version = 11 : i64} {
  func.func @_mm_stats_kernel(%arg0: i32, %arg1: i32, %arg2: i32, %arg3: memref<32x256xbf16, #tpu.memory_space<vmem>>, %arg4: memref<256x128xbf16, #tpu.memory_space<vmem>>, %arg5: memref<32x128xbf16, #tpu.memory_space<vmem>>, %arg6: memref<1x128xf32, #tpu.memory_space<vmem>>, %arg7: memref<1x128xf32, #tpu.memory_space<vmem>>, %arg8: memref<32x128xf32, #tpu.memory_space<vmem>>) attributes {dimension_semantics = [#tpu.dimension_semantics<parallel>, #tpu.dimension_semantics<arbitrary>, #tpu.dimension_semantics<arbitrary>], iteration_bounds = array<i64: 1, 1, 1>, scalar_prefetch = 0 : i64, scratch_operands = 1 : i64, tpu.core_type = #tpu.core_type<tc>, window_params = [{transform_indices = @transform_0, window_bounds = array<i64: 32, 256>}, {transform_indices = @transform_1, window_bounds = array<i64: 256, 128>}, {transform_indices = @transform_2, window_bounds = array<i64: 32, 128>}, {transform_indices = @transform_3, window_bounds = array<i64: 1, 128>}, {transform_indices = @transform_4, window_bounds = array<i64: 1, 128>}]} {
    %c0_i32 = arith.constant 0 : i32
    %0 = arith.cmpi eq, %arg2, %c0_i32 : i32
    %1 = arith.extui %0 : i1 to i32
    %c0_i32_0 = arith.constant 0 : i32
    %2 = arith.cmpi ne, %1, %c0_i32_0 : i32
    scf.if %2 {
      %cst_10 = arith.constant 0.000000e+00 : f32
      %12 = vector.broadcast %cst_10 : f32 to vector<32x128xf32>
      %c0_11 = arith.constant 0 : index
      %c0_12 = arith.constant 0 : index
      %13 = vector.load %arg8[%c0_11, %c0_12] : memref<32x128xf32, #tpu.memory_space<vmem>>, vector<32x128xf32>
      tpu.vector_store %arg8[%c0_11, %c0_12], %12 {strides = array<i32>} : memref<32x128xf32, #tpu.memory_space<vmem>>, vector<32x128xf32>,
    } else {
    }
    %c0 = arith.constant 0 : index
    %c0_1 = arith.constant 0 : index
    %3 = vector.load %arg8[%c0, %c0_1] : memref<32x128xf32, #tpu.memory_space<vmem>>, vector<32x128xf32>
    %c0_2 = arith.constant 0 : index
    %c0_3 = arith.constant 0 : index
    %4 = vector.load %arg3[%c0_2, %c0_3] : memref<32x256xbf16, #tpu.memory_space<vmem>>, vector<32x256xbf16>
    %c0_4 = arith.constant 0 : index
    %c0_5 = arith.constant 0 : index
    %5 = vector.load %arg4[%c0_4, %c0_5] : memref<256x128xbf16, #tpu.memory_space<vmem>>, vector<256x128xbf16>
    %cst = arith.constant dense<0.000000e+00> : vector<32x128xf32>
    %6 = tpu.matmul %4, %5, %cst {dimension_numbers = #tpu.dot_dimension_numbers<[1], [0], [0], [1], [0, 0, 1, 1], [], []>} : vector<32x256xbf16>, vector<256x128xbf16>, vector<32x128xf32> -> vector<32x128xf32>
    %7 = arith.addf %3, %6 : vector<32x128xf32>
    %c0_6 = arith.constant 0 : index
    %c0_7 = arith.constant 0 : index
    %8 = vector.load %arg8[%c0_6, %c0_7] : memref<32x128xf32, #tpu.memory_space<vmem>>, vector<32x128xf32>
    tpu.vector_store %arg8[%c0_6, %c0_7], %7 {strides = array<i32>} : memref<32x128xf32, #tpu.memory_space<vmem>>, vector<32x128xf32>,
    %c0_i32_8 = arith.constant 0 : i32
    %9 = arith.cmpi eq, %arg2, %c0_i32_8 : i32
    %10 = arith.extui %9 : i1 to i32
    %c0_i32_9 = arith.constant 0 : i32
    %11 = arith.cmpi ne, %10, %c0_i32_9 : i32
    scf.if %11 {
      %c0_10 = arith.constant 0 : index
      %c0_11 = arith.constant 0 : index
      %12 = vector.load %arg8[%c0_10, %c0_11] : memref<32x128xf32, #tpu.memory_space<vmem>>, vector<32x128xf32>
      %13 = arith.truncf %12 : vector<32x128xf32> to vector<32x128xbf16>
      %c0_12 = arith.constant 0 : index
      %c0_13 = arith.constant 0 : index
      %14 = vector.load %arg5[%c0_12, %c0_13] : memref<32x128xbf16, #tpu.memory_space<vmem>>, vector<32x128xbf16>
      tpu.vector_store %arg5[%c0_12, %c0_13], %13 {strides = array<i32>} : memref<32x128xbf16, #tpu.memory_space<vmem>>, vector<32x128xbf16>,
      %c0_i32_14 = arith.constant 0 : i32
      %15 = arith.cmpi eq, %arg1, %c0_i32_14 : i32
      %16 = arith.extui %15 : i1 to i32
      %c0_i32_15 = arith.constant 0 : i32
      %17 = arith.cmpi ne, %16, %c0_i32_15 : i32
      scf.if %17 {
        %cst_26 = arith.constant 0.000000e+00 : f32
        %29 = vector.broadcast %cst_26 : f32 to vector<1x128xf32>
        %c0_27 = arith.constant 0 : index
        %c0_28 = arith.constant 0 : index
        %30 = vector.load %arg6[%c0_27, %c0_28] : memref<1x128xf32, #tpu.memory_space<vmem>>, vector<1x128xf32>
        tpu.vector_store %arg6[%c0_27, %c0_28], %29 {strides = array<i32>} : memref<1x128xf32, #tpu.memory_space<vmem>>, vector<1x128xf32>,
        %cst_29 = arith.constant 0.000000e+00 : f32
        %31 = vector.broadcast %cst_29 : f32 to vector<1x128xf32>
        %c0_30 = arith.constant 0 : index
        %c0_31 = arith.constant 0 : index
        %32 = vector.load %arg7[%c0_30, %c0_31] : memref<1x128xf32, #tpu.memory_space<vmem>>, vector<1x128xf32>
        tpu.vector_store %arg7[%c0_30, %c0_31], %31 {strides = array<i32>} : memref<1x128xf32, #tpu.memory_space<vmem>>, vector<1x128xf32>,
      } else {
      }
      %c0_16 = arith.constant 0 : index
      %c0_17 = arith.constant 0 : index
      %18 = vector.load %arg6[%c0_16, %c0_17] : memref<1x128xf32, #tpu.memory_space<vmem>>, vector<1x128xf32>
      %cst_18 = arith.constant dense<0.000000e+00> : vector<128xf32>
      %19 = vector.multi_reduction <add>, %12, %cst_18 [0] : vector<32x128xf32> to vector<128xf32>
      %20 = vector.shape_cast %19 : vector<128xf32> to vector<1x128xf32>
      %21 = arith.addf %18, %20 : vector<1x128xf32>
      %c0_19 = arith.constant 0 : index
      %c0_20 = arith.constant 0 : index
      %22 = vector.load %arg6[%c0_19, %c0_20] : memref<1x128xf32, #tpu.memory_space<vmem>>, vector<1x128xf32>
      tpu.vector_store %arg6[%c0_19, %c0_20], %21 {strides = array<i32>} : memref<1x128xf32, #tpu.memory_space<vmem>>, vector<1x128xf32>,
      %c0_21 = arith.constant 0 : index
      %c0_22 = arith.constant 0 : index
      %23 = vector.load %arg7[%c0_21, %c0_22] : memref<1x128xf32, #tpu.memory_space<vmem>>, vector<1x128xf32>
      %24 = arith.mulf %12, %12 : vector<32x128xf32>
      %cst_23 = arith.constant dense<0.000000e+00> : vector<128xf32>
      %25 = vector.multi_reduction <add>, %24, %cst_23 [0] : vector<32x128xf32> to vector<128xf32>
      %26 = vector.shape_cast %25 : vector<128xf32> to vector<1x128xf32>
      %27 = arith.addf %23, %26 : vector<1x128xf32>
      %c0_24 = arith.constant 0 : index
      %c0_25 = arith.constant 0 : index
      %28 = vector.load %arg7[%c0_24, %c0_25] : memref<1x128xf32, #tpu.memory_space<vmem>>, vector<1x128xf32>
      tpu.vector_store %arg7[%c0_24, %c0_25], %27 {strides = array<i32>} : memref<1x128xf32, #tpu.memory_space<vmem>>, vector<1x128xf32>,
    } else {
    }
    return
  }
  func.func @transform_0(%arg0: i32, %arg1: i32, %arg2: i32) -> (i32, i32) {
    %c0_i32 = arith.constant 0 : i32
    return %arg1, %arg2 : i32, i32
  }
  func.func @transform_1(%arg0: i32, %arg1: i32, %arg2: i32) -> (i32, i32) {
    %c0_i32 = arith.constant 0 : i32
    return %arg2, %arg0 : i32, i32
  }
  func.func @transform_2(%arg0: i32, %arg1: i32, %arg2: i32) -> (i32, i32) {
    %c0_i32 = arith.constant 0 : i32
    return %arg1, %arg0 : i32, i32
  }
  func.func @transform_3(%arg0: i32, %arg1: i32, %arg2: i32) -> (i32, i32) {
    %c0_i32 = arith.constant 0 : i32
    %c0_i32_0 = arith.constant 0 : i32
    return %c0_i32, %arg0 : i32, i32
  }
  func.func @transform_4(%arg0: i32, %arg1: i32, %arg2: i32) -> (i32, i32) {
    %c0_i32 = arith.constant 0 : i32
    %c0_i32_0 = arith.constant 0 : i32
    return %c0_i32, %arg0 : i32, i32
  }
}

module attributes {stable_mosaic.version = 11 : i64} {
  func.func @_mm_stats_kernel(%arg0: i32, %arg1: i32, %arg2: i32, %arg3: memref<32x128xbf16, #tpu.memory_space<vmem>>, %arg4: memref<128x128xbf16, #tpu.memory_space<vmem>>, %arg5: memref<32x128xbf16, #tpu.memory_space<vmem>>, %arg6: memref<1x128xf32, #tpu.memory_space<vmem>>, %arg7: memref<1x128xf32, #tpu.memory_space<vmem>>, %arg8: memref<32x128xf32, #tpu.memory_space<vmem>>) attributes {dimension_semantics = [#tpu.dimension_semantics<parallel>, #tpu.dimension_semantics<arbitrary>, #tpu.dimension_semantics<arbitrary>], iteration_bounds = array<i64: 1, 1, 1>, scalar_prefetch = 0 : i64, scratch_operands = 1 : i64, tpu.core_type = #tpu.core_type<tc>, window_params = [{transform_indices = @transform_0, window_bounds = array<i64: 32, 128>}, {transform_indices = @transform_1, window_bounds = array<i64: 128, 128>}, {transform_indices = @transform_2, window_bounds = array<i64: 32, 128>}, {transform_indices = @transform_3, window_bounds = array<i64: 1, 128>}, {transform_indices = @transform_4, window_bounds = array<i64: 1, 128>}]} {
    %c0_i32 = arith.constant 0 : i32
    %0 = arith.cmpi eq, %arg2, %c0_i32 : i32
    %1 = arith.extui %0 : i1 to i32
    %c0_i32_0 = arith.constant 0 : i32
    %2 = arith.cmpi ne, %1, %c0_i32_0 : i32
    scf.if %2 {
      %cst_10 = arith.constant 0.000000e+00 : f32
      %12 = vector.broadcast %cst_10 : f32 to vector<32x128xf32>
      %c0_11 = arith.constant 0 : index
      %c0_12 = arith.constant 0 : index
      %13 = vector.load %arg8[%c0_11, %c0_12] : memref<32x128xf32, #tpu.memory_space<vmem>>, vector<32x128xf32>
      tpu.vector_store %arg8[%c0_11, %c0_12], %12 {strides = array<i32>} : memref<32x128xf32, #tpu.memory_space<vmem>>, vector<32x128xf32>,
    } else {
    }
    %c0 = arith.constant 0 : index
    %c0_1 = arith.constant 0 : index
    %3 = vector.load %arg8[%c0, %c0_1] : memref<32x128xf32, #tpu.memory_space<vmem>>, vector<32x128xf32>
    %c0_2 = arith.constant 0 : index
    %c0_3 = arith.constant 0 : index
    %4 = vector.load %arg3[%c0_2, %c0_3] : memref<32x128xbf16, #tpu.memory_space<vmem>>, vector<32x128xbf16>
    %c0_4 = arith.constant 0 : index
    %c0_5 = arith.constant 0 : index
    %5 = vector.load %arg4[%c0_4, %c0_5] : memref<128x128xbf16, #tpu.memory_space<vmem>>, vector<128x128xbf16>
    %cst = arith.constant dense<0.000000e+00> : vector<32x128xf32>
    %6 = tpu.matmul %4, %5, %cst {dimension_numbers = #tpu.dot_dimension_numbers<[1], [0], [0], [1], [0, 0, 1, 1], [], []>} : vector<32x128xbf16>, vector<128x128xbf16>, vector<32x128xf32> -> vector<32x128xf32>
    %7 = arith.addf %3, %6 : vector<32x128xf32>
    %c0_6 = arith.constant 0 : index
    %c0_7 = arith.constant 0 : index
    %8 = vector.load %arg8[%c0_6, %c0_7] : memref<32x128xf32, #tpu.memory_space<vmem>>, vector<32x128xf32>
    tpu.vector_store %arg8[%c0_6, %c0_7], %7 {strides = array<i32>} : memref<32x128xf32, #tpu.memory_space<vmem>>, vector<32x128xf32>,
    %c0_i32_8 = arith.constant 0 : i32
    %9 = arith.cmpi eq, %arg2, %c0_i32_8 : i32
    %10 = arith.extui %9 : i1 to i32
    %c0_i32_9 = arith.constant 0 : i32
    %11 = arith.cmpi ne, %10, %c0_i32_9 : i32
    scf.if %11 {
      %c0_10 = arith.constant 0 : index
      %c0_11 = arith.constant 0 : index
      %12 = vector.load %arg8[%c0_10, %c0_11] : memref<32x128xf32, #tpu.memory_space<vmem>>, vector<32x128xf32>
      %13 = arith.truncf %12 : vector<32x128xf32> to vector<32x128xbf16>
      %c0_12 = arith.constant 0 : index
      %c0_13 = arith.constant 0 : index
      %14 = vector.load %arg5[%c0_12, %c0_13] : memref<32x128xbf16, #tpu.memory_space<vmem>>, vector<32x128xbf16>
      tpu.vector_store %arg5[%c0_12, %c0_13], %13 {strides = array<i32>} : memref<32x128xbf16, #tpu.memory_space<vmem>>, vector<32x128xbf16>,
      %c0_i32_14 = arith.constant 0 : i32
      %15 = arith.cmpi eq, %arg1, %c0_i32_14 : i32
      %16 = arith.extui %15 : i1 to i32
      %c0_i32_15 = arith.constant 0 : i32
      %17 = arith.cmpi ne, %16, %c0_i32_15 : i32
      scf.if %17 {
        %cst_26 = arith.constant 0.000000e+00 : f32
        %29 = vector.broadcast %cst_26 : f32 to vector<1x128xf32>
        %c0_27 = arith.constant 0 : index
        %c0_28 = arith.constant 0 : index
        %30 = vector.load %arg6[%c0_27, %c0_28] : memref<1x128xf32, #tpu.memory_space<vmem>>, vector<1x128xf32>
        tpu.vector_store %arg6[%c0_27, %c0_28], %29 {strides = array<i32>} : memref<1x128xf32, #tpu.memory_space<vmem>>, vector<1x128xf32>,
        %cst_29 = arith.constant 0.000000e+00 : f32
        %31 = vector.broadcast %cst_29 : f32 to vector<1x128xf32>
        %c0_30 = arith.constant 0 : index
        %c0_31 = arith.constant 0 : index
        %32 = vector.load %arg7[%c0_30, %c0_31] : memref<1x128xf32, #tpu.memory_space<vmem>>, vector<1x128xf32>
        tpu.vector_store %arg7[%c0_30, %c0_31], %31 {strides = array<i32>} : memref<1x128xf32, #tpu.memory_space<vmem>>, vector<1x128xf32>,
      } else {
      }
      %c0_16 = arith.constant 0 : index
      %c0_17 = arith.constant 0 : index
      %18 = vector.load %arg6[%c0_16, %c0_17] : memref<1x128xf32, #tpu.memory_space<vmem>>, vector<1x128xf32>
      %cst_18 = arith.constant dense<0.000000e+00> : vector<128xf32>
      %19 = vector.multi_reduction <add>, %12, %cst_18 [0] : vector<32x128xf32> to vector<128xf32>
      %20 = vector.shape_cast %19 : vector<128xf32> to vector<1x128xf32>
      %21 = arith.addf %18, %20 : vector<1x128xf32>
      %c0_19 = arith.constant 0 : index
      %c0_20 = arith.constant 0 : index
      %22 = vector.load %arg6[%c0_19, %c0_20] : memref<1x128xf32, #tpu.memory_space<vmem>>, vector<1x128xf32>
      tpu.vector_store %arg6[%c0_19, %c0_20], %21 {strides = array<i32>} : memref<1x128xf32, #tpu.memory_space<vmem>>, vector<1x128xf32>,
      %c0_21 = arith.constant 0 : index
      %c0_22 = arith.constant 0 : index
      %23 = vector.load %arg7[%c0_21, %c0_22] : memref<1x128xf32, #tpu.memory_space<vmem>>, vector<1x128xf32>
      %24 = arith.mulf %12, %12 : vector<32x128xf32>
      %cst_23 = arith.constant dense<0.000000e+00> : vector<128xf32>
      %25 = vector.multi_reduction <add>, %24, %cst_23 [0] : vector<32x128xf32> to vector<128xf32>
      %26 = vector.shape_cast %25 : vector<128xf32> to vector<1x128xf32>
      %27 = arith.addf %23, %26 : vector<1x128xf32>
      %c0_24 = arith.constant 0 : index
      %c0_25 = arith.constant 0 : index
      %28 = vector.load %arg7[%c0_24, %c0_25] : memref<1x128xf32, #tpu.memory_space<vmem>>, vector<1x128xf32>
      tpu.vector_store %arg7[%c0_24, %c0_25], %27 {strides = array<i32>} : memref<1x128xf32, #tpu.memory_space<vmem>>, vector<1x128xf32>,
    } else {
    }
    return
  }
  func.func @transform_0(%arg0: i32, %arg1: i32, %arg2: i32) -> (i32, i32) {
    %c0_i32 = arith.constant 0 : i32
    return %arg1, %arg2 : i32, i32
  }
  func.func @transform_1(%arg0: i32, %arg1: i32, %arg2: i32) -> (i32, i32) {
    %c0_i32 = arith.constant 0 : i32
    return %arg2, %arg0 : i32, i32
  }
  func.func @transform_2(%arg0: i32, %arg1: i32, %arg2: i32) -> (i32, i32) {
    %c0_i32 = arith.constant 0 : i32
    return %arg1, %arg0 : i32, i32
  }
  func.func @transform_3(%arg0: i32, %arg1: i32, %arg2: i32) -> (i32, i32) {
    %c0_i32 = arith.constant 0 : i32
    %c0_i32_0 = arith.constant 0 : i32
    return %c0_i32, %arg0 : i32, i32
  }
  func.func @transform_4(%arg0: i32, %arg1: i32, %arg2: i32) -> (i32, i32) {
    %c0_i32 = arith.constant 0 : i32
    %c0_i32_0 = arith.constant 0 : i32
    return %c0_i32, %arg0 : i32, i32
  }
}

module attributes {stable_mosaic.version = 11 : i64} {
  func.func @_mm_stats_kernel(%arg0: i32, %arg1: i32, %arg2: i32, %arg3: memref<128x128xbf16, #tpu.memory_space<vmem>>, %arg4: memref<128x128xbf16, #tpu.memory_space<vmem>>, %arg5: memref<128x128xbf16, #tpu.memory_space<vmem>>, %arg6: memref<1x128xf32, #tpu.memory_space<vmem>>, %arg7: memref<1x128xf32, #tpu.memory_space<vmem>>, %arg8: memref<128x128xf32, #tpu.memory_space<vmem>>) attributes {dimension_semantics = [#tpu.dimension_semantics<parallel>, #tpu.dimension_semantics<arbitrary>, #tpu.dimension_semantics<arbitrary>], iteration_bounds = array<i64: 1, 1, 1>, scalar_prefetch = 0 : i64, scratch_operands = 1 : i64, tpu.core_type = #tpu.core_type<tc>, window_params = [{transform_indices = @transform_0, window_bounds = array<i64: 128, 128>}, {transform_indices = @transform_1, window_bounds = array<i64: 128, 128>}, {transform_indices = @transform_2, window_bounds = array<i64: 128, 128>}, {transform_indices = @transform_3, window_bounds = array<i64: 1, 128>}, {transform_indices = @transform_4, window_bounds = array<i64: 1, 128>}]} {
    %c0_i32 = arith.constant 0 : i32
    %0 = arith.cmpi eq, %arg2, %c0_i32 : i32
    %1 = arith.extui %0 : i1 to i32
    %c0_i32_0 = arith.constant 0 : i32
    %2 = arith.cmpi ne, %1, %c0_i32_0 : i32
    scf.if %2 {
      %cst_10 = arith.constant 0.000000e+00 : f32
      %12 = vector.broadcast %cst_10 : f32 to vector<128x128xf32>
      %c0_11 = arith.constant 0 : index
      %c0_12 = arith.constant 0 : index
      %13 = vector.load %arg8[%c0_11, %c0_12] : memref<128x128xf32, #tpu.memory_space<vmem>>, vector<128x128xf32>
      tpu.vector_store %arg8[%c0_11, %c0_12], %12 {strides = array<i32>} : memref<128x128xf32, #tpu.memory_space<vmem>>, vector<128x128xf32>,
    } else {
    }
    %c0 = arith.constant 0 : index
    %c0_1 = arith.constant 0 : index
    %3 = vector.load %arg8[%c0, %c0_1] : memref<128x128xf32, #tpu.memory_space<vmem>>, vector<128x128xf32>
    %c0_2 = arith.constant 0 : index
    %c0_3 = arith.constant 0 : index
    %4 = vector.load %arg3[%c0_2, %c0_3] : memref<128x128xbf16, #tpu.memory_space<vmem>>, vector<128x128xbf16>
    %c0_4 = arith.constant 0 : index
    %c0_5 = arith.constant 0 : index
    %5 = vector.load %arg4[%c0_4, %c0_5] : memref<128x128xbf16, #tpu.memory_space<vmem>>, vector<128x128xbf16>
    %cst = arith.constant dense<0.000000e+00> : vector<128x128xf32>
    %6 = tpu.matmul %4, %5, %cst {dimension_numbers = #tpu.dot_dimension_numbers<[1], [0], [0], [1], [0, 0, 1, 1], [], []>} : vector<128x128xbf16>, vector<128x128xbf16>, vector<128x128xf32> -> vector<128x128xf32>
    %7 = arith.addf %3, %6 : vector<128x128xf32>
    %c0_6 = arith.constant 0 : index
    %c0_7 = arith.constant 0 : index
    %8 = vector.load %arg8[%c0_6, %c0_7] : memref<128x128xf32, #tpu.memory_space<vmem>>, vector<128x128xf32>
    tpu.vector_store %arg8[%c0_6, %c0_7], %7 {strides = array<i32>} : memref<128x128xf32, #tpu.memory_space<vmem>>, vector<128x128xf32>,
    %c0_i32_8 = arith.constant 0 : i32
    %9 = arith.cmpi eq, %arg2, %c0_i32_8 : i32
    %10 = arith.extui %9 : i1 to i32
    %c0_i32_9 = arith.constant 0 : i32
    %11 = arith.cmpi ne, %10, %c0_i32_9 : i32
    scf.if %11 {
      %c0_10 = arith.constant 0 : index
      %c0_11 = arith.constant 0 : index
      %12 = vector.load %arg8[%c0_10, %c0_11] : memref<128x128xf32, #tpu.memory_space<vmem>>, vector<128x128xf32>
      %13 = arith.truncf %12 : vector<128x128xf32> to vector<128x128xbf16>
      %c0_12 = arith.constant 0 : index
      %c0_13 = arith.constant 0 : index
      %14 = vector.load %arg5[%c0_12, %c0_13] : memref<128x128xbf16, #tpu.memory_space<vmem>>, vector<128x128xbf16>
      tpu.vector_store %arg5[%c0_12, %c0_13], %13 {strides = array<i32>} : memref<128x128xbf16, #tpu.memory_space<vmem>>, vector<128x128xbf16>,
      %c0_i32_14 = arith.constant 0 : i32
      %15 = arith.cmpi eq, %arg1, %c0_i32_14 : i32
      %16 = arith.extui %15 : i1 to i32
      %c0_i32_15 = arith.constant 0 : i32
      %17 = arith.cmpi ne, %16, %c0_i32_15 : i32
      scf.if %17 {
        %cst_26 = arith.constant 0.000000e+00 : f32
        %29 = vector.broadcast %cst_26 : f32 to vector<1x128xf32>
        %c0_27 = arith.constant 0 : index
        %c0_28 = arith.constant 0 : index
        %30 = vector.load %arg6[%c0_27, %c0_28] : memref<1x128xf32, #tpu.memory_space<vmem>>, vector<1x128xf32>
        tpu.vector_store %arg6[%c0_27, %c0_28], %29 {strides = array<i32>} : memref<1x128xf32, #tpu.memory_space<vmem>>, vector<1x128xf32>,
        %cst_29 = arith.constant 0.000000e+00 : f32
        %31 = vector.broadcast %cst_29 : f32 to vector<1x128xf32>
        %c0_30 = arith.constant 0 : index
        %c0_31 = arith.constant 0 : index
        %32 = vector.load %arg7[%c0_30, %c0_31] : memref<1x128xf32, #tpu.memory_space<vmem>>, vector<1x128xf32>
        tpu.vector_store %arg7[%c0_30, %c0_31], %31 {strides = array<i32>} : memref<1x128xf32, #tpu.memory_space<vmem>>, vector<1x128xf32>,
      } else {
      }
      %c0_16 = arith.constant 0 : index
      %c0_17 = arith.constant 0 : index
      %18 = vector.load %arg6[%c0_16, %c0_17] : memref<1x128xf32, #tpu.memory_space<vmem>>, vector<1x128xf32>
      %cst_18 = arith.constant dense<0.000000e+00> : vector<128xf32>
      %19 = vector.multi_reduction <add>, %12, %cst_18 [0] : vector<128x128xf32> to vector<128xf32>
      %20 = vector.shape_cast %19 : vector<128xf32> to vector<1x128xf32>
      %21 = arith.addf %18, %20 : vector<1x128xf32>
      %c0_19 = arith.constant 0 : index
      %c0_20 = arith.constant 0 : index
      %22 = vector.load %arg6[%c0_19, %c0_20] : memref<1x128xf32, #tpu.memory_space<vmem>>, vector<1x128xf32>
      tpu.vector_store %arg6[%c0_19, %c0_20], %21 {strides = array<i32>} : memref<1x128xf32, #tpu.memory_space<vmem>>, vector<1x128xf32>,
      %c0_21 = arith.constant 0 : index
      %c0_22 = arith.constant 0 : index
      %23 = vector.load %arg7[%c0_21, %c0_22] : memref<1x128xf32, #tpu.memory_space<vmem>>, vector<1x128xf32>
      %24 = arith.mulf %12, %12 : vector<128x128xf32>
      %cst_23 = arith.constant dense<0.000000e+00> : vector<128xf32>
      %25 = vector.multi_reduction <add>, %24, %cst_23 [0] : vector<128x128xf32> to vector<128xf32>
      %26 = vector.shape_cast %25 : vector<128xf32> to vector<1x128xf32>
      %27 = arith.addf %23, %26 : vector<1x128xf32>
      %c0_24 = arith.constant 0 : index
      %c0_25 = arith.constant 0 : index
      %28 = vector.load %arg7[%c0_24, %c0_25] : memref<1x128xf32, #tpu.memory_space<vmem>>, vector<1x128xf32>
      tpu.vector_store %arg7[%c0_24, %c0_25], %27 {strides = array<i32>} : memref<1x128xf32, #tpu.memory_space<vmem>>, vector<1x128xf32>,
    } else {
    }
    return
  }
  func.func @transform_0(%arg0: i32, %arg1: i32, %arg2: i32) -> (i32, i32) {
    %c0_i32 = arith.constant 0 : i32
    return %arg1, %arg2 : i32, i32
  }
  func.func @transform_1(%arg0: i32, %arg1: i32, %arg2: i32) -> (i32, i32) {
    %c0_i32 = arith.constant 0 : i32
    return %arg2, %arg0 : i32, i32
  }
  func.func @transform_2(%arg0: i32, %arg1: i32, %arg2: i32) -> (i32, i32) {
    %c0_i32 = arith.constant 0 : i32
    return %arg1, %arg0 : i32, i32
  }
  func.func @transform_3(%arg0: i32, %arg1: i32, %arg2: i32) -> (i32, i32) {
    %c0_i32 = arith.constant 0 : i32
    %c0_i32_0 = arith.constant 0 : i32
    return %c0_i32, %arg0 : i32, i32
  }
  func.func @transform_4(%arg0: i32, %arg1: i32, %arg2: i32) -> (i32, i32) {
    %c0_i32 = arith.constant 0 : i32
    %c0_i32_0 = arith.constant 0 : i32
    return %c0_i32, %arg0 : i32, i32
  }
}

module attributes {stable_mosaic.version = 11 : i64} {
  func.func @_mm_bias_act_kernel(%arg0: i32, %arg1: i32, %arg2: i32, %arg3: memref<512x896xbf16, #tpu.memory_space<vmem>>, %arg4: memref<896x128xbf16, #tpu.memory_space<vmem>>, %arg5: memref<1x128xf32, #tpu.memory_space<vmem>>, %arg6: memref<512x128xf32, #tpu.memory_space<vmem>>, %arg7: memref<512x128xf32, #tpu.memory_space<vmem>>) attributes {dimension_semantics = [#tpu.dimension_semantics<parallel>, #tpu.dimension_semantics<parallel>, #tpu.dimension_semantics<arbitrary>], iteration_bounds = array<i64: 1, 1, 1>, scalar_prefetch = 0 : i64, scratch_operands = 1 : i64, tpu.core_type = #tpu.core_type<tc>, window_params = [{transform_indices = @transform_0, window_bounds = array<i64: 512, 896>}, {transform_indices = @transform_1, window_bounds = array<i64: 896, 128>}, {transform_indices = @transform_2, window_bounds = array<i64: 1, 128>}, {transform_indices = @transform_3, window_bounds = array<i64: 512, 128>}]} {
    %c0_i32 = arith.constant 0 : i32
    %0 = arith.cmpi eq, %arg2, %c0_i32 : i32
    %1 = arith.extui %0 : i1 to i32
    %c0_i32_0 = arith.constant 0 : i32
    %2 = arith.cmpi ne, %1, %c0_i32_0 : i32
    scf.if %2 {
      %cst_10 = arith.constant 0.000000e+00 : f32
      %12 = vector.broadcast %cst_10 : f32 to vector<512x128xf32>
      %c0_11 = arith.constant 0 : index
      %c0_12 = arith.constant 0 : index
      %13 = vector.load %arg7[%c0_11, %c0_12] : memref<512x128xf32, #tpu.memory_space<vmem>>, vector<512x128xf32>
      tpu.vector_store %arg7[%c0_11, %c0_12], %12 {strides = array<i32>} : memref<512x128xf32, #tpu.memory_space<vmem>>, vector<512x128xf32>,
    } else {
    }
    %c0 = arith.constant 0 : index
    %c0_1 = arith.constant 0 : index
    %3 = vector.load %arg7[%c0, %c0_1] : memref<512x128xf32, #tpu.memory_space<vmem>>, vector<512x128xf32>
    %c0_2 = arith.constant 0 : index
    %c0_3 = arith.constant 0 : index
    %4 = vector.load %arg3[%c0_2, %c0_3] : memref<512x896xbf16, #tpu.memory_space<vmem>>, vector<512x896xbf16>
    %c0_4 = arith.constant 0 : index
    %c0_5 = arith.constant 0 : index
    %5 = vector.load %arg4[%c0_4, %c0_5] : memref<896x128xbf16, #tpu.memory_space<vmem>>, vector<896x128xbf16>
    %cst = arith.constant dense<0.000000e+00> : vector<512x128xf32>
    %6 = tpu.matmul %4, %5, %cst {dimension_numbers = #tpu.dot_dimension_numbers<[1], [0], [0], [1], [0, 0, 1, 1], [], []>} : vector<512x896xbf16>, vector<896x128xbf16>, vector<512x128xf32> -> vector<512x128xf32>
    %7 = arith.addf %3, %6 : vector<512x128xf32>
    %c0_6 = arith.constant 0 : index
    %c0_7 = arith.constant 0 : index
    %8 = vector.load %arg7[%c0_6, %c0_7] : memref<512x128xf32, #tpu.memory_space<vmem>>, vector<512x128xf32>
    tpu.vector_store %arg7[%c0_6, %c0_7], %7 {strides = array<i32>} : memref<512x128xf32, #tpu.memory_space<vmem>>, vector<512x128xf32>,
    %c0_i32_8 = arith.constant 0 : i32
    %9 = arith.cmpi eq, %arg2, %c0_i32_8 : i32
    %10 = arith.extui %9 : i1 to i32
    %c0_i32_9 = arith.constant 0 : i32
    %11 = arith.cmpi ne, %10, %c0_i32_9 : i32
    scf.if %11 {
      %c0_10 = arith.constant 0 : index
      %c0_11 = arith.constant 0 : index
      %12 = vector.load %arg7[%c0_10, %c0_11] : memref<512x128xf32, #tpu.memory_space<vmem>>, vector<512x128xf32>
      %c0_12 = arith.constant 0 : index
      %c0_13 = arith.constant 0 : index
      %13 = vector.load %arg5[%c0_12, %c0_13] : memref<1x128xf32, #tpu.memory_space<vmem>>, vector<1x128xf32>
      %14 = vector.broadcast %13 : vector<1x128xf32> to vector<512x128xf32>
      %15 = arith.addf %12, %14 : vector<512x128xf32>
      %16 = math.tanh %15 : vector<512x128xf32>
      %c0_14 = arith.constant 0 : index
      %c0_15 = arith.constant 0 : index
      %17 = vector.load %arg6[%c0_14, %c0_15] : memref<512x128xf32, #tpu.memory_space<vmem>>, vector<512x128xf32>
      tpu.vector_store %arg6[%c0_14, %c0_15], %16 {strides = array<i32>} : memref<512x128xf32, #tpu.memory_space<vmem>>, vector<512x128xf32>,
    } else {
    }
    return
  }
  func.func @transform_0(%arg0: i32, %arg1: i32, %arg2: i32) -> (i32, i32) {
    %c0_i32 = arith.constant 0 : i32
    return %arg0, %arg2 : i32, i32
  }
  func.func @transform_1(%arg0: i32, %arg1: i32, %arg2: i32) -> (i32, i32) {
    %c0_i32 = arith.constant 0 : i32
    return %arg2, %arg1 : i32, i32
  }
  func.func @transform_2(%arg0: i32, %arg1: i32, %arg2: i32) -> (i32, i32) {
    %c0_i32 = arith.constant 0 : i32
    %c0_i32_0 = arith.constant 0 : i32
    return %c0_i32, %arg1 : i32, i32
  }
  func.func @transform_3(%arg0: i32, %arg1: i32, %arg2: i32) -> (i32, i32) {
    %c0_i32 = arith.constant 0 : i32
    return %arg0, %arg1 : i32, i32
  }
}

</mosaic_0001>

<bundles_post_ra>
// kernel: resnet_generator_forward.48
= control target key start
LH: loop header
LB: loop body
LE: loop exit
PB: predicated region body
PF: predicated region fallthrough
CT: control target
= control target key end

     0   :  { %s1502_s0 = inlined_call_operand.vmem [shape: bf16[512,128], index: 0, kind: input, shape index: {}]   ;;  %s1503_s1 = inlined_call_operand.vmem [shape: f32[1,128], index: 1, kind: input, shape index: {}]   ;;  %s1504_s2 = inlined_call_operand.vmem [shape: f32[1,128], index: 2, kind: input, shape index: {}]   ;;  %s1505_s3 = inlined_call_operand.vmem [shape: bf16[512,128], index: 3, kind: output, shape index: {}]  }
   0x1   :  { %v803_v0 = vld [vmem:[%s1502_s0] sm:$0xff]   ;;  %v1090_v4 = vld [vmem:[%s1502_s0 + $0x8] sm:$0xff]   ;;  %v1091_v5 = vld [vmem:[%s1502_s0 + $0x10] sm:$0xff]  }
   0x2   :  { %v1178_v1 = vld [vmem:[%s1503_s1] ss:$0 sm:$0xff]  ;;  %v804_v2 = vunpack.c.l.bf16 %v803_v0  ;;  %v805_v3 = vunpack.c.h.bf16 %v803_v0  ;;  %v1092_v6 = vld [vmem:[%s1502_s0 + $0x18] sm:$0xff]   ;;  %v808_v8 = vunpack.c.l.bf16 %v1090_v4  ;;  %v809_v9 = vunpack.c.h.bf16 %v1090_v4  ;;  %v1094_v33 = vld [vmem:[%s1502_s0 + $0x28] sm:$0xff]  }
   0x3   :  { %v1192_v7 = vld [vmem:[%s1504_s2] ss:$0 sm:$0xff]  ;;  %v812_v10 = vunpack.c.l.bf16 %v1091_v5  ;;  %v813_v11 = vunpack.c.h.bf16 %v1091_v5  ;;  %v816_v14 = vunpack.c.l.bf16 %v1092_v6  ;;  %v817_v15 = vunpack.c.h.bf16 %v1092_v6  ;;  %v1095_v38 = vld [vmem:[%s1502_s0 + $0x30] sm:$0xff]   ;;  %v1096_v43 = vld [vmem:[%s1502_s0 + $0x38] sm:$0xff]  }
   0x4   :  { %v149_v12 = vmul.f32 %v804_v2, %v1178_v1  ;;  %v150_v13 = vmul.f32 %v805_v3, %v1178_v1  ;;  %v151_v16 = vmul.f32 %v808_v8, %v1178_v1  ;;  %v152_v17 = vmul.f32 %v809_v9, %v1178_v1  ;;  %v1093_v28 = vld [vmem:[%s1502_s0 + $0x20] sm:$0xff]  }
   0x5   :  { %v153_v18 = vmul.f32 %v812_v10, %v1178_v1  ;;  %v154_v19 = vmul.f32 %v813_v11, %v1178_v1  ;;  %v155_v22 = vmul.f32 %v816_v14, %v1178_v1  ;;  %v156_v23 = vmul.f32 %v817_v15, %v1178_v1  ;;  %v1097_v0 = vld [vmem:[%s1502_s0 + $0x40] sm:$0xff]   ;;  %v1098_v11 = vld [vmem:[%s1502_s0 + $0x48] sm:$0xff]  }
   0x6   :  { %v220_v20 = vadd.f32 %v1192_v7, %v149_v12  ;;  %v221_v21 = vadd.f32 %v1192_v7, %v150_v13  ;;  %v222_v24 = vadd.f32 %v1192_v7, %v151_v16  ;;  %v223_v25 = vadd.f32 %v1192_v7, %v152_v17  ;;  %v1099_v16 = vld [vmem:[%s1502_s0 + $0x50] sm:$0xff]  }
   0x7   :  { %v224_v26 = vadd.f32 %v1192_v7, %v153_v18  ;;  %v225_v27 = vadd.f32 %v1192_v7, %v154_v19  ;;  %v226_v31 = vadd.f32 %v1192_v7, %v155_v22  ;;  %v227_v32 = vadd.f32 %v1192_v7, %v156_v23 }
   0x8   :  { %v284_v29 = vmax.f32 %v220_v20, 0.0  ;;  %v285_v30 = vmax.f32 %v221_v21, 0.0  ;;  %v286_v34 = vmax.f32 %v222_v24, 0.0  ;;  %v287_v35 = vmax.f32 %v223_v25, 0.0  ;;  %v1100_v25 = vld [vmem:[%s1502_s0 + $0x58] sm:$0xff]  }
   0x9   :  { %v288_v36 = vmax.f32 %v224_v26, 0.0  ;;  %v289_v37 = vmax.f32 %v225_v27, 0.0  ;;  %v290_v40 = vmax.f32 %v226_v31, 0.0  ;;  %v291_v41 = vmax.f32 %v227_v32, 0.0 }
   0xa   :  { %v933_v39 = vpack.c.bf16 %v285_v30, %v284_v29  ;;  %v820_v42 = vunpack.c.l.bf16 %v1093_v28  ;;  %v938_v44 = vpack.c.bf16 %v287_v35, %v286_v34  ;;  %v821_v46 = vunpack.c.h.bf16 %v1093_v28 }
   0xb   :  { %v943_v45 = vpack.c.bf16 %v289_v37, %v288_v36  ;;  %v824_v47 = vunpack.c.l.bf16 %v1094_v33  ;;  %v948_v48 = vpack.c.bf16 %v291_v41, %v290_v40  ;;  %v825_v50 = vunpack.c.h.bf16 %v1094_v33 }
   0xc   :  { %934 = vst [vmem:[%s1505_s3] sm:$0xff] %v933_v39   ;;  %v157_v49 = vmul.f32 %v820_v42, %v1178_v1  ;;  %v828_v51 = vunpack.c.l.bf16 %v1095_v38  ;;  %1121 = vst [vmem:[%s1505_s3 + $0x8] sm:$0xff] %v938_v44   ;;  %v158_v52 = vmul.f32 %v821_v46, %v1178_v1  ;;  %v829_v54 = vunpack.c.h.bf16 %v1095_v38  ;;  %v1101_v38 = vld [vmem:[%s1502_s0 + $0x60] sm:$0xff]  }
   0xd   :  { %1122 = vst [vmem:[%s1505_s3 + $0x10] sm:$0xff] %v943_v45   ;;  %v159_v53 = vmul.f32 %v824_v47, %v1178_v1  ;;  %v832_v55 = vunpack.c.l.bf16 %v1096_v43  ;;  %1123 = vst [vmem:[%s1505_s3 + $0x18] sm:$0xff] %v948_v48   ;;  %v160_v57 = vmul.f32 %v825_v50, %v1178_v1  ;;  %v833_v59 = vunpack.c.h.bf16 %v1096_v43 }
   0xe   :  { %v228_v56 = vadd.f32 %v1192_v7, %v157_v49  ;;  %v161_v58 = vmul.f32 %v828_v51, %v1178_v1  ;;  %v229_v60 = vadd.f32 %v1192_v7, %v158_v52  ;;  %v162_v62 = vmul.f32 %v829_v54, %v1178_v1  ;;  %v1102_v51 = vld [vmem:[%s1502_s0 + $0x68] sm:$0xff]  }
   0xf   :  { %v230_v61 = vadd.f32 %v1192_v7, %v159_v53  ;;  %v163_v63 = vmul.f32 %v832_v55, %v1178_v1  ;;  %v231_v3 = vadd.f32 %v1192_v7, %v160_v57  ;;  %v164_v5 = vmul.f32 %v833_v59, %v1178_v1 }
  0x10   :  { %v292_v2 = vmax.f32 %v228_v56, 0.0  ;;  %v232_v4 = vadd.f32 %v1192_v7, %v161_v58  ;;  %v293_v6 = vmax.f32 %v229_v60, 0.0  ;;  %v233_v9 = vadd.f32 %v1192_v7, %v162_v62  ;;  %v1103_v60 = vld [vmem:[%s1502_s0 + $0x70] sm:$0xff]  }
  0x11   :  { %v294_v8 = vmax.f32 %v230_v61, 0.0  ;;  %v234_v10 = vadd.f32 %v1192_v7, %v163_v63  ;;  %v295_v12 = vmax.f32 %v231_v3, 0.0  ;;  %v235_v14 = vadd.f32 %v1192_v7, %v164_v5 }
  0x12   :  { %v296_v13 = vmax.f32 %v232_v4, 0.0  ;;  %v836_v15 = vunpack.c.l.bf16 %v1097_v0  ;;  %v953_v17 = vpack.c.bf16 %v293_v6, %v292_v2  ;;  %v297_v18 = vmax.f32 %v233_v9, 0.0  ;;  %v1104_v2 = vld [vmem:[%s1502_s0 + $0x78] sm:$0xff]  }
  0x13   :  { %v298_v19 = vmax.f32 %v234_v10, 0.0  ;;  %v837_v20 = vunpack.c.h.bf16 %v1097_v0  ;;  %v958_v21 = vpack.c.bf16 %v295_v12, %v294_v8  ;;  %v299_v22 = vmax.f32 %v235_v14, 0.0  ;;  %v1105_v12 = vld [vmem:[%s1502_s0 + $0x80] sm:$0xff]  }
  0x14   :  { %v165_v23 = vmul.f32 %v836_v15, %v1178_v1  ;;  %v840_v24 = vunpack.c.l.bf16 %v1098_v11  ;;  %1124 = vst [vmem:[%s1505_s3 + $0x20] sm:$0xff] %v953_v17   ;;  %v963_v26 = vpack.c.bf16 %v297_v18, %v296_v13  ;;  %v841_v28 = vunpack.c.h.bf16 %v1098_v11 }
  0x15   :  { %v166_v27 = vmul.f32 %v837_v20, %v1178_v1  ;;  %v844_v29 = vunpack.c.l.bf16 %v1099_v16  ;;  %1125 = vst [vmem:[%s1505_s3 + $0x28] sm:$0xff] %v958_v21   ;;  %v968_v30 = vpack.c.bf16 %v299_v22, %v298_v19  ;;  %v845_v33 = vunpack.c.h.bf16 %v1099_v16 }
  0x16   :  { %v236_v31 = vadd.f32 %v1192_v7, %v165_v23  ;;  %v167_v32 = vmul.f32 %v840_v24, %v1178_v1  ;;  %1126 = vst [vmem:[%s1505_s3 + $0x30] sm:$0xff] %v963_v26   ;;  %v168_v35 = vmul.f32 %v841_v28, %v1178_v1  ;;  %v848_v37 = vunpack.c.l.bf16 %v1100_v25 }
  0x17   :  { %v237_v34 = vadd.f32 %v1192_v7, %v166_v27  ;;  %v169_v36 = vmul.f32 %v844_v29, %v1178_v1  ;;  %1127 = vst [vmem:[%s1505_s3 + $0x38] sm:$0xff] %v968_v30   ;;  %v170_v41 = vmul.f32 %v845_v33, %v1178_v1  ;;  %v849_v42 = vunpack.c.h.bf16 %v1100_v25  ;;  %v1106_v29 = vld [vmem:[%s1502_s0 + $0x88] sm:$0xff]  }
  0x18   :  { %v300_v39 = vmax.f32 %v236_v31, 0.0  ;;  %v238_v40 = vadd.f32 %v1192_v7, %v167_v32  ;;  %v239_v44 = vadd.f32 %v1192_v7, %v168_v35  ;;  %v171_v46 = vmul.f32 %v848_v37, %v1178_v1 }
  0x19   :  { %v301_v43 = vmax.f32 %v237_v34, 0.0  ;;  %v240_v45 = vadd.f32 %v1192_v7, %v169_v36  ;;  %v241_v48 = vadd.f32 %v1192_v7, %v170_v41  ;;  %v172_v49 = vmul.f32 %v849_v42, %v1178_v1  ;;  %v1107_v34 = vld [vmem:[%s1502_s0 + $0x90] sm:$0xff]  }
  0x1a   :  { %v302_v47 = vmax.f32 %v238_v40, 0.0  ;;  %v852_v50 = vunpack.c.l.bf16 %v1101_v38  ;;  %v303_v53 = vmax.f32 %v239_v44, 0.0  ;;  %v242_v55 = vadd.f32 %v1192_v7, %v171_v46 }
  0x1b   :  { %v973_v52 = vpack.c.bf16 %v301_v43, %v300_v39  ;;  %v304_v54 = vmax.f32 %v240_v45, 0.0  ;;  %v305_v56 = vmax.f32 %v241_v48, 0.0  ;;  %v243_v57 = vadd.f32 %v1192_v7, %v172_v49  ;;  %v1108_v43 = vld [vmem:[%s1502_s0 + $0x98] sm:$0xff]  }
  0x1c   :  { %v853_v58 = vunpack.c.h.bf16 %v1101_v38  ;;  %v173_v59 = vmul.f32 %v852_v50, %v1178_v1  ;;  %v978_v61 = vpack.c.bf16 %v303_v53, %v302_v47  ;;  %v306_v62 = vmax.f32 %v242_v55, 0.0 }
  0x1d   :  { %1128 = vst [vmem:[%s1505_s3 + $0x40] sm:$0xff] %v973_v52   ;;  %v856_v63 = vunpack.c.l.bf16 %v1102_v51  ;;  %v857_v0 = vunpack.c.h.bf16 %v1102_v51  ;;  %v983_v3 = vpack.c.bf16 %v305_v56, %v304_v54  ;;  %v307_v4 = vmax.f32 %v243_v57, 0.0  ;;  %v1109_v56 = vld [vmem:[%s1502_s0 + $0xa0] sm:$0xff]  }
  0x1e   :  { %v174_v5 = vmul.f32 %v853_v58, %v1178_v1  ;;  %v244_v6 = vadd.f32 %v1192_v7, %v173_v59  ;;  %1129 = vst [vmem:[%s1505_s3 + $0x48] sm:$0xff] %v978_v61   ;;  %v860_v10 = vunpack.c.l.bf16 %v1103_v60  ;;  %v861_v11 = vunpack.c.h.bf16 %v1103_v60 }
  0x1f   :  { %v175_v8 = vmul.f32 %v856_v63, %v1178_v1  ;;  %v176_v9 = vmul.f32 %v857_v0, %v1178_v1  ;;  %1130 = vst [vmem:[%s1505_s3 + $0x50] sm:$0xff] %v983_v3   ;;  %v988_v13 = vpack.c.bf16 %v307_v4, %v306_v62  ;;  %v864_v16 = vunpack.c.l.bf16 %v1104_v2 }
  0x20   :  { %v245_v14 = vadd.f32 %v1192_v7, %v174_v5  ;;  %v308_v15 = vmax.f32 %v244_v6, 0.0  ;;  %v177_v19 = vmul.f32 %v860_v10, %v1178_v1  ;;  %v178_v20 = vmul.f32 %v861_v11, %v1178_v1 }
  0x21   :  { %v246_v17 = vadd.f32 %v1192_v7, %v175_v8  ;;  %v247_v18 = vadd.f32 %v1192_v7, %v176_v9  ;;  %1131 = vst [vmem:[%s1505_s3 + $0x58] sm:$0xff] %v988_v13   ;;  %v865_v22 = vunpack.c.h.bf16 %v1104_v2  ;;  %v179_v23 = vmul.f32 %v864_v16, %v1178_v1  ;;  %v1110_v2 = vld [vmem:[%s1502_s0 + $0xa8] sm:$0xff]   ;;  %v1111_v16 = vld [vmem:[%s1502_s0 + $0xb0] sm:$0xff]  }
  0x22   :  { %v309_v21 = vmax.f32 %v245_v14, 0.0  ;;  %v868_v24 = vunpack.c.l.bf16 %v1105_v12  ;;  %v248_v27 = vadd.f32 %v1192_v7, %v177_v19  ;;  %v249_v28 = vadd.f32 %v1192_v7, %v178_v20 }
  0x23   :  { %v310_v25 = vmax.f32 %v246_v17, 0.0  ;;  %v311_v26 = vmax.f32 %v247_v18, 0.0  ;;  %v180_v31 = vmul.f32 %v865_v22, %v1178_v1  ;;  %v250_v32 = vadd.f32 %v1192_v7, %v179_v23 }
  0x24   :  { %v993_v30 = vpack.c.bf16 %v309_v21, %v308_v15  ;;  %v869_v33 = vunpack.c.h.bf16 %v1105_v12  ;;  %v312_v36 = vmax.f32 %v248_v27, 0.0  ;;  %v313_v37 = vmax.f32 %v249_v28, 0.0  ;;  %v1112_v21 = vld [vmem:[%s1502_s0 + $0xb8] sm:$0xff]  }
  0x25   :  { %v998_v35 = vpack.c.bf16 %v311_v26, %v310_v25  ;;  %v181_v38 = vmul.f32 %v868_v24, %v1178_v1  ;;  %v251_v39 = vadd.f32 %v1192_v7, %v180_v31  ;;  %v314_v40 = vmax.f32 %v250_v32, 0.0 }
  0x26   :  { %1132 = vst [vmem:[%s1505_s3 + $0x60] sm:$0xff] %v993_v30   ;;  %v182_v41 = vmul.f32 %v869_v33, %v1178_v1  ;;  %v872_v42 = vunpack.c.l.bf16 %v1106_v29  ;;  %v1003_v44 = vpack.c.bf16 %v313_v37, %v312_v36  ;;  %v873_v46 = vunpack.c.h.bf16 %v1106_v29 }
  0x27   :  { %1133 = vst [vmem:[%s1505_s3 + $0x68] sm:$0xff] %v998_v35   ;;  %v252_v45 = vadd.f32 %v1192_v7, %v181_v38  ;;  %v876_v47 = vunpack.c.l.bf16 %v1107_v34  ;;  %v315_v48 = vmax.f32 %v251_v39, 0.0  ;;  %v877_v51 = vunpack.c.h.bf16 %v1107_v34  ;;  %v1113_v34 = vld [vmem:[%s1502_s0 + $0xc0] sm:$0xff]  }
  0x28   :  { %v253_v49 = vadd.f32 %v1192_v7, %v182_v41  ;;  %v183_v50 = vmul.f32 %v872_v42, %v1178_v1  ;;  %1134 = vst [vmem:[%s1505_s3 + $0x70] sm:$0xff] %v1003_v44   ;;  %v184_v53 = vmul.f32 %v873_v46, %v1178_v1  ;;  %v880_v55 = vunpack.c.l.bf16 %v1108_v43 }
  0x29   :  { %v316_v52 = vmax.f32 %v252_v45, 0.0  ;;  %v185_v54 = vmul.f32 %v876_v47, %v1178_v1  ;;  %v1008_v57 = vpack.c.bf16 %v315_v48, %v314_v40  ;;  %v186_v60 = vmul.f32 %v877_v51, %v1178_v1  ;;  %v1114_v47 = vld [vmem:[%s1502_s0 + $0xc8] sm:$0xff]  }
  0x2a   :  { %v317_v58 = vmax.f32 %v253_v49, 0.0  ;;  %v254_v59 = vadd.f32 %v1192_v7, %v183_v50  ;;  %v255_v61 = vadd.f32 %v1192_v7, %v184_v53  ;;  %v881_v63 = vunpack.c.h.bf16 %v1108_v43 }
  0x2b   :  { %v256_v62 = vadd.f32 %v1192_v7, %v185_v54  ;;  %v187_v0 = vmul.f32 %v880_v55, %v1178_v1  ;;  %1135 = vst [vmem:[%s1505_s3 + $0x78] sm:$0xff] %v1008_v57   ;;  %v257_v5 = vadd.f32 %v1192_v7, %v186_v60  ;;  %v884_v6 = vunpack.c.l.bf16 %v1109_v56 }
  0x2c   :  { %v1013_v3 = vpack.c.bf16 %v317_v58, %v316_v52  ;;  %v318_v4 = vmax.f32 %v254_v59, 0.0  ;;  %v319_v8 = vmax.f32 %v255_v61, 0.0  ;;  %v188_v10 = vmul.f32 %v881_v63, %v1178_v1  ;;  %v1115_v52 = vld [vmem:[%s1502_s0 + $0xd0] sm:$0xff]   ;;  %v1116_v61 = vld [vmem:[%s1502_s0 + $0xd8] sm:$0xff]  }
  0x2d   :  { %v320_v9 = vmax.f32 %v256_v62, 0.0  ;;  %v258_v11 = vadd.f32 %v1192_v7, %v187_v0  ;;  %v321_v12 = vmax.f32 %v257_v5, 0.0  ;;  %v885_v13 = vunpack.c.h.bf16 %v1109_v56 }
  0x2e   :  { %1136 = vst [vmem:[%s1505_s3 + $0x80] sm:$0xff] %v1013_v3   ;;  %v189_v14 = vmul.f32 %v884_v6, %v1178_v1  ;;  %v888_v15 = vunpack.c.l.bf16 %v1110_v2  ;;  %v1018_v17 = vpack.c.bf16 %v319_v8, %v318_v4  ;;  %v259_v18 = vadd.f32 %v1192_v7, %v188_v10 }
  0x2f   :  { %v322_v19 = vmax.f32 %v258_v11, 0.0  ;;  %v889_v20 = vunpack.c.h.bf16 %v1110_v2  ;;  %v1023_v22 = vpack.c.bf16 %v321_v12, %v320_v9  ;;  %v190_v23 = vmul.f32 %v885_v13, %v1178_v1  ;;  %v1117_v12 = vld [vmem:[%s1502_s0 + $0xe0] sm:$0xff]  }
  0x30   :  { %v260_v24 = vadd.f32 %v1192_v7, %v189_v14  ;;  %v191_v25 = vmul.f32 %v888_v15, %v1178_v1  ;;  %1137 = vst [vmem:[%s1505_s3 + $0x88] sm:$0xff] %v1018_v17   ;;  %v323_v26 = vmax.f32 %v259_v18, 0.0  ;;  %v892_v28 = vunpack.c.l.bf16 %v1111_v16 }
  0x31   :  { %v192_v27 = vmul.f32 %v889_v20, %v1178_v1  ;;  %v893_v29 = vunpack.c.h.bf16 %v1111_v16  ;;  %1138 = vst [vmem:[%s1505_s3 + $0x90] sm:$0xff] %v1023_v22   ;;  %v261_v30 = vadd.f32 %v1192_v7, %v190_v23  ;;  %v896_v33 = vunpack.c.l.bf16 %v1112_v21 }
  0x32   :  { %v324_v31 = vmax.f32 %v260_v24, 0.0  ;;  %v262_v32 = vadd.f32 %v1192_v7, %v191_v25  ;;  %v1028_v35 = vpack.c.bf16 %v323_v26, %v322_v19  ;;  %v193_v37 = vmul.f32 %v892_v28, %v1178_v1 }
  0x33   :  { %v263_v36 = vadd.f32 %v1192_v7, %v192_v27  ;;  %v194_v38 = vmul.f32 %v893_v29, %v1178_v1  ;;  %v325_v39 = vmax.f32 %v261_v30, 0.0  ;;  %v897_v41 = vunpack.c.h.bf16 %v1112_v21  ;;  %v1118_v21 = vld [vmem:[%s1502_s0 + $0xe8] sm:$0xff]  }
  0x34   :  { %v326_v40 = vmax.f32 %v262_v32, 0.0  ;;  %v195_v42 = vmul.f32 %v896_v33, %v1178_v1  ;;  %1139 = vst [vmem:[%s1505_s3 + $0x98] sm:$0xff] %v1028_v35   ;;  %v264_v44 = vadd.f32 %v1192_v7, %v193_v37  ;;  %v900_v46 = vunpack.c.l.bf16 %v1113_v34 }
  0x35   :  { %v327_v43 = vmax.f32 %v263_v36, 0.0  ;;  %v265_v45 = vadd.f32 %v1192_v7, %v194_v38  ;;  %v1033_v48 = vpack.c.bf16 %v325_v39, %v324_v31  ;;  %v196_v49 = vmul.f32 %v897_v41, %v1178_v1  ;;  %v1120_v39 = vld [vmem:[%s1502_s0 + $0xf8] sm:$0xff]  }
  0x36   :  { %v266_v50 = vadd.f32 %v1192_v7, %v195_v42  ;;  %v901_v51 = vunpack.c.h.bf16 %v1113_v34  ;;  %v328_v54 = vmax.f32 %v264_v44, 0.0  ;;  %v197_v56 = vmul.f32 %v900_v46, %v1178_v1  ;;  %v1119_v34 = vld [vmem:[%s1502_s0 + $0xf0] sm:$0xff]  }
  0x37   :  { %v1038_v53 = vpack.c.bf16 %v327_v43, %v326_v40  ;;  %v329_v55 = vmax.f32 %v265_v45, 0.0  ;;  %1140 = vst [vmem:[%s1505_s3 + $0xa0] sm:$0xff] %v1033_v48   ;;  %v267_v57 = vadd.f32 %v1192_v7, %v196_v49  ;;  %v904_v60 = vunpack.c.l.bf16 %v1114_v47 }
  0x38   :  { %v330_v58 = vmax.f32 %v266_v50, 0.0  ;;  %v198_v59 = vmul.f32 %v901_v51, %v1178_v1  ;;  %v268_v63 = vadd.f32 %v1192_v7, %v197_v56  ;;  %v905_v0 = vunpack.c.h.bf16 %v1114_v47 }
  0x39   :  { %1141 = vst [vmem:[%s1505_s3 + $0xa8] sm:$0xff] %v1038_v53   ;;  %v1043_v62 = vpack.c.bf16 %v329_v55, %v328_v54  ;;  %v908_v2 = vunpack.c.l.bf16 %v1115_v52  ;;  %v331_v3 = vmax.f32 %v267_v57, 0.0  ;;  %v199_v5 = vmul.f32 %v904_v60, %v1178_v1 }
  0x3a   :  { %v269_v4 = vadd.f32 %v1192_v7, %v198_v59  ;;  %v909_v6 = vunpack.c.h.bf16 %v1115_v52  ;;  %v332_v8 = vmax.f32 %v268_v63, 0.0  ;;  %v200_v9 = vmul.f32 %v905_v0, %v1178_v1 }
  0x3b   :  { %1142 = vst [vmem:[%s1505_s3 + $0xb0] sm:$0xff] %v1043_v62   ;;  %v201_v10 = vmul.f32 %v908_v2, %v1178_v1  ;;  %v912_v11 = vunpack.c.l.bf16 %v1116_v61  ;;  %v1048_v13 = vpack.c.bf16 %v331_v3, %v330_v58  ;;  %v270_v15 = vadd.f32 %v1192_v7, %v199_v5 }
  0x3c   :  { %v333_v14 = vmax.f32 %v269_v4, 0.0  ;;  %v202_v16 = vmul.f32 %v909_v6, %v1178_v1  ;;  %v271_v17 = vadd.f32 %v1192_v7, %v200_v9  ;;  %v913_v19 = vunpack.c.h.bf16 %v1116_v61 }
  0x3d   :  { %v272_v18 = vadd.f32 %v1192_v7, %v201_v10  ;;  %v203_v20 = vmul.f32 %v912_v11, %v1178_v1  ;;  %1143 = vst [vmem:[%s1505_s3 + $0xb8] sm:$0xff] %v1048_v13   ;;  %v334_v23 = vmax.f32 %v270_v15, 0.0  ;;  %v916_v25 = vunpack.c.l.bf16 %v1117_v12 }
  0x3e   :  { %v1053_v22 = vpack.c.bf16 %v333_v14, %v332_v8  ;;  %v273_v24 = vadd.f32 %v1192_v7, %v202_v16  ;;  %v335_v26 = vmax.f32 %v271_v17, 0.0  ;;  %v204_v28 = vmul.f32 %v913_v19, %v1178_v1 }
  0x3f   :  { %v336_v27 = vmax.f32 %v272_v18, 0.0  ;;  %v274_v29 = vadd.f32 %v1192_v7, %v203_v20  ;;  %v917_v31 = vunpack.c.h.bf16 %v1117_v12  ;;  %v205_v32 = vmul.f32 %v916_v25, %v1178_v1 }
  0x40   :  { %1144 = vst [vmem:[%s1505_s3 + $0xc0] sm:$0xff] %v1053_v22   ;;  %v337_v30 = vmax.f32 %v273_v24, 0.0  ;;  %v920_v33 = vunpack.c.l.bf16 %v1118_v21  ;;  %v1058_v35 = vpack.c.bf16 %v335_v26, %v334_v23  ;;  %v275_v36 = vadd.f32 %v1192_v7, %v204_v28 }
  0x41   :  { %v338_v37 = vmax.f32 %v274_v29, 0.0  ;;  %v921_v38 = vunpack.c.h.bf16 %v1118_v21  ;;  %v206_v41 = vmul.f32 %v917_v31, %v1178_v1  ;;  %v276_v42 = vadd.f32 %v1192_v7, %v205_v32 }
  0x42   :  { %v1063_v40 = vpack.c.bf16 %v337_v30, %v336_v27  ;;  %v207_v43 = vmul.f32 %v920_v33, %v1178_v1  ;;  %1145 = vst [vmem:[%s1505_s3 + $0xc8] sm:$0xff] %v1058_v35   ;;  %v339_v44 = vmax.f32 %v275_v36, 0.0  ;;  %v924_v46 = vunpack.c.l.bf16 %v1119_v34 }
  0x43   :  { %v208_v45 = vmul.f32 %v921_v38, %v1178_v1  ;;  %v925_v47 = vunpack.c.h.bf16 %v1119_v34  ;;  %v277_v48 = vadd.f32 %v1192_v7, %v206_v41  ;;  %v340_v49 = vmax.f32 %v276_v42, 0.0 }
  0x44   :  { %1146 = vst [vmem:[%s1505_s3 + $0xd0] sm:$0xff] %v1063_v40   ;;  %v278_v50 = vadd.f32 %v1192_v7, %v207_v43  ;;  %v928_v51 = vunpack.c.l.bf16 %v1120_v39  ;;  %v1068_v52 = vpack.c.bf16 %v339_v44, %v338_v37  ;;  %v209_v54 = vmul.f32 %v924_v46, %v1178_v1 }
  0x45   :  { %v279_v53 = vadd.f32 %v1192_v7, %v208_v45  ;;  %v210_v55 = vmul.f32 %v925_v47, %v1178_v1  ;;  %v341_v56 = vmax.f32 %v277_v48, 0.0  ;;  %v929_v58 = vunpack.c.h.bf16 %v1120_v39 }
  0x46   :  { %v342_v57 = vmax.f32 %v278_v50, 0.0  ;;  %v211_v59 = vmul.f32 %v928_v51, %v1178_v1  ;;  %1147 = vst [vmem:[%s1505_s3 + $0xd8] sm:$0xff] %v1068_v52   ;;  %v280_v61 = vadd.f32 %v1192_v7, %v209_v54 }
  0x47   :  { %v343_v60 = vmax.f32 %v279_v53, 0.0  ;;  %v281_v62 = vadd.f32 %v1192_v7, %v210_v55  ;;  %v1073_v63 = vpack.c.bf16 %v341_v56, %v340_v49  ;;  %v212_v0 = vmul.f32 %v929_v58, %v1178_v1 }
  0x48   :  { %v282_v2 = vadd.f32 %v1192_v7, %v211_v59  ;;  %v344_v4 = vmax.f32 %v280_v61, 0.0 }
  0x49   :  { %v1078_v3 = vpack.c.bf16 %v343_v60, %v342_v57  ;;  %v345_v5 = vmax.f32 %v281_v62, 0.0  ;;  %1148 = vst [vmem:[%s1505_s3 + $0xe0] sm:$0xff] %v1073_v63   ;;  %v283_v6 = vadd.f32 %v1192_v7, %v212_v0 }
  0x4a   :  { %v346_v8 = vmax.f32 %v282_v2, 0.0 }
  0x4b   :  { %1149 = vst [vmem:[%s1505_s3 + $0xe8] sm:$0xff] %v1078_v3   ;;  %v1083_v9 = vpack.c.bf16 %v345_v5, %v344_v4  ;;  %v347_v10 = vmax.f32 %v283_v6, 0.0 }
  0x4d   :  { %1150 = vst [vmem:[%s1505_s3 + $0xf0] sm:$0xff] %v1083_v9   ;;  %v1088_v1 = vpack.c.bf16 %v347_v10, %v346_v8 }
  0x4f   :  { %1151 = vst [vmem:[%s1505_s3 + $0xf8] sm:$0xff] %v1088_v1  }

// kernel: resnet_generator_forward.49
= control target key start
LH: loop header
LB: loop body
LE: loop exit
PB: predicated region body
PF: predicated region fallthrough
CT: control target
= control target key end

     0   :  { %v817_v32 = vmov 0.0   ;;  %s999_s1 = inlined_call_operand.vmem [shape: bf16[256,128], index: 1, kind: input, shape index: {}]   ;;  %s1000_s0 = inlined_call_operand.vmem [shape: bf16[128,256], index: 0, kind: input, shape index: {}]   ;;  %s1001_s3 = inlined_call_operand.vmem [shape: f32[1,128], index: 3, kind: output, shape index: {1}]   ;;  %s1002_s4 = inlined_call_operand.vmem [shape: f32[1,128], index: 4, kind: output, shape index: {2}]   ;;  %s1003_s2 = inlined_call_operand.vmem [shape: bf16[128,128], index: 2, kind: output, shape index: {0}]  }
   0x1   :  { %v777_v0 = vld [vmem:[%s999_s1 + $0x40] sm:$0xff]   ;;  %v779_v2 = vld [vmem:[%s999_s1 + $0x48] sm:$0xff]   ;;  %v781_v4 = vld [vmem:[%s999_s1 + $0x50] sm:$0xff]   ;;  %507 = vst [vmem:[%s1001_s3] sm:$0x1] %v817_v32 }
   0x2   :  { %v778_v1 = vld [vmem:[%s999_s1] sm:$0xff]   ;;  %696 = vmatprep.subr.bf16.mxu0 %v777_v0  ;;  %760 = vmatprep.subr.bf16.mxu1 %v777_v0  ;;  %v780_v3 = vld [vmem:[%s999_s1 + $0x8] sm:$0xff]   ;;  %v782_v5 = vld [vmem:[%s999_s1 + $0x10] sm:$0xff]   ;;  %508 = vst [vmem:[%s1002_s4] sm:$0x1] %v817_v32 }
   0x3   :  { %697 = vmatpush3.bf16.msra.mxu0 %v778_v1  ;;  %768 = vmatpush3.bf16.msra.mxu1 %v778_v1  ;;  %v783_v6 = vld [vmem:[%s999_s1 + $0x58] sm:$0xff]   ;;  %v785_v8 = vld [vmem:[%s999_s1 + $0x60] sm:$0xff]   ;;  %v787_v10 = vld [vmem:[%s999_s1 + $0x68] sm:$0xff]  }
   0x4   :  { %698 = vmatprep.subr.bf16.mxu0 %v779_v2  ;;  %761 = vmatprep.subr.bf16.mxu1 %v779_v2  ;;  %v784_v7 = vld [vmem:[%s999_s1 + $0x18] sm:$0xff]   ;;  %v786_v9 = vld [vmem:[%s999_s1 + $0x20] sm:$0xff]   ;;  %v788_v12 = vld [vmem:[%s999_s1 + $0x28] sm:$0xff]  }
   0x5   :  { %v795_v11 = vld [vmem:[%s1000_s0 + $0x4] ss:$8 sps:$4 sm:$0xff]   ;;  %v789_v14 = vld [vmem:[%s999_s1 + $0x70] sm:$0xff]   ;;  %v791_v16 = vld [vmem:[%s999_s1 + $0x78] sm:$0xff]  }
   0x6   :  { %v801_v13 = vld [vmem:[%s1000_s0 + $0x44] ss:$8 sps:$4 sm:$0xff]   ;;  %307 = vmatprep.mubr.bf16.mxu0 %v795_v11  ;;  %v790_v15 = vld [vmem:[%s999_s1 + $0x30] sm:$0xff]   ;;  %v792_v17 = vld [vmem:[%s999_s1 + $0x38] sm:$0xff]  }
   0x7   :  { %699 = vmatpush3.bf16.msra.mxu0 %v780_v3  ;;  %769 = vmatpush3.bf16.msra.mxu1 %v780_v3  ;;  %v793_v18 = vld [vmem:[%s1000_s0] ss:$8 sps:$4 sm:$0xff]   ;;  %v796_v20 = vld [vmem:[%s1000_s0 + $0x14] ss:$8 sps:$4 sm:$0xff]   ;;  %v798_v22 = vld [vmem:[%s1000_s0 + $0x10] ss:$8 sps:$4 sm:$0xff]  }
   0x8   :  { %700 = vmatprep.subr.bf16.mxu0 %v781_v4  ;;  %762 = vmatprep.subr.bf16.mxu1 %v781_v4  ;;  %v799_v19 = vld [vmem:[%s1000_s0 + $0x40] ss:$8 sps:$4 sm:$0xff]   ;;  %v805_v21 = vld [vmem:[%s1000_s0 + $0x54] ss:$8 sps:$4 sm:$0xff]   ;;  %v807_v23 = vld [vmem:[%s1000_s0 + $0x50] ss:$8 sps:$4 sm:$0xff]  }
   0x9   :  { %339 = vmatprep.mubr.bf16.mxu1 %v801_v13  ;;  %v802_v24 = vld [vmem:[%s1000_s0 + $0x24] ss:$8 sps:$4 sm:$0xff]   ;;  %v804_v26 = vld [vmem:[%s1000_s0 + $0x20] ss:$8 sps:$4 sm:$0xff]   ;;  %v808_v28 = vld [vmem:[%s1000_s0 + $0x34] ss:$8 sps:$4 sm:$0xff]  }
   0xa   :  { %v811_v25 = vld [vmem:[%s1000_s0 + $0x64] ss:$8 sps:$4 sm:$0xff]   ;;  %v813_v27 = vld [vmem:[%s1000_s0 + $0x60] ss:$8 sps:$4 sm:$0xff]   ;;  %v814_v29 = vld [vmem:[%s1000_s0 + $0x74] ss:$8 sps:$4 sm:$0xff]  }
   0xb   :  { %701 = vmatpush3.bf16.msra.mxu0 %v782_v5  ;;  %770 = vmatpush3.bf16.msra.mxu1 %v782_v5  ;;  %v810_v30 = vld [vmem:[%s1000_s0 + $0x30] ss:$8 sps:$4 sm:$0xff]  }
   0xc   :  { %702 = vmatprep.subr.bf16.mxu0 %v783_v6  ;;  %763 = vmatprep.subr.bf16.mxu1 %v783_v6  ;;  %v816_v31 = vld [vmem:[%s1000_s0 + $0x70] ss:$8 sps:$4 sm:$0xff]  }
   0xf   :  { %703 = vmatpush3.bf16.msra.mxu0 %v784_v7  ;;  %771 = vmatpush3.bf16.msra.mxu1 %v784_v7 }
  0x10   :  { %704 = vmatprep.subr.bf16.mxu0 %v785_v8  ;;  %764 = vmatprep.subr.bf16.mxu1 %v785_v8 }
  0x13   :  { %705 = vmatpush3.bf16.msra.mxu0 %v786_v9  ;;  %772 = vmatpush3.bf16.msra.mxu1 %v786_v9 }
  0x14   :  { %706 = vmatprep.subr.bf16.mxu0 %v787_v10  ;;  %765 = vmatprep.subr.bf16.mxu1 %v787_v10 }
  0x17   :  { %707 = vmatpush3.bf16.msra.mxu0 %v788_v12  ;;  %773 = vmatpush3.bf16.msra.mxu1 %v788_v12 }
  0x18   :  { %708 = vmatprep.subr.bf16.mxu0 %v789_v14  ;;  %766 = vmatprep.subr.bf16.mxu1 %v789_v14 }
  0x1b   :  { %709 = vmatpush3.bf16.msra.mxu0 %v790_v15  ;;  %774 = vmatpush3.bf16.msra.mxu1 %v790_v15 }
  0x1c   :  { %710 = vmatprep.subr.bf16.mxu0 %v791_v16  ;;  %767 = vmatprep.subr.bf16.mxu1 %v791_v16 }
  0x1f   :  { %711 = vmatpush3.bf16.msra.mxu0 %v792_v17  ;;  %775 = vmatpush3.bf16.msra.mxu1 %v792_v17 }
  0x22   :  { %308 = vmatmul.mubr.bf16.vlgmr.msra.gmra.mrb[0].mxu0 %v793_v18  ;;  %340 = vmatmul.mubr.bf16.vlgmr.msra.gmra.mrb[0].mxu1 %v799_v19 }
  0x23   :  { %315 = vmatprep.mubr.bf16.mxu0 %v796_v20  ;;  %347 = vmatprep.mubr.bf16.mxu1 %v805_v21 }
  0x2a   :  { %316 = vmatmul.mubr.bf16.gmra.mrb[4].mxu0 %v798_v22  ;;  %348 = vmatmul.mubr.bf16.gmra.mrb[4].mxu1 %v807_v23 }
  0x2b   :  { %323 = vmatprep.mubr.bf16.mxu0 %v802_v24  ;;  %355 = vmatprep.mubr.bf16.mxu1 %v811_v25 }
  0x32   :  { %324 = vmatmul.mubr.bf16.gmra.mrb[8].mxu0 %v804_v26  ;;  %356 = vmatmul.mubr.bf16.gmra.mrb[8].mxu1 %v813_v27 }
  0x33   :  { %331 = vmatprep.mubr.bf16.mxu0 %v808_v28  ;;  %363 = vmatprep.mubr.bf16.mxu1 %v814_v29 }
  0x3a   :  { %332 = vmatmul.mubr.bf16.gmra.mrb[12].mxu0 %v810_v30  ;;  %364 = vmatmul.mubr.bf16.gmra.mrb[12].mxu1 %v816_v31 }
  0xf5   :  { %v712_v33 = vpop.f32.mrb[0].mxu0  ;;  %v736_v34 = vpop.f32.mrb[0].mxu1 }
  0xf6   :  { %v713_v35 = vpop.f32.mrb[1].mxu0  ;;  %v737_v36 = vpop.f32.mrb[1].mxu1 }
  0xf7   :  { %v714_v37 = vadd.f32 %v713_v35, %v712_v33  ;;  %v715_v38 = vpop.f32.mrb[2].mxu0  ;;  %v945_v39 = vadd.f32 %v737_v36, %v736_v34  ;;  %v739_v40 = vpop.f32.mrb[2].mxu1 }
  0xf8   :  { %v716_v41 = vpop.f32.mrb[3].mxu0  ;;  %v740_v42 = vpop.f32.mrb[3].mxu1 }
  0xf9   :  { %v717_v43 = vadd.f32 %v716_v41, %v715_v38  ;;  %v947_v44 = vadd.f32 %v740_v42, %v739_v40  ;;  %v534_v45 = vmul.f32 %v714_v37, %v714_v37 }
  0xfb   :  { %v652_v46 = vpack.c.bf16 %v717_v43, %v714_v37  ;;  %v510_v47 = vadd.f32 %v717_v43, %v714_v37  ;;  %v535_v48 = vmul.f32 %v717_v43, %v717_v43  ;;  %v672_v49 = vpack.c.bf16 %v947_v44, %v945_v39 }
  0xfd   :  { %653 = vst [vmem:[%s1003_s2] sm:$0xff] %v652_v46   ;;  %v550_v50 = vadd.f32 %v535_v48, %v534_v45  ;;  %v718_v51 = vpop.f32.mrb[4].mxu0  ;;  %692 = vst [vmem:[%s1003_s2 + $0x20] sm:$0xff] %v672_v49   ;;  %v742_v52 = vpop.f32.mrb[4].mxu1  ;;  %v542_v48 = vmul.f32 %v945_v39, %v945_v39 }
  0xfe   :  { %v719_v53 = vpop.f32.mrb[5].mxu0  ;;  %v743_v54 = vpop.f32.mrb[5].mxu1 }
  0xff   :  { %v720_v55 = vadd.f32 %v719_v53, %v718_v51  ;;  %v721_v56 = vpop.f32.mrb[6].mxu0  ;;  %v957_v57 = vadd.f32 %v743_v54, %v742_v52  ;;  %v745_v58 = vpop.f32.mrb[6].mxu1  ;;  %v543_v51 = vmul.f32 %v947_v44, %v947_v44 }
 0x100   :  { %v722_v59 = vpop.f32.mrb[7].mxu0  ;;  %v746_v60 = vpop.f32.mrb[7].mxu1 }
 0x101   :  { %v511_v61 = vadd.f32 %v720_v55, %v510_v47  ;;  %v536_v62 = vmul.f32 %v720_v55, %v720_v55  ;;  %v723_v63 = vadd.f32 %v722_v59, %v721_v56  ;;  %v747_v0 = vadd.f32 %v746_v60, %v745_v58 }
 0x102   :  { %v544_v54 = vmul.f32 %v957_v57, %v957_v57 }
 0x103   :  { %v551_v1 = vadd.f32 %v550_v50, %v536_v62  ;;  %v657_v2 = vpack.c.bf16 %v723_v63, %v720_v55  ;;  %v512_v3 = vadd.f32 %v723_v63, %v511_v61  ;;  %v537_v4 = vmul.f32 %v723_v63, %v723_v63 }
 0x104   :  { %v677_v5 = vpack.c.bf16 %v747_v0, %v957_v57  ;;  %v545_v58 = vmul.f32 %v747_v0, %v747_v0 }
 0x105   :  { %689 = vst [vmem:[%s1003_s2 + $0x8] sm:$0xff] %v657_v2   ;;  %v552_v6 = vadd.f32 %v551_v1, %v537_v4  ;;  %v724_v7 = vpop.f32.mrb[8].mxu0  ;;  %v748_v8 = vpop.f32.mrb[8].mxu1 }
 0x106   :  { %v725_v9 = vpop.f32.mrb[9].mxu0  ;;  %693 = vst [vmem:[%s1003_s2 + $0x28] sm:$0xff] %v677_v5   ;;  %v749_v10 = vpop.f32.mrb[9].mxu1 }
 0x107   :  { %v726_v11 = vadd.f32 %v725_v9, %v724_v7  ;;  %v727_v12 = vpop.f32.mrb[10].mxu0  ;;  %v750_v13 = vadd.f32 %v749_v10, %v748_v8  ;;  %v751_v14 = vpop.f32.mrb[10].mxu1 }
 0x108   :  { %v728_v15 = vpop.f32.mrb[11].mxu0  ;;  %v752_v16 = vpop.f32.mrb[11].mxu1 }
 0x109   :  { %v513_v17 = vadd.f32 %v726_v11, %v512_v3  ;;  %v538_v18 = vmul.f32 %v726_v11, %v726_v11  ;;  %v729_v19 = vadd.f32 %v728_v15, %v727_v12  ;;  %v753_v20 = vadd.f32 %v752_v16, %v751_v14  ;;  %v509_v16 = vld [vmem:[%s1001_s3] sm:$0x1] }
 0x10a   :  { %v546_v61 = vmul.f32 %v750_v13, %v750_v13 }
 0x10b   :  { %v553_v21 = vadd.f32 %v552_v6, %v538_v18  ;;  %v662_v22 = vpack.c.bf16 %v729_v19, %v726_v11  ;;  %v514_v23 = vadd.f32 %v729_v19, %v513_v17  ;;  %v539_v24 = vmul.f32 %v729_v19, %v729_v19  ;;  %v533_v19 = vld [vmem:[%s1002_s4] sm:$0x1] }
 0x10c   :  { %v682_v25 = vpack.c.bf16 %v753_v20, %v750_v13  ;;  %v547_v2 = vmul.f32 %v753_v20, %v753_v20 }
 0x10d   :  { %690 = vst [vmem:[%s1003_s2 + $0x10] sm:$0xff] %v662_v22   ;;  %v554_v26 = vadd.f32 %v553_v21, %v539_v24  ;;  %v730_v27 = vpop.f32.mrb[12].mxu0  ;;  %v754_v28 = vpop.f32.mrb[12].mxu1 }
 0x10e   :  { %v731_v29 = vpop.f32.mrb[13].mxu0  ;;  %694 = vst [vmem:[%s1003_s2 + $0x30] sm:$0xff] %v682_v25   ;;  %v755_v30 = vpop.f32.mrb[13].mxu1 }
 0x10f   :  { %v732_v31 = vadd.f32 %v731_v29, %v730_v27  ;;  %v733_v32 = vpop.f32.mrb[14].mxu0  ;;  %v756_v33 = vadd.f32 %v755_v30, %v754_v28  ;;  %v757_v34 = vpop.f32.mrb[14].mxu1 }
 0x110   :  { %v734_v35 = vpop.f32.mrb[15].mxu0  ;;  %v758_v36 = vpop.f32.mrb[15].mxu1 }
 0x111   :  { %v515_v37 = vadd.f32 %v732_v31, %v514_v23  ;;  %v540_v38 = vmul.f32 %v732_v31, %v732_v31  ;;  %v735_v40 = vadd.f32 %v734_v35, %v733_v32  ;;  %v759_v41 = vadd.f32 %v758_v36, %v757_v34 }
 0x112   :  { %v548_v3 = vmul.f32 %v756_v33, %v756_v33 }
 0x113   :  { %v555_v42 = vadd.f32 %v554_v26, %v540_v38  ;;  %v667_v43 = vpack.c.bf16 %v735_v40, %v732_v31  ;;  %v516_v45 = vadd.f32 %v735_v40, %v515_v37  ;;  %v541_v46 = vmul.f32 %v735_v40, %v735_v40 }
 0x114   :  { %v687_v47 = vpack.c.bf16 %v759_v41, %v756_v33  ;;  %v549_v7 = vmul.f32 %v759_v41, %v759_v41 }
 0x115   :  { %691 = vst [vmem:[%s1003_s2 + $0x18] sm:$0xff] %v667_v43   ;;  %v517_v49 = vadd.f32 %v945_v39, %v516_v45  ;;  %v556_v50 = vadd.f32 %v555_v42, %v541_v46 }
 0x116   :  { %695 = vst [vmem:[%s1003_s2 + $0x38] sm:$0xff] %v687_v47  }
 0x117   :  { %v518_v52 = vadd.f32 %v947_v44, %v517_v49  ;;  %v557_v53 = vadd.f32 %v556_v50, %v542_v48 }
 0x119   :  { %v558_v55 = vadd.f32 %v557_v53, %v543_v51  ;;  %v519_v56 = vadd.f32 %v957_v57, %v518_v52 }
 0x11b   :  { %v520_v59 = vadd.f32 %v747_v0, %v519_v56  ;;  %v559_v39 = vadd.f32 %v558_v55, %v544_v54 }
 0x11d   :  { %v521_v60 = vadd.f32 %v750_v13, %v520_v59  ;;  %v560_v62 = vadd.f32 %v559_v39, %v545_v58 }
 0x11f   :  { %v561_v63 = vadd.f32 %v560_v62, %v546_v61  ;;  %v522_v1 = vadd.f32 %v753_v20, %v521_v60 }
 0x121   :  { %v562_v4 = vadd.f32 %v561_v63, %v547_v2  ;;  %v523_v5 = vadd.f32 %v756_v33, %v522_v1 }
 0x123   :  { %v563_v44 = vadd.f32 %v562_v4, %v548_v3  ;;  %v524_v6 = vadd.f32 %v759_v41, %v523_v5 }
 0x125   :  { %v525_v8 = vrot.slane %v524_v6, 4  ;;  %v564_v9 = vadd.f32 %v563_v44, %v549_v7 }
 0x127   :  { %v526_v10 = vadd.f32 %v525_v8, %v524_v6  ;;  %v565_v11 = vrot.slane %v564_v9, 4 }
 0x129   :  { %v527_v57 = vrot.slane %v526_v10, 2  ;;  %v566_v12 = vadd.f32 %v565_v11, %v564_v9 }
 0x12b   :  { %v528_v0 = vadd.f32 %v527_v57, %v526_v10  ;;  %v567_v14 = vrot.slane %v566_v12, 2 }
 0x12d   :  { %v529_v15 = vrot.slane %v528_v0, 1  ;;  %v568_v13 = vadd.f32 %v567_v14, %v566_v12 }
 0x12f   :  { %v530_v17 = vadd.f32 %v529_v15, %v528_v0  ;;  %v569_v18 = vrot.slane %v568_v13, 1 }
 0x131   :  { %v531_v20 = vadd.f32 %v530_v17, %v509_v16  ;;  %v570_v21 = vadd.f32 %v569_v18, %v568_v13 }
 0x133   :  { %532 = vst [vmem:[%s1001_s3] sm:$0x1] %v531_v20  ;;  %v571_v22 = vadd.f32 %v570_v21, %v533_v19 }
 0x135   :  { %572 = vst [vmem:[%s1002_s4] sm:$0x1] %v571_v22 }

// kernel: resnet_generator_forward.47
= control target key start
LH: loop header
LB: loop body
LE: loop exit
PB: predicated region body
PF: predicated region fallthrough
CT: control target
= control target key end

     0   :  { %v2234_v0 = vmov 0   ;;  %s2839_s1 = inlined_call_operand.vmem [shape: bf16[256,128], index: 1, kind: input, shape index: {}]   ;;  %s2840_s0 = inlined_call_operand.vmem [shape: bf16[512,256], index: 0, kind: input, shape index: {}]   ;;  %s2841_s2 = inlined_call_operand.vmem [shape: bf16[512,128], index: 2, kind: output, shape index: {0}]   ;;  %s2842_s3 = inlined_call_operand.vmem [shape: f32[1,128], index: 3, kind: output, shape index: {1}]   ;;  %s2843_s4 = inlined_call_operand.vmem [shape: f32[1,128], index: 4, kind: output, shape index: {2}]  }
   0x1   :  { %659 = vmatprep.subr.bf16.mxu0 %v2234_v0  ;;  %v2122_v1 = vld [vmem:[%s2839_s1] sm:$0xff]   ;;  %2088 = vmatprep.subr.bf16.mxu1 %v2234_v0  ;;  %v2123_v2 = vld [vmem:[%s2839_s1 + $0x8] sm:$0xff]   ;;  %v2124_v3 = vld [vmem:[%s2839_s1 + $0x10] sm:$0xff]  }
   0x2   :  { %660 = vmatpush1.bf16.msra.mxu0 %v2122_v1  ;;  %2104 = vmatpush1.bf16.msra.mxu1 %v2122_v1  ;;  %v2125_v4 = vld [vmem:[%s2839_s1 + $0x18] sm:$0xff]   ;;  %v2126_v5 = vld [vmem:[%s2839_s1 + $0x20] sm:$0xff]   ;;  %v2127_v7 = vld [vmem:[%s2839_s1 + $0x28] sm:$0xff]  }
   0x3   :  { %661 = vmatprep.subr.bf16.mxu0 %v2234_v0  ;;  %2089 = vmatprep.subr.bf16.mxu1 %v2234_v0  ;;  %v2140_v6 = vld [vmem:[%s2840_s0 + $0x4] ss:$8 sps:$4 sm:$0xff]   ;;  %v2128_v8 = vld [vmem:[%s2839_s1 + $0x30] sm:$0xff]   ;;  %v2129_v9 = vld [vmem:[%s2839_s1 + $0x38] sm:$0xff]  }
   0x4   :  { %691 = vmatprep.mubr.bf16.mxu0 %v2140_v6  ;;  %v2164_v10 = vld [vmem:[%s2840_s0 + $0x104] ss:$8 sps:$4 sm:$0xff]   ;;  %v2132_v13 = vld [vmem:[%s2839_s1 + $0x50] sm:$0xff]   ;;  %v2133_v14 = vld [vmem:[%s2839_s1 + $0x58] sm:$0xff]  }
   0x5   :  { %819 = vmatprep.mubr.bf16.mxu1 %v2164_v10  ;;  %v2130_v11 = vld [vmem:[%s2839_s1 + $0x40] sm:$0xff]   ;;  %v2131_v12 = vld [vmem:[%s2839_s1 + $0x48] sm:$0xff]   ;;  %v2136_v17 = vld [vmem:[%s2839_s1 + $0x70] sm:$0xff]  }
   0x6   :  { %662 = vmatpush1.bf16.msra.mxu0 %v2123_v2  ;;  %2105 = vmatpush1.bf16.msra.mxu1 %v2123_v2  ;;  %v2134_v15 = vld [vmem:[%s2839_s1 + $0x60] sm:$0xff]   ;;  %v2135_v16 = vld [vmem:[%s2839_s1 + $0x68] sm:$0xff]   ;;  %v2137_v18 = vld [vmem:[%s2839_s1 + $0x78] sm:$0xff]  }
   0x7   :  { %663 = vmatprep.subr.bf16.mxu0 %v2234_v0  ;;  %2090 = vmatprep.subr.bf16.mxu1 %v2234_v0  ;;  %v2138_v19 = vld [vmem:[%s2840_s0] ss:$8 sps:$4 sm:$0xff]   ;;  %v2141_v21 = vld [vmem:[%s2840_s0 + $0x14] ss:$8 sps:$4 sm:$0xff]   ;;  %v2143_v23 = vld [vmem:[%s2840_s0 + $0x10] ss:$8 sps:$4 sm:$0xff]  }
   0x8   :  { %v2162_v20 = vld [vmem:[%s2840_s0 + $0x100] ss:$8 sps:$4 sm:$0xff]   ;;  %v2168_v22 = vld [vmem:[%s2840_s0 + $0x114] ss:$8 sps:$4 sm:$0xff]   ;;  %v2170_v24 = vld [vmem:[%s2840_s0 + $0x110] ss:$8 sps:$4 sm:$0xff]  }
   0x9   :  { %v2144_v25 = vld [vmem:[%s2840_s0 + $0x24] ss:$8 sps:$4 sm:$0xff]   ;;  %v2146_v27 = vld [vmem:[%s2840_s0 + $0x20] ss:$8 sps:$4 sm:$0xff]   ;;  %v2147_v29 = vld [vmem:[%s2840_s0 + $0x34] ss:$8 sps:$4 sm:$0xff]  }
   0xa   :  { %664 = vmatpush1.bf16.msra.mxu0 %v2124_v3  ;;  %2106 = vmatpush1.bf16.msra.mxu1 %v2124_v3  ;;  %v2174_v26 = vld [vmem:[%s2840_s0 + $0x124] ss:$8 sps:$4 sm:$0xff]   ;;  %v2176_v28 = vld [vmem:[%s2840_s0 + $0x120] ss:$8 sps:$4 sm:$0xff]   ;;  %v2180_v30 = vld [vmem:[%s2840_s0 + $0x134] ss:$8 sps:$4 sm:$0xff]  }
   0xb   :  { %665 = vmatprep.subr.bf16.mxu0 %v2234_v0  ;;  %2091 = vmatprep.subr.bf16.mxu1 %v2234_v0  ;;  %v2149_v31 = vld [vmem:[%s2840_s0 + $0x30] ss:$8 sps:$4 sm:$0xff]   ;;  %v2150_v33 = vld [vmem:[%s2840_s0 + $0x44] ss:$8 sps:$4 sm:$0xff]   ;;  %v2152_v35 = vld [vmem:[%s2840_s0 + $0x40] ss:$8 sps:$4 sm:$0xff]  }
   0xc   :  { %v2182_v32 = vld [vmem:[%s2840_s0 + $0x130] ss:$8 sps:$4 sm:$0xff]   ;;  %v2186_v34 = vld [vmem:[%s2840_s0 + $0x144] ss:$8 sps:$4 sm:$0xff]   ;;  %v2188_v36 = vld [vmem:[%s2840_s0 + $0x140] ss:$8 sps:$4 sm:$0xff]  }
   0xd   :  { %v2153_v37 = vld [vmem:[%s2840_s0 + $0x54] ss:$8 sps:$4 sm:$0xff]   ;;  %v2155_v39 = vld [vmem:[%s2840_s0 + $0x50] ss:$8 sps:$4 sm:$0xff]   ;;  %v2156_v41 = vld [vmem:[%s2840_s0 + $0x64] ss:$8 sps:$4 sm:$0xff]  }
   0xe   :  { %666 = vmatpush1.bf16.msra.mxu0 %v2125_v4  ;;  %2107 = vmatpush1.bf16.msra.mxu1 %v2125_v4  ;;  %v2192_v38 = vld [vmem:[%s2840_s0 + $0x154] ss:$8 sps:$4 sm:$0xff]   ;;  %v2194_v40 = vld [vmem:[%s2840_s0 + $0x150] ss:$8 sps:$4 sm:$0xff]   ;;  %v2198_v42 = vld [vmem:[%s2840_s0 + $0x164] ss:$8 sps:$4 sm:$0xff]  }
   0xf   :  { %667 = vmatprep.subr.bf16.mxu0 %v2234_v0  ;;  %2092 = vmatprep.subr.bf16.mxu1 %v2234_v0  ;;  %v2158_v43 = vld [vmem:[%s2840_s0 + $0x60] ss:$8 sps:$4 sm:$0xff]   ;;  %v2159_v45 = vld [vmem:[%s2840_s0 + $0x74] ss:$8 sps:$4 sm:$0xff]   ;;  %v2161_v47 = vld [vmem:[%s2840_s0 + $0x70] ss:$8 sps:$4 sm:$0xff]  }
  0x10   :  { %v2200_v44 = vld [vmem:[%s2840_s0 + $0x160] ss:$8 sps:$4 sm:$0xff]   ;;  %v2204_v46 = vld [vmem:[%s2840_s0 + $0x174] ss:$8 sps:$4 sm:$0xff]   ;;  %v2206_v48 = vld [vmem:[%s2840_s0 + $0x170] ss:$8 sps:$4 sm:$0xff]  }
  0x11   :  { %v2165_v49 = vld [vmem:[%s2840_s0 + $0x84] ss:$8 sps:$4 sm:$0xff]   ;;  %v2167_v51 = vld [vmem:[%s2840_s0 + $0x80] ss:$8 sps:$4 sm:$0xff]   ;;  %v2171_v53 = vld [vmem:[%s2840_s0 + $0x94] ss:$8 sps:$4 sm:$0xff]  }
  0x12   :  { %668 = vmatpush1.bf16.msra.mxu0 %v2126_v5  ;;  %2108 = vmatpush1.bf16.msra.mxu1 %v2126_v5  ;;  %v2210_v50 = vld [vmem:[%s2840_s0 + $0x184] ss:$8 sps:$4 sm:$0xff]   ;;  %v2212_v52 = vld [vmem:[%s2840_s0 + $0x180] ss:$8 sps:$4 sm:$0xff]   ;;  %v2213_v54 = vld [vmem:[%s2840_s0 + $0x194] ss:$8 sps:$4 sm:$0xff]  }
  0x13   :  { %669 = vmatprep.subr.bf16.mxu0 %v2234_v0  ;;  %2093 = vmatprep.subr.bf16.mxu1 %v2234_v0  ;;  %v2173_v55 = vld [vmem:[%s2840_s0 + $0x90] ss:$8 sps:$4 sm:$0xff]   ;;  %v2177_v57 = vld [vmem:[%s2840_s0 + $0xa4] ss:$8 sps:$4 sm:$0xff]   ;;  %v2179_v59 = vld [vmem:[%s2840_s0 + $0xa0] ss:$8 sps:$4 sm:$0xff]  }
  0x14   :  { %v2215_v56 = vld [vmem:[%s2840_s0 + $0x190] ss:$8 sps:$4 sm:$0xff]   ;;  %v2216_v58 = vld [vmem:[%s2840_s0 + $0x1a4] ss:$8 sps:$4 sm:$0xff]   ;;  %v2218_v60 = vld [vmem:[%s2840_s0 + $0x1a0] ss:$8 sps:$4 sm:$0xff]  }
  0x15   :  { %v2183_v61 = vld [vmem:[%s2840_s0 + $0xb4] ss:$8 sps:$4 sm:$0xff]   ;;  %v2185_v63 = vld [vmem:[%s2840_s0 + $0xb0] ss:$8 sps:$4 sm:$0xff]   ;;  %v2189_v1 = vld [vmem:[%s2840_s0 + $0xc4] ss:$8 sps:$4 sm:$0xff]  }
  0x16   :  { %670 = vmatpush1.bf16.msra.mxu0 %v2127_v7  ;;  %2109 = vmatpush1.bf16.msra.mxu1 %v2127_v7  ;;  %v2219_v62 = vld [vmem:[%s2840_s0 + $0x1b4] ss:$8 sps:$4 sm:$0xff]   ;;  %v2222_v2 = vld [vmem:[%s2840_s0 + $0x1c4] ss:$8 sps:$4 sm:$0xff]   ;;  %v2191_v3 = vld [vmem:[%s2840_s0 + $0xc0] ss:$8 sps:$4 sm:$0xff]  }
  0x17   :  { %671 = vmatprep.subr.bf16.mxu0 %v2234_v0  ;;  %2094 = vmatprep.subr.bf16.mxu1 %v2234_v0  ;;  %v2224_v4 = vld [vmem:[%s2840_s0 + $0x1c0] ss:$8 sps:$4 sm:$0xff]   ;;  %v2195_v5 = vld [vmem:[%s2840_s0 + $0xd4] ss:$8 sps:$4 sm:$0xff]   ;;  %v2197_v7 = vld [vmem:[%s2840_s0 + $0xd0] ss:$8 sps:$4 sm:$0xff]  }
  0x18   :  { %v2225_v6 = vld [vmem:[%s2840_s0 + $0x1d4] ss:$8 sps:$4 sm:$0xff]   ;;  %v2228_v10 = vld [vmem:[%s2840_s0 + $0x1e4] ss:$8 sps:$4 sm:$0xff]  }
  0x1a   :  { %672 = vmatpush1.bf16.msra.mxu0 %v2128_v8  ;;  %2110 = vmatpush1.bf16.msra.mxu1 %v2128_v8  ;;  %v2227_v8 = vld [vmem:[%s2840_s0 + $0x1d0] ss:$8 sps:$4 sm:$0xff]  }
  0x1b   :  { %673 = vmatprep.subr.bf16.mxu0 %v2234_v0  ;;  %2095 = vmatprep.subr.bf16.mxu1 %v2234_v0 }
  0x1e   :  { %674 = vmatpush1.bf16.msra.mxu0 %v2129_v9  ;;  %2111 = vmatpush1.bf16.msra.mxu1 %v2129_v9  ;;  %v2201_v9 = vld [vmem:[%s2840_s0 + $0xe4] ss:$8 sps:$4 sm:$0xff]  }
  0x1f   :  { %675 = vmatprep.subr.bf16.mxu0 %v2234_v0  ;;  %2096 = vmatprep.subr.bf16.mxu1 %v2234_v0 }
  0x22   :  { %676 = vmatpush1.bf16.msra.mxu0 %v2130_v11  ;;  %2112 = vmatpush1.bf16.msra.mxu1 %v2130_v11  ;;  %v2203_v11 = vld [vmem:[%s2840_s0 + $0xe0] ss:$8 sps:$4 sm:$0xff]  }
  0x23   :  { %677 = vmatprep.subr.bf16.mxu0 %v2234_v0  ;;  %2097 = vmatprep.subr.bf16.mxu1 %v2234_v0 }
  0x26   :  { %678 = vmatpush1.bf16.msra.mxu0 %v2131_v12  ;;  %2113 = vmatpush1.bf16.msra.mxu1 %v2131_v12  ;;  %v2230_v12 = vld [vmem:[%s2840_s0 + $0x1e0] ss:$8 sps:$4 sm:$0xff]  }
  0x27   :  { %679 = vmatprep.subr.bf16.mxu0 %v2234_v0  ;;  %2098 = vmatprep.subr.bf16.mxu1 %v2234_v0 }
  0x2a   :  { %680 = vmatpush1.bf16.msra.mxu0 %v2132_v13  ;;  %2114 = vmatpush1.bf16.msra.mxu1 %v2132_v13  ;;  %v2207_v13 = vld [vmem:[%s2840_s0 + $0xf4] ss:$8 sps:$4 sm:$0xff]  }
  0x2b   :  { %681 = vmatprep.subr.bf16.mxu0 %v2234_v0  ;;  %2099 = vmatprep.subr.bf16.mxu1 %v2234_v0 }
  0x2e   :  { %682 = vmatpush1.bf16.msra.mxu0 %v2133_v14  ;;  %2115 = vmatpush1.bf16.msra.mxu1 %v2133_v14  ;;  %v2231_v14 = vld [vmem:[%s2840_s0 + $0x1f4] ss:$8 sps:$4 sm:$0xff]  }
  0x2f   :  { %683 = vmatprep.subr.bf16.mxu0 %v2234_v0  ;;  %2100 = vmatprep.subr.bf16.mxu1 %v2234_v0 }
  0x32   :  { %684 = vmatpush1.bf16.msra.mxu0 %v2134_v15  ;;  %2116 = vmatpush1.bf16.msra.mxu1 %v2134_v15  ;;  %v2209_v15 = vld [vmem:[%s2840_s0 + $0xf0] ss:$8 sps:$4 sm:$0xff]  }
  0x33   :  { %685 = vmatprep.subr.bf16.mxu0 %v2234_v0  ;;  %2101 = vmatprep.subr.bf16.mxu1 %v2234_v0 }
  0x36   :  { %686 = vmatpush1.bf16.msra.mxu0 %v2135_v16  ;;  %2117 = vmatpush1.bf16.msra.mxu1 %v2135_v16  ;;  %v2233_v16 = vld [vmem:[%s2840_s0 + $0x1f0] ss:$8 sps:$4 sm:$0xff]  }
  0x37   :  { %687 = vmatprep.subr.bf16.mxu0 %v2234_v0  ;;  %2102 = vmatprep.subr.bf16.mxu1 %v2234_v0 }
  0x3a   :  { %688 = vmatpush1.bf16.msra.mxu0 %v2136_v17  ;;  %2118 = vmatpush1.bf16.msra.mxu1 %v2136_v17 }
  0x3b   :  { %689 = vmatprep.subr.bf16.mxu0 %v2234_v0  ;;  %2103 = vmatprep.subr.bf16.mxu1 %v2234_v0  ;;  %v2221_v0 = vld [vmem:[%s2840_s0 + $0x1b0] ss:$8 sps:$4 sm:$0xff]  }
  0x3e   :  { %690 = vmatpush1.bf16.msra.mxu0 %v2137_v18  ;;  %2119 = vmatpush1.bf16.msra.mxu1 %v2137_v18 }
  0x41   :  { %692 = vmatmul.mubr.bf16.vlgmr.msra.gmra.mrb[0].mxu0 %v2138_v19  ;;  %820 = vmatmul.mubr.bf16.vlgmr.msra.gmra.mrb[0].mxu1 %v2162_v20 }
  0x42   :  { %699 = vmatprep.mubr.bf16.mxu0 %v2141_v21  ;;  %827 = vmatprep.mubr.bf16.mxu1 %v2168_v22 }
  0x49   :  { %700 = vmatmul.mubr.bf16.gmra.mrb[4].mxu0 %v2143_v23  ;;  %828 = vmatmul.mubr.bf16.gmra.mrb[4].mxu1 %v2170_v24 }
  0x4a   :  { %707 = vmatprep.mubr.bf16.mxu0 %v2144_v25  ;;  %835 = vmatprep.mubr.bf16.mxu1 %v2174_v26 }
  0x51   :  { %708 = vmatmul.mubr.bf16.gmra.mrb[8].mxu0 %v2146_v27  ;;  %836 = vmatmul.mubr.bf16.gmra.mrb[8].mxu1 %v2176_v28 }
  0x52   :  { %715 = vmatprep.mubr.bf16.mxu0 %v2147_v29  ;;  %843 = vmatprep.mubr.bf16.mxu1 %v2180_v30 }
  0x59   :  { %716 = vmatmul.mubr.bf16.gmra.mrb[12].mxu0 %v2149_v31  ;;  %844 = vmatmul.mubr.bf16.gmra.mrb[12].mxu1 %v2182_v32 }
  0x5a   :  { %723 = vmatprep.mubr.bf16.mxu0 %v2150_v33  ;;  %851 = vmatprep.mubr.bf16.mxu1 %v2186_v34 }
  0x61   :  { %724 = vmatmul.mubr.bf16.gmra.mrb[16].mxu0 %v2152_v35  ;;  %852 = vmatmul.mubr.bf16.gmra.mrb[16].mxu1 %v2188_v36 }
  0x62   :  { %731 = vmatprep.mubr.bf16.mxu0 %v2153_v37  ;;  %859 = vmatprep.mubr.bf16.mxu1 %v2192_v38 }
  0x69   :  { %732 = vmatmul.mubr.bf16.gmra.mrb[20].mxu0 %v2155_v39  ;;  %860 = vmatmul.mubr.bf16.gmra.mrb[20].mxu1 %v2194_v40 }
  0x6a   :  { %739 = vmatprep.mubr.bf16.mxu0 %v2156_v41  ;;  %867 = vmatprep.mubr.bf16.mxu1 %v2198_v42 }
  0x71   :  { %740 = vmatmul.mubr.bf16.gmra.mrb[24].mxu0 %v2158_v43  ;;  %868 = vmatmul.mubr.bf16.gmra.mrb[24].mxu1 %v2200_v44 }
  0x72   :  { %747 = vmatprep.mubr.bf16.mxu0 %v2159_v45  ;;  %875 = vmatprep.mubr.bf16.mxu1 %v2204_v46 }
  0x79   :  { %748 = vmatmul.mubr.bf16.gmra.mrb[28].mxu0 %v2161_v47  ;;  %876 = vmatmul.mubr.bf16.gmra.mrb[28].mxu1 %v2206_v48 }
  0x7a   :  { %755 = vmatprep.mubr.bf16.mxu0 %v2165_v49  ;;  %883 = vmatprep.mubr.bf16.mxu1 %v2210_v50 }
  0x81   :  { %756 = vmatmul.mubr.bf16.gmra.mrb[32].mxu0 %v2167_v51  ;;  %884 = vmatmul.mubr.bf16.gmra.mrb[32].mxu1 %v2212_v52 }
  0x82   :  { %763 = vmatprep.mubr.bf16.mxu0 %v2171_v53  ;;  %891 = vmatprep.mubr.bf16.mxu1 %v2213_v54 }
  0x89   :  { %764 = vmatmul.mubr.bf16.gmra.mrb[36].mxu0 %v2173_v55  ;;  %892 = vmatmul.mubr.bf16.gmra.mrb[36].mxu1 %v2215_v56 }
  0x8a   :  { %771 = vmatprep.mubr.bf16.mxu0 %v2177_v57  ;;  %899 = vmatprep.mubr.bf16.mxu1 %v2216_v58 }
  0x91   :  { %772 = vmatmul.mubr.bf16.gmra.mrb[40].mxu0 %v2179_v59  ;;  %900 = vmatmul.mubr.bf16.gmra.mrb[40].mxu1 %v2218_v60 }
  0x92   :  { %779 = vmatprep.mubr.bf16.mxu0 %v2183_v61  ;;  %907 = vmatprep.mubr.bf16.mxu1 %v2219_v62 }
  0x99   :  { %780 = vmatmul.mubr.bf16.gmra.mrb[44].mxu0 %v2185_v63  ;;  %908 = vmatmul.mubr.bf16.gmra.mrb[44].mxu1 %v2221_v0 }
  0x9a   :  { %787 = vmatprep.mubr.bf16.mxu0 %v2189_v1  ;;  %915 = vmatprep.mubr.bf16.mxu1 %v2222_v2 }
  0xa1   :  { %788 = vmatmul.mubr.bf16.gmra.mrb[48].mxu0 %v2191_v3  ;;  %916 = vmatmul.mubr.bf16.gmra.mrb[48].mxu1 %v2224_v4 }
  0xa2   :  { %795 = vmatprep.mubr.bf16.mxu0 %v2195_v5  ;;  %923 = vmatprep.mubr.bf16.mxu1 %v2225_v6 }
  0xa9   :  { %796 = vmatmul.mubr.bf16.gmra.mrb[52].mxu0 %v2197_v7  ;;  %924 = vmatmul.mubr.bf16.gmra.mrb[52].mxu1 %v2227_v8 }
  0xaa   :  { %803 = vmatprep.mubr.bf16.mxu0 %v2201_v9  ;;  %931 = vmatprep.mubr.bf16.mxu1 %v2228_v10 }
  0xb1   :  { %804 = vmatmul.mubr.bf16.gmra.mrb[56].mxu0 %v2203_v11  ;;  %932 = vmatmul.mubr.bf16.gmra.mrb[56].mxu1 %v2230_v12 }
  0xb2   :  { %811 = vmatprep.mubr.bf16.mxu0 %v2207_v13  ;;  %939 = vmatprep.mubr.bf16.mxu1 %v2231_v14 }
  0xb9   :  { %812 = vmatmul.mubr.bf16.gmra.mrb[60].mxu0 %v2209_v15  ;;  %940 = vmatmul.mubr.bf16.gmra.mrb[60].mxu1 %v2233_v16 }
 0x114   :  { %v693_v17 = vpop.f32.mrb[0].mxu0  ;;  %v2533_v18 = vpop.f32.mrb[0].mxu1 }
 0x115   :  { %v695_v19 = vpop.f32.mrb[1].mxu0  ;;  %v823_v20 = vpop.f32.mrb[1].mxu1  ;;  %v1542_v21 = vmul.f32 %v693_v17, %v693_v17 }
 0x116   :  { %v696_v22 = vpop.f32.mrb[2].mxu0  ;;  %v2535_v23 = vpop.f32.mrb[2].mxu1 }
 0x117   :  { %v1900_v24 = vpack.c.bf16 %v696_v22, %v693_v17  ;;  %v1470_v25 = vadd.f32 %v696_v22, %v693_v17  ;;  %v1543_v26 = vmul.f32 %v696_v22, %v696_v22  ;;  %v698_v27 = vpop.f32.mrb[3].mxu0  ;;  %v1980_v28 = vpack.c.bf16 %v2535_v23, %v2533_v18  ;;  %v826_v29 = vpop.f32.mrb[3].mxu1 }
 0x119   :  { %1901 = vst [vmem:[%s2841_s2] sm:$0xff] %v1900_v24   ;;  %v1606_v30 = vadd.f32 %v1543_v26, %v1542_v21  ;;  %2072 = vst [vmem:[%s2841_s2 + $0x80] sm:$0xff] %v1980_v28  }
 0x11c   :  { %v701_v31 = vpop.f32.mrb[4].mxu0  ;;  %v2545_v32 = vpop.f32.mrb[4].mxu1 }
 0x11d   :  { %v1471_v33 = vadd.f32 %v1470_v25, %v701_v31  ;;  %v1544_v34 = vmul.f32 %v701_v31, %v701_v31  ;;  %v703_v35 = vpop.f32.mrb[5].mxu0  ;;  %v831_v36 = vpop.f32.mrb[5].mxu1 }
 0x11e   :  { %v704_v37 = vpop.f32.mrb[6].mxu0  ;;  %v2547_v38 = vpop.f32.mrb[6].mxu1 }
 0x11f   :  { %v1607_v39 = vadd.f32 %v1606_v30, %v1544_v34  ;;  %v1905_v40 = vpack.c.bf16 %v704_v37, %v701_v31  ;;  %v1472_v41 = vadd.f32 %v1471_v33, %v704_v37  ;;  %v1545_v42 = vmul.f32 %v704_v37, %v704_v37  ;;  %v706_v43 = vpop.f32.mrb[7].mxu0  ;;  %v834_v44 = vpop.f32.mrb[7].mxu1 }
 0x120   :  { %v1985_v45 = vpack.c.bf16 %v2547_v38, %v2545_v32 }
 0x121   :  { %2057 = vst [vmem:[%s2841_s2 + $0x8] sm:$0xff] %v1905_v40   ;;  %v1608_v46 = vadd.f32 %v1607_v39, %v1545_v42 }
 0x122   :  { %2073 = vst [vmem:[%s2841_s2 + $0x88] sm:$0xff] %v1985_v45  }
 0x124   :  { %v709_v47 = vpop.f32.mrb[8].mxu0  ;;  %v2557_v48 = vpop.f32.mrb[8].mxu1 }
 0x125   :  { %v1473_v49 = vadd.f32 %v1472_v41, %v709_v47  ;;  %v1546_v50 = vmul.f32 %v709_v47, %v709_v47  ;;  %v711_v51 = vpop.f32.mrb[9].mxu0  ;;  %v839_v52 = vpop.f32.mrb[9].mxu1 }
 0x126   :  { %v712_v53 = vpop.f32.mrb[10].mxu0  ;;  %v2559_v54 = vpop.f32.mrb[10].mxu1 }
 0x127   :  { %v1609_v55 = vadd.f32 %v1608_v46, %v1546_v50  ;;  %v1910_v56 = vpack.c.bf16 %v712_v53, %v709_v47  ;;  %v1474_v57 = vadd.f32 %v1473_v49, %v712_v53  ;;  %v1547_v58 = vmul.f32 %v712_v53, %v712_v53  ;;  %v714_v59 = vpop.f32.mrb[11].mxu0  ;;  %v842_v60 = vpop.f32.mrb[11].mxu1 }
 0x128   :  { %v1990_v61 = vpack.c.bf16 %v2559_v54, %v2557_v48 }
 0x129   :  { %2058 = vst [vmem:[%s2841_s2 + $0x10] sm:$0xff] %v1910_v56   ;;  %v1610_v62 = vadd.f32 %v1609_v55, %v1547_v58 }
 0x12a   :  { %2074 = vst [vmem:[%s2841_s2 + $0x90] sm:$0xff] %v1990_v61  }
 0x12c   :  { %v717_v63 = vpop.f32.mrb[12].mxu0  ;;  %v2569_v0 = vpop.f32.mrb[12].mxu1 }
 0x12d   :  { %v1475_v1 = vadd.f32 %v1474_v57, %v717_v63  ;;  %v1548_v2 = vmul.f32 %v717_v63, %v717_v63  ;;  %v719_v3 = vpop.f32.mrb[13].mxu0  ;;  %v847_v4 = vpop.f32.mrb[13].mxu1 }
 0x12e   :  { %v720_v5 = vpop.f32.mrb[14].mxu0  ;;  %v2571_v6 = vpop.f32.mrb[14].mxu1 }
 0x12f   :  { %v1611_v7 = vadd.f32 %v1610_v62, %v1548_v2  ;;  %v1915_v8 = vpack.c.bf16 %v720_v5, %v717_v63  ;;  %v1476_v9 = vadd.f32 %v1475_v1, %v720_v5  ;;  %v1549_v10 = vmul.f32 %v720_v5, %v720_v5  ;;  %v722_v11 = vpop.f32.mrb[15].mxu0  ;;  %v850_v12 = vpop.f32.mrb[15].mxu1 }
 0x130   :  { %v1995_v13 = vpack.c.bf16 %v2571_v6, %v2569_v0 }
 0x131   :  { %2059 = vst [vmem:[%s2841_s2 + $0x18] sm:$0xff] %v1915_v8   ;;  %v1612_v14 = vadd.f32 %v1611_v7, %v1549_v10 }
 0x132   :  { %2075 = vst [vmem:[%s2841_s2 + $0x98] sm:$0xff] %v1995_v13  }
 0x134   :  { %v725_v15 = vpop.f32.mrb[16].mxu0  ;;  %v2581_v16 = vpop.f32.mrb[16].mxu1 }
 0x135   :  { %v1477_v17 = vadd.f32 %v1476_v9, %v725_v15  ;;  %v1550_v19 = vmul.f32 %v725_v15, %v725_v15  ;;  %v727_v20 = vpop.f32.mrb[17].mxu0  ;;  %v855_v21 = vpop.f32.mrb[17].mxu1 }
 0x136   :  { %v728_v22 = vpop.f32.mrb[18].mxu0  ;;  %v2583_v24 = vpop.f32.mrb[18].mxu1 }
 0x137   :  { %v1613_v25 = vadd.f32 %v1612_v14, %v1550_v19  ;;  %v1920_v26 = vpack.c.bf16 %v728_v22, %v725_v15  ;;  %v1478_v27 = vadd.f32 %v1477_v17, %v728_v22  ;;  %v1551_v28 = vmul.f32 %v728_v22, %v728_v22  ;;  %v730_v29 = vpop.f32.mrb[19].mxu0  ;;  %v858_v30 = vpop.f32.mrb[19].mxu1 }
 0x138   :  { %v2000_v31 = vpack.c.bf16 %v2583_v24, %v2581_v16 }
 0x139   :  { %2060 = vst [vmem:[%s2841_s2 + $0x20] sm:$0xff] %v1920_v26   ;;  %v1614_v33 = vadd.f32 %v1613_v25, %v1551_v28 }
 0x13a   :  { %2076 = vst [vmem:[%s2841_s2 + $0xa0] sm:$0xff] %v2000_v31  }
 0x13c   :  { %v733_v34 = vpop.f32.mrb[20].mxu0  ;;  %v2593_v35 = vpop.f32.mrb[20].mxu1 }
 0x13d   :  { %v1479_v36 = vadd.f32 %v1478_v27, %v733_v34  ;;  %v1552_v37 = vmul.f32 %v733_v34, %v733_v34  ;;  %v735_v39 = vpop.f32.mrb[21].mxu0  ;;  %v863_v40 = vpop.f32.mrb[21].mxu1  ;;  %v2235_v27 = vmov 0.0  }
 0x13e   :  { %v736_v41 = vpop.f32.mrb[22].mxu0  ;;  %v2595_v42 = vpop.f32.mrb[22].mxu1  ;;  %1467 = vst [vmem:[%s2842_s3] sm:$0x1] %v2235_v27  ;;  %1468 = vst [vmem:[%s2843_s4] sm:$0x1] %v2235_v27 }
 0x13f   :  { %v1615_v43 = vadd.f32 %v1614_v33, %v1552_v37  ;;  %v1925_v44 = vpack.c.bf16 %v736_v41, %v733_v34  ;;  %v1480_v45 = vadd.f32 %v1479_v36, %v736_v41  ;;  %v1553_v46 = vmul.f32 %v736_v41, %v736_v41  ;;  %v738_v47 = vpop.f32.mrb[23].mxu0  ;;  %v866_v49 = vpop.f32.mrb[23].mxu1 }
 0x140   :  { %v2005_v50 = vpack.c.bf16 %v2595_v42, %v2593_v35 }
 0x141   :  { %2061 = vst [vmem:[%s2841_s2 + $0x28] sm:$0xff] %v1925_v44   ;;  %v1616_v51 = vadd.f32 %v1615_v43, %v1553_v46 }
 0x142   :  { %2077 = vst [vmem:[%s2841_s2 + $0xa8] sm:$0xff] %v2005_v50  }
 0x144   :  { %v741_v52 = vpop.f32.mrb[24].mxu0  ;;  %v2605_v53 = vpop.f32.mrb[24].mxu1 }
 0x145   :  { %v1481_v55 = vadd.f32 %v1480_v45, %v741_v52  ;;  %v1554_v56 = vmul.f32 %v741_v52, %v741_v52  ;;  %v743_v57 = vpop.f32.mrb[25].mxu0  ;;  %v871_v58 = vpop.f32.mrb[25].mxu1 }
 0x146   :  { %v744_v59 = vpop.f32.mrb[26].mxu0  ;;  %v2607_v60 = vpop.f32.mrb[26].mxu1 }
 0x147   :  { %v1617_v61 = vadd.f32 %v1616_v51, %v1554_v56  ;;  %v1930_v62 = vpack.c.bf16 %v744_v59, %v741_v52  ;;  %v1482_v63 = vadd.f32 %v1481_v55, %v744_v59  ;;  %v1555_v1 = vmul.f32 %v744_v59, %v744_v59  ;;  %v746_v2 = vpop.f32.mrb[27].mxu0  ;;  %v874_v3 = vpop.f32.mrb[27].mxu1 }
 0x148   :  { %v2010_v4 = vpack.c.bf16 %v2607_v60, %v2605_v53 }
 0x149   :  { %2062 = vst [vmem:[%s2841_s2 + $0x30] sm:$0xff] %v1930_v62   ;;  %v1618_v5 = vadd.f32 %v1617_v61, %v1555_v1 }
 0x14a   :  { %2078 = vst [vmem:[%s2841_s2 + $0xb0] sm:$0xff] %v2010_v4  }
 0x14c   :  { %v749_v7 = vpop.f32.mrb[28].mxu0  ;;  %v2617_v8 = vpop.f32.mrb[28].mxu1 }
 0x14d   :  { %v1483_v9 = vadd.f32 %v1482_v63, %v749_v7  ;;  %v1556_v10 = vmul.f32 %v749_v7, %v749_v7  ;;  %v751_v11 = vpop.f32.mrb[29].mxu0  ;;  %v879_v12 = vpop.f32.mrb[29].mxu1 }
 0x14e   :  { %v752_v13 = vpop.f32.mrb[30].mxu0  ;;  %v2619_v14 = vpop.f32.mrb[30].mxu1 }
 0x14f   :  { %v1619_v15 = vadd.f32 %v1618_v5, %v1556_v10  ;;  %v1935_v17 = vpack.c.bf16 %v752_v13, %v749_v7  ;;  %v1484_v19 = vadd.f32 %v1483_v9, %v752_v13  ;;  %v1557_v20 = vmul.f32 %v752_v13, %v752_v13  ;;  %v754_v21 = vpop.f32.mrb[31].mxu0  ;;  %v882_v22 = vpop.f32.mrb[31].mxu1 }
 0x150   :  { %v2015_v25 = vpack.c.bf16 %v2619_v14, %v2617_v8 }
 0x151   :  { %2063 = vst [vmem:[%s2841_s2 + $0x38] sm:$0xff] %v1935_v17   ;;  %v1620_v26 = vadd.f32 %v1619_v15, %v1557_v20 }
 0x152   :  { %2079 = vst [vmem:[%s2841_s2 + $0xb8] sm:$0xff] %v2015_v25  }
 0x154   :  { %v757_v28 = vpop.f32.mrb[32].mxu0  ;;  %v2635_v29 = vpop.f32.mrb[32].mxu1 }
 0x155   :  { %v1485_v30 = vadd.f32 %v1484_v19, %v757_v28  ;;  %v1558_v31 = vmul.f32 %v757_v28, %v757_v28  ;;  %v759_v33 = vpop.f32.mrb[33].mxu0  ;;  %v887_v34 = vpop.f32.mrb[33].mxu1 }
 0x156   :  { %v760_v36 = vpop.f32.mrb[34].mxu0  ;;  %v2637_v37 = vpop.f32.mrb[34].mxu1 }
 0x157   :  { %v1621_v39 = vadd.f32 %v1620_v26, %v1558_v31  ;;  %v1940_v40 = vpack.c.bf16 %v760_v36, %v757_v28  ;;  %v1486_v41 = vadd.f32 %v1485_v30, %v760_v36  ;;  %v1559_v43 = vmul.f32 %v760_v36, %v760_v36  ;;  %v762_v44 = vpop.f32.mrb[35].mxu0  ;;  %v890_v45 = vpop.f32.mrb[35].mxu1 }
 0x158   :  { %v2020_v46 = vpack.c.bf16 %v2637_v37, %v2635_v29 }
 0x159   :  { %2064 = vst [vmem:[%s2841_s2 + $0x40] sm:$0xff] %v1940_v40   ;;  %v1622_v47 = vadd.f32 %v1621_v39, %v1559_v43 }
 0x15a   :  { %2080 = vst [vmem:[%s2841_s2 + $0xc0] sm:$0xff] %v2020_v46  }
 0x15c   :  { %v765_v49 = vpop.f32.mrb[36].mxu0  ;;  %v2647_v50 = vpop.f32.mrb[36].mxu1 }
 0x15d   :  { %v1487_v51 = vadd.f32 %v1486_v41, %v765_v49  ;;  %v1560_v52 = vmul.f32 %v765_v49, %v765_v49  ;;  %v767_v55 = vpop.f32.mrb[37].mxu0  ;;  %v895_v56 = vpop.f32.mrb[37].mxu1 }
 0x15e   :  { %v768_v57 = vpop.f32.mrb[38].mxu0  ;;  %v2649_v58 = vpop.f32.mrb[38].mxu1 }
 0x15f   :  { %v1623_v59 = vadd.f32 %v1622_v47, %v1560_v52  ;;  %v1945_v61 = vpack.c.bf16 %v768_v57, %v765_v49  ;;  %v1488_v62 = vadd.f32 %v1487_v51, %v768_v57  ;;  %v1561_v63 = vmul.f32 %v768_v57, %v768_v57  ;;  %v770_v1 = vpop.f32.mrb[39].mxu0  ;;  %v898_v2 = vpop.f32.mrb[39].mxu1 }
 0x160   :  { %v2025_v3 = vpack.c.bf16 %v2649_v58, %v2647_v50 }
 0x161   :  { %2065 = vst [vmem:[%s2841_s2 + $0x48] sm:$0xff] %v1945_v61   ;;  %v1624_v4 = vadd.f32 %v1623_v59, %v1561_v63 }
 0x162   :  { %2081 = vst [vmem:[%s2841_s2 + $0xc8] sm:$0xff] %v2025_v3  }
 0x164   :  { %v773_v5 = vpop.f32.mrb[40].mxu0  ;;  %v2659_v7 = vpop.f32.mrb[40].mxu1 }
 0x165   :  { %v1489_v9 = vadd.f32 %v1488_v62, %v773_v5  ;;  %v1562_v10 = vmul.f32 %v773_v5, %v773_v5  ;;  %v775_v11 = vpop.f32.mrb[41].mxu0  ;;  %v903_v12 = vpop.f32.mrb[41].mxu1 }
 0x166   :  { %v776_v13 = vpop.f32.mrb[42].mxu0  ;;  %v2661_v15 = vpop.f32.mrb[42].mxu1 }
 0x167   :  { %v1625_v17 = vadd.f32 %v1624_v4, %v1562_v10  ;;  %v1950_v19 = vpack.c.bf16 %v776_v13, %v773_v5  ;;  %v1490_v20 = vadd.f32 %v1489_v9, %v776_v13  ;;  %v1563_v21 = vmul.f32 %v776_v13, %v776_v13  ;;  %v778_v22 = vpop.f32.mrb[43].mxu0  ;;  %v906_v25 = vpop.f32.mrb[43].mxu1 }
 0x168   :  { %v2030_v26 = vpack.c.bf16 %v2661_v15, %v2659_v7 }
 0x169   :  { %2066 = vst [vmem:[%s2841_s2 + $0x50] sm:$0xff] %v1950_v19   ;;  %v1626_v27 = vadd.f32 %v1625_v17, %v1563_v21 }
 0x16a   :  { %2082 = vst [vmem:[%s2841_s2 + $0xd0] sm:$0xff] %v2030_v26  }
 0x16c   :  { %v781_v28 = vpop.f32.mrb[44].mxu0  ;;  %v2671_v30 = vpop.f32.mrb[44].mxu1 }
 0x16d   :  { %v1491_v31 = vadd.f32 %v1490_v20, %v781_v28  ;;  %v1564_v33 = vmul.f32 %v781_v28, %v781_v28  ;;  %v783_v34 = vpop.f32.mrb[45].mxu0  ;;  %v911_v36 = vpop.f32.mrb[45].mxu1 }
 0x16e   :  { %v784_v39 = vpop.f32.mrb[46].mxu0  ;;  %v2673_v40 = vpop.f32.mrb[46].mxu1 }
 0x16f   :  { %v1627_v41 = vadd.f32 %v1626_v27, %v1564_v33  ;;  %v1955_v43 = vpack.c.bf16 %v784_v39, %v781_v28  ;;  %v1492_v44 = vadd.f32 %v1491_v31, %v784_v39  ;;  %v1565_v45 = vmul.f32 %v784_v39, %v784_v39  ;;  %v786_v46 = vpop.f32.mrb[47].mxu0  ;;  %v914_v47 = vpop.f32.mrb[47].mxu1 }
 0x170   :  { %v2035_v49 = vpack.c.bf16 %v2673_v40, %v2671_v30 }
 0x171   :  { %2067 = vst [vmem:[%s2841_s2 + $0x58] sm:$0xff] %v1955_v43   ;;  %v1628_v51 = vadd.f32 %v1627_v41, %v1565_v45 }
 0x172   :  { %2083 = vst [vmem:[%s2841_s2 + $0xd8] sm:$0xff] %v2035_v49  }
 0x174   :  { %v789_v52 = vpop.f32.mrb[48].mxu0  ;;  %v2683_v55 = vpop.f32.mrb[48].mxu1 }
 0x175   :  { %v1493_v56 = vadd.f32 %v1492_v44, %v789_v52  ;;  %v1566_v57 = vmul.f32 %v789_v52, %v789_v52  ;;  %v791_v59 = vpop.f32.mrb[49].mxu0  ;;  %v919_v61 = vpop.f32.mrb[49].mxu1 }
 0x176   :  { %v792_v62 = vpop.f32.mrb[50].mxu0  ;;  %v2685_v63 = vpop.f32.mrb[50].mxu1 }
 0x177   :  { %v1629_v1 = vadd.f32 %v1628_v51, %v1566_v57  ;;  %v1960_v2 = vpack.c.bf16 %v792_v62, %v789_v52  ;;  %v1494_v3 = vadd.f32 %v1493_v56, %v792_v62  ;;  %v1567_v4 = vmul.f32 %v792_v62, %v792_v62  ;;  %v794_v5 = vpop.f32.mrb[51].mxu0  ;;  %v922_v9 = vpop.f32.mrb[51].mxu1 }
 0x178   :  { %v2040_v10 = vpack.c.bf16 %v2685_v63, %v2683_v55 }
 0x179   :  { %2068 = vst [vmem:[%s2841_s2 + $0x60] sm:$0xff] %v1960_v2   ;;  %v1630_v11 = vadd.f32 %v1629_v1, %v1567_v4 }
 0x17a   :  { %2084 = vst [vmem:[%s2841_s2 + $0xe0] sm:$0xff] %v2040_v10  }
 0x17c   :  { %v797_v12 = vpop.f32.mrb[52].mxu0  ;;  %v2695_v13 = vpop.f32.mrb[52].mxu1 }
 0x17d   :  { %v1495_v17 = vadd.f32 %v1494_v3, %v797_v12  ;;  %v1568_v19 = vmul.f32 %v797_v12, %v797_v12  ;;  %v799_v20 = vpop.f32.mrb[53].mxu0  ;;  %v927_v21 = vpop.f32.mrb[53].mxu1 }
 0x17e   :  { %v800_v22 = vpop.f32.mrb[54].mxu0  ;;  %v2697_v25 = vpop.f32.mrb[54].mxu1 }
 0x17f   :  { %v1631_v26 = vadd.f32 %v1630_v11, %v1568_v19  ;;  %v1965_v27 = vpack.c.bf16 %v800_v22, %v797_v12  ;;  %v1496_v28 = vadd.f32 %v1495_v17, %v800_v22  ;;  %v1569_v31 = vmul.f32 %v800_v22, %v800_v22  ;;  %v802_v33 = vpop.f32.mrb[55].mxu0  ;;  %v930_v34 = vpop.f32.mrb[55].mxu1 }
 0x180   :  { %v2045_v36 = vpack.c.bf16 %v2697_v25, %v2695_v13 }
 0x181   :  { %2069 = vst [vmem:[%s2841_s2 + $0x68] sm:$0xff] %v1965_v27   ;;  %v1632_v39 = vadd.f32 %v1631_v26, %v1569_v31  ;;  %v1574_v31 = vmul.f32 %v2533_v18, %v2533_v18 }
 0x182   :  { %2085 = vst [vmem:[%s2841_s2 + $0xe8] sm:$0xff] %v2045_v36   ;;  %v1575_v36 = vmul.f32 %v2535_v23, %v2535_v23 }
 0x184   :  { %v805_v41 = vpop.f32.mrb[56].mxu0  ;;  %v2707_v43 = vpop.f32.mrb[56].mxu1 }
 0x185   :  { %v1497_v44 = vadd.f32 %v1496_v28, %v805_v41  ;;  %v1570_v45 = vmul.f32 %v805_v41, %v805_v41  ;;  %v807_v46 = vpop.f32.mrb[57].mxu0  ;;  %v935_v47 = vpop.f32.mrb[57].mxu1 }
 0x186   :  { %v808_v49 = vpop.f32.mrb[58].mxu0  ;;  %v2709_v51 = vpop.f32.mrb[58].mxu1 }
 0x187   :  { %v1633_v52 = vadd.f32 %v1632_v39, %v1570_v45  ;;  %v1970_v56 = vpack.c.bf16 %v808_v49, %v805_v41  ;;  %v1498_v57 = vadd.f32 %v1497_v44, %v808_v49  ;;  %v1571_v59 = vmul.f32 %v808_v49, %v808_v49  ;;  %v810_v61 = vpop.f32.mrb[59].mxu0  ;;  %v938_v62 = vpop.f32.mrb[59].mxu1 }
 0x188   :  { %v2050_v1 = vpack.c.bf16 %v2709_v51, %v2707_v43  ;;  %v1576_v44 = vmul.f32 %v2545_v32, %v2545_v32 }
 0x189   :  { %2070 = vst [vmem:[%s2841_s2 + $0x70] sm:$0xff] %v1970_v56   ;;  %v1634_v2 = vadd.f32 %v1633_v52, %v1571_v59  ;;  %v1578_v52 = vmul.f32 %v2557_v48, %v2557_v48 }
 0x18a   :  { %2086 = vst [vmem:[%s2841_s2 + $0xf0] sm:$0xff] %v2050_v1  }
 0x18c   :  { %v813_v3 = vpop.f32.mrb[60].mxu0  ;;  %v2719_v4 = vpop.f32.mrb[60].mxu1 }
 0x18d   :  { %v1499_v5 = vadd.f32 %v1498_v57, %v813_v3  ;;  %v1572_v9 = vmul.f32 %v813_v3, %v813_v3  ;;  %v815_v10 = vpop.f32.mrb[61].mxu0  ;;  %v943_v11 = vpop.f32.mrb[61].mxu1 }
 0x18e   :  { %v816_v12 = vpop.f32.mrb[62].mxu0  ;;  %v2721_v17 = vpop.f32.mrb[62].mxu1 }
 0x18f   :  { %v1635_v19 = vadd.f32 %v1634_v2, %v1572_v9  ;;  %v1975_v20 = vpack.c.bf16 %v816_v12, %v813_v3  ;;  %v1500_v21 = vadd.f32 %v1499_v5, %v816_v12  ;;  %v1573_v22 = vmul.f32 %v816_v12, %v816_v12  ;;  %v818_v26 = vpop.f32.mrb[63].mxu0  ;;  %v946_v27 = vpop.f32.mrb[63].mxu1 }
 0x190   :  { %v2055_v28 = vpack.c.bf16 %v2721_v17, %v2719_v4 }
 0x191   :  { %2071 = vst [vmem:[%s2841_s2 + $0x78] sm:$0xff] %v1975_v20   ;;  %v1501_v33 = vadd.f32 %v1500_v21, %v2533_v18  ;;  %v1636_v34 = vadd.f32 %v1635_v19, %v1573_v22  ;;  %v1577_v18 = vmul.f32 %v2547_v38, %v2547_v38 }
 0x192   :  { %2087 = vst [vmem:[%s2841_s2 + $0xf8] sm:$0xff] %v2055_v28  }
 0x193   :  { %v1502_v39 = vadd.f32 %v1501_v33, %v2535_v23  ;;  %v1637_v41 = vadd.f32 %v1636_v34, %v1574_v31  ;;  %v1579_v23 = vmul.f32 %v2559_v54, %v2559_v54 }
 0x195   :  { %v1503_v45 = vadd.f32 %v1502_v39, %v2545_v32  ;;  %v1638_v46 = vadd.f32 %v1637_v41, %v1575_v36  ;;  %v1580_v32 = vmul.f32 %v2569_v0, %v2569_v0  ;;  %v1590_v39 = vmul.f32 %v2635_v29, %v2635_v29 }
 0x197   :  { %v1504_v47 = vadd.f32 %v1503_v45, %v2547_v38  ;;  %v1639_v49 = vadd.f32 %v1638_v46, %v1576_v44  ;;  %v1581_v38 = vmul.f32 %v2571_v6, %v2571_v6  ;;  %v1591_v45 = vmul.f32 %v2637_v37, %v2637_v37 }
 0x199   :  { %v1505_v56 = vadd.f32 %v1504_v47, %v2557_v48  ;;  %v1640_v57 = vadd.f32 %v1639_v49, %v1577_v18  ;;  %v1582_v48 = vmul.f32 %v2581_v16, %v2581_v16  ;;  %v1592_v18 = vmul.f32 %v2647_v50, %v2647_v50 }
 0x19a   :  { %v1593_v49 = vmul.f32 %v2649_v58, %v2649_v58 }
 0x19b   :  { %v1506_v59 = vadd.f32 %v1505_v56, %v2559_v54  ;;  %v1641_v61 = vadd.f32 %v1640_v57, %v1578_v52  ;;  %v1583_v54 = vmul.f32 %v2583_v24, %v2583_v24  ;;  %v1594_v56 = vmul.f32 %v2659_v7, %v2659_v7 }
 0x19d   :  { %v1507_v62 = vadd.f32 %v1506_v59, %v2569_v0  ;;  %v1642_v1 = vadd.f32 %v1641_v61, %v1579_v23  ;;  %v1584_v0 = vmul.f32 %v2593_v35, %v2593_v35  ;;  %v1595_v23 = vmul.f32 %v2661_v15, %v2661_v15 }
 0x19e   :  { %v1596_v61 = vmul.f32 %v2671_v30, %v2671_v30 }
 0x19f   :  { %v1508_v2 = vadd.f32 %v1507_v62, %v2571_v6  ;;  %v1643_v3 = vadd.f32 %v1642_v1, %v1580_v32  ;;  %v1585_v6 = vmul.f32 %v2595_v42, %v2595_v42  ;;  %v1597_v62 = vmul.f32 %v2673_v40, %v2673_v40 }
 0x1a1   :  { %v1644_v5 = vadd.f32 %v1643_v3, %v1581_v38  ;;  %v1509_v9 = vadd.f32 %v1508_v2, %v2581_v16  ;;  %v1586_v16 = vmul.f32 %v2605_v53, %v2605_v53  ;;  %v1598_v38 = vmul.f32 %v2683_v55, %v2683_v55 }
 0x1a2   :  { %v1599_v3 = vmul.f32 %v2685_v63, %v2685_v63 }
 0x1a3   :  { %v1510_v10 = vadd.f32 %v1509_v9, %v2583_v24  ;;  %v1645_v11 = vadd.f32 %v1644_v5, %v1582_v48  ;;  %v1587_v24 = vmul.f32 %v2607_v60, %v2607_v60  ;;  %v1600_v5 = vmul.f32 %v2695_v13, %v2695_v13 }
 0x1a5   :  { %v1511_v12 = vadd.f32 %v1510_v10, %v2593_v35  ;;  %v1646_v19 = vadd.f32 %v1645_v11, %v1583_v54  ;;  %v1588_v35 = vmul.f32 %v2617_v8, %v2617_v8  ;;  %v1601_v54 = vmul.f32 %v2697_v25, %v2697_v25 }
 0x1a6   :  { %v1602_v11 = vmul.f32 %v2707_v43, %v2707_v43 }
 0x1a7   :  { %v1512_v20 = vadd.f32 %v1511_v12, %v2595_v42  ;;  %v1647_v21 = vadd.f32 %v1646_v19, %v1584_v0  ;;  %v1589_v42 = vmul.f32 %v2619_v14, %v2619_v14  ;;  %v1603_v12 = vmul.f32 %v2709_v51, %v2709_v51 }
 0x1a9   :  { %v1513_v22 = vadd.f32 %v1512_v20, %v2605_v53  ;;  %v1648_v26 = vadd.f32 %v1647_v21, %v1585_v6  ;;  %v1605_v21 = vmul.f32 %v2721_v17, %v2721_v17 }
 0x1ab   :  { %v1514_v27 = vadd.f32 %v1513_v22, %v2607_v60  ;;  %v1649_v28 = vadd.f32 %v1648_v26, %v1586_v16 }
 0x1ad   :  { %v1515_v31 = vadd.f32 %v1514_v27, %v2617_v8  ;;  %v1650_v33 = vadd.f32 %v1649_v28, %v1587_v24 }
 0x1af   :  { %v1516_v34 = vadd.f32 %v1515_v31, %v2619_v14  ;;  %v1651_v36 = vadd.f32 %v1650_v33, %v1588_v35 }
 0x1b1   :  { %v1517_v53 = vadd.f32 %v1516_v34, %v2635_v29  ;;  %v1652_v41 = vadd.f32 %v1651_v36, %v1589_v42 }
 0x1b3   :  { %v1653_v60 = vadd.f32 %v1652_v41, %v1590_v39  ;;  %v1518_v44 = vadd.f32 %v1517_v53, %v2637_v37 }
 0x1b5   :  { %v1654_v8 = vadd.f32 %v1653_v60, %v1591_v45  ;;  %v1519_v46 = vadd.f32 %v1518_v44, %v2647_v50 }
 0x1b7   :  { %v1655_v14 = vadd.f32 %v1654_v8, %v1592_v18  ;;  %v1520_v47 = vadd.f32 %v1519_v46, %v2649_v58 }
 0x1b9   :  { %v1656_v29 = vadd.f32 %v1655_v14, %v1593_v49  ;;  %v1521_v52 = vadd.f32 %v1520_v47, %v2659_v7 }
 0x1bb   :  { %v1657_v57 = vadd.f32 %v1656_v29, %v1594_v56  ;;  %v1522_v37 = vadd.f32 %v1521_v52, %v2661_v15 }
 0x1bd   :  { %v1658_v59 = vadd.f32 %v1657_v57, %v1595_v23  ;;  %v1523_v50 = vadd.f32 %v1522_v37, %v2671_v30 }
 0x1bf   :  { %v1659_v32 = vadd.f32 %v1658_v59, %v1596_v61  ;;  %v1524_v58 = vadd.f32 %v1523_v50, %v2673_v40 }
 0x1c1   :  { %v1660_v1 = vadd.f32 %v1659_v32, %v1597_v62  ;;  %v1525_v7 = vadd.f32 %v1524_v58, %v2683_v55 }
 0x1c3   :  { %v1661_v2 = vadd.f32 %v1660_v1, %v1598_v38  ;;  %v1526_v15 = vadd.f32 %v1525_v7, %v2685_v63 }
 0x1c5   :  { %v1662_v48 = vadd.f32 %v1661_v2, %v1599_v3  ;;  %v1527_v30 = vadd.f32 %v1526_v15, %v2695_v13  ;;  %v1604_v13 = vmul.f32 %v2719_v4, %v2719_v4 }
 0x1c7   :  { %v1663_v9 = vadd.f32 %v1662_v48, %v1600_v5  ;;  %v1528_v40 = vadd.f32 %v1527_v30, %v2697_v25 }
 0x1c9   :  { %v1664_v10 = vadd.f32 %v1663_v9, %v1601_v54  ;;  %v1529_v55 = vadd.f32 %v1528_v40, %v2707_v43 }
 0x1cb   :  { %v1665_v0 = vadd.f32 %v1664_v10, %v1602_v11  ;;  %v1530_v63 = vadd.f32 %v1529_v55, %v2709_v51 }
 0x1cd   :  { %v1666_v19 = vadd.f32 %v1665_v0, %v1603_v12  ;;  %v1531_v6 = vadd.f32 %v1530_v63, %v2719_v4  ;;  %v1469_v4 = vld [vmem:[%s2842_s3] sm:$0x1] }
 0x1cf   :  { %v1667_v20 = vadd.f32 %v1666_v19, %v1604_v13  ;;  %v1532_v25 = vadd.f32 %v1531_v6, %v2721_v17  ;;  %v1541_v17 = vld [vmem:[%s2843_s4] sm:$0x1] }
 0x1d1   :  { %v1533_v16 = vrot.slane %v1532_v25, 4  ;;  %v1668_v43 = vadd.f32 %v1667_v20, %v1605_v21 }
 0x1d3   :  { %v1534_v22 = vadd.f32 %v1533_v16, %v1532_v25  ;;  %v1669_v26 = vrot.slane %v1668_v43, 4 }
 0x1d5   :  { %v1535_v24 = vrot.slane %v1534_v22, 2  ;;  %v1670_v27 = vadd.f32 %v1669_v26, %v1668_v43 }
 0x1d7   :  { %v1536_v28 = vadd.f32 %v1535_v24, %v1534_v22  ;;  %v1671_v51 = vrot.slane %v1670_v27, 2 }
 0x1d9   :  { %v1537_v35 = vrot.slane %v1536_v28, 1  ;;  %v1672_v31 = vadd.f32 %v1671_v51, %v1670_v27 }
 0x1db   :  { %v1538_v33 = vadd.f32 %v1537_v35, %v1536_v28  ;;  %v1673_v42 = vrot.slane %v1672_v31, 1 }
 0x1dd   :  { %v1539_v34 = vadd.f32 %v1538_v33, %v1469_v4  ;;  %v1674_v36 = vadd.f32 %v1673_v42, %v1672_v31 }
 0x1df   :  { %1540 = vst [vmem:[%s2842_s3] sm:$0x1] %v1539_v34  ;;  %v1675_v53 = vadd.f32 %v1674_v36, %v1541_v17 }
 0x1e1   :  { %1676 = vst [vmem:[%s2843_s4] sm:$0x1] %v1675_v53 }

// kernel: resnet_generator_forward.50
= control target key start
LH: loop header
LB: loop body
LE: loop exit
PB: predicated region body
PF: predicated region fallthrough
CT: control target
= control target key end

     0   :  { %s422_s0 = inlined_call_operand.vmem [shape: bf16[128,128], index: 0, kind: input, shape index: {}]   ;;  %s423_s1 = inlined_call_operand.vmem [shape: f32[1,128], index: 1, kind: input, shape index: {}]   ;;  %s424_s2 = inlined_call_operand.vmem [shape: f32[1,128], index: 2, kind: input, shape index: {}]   ;;  %s425_s3 = inlined_call_operand.vmem [shape: bf16[128,128], index: 3, kind: output, shape index: {}]  }
   0x1   :  { %v227_v0 = vld [vmem:[%s422_s0] sm:$0xff]   ;;  %v298_v4 = vld [vmem:[%s422_s0 + $0x8] sm:$0xff]   ;;  %v299_v5 = vld [vmem:[%s422_s0 + $0x10] sm:$0xff]  }
   0x2   :  { %v338_v1 = vld [vmem:[%s423_s1] ss:$0 sm:$0xff]  ;;  %v228_v2 = vunpack.c.l.bf16 %v227_v0  ;;  %v229_v3 = vunpack.c.h.bf16 %v227_v0  ;;  %v300_v6 = vld [vmem:[%s422_s0 + $0x18] sm:$0xff]   ;;  %v232_v8 = vunpack.c.l.bf16 %v298_v4  ;;  %v233_v9 = vunpack.c.h.bf16 %v298_v4  ;;  %v302_v33 = vld [vmem:[%s422_s0 + $0x28] sm:$0xff]  }
   0x3   :  { %v352_v7 = vld [vmem:[%s424_s2] ss:$0 sm:$0xff]  ;;  %v236_v10 = vunpack.c.l.bf16 %v299_v5  ;;  %v237_v11 = vunpack.c.h.bf16 %v299_v5  ;;  %v240_v14 = vunpack.c.l.bf16 %v300_v6  ;;  %v241_v15 = vunpack.c.h.bf16 %v300_v6  ;;  %v303_v38 = vld [vmem:[%s422_s0 + $0x30] sm:$0xff]   ;;  %v304_v43 = vld [vmem:[%s422_s0 + $0x38] sm:$0xff]  }
   0x4   :  { %v53_v12 = vmul.f32 %v228_v2, %v338_v1  ;;  %v54_v13 = vmul.f32 %v229_v3, %v338_v1  ;;  %v55_v16 = vmul.f32 %v232_v8, %v338_v1  ;;  %v56_v17 = vmul.f32 %v233_v9, %v338_v1  ;;  %v301_v28 = vld [vmem:[%s422_s0 + $0x20] sm:$0xff]  }
   0x5   :  { %v57_v18 = vmul.f32 %v236_v10, %v338_v1  ;;  %v58_v19 = vmul.f32 %v237_v11, %v338_v1  ;;  %v59_v22 = vmul.f32 %v240_v14, %v338_v1  ;;  %v60_v23 = vmul.f32 %v241_v15, %v338_v1 }
   0x6   :  { %v76_v20 = vadd.f32 %v352_v7, %v53_v12  ;;  %v77_v21 = vadd.f32 %v352_v7, %v54_v13  ;;  %v78_v24 = vadd.f32 %v352_v7, %v55_v16  ;;  %v79_v25 = vadd.f32 %v352_v7, %v56_v17 }
   0x7   :  { %v80_v26 = vadd.f32 %v352_v7, %v57_v18  ;;  %v81_v27 = vadd.f32 %v352_v7, %v58_v19  ;;  %v82_v31 = vadd.f32 %v352_v7, %v59_v22  ;;  %v83_v32 = vadd.f32 %v352_v7, %v60_v23 }
   0x8   :  { %v92_v29 = vmax.f32 %v76_v20, 0.0  ;;  %v93_v30 = vmax.f32 %v77_v21, 0.0  ;;  %v94_v34 = vmax.f32 %v78_v24, 0.0  ;;  %v95_v35 = vmax.f32 %v79_v25, 0.0 }
   0x9   :  { %v96_v36 = vmax.f32 %v80_v26, 0.0  ;;  %v97_v37 = vmax.f32 %v81_v27, 0.0  ;;  %v98_v40 = vmax.f32 %v82_v31, 0.0  ;;  %v99_v41 = vmax.f32 %v83_v32, 0.0 }
   0xa   :  { %v261_v39 = vpack.c.bf16 %v93_v30, %v92_v29  ;;  %v244_v42 = vunpack.c.l.bf16 %v301_v28  ;;  %v266_v44 = vpack.c.bf16 %v95_v35, %v94_v34  ;;  %v245_v46 = vunpack.c.h.bf16 %v301_v28 }
   0xb   :  { %v271_v45 = vpack.c.bf16 %v97_v37, %v96_v36  ;;  %v248_v47 = vunpack.c.l.bf16 %v302_v33  ;;  %v276_v48 = vpack.c.bf16 %v99_v41, %v98_v40  ;;  %v249_v50 = vunpack.c.h.bf16 %v302_v33 }
   0xc   :  { %262 = vst [vmem:[%s425_s3] sm:$0xff] %v261_v39   ;;  %v61_v49 = vmul.f32 %v244_v42, %v338_v1  ;;  %v252_v51 = vunpack.c.l.bf16 %v303_v38  ;;  %305 = vst [vmem:[%s425_s3 + $0x8] sm:$0xff] %v266_v44   ;;  %v62_v52 = vmul.f32 %v245_v46, %v338_v1  ;;  %v253_v54 = vunpack.c.h.bf16 %v303_v38 }
   0xd   :  { %306 = vst [vmem:[%s425_s3 + $0x10] sm:$0xff] %v271_v45   ;;  %v63_v53 = vmul.f32 %v248_v47, %v338_v1  ;;  %v256_v55 = vunpack.c.l.bf16 %v304_v43  ;;  %307 = vst [vmem:[%s425_s3 + $0x18] sm:$0xff] %v276_v48   ;;  %v64_v57 = vmul.f32 %v249_v50, %v338_v1  ;;  %v257_v59 = vunpack.c.h.bf16 %v304_v43 }
   0xe   :  { %v84_v56 = vadd.f32 %v352_v7, %v61_v49  ;;  %v65_v58 = vmul.f32 %v252_v51, %v338_v1  ;;  %v85_v60 = vadd.f32 %v352_v7, %v62_v52  ;;  %v66_v62 = vmul.f32 %v253_v54, %v338_v1 }
   0xf   :  { %v86_v61 = vadd.f32 %v352_v7, %v63_v53  ;;  %v67_v63 = vmul.f32 %v256_v55, %v338_v1  ;;  %v87_v2 = vadd.f32 %v352_v7, %v64_v57  ;;  %v68_v4 = vmul.f32 %v257_v59, %v338_v1 }
  0x10   :  { %v100_v0 = vmax.f32 %v84_v56, 0.0  ;;  %v88_v3 = vadd.f32 %v352_v7, %v65_v58  ;;  %v101_v5 = vmax.f32 %v85_v60, 0.0  ;;  %v89_v8 = vadd.f32 %v352_v7, %v66_v62 }
  0x11   :  { %v102_v6 = vmax.f32 %v86_v61, 0.0  ;;  %v90_v9 = vadd.f32 %v352_v7, %v67_v63  ;;  %v103_v10 = vmax.f32 %v87_v2, 0.0  ;;  %v91_v12 = vadd.f32 %v352_v7, %v68_v4 }
  0x12   :  { %v104_v11 = vmax.f32 %v88_v3, 0.0  ;;  %v281_v13 = vpack.c.bf16 %v101_v5, %v100_v0  ;;  %v105_v14 = vmax.f32 %v89_v8, 0.0 }
  0x13   :  { %v106_v15 = vmax.f32 %v90_v9, 0.0  ;;  %v286_v16 = vpack.c.bf16 %v103_v10, %v102_v6  ;;  %v107_v17 = vmax.f32 %v91_v12, 0.0 }
  0x14   :  { %308 = vst [vmem:[%s425_s3 + $0x20] sm:$0xff] %v281_v13   ;;  %v291_v1 = vpack.c.bf16 %v105_v14, %v104_v11 }
  0x15   :  { %309 = vst [vmem:[%s425_s3 + $0x28] sm:$0xff] %v286_v16   ;;  %v296_v18 = vpack.c.bf16 %v107_v17, %v106_v15 }
  0x16   :  { %310 = vst [vmem:[%s425_s3 + $0x30] sm:$0xff] %v291_v1  }
  0x17   :  { %311 = vst [vmem:[%s425_s3 + $0x38] sm:$0xff] %v296_v18  }

// kernel: resnet_generator_forward.51
= control target key start
LH: loop header
LB: loop body
LE: loop exit
PB: predicated region body
PF: predicated region fallthrough
CT: control target
= control target key end

     0   :  { %v578_v30 = vmov 0.0   ;;  %s718_s1 = inlined_call_operand.vmem [shape: bf16[384,128], index: 1, kind: input, shape index: {}]   ;;  %s719_s0 = inlined_call_operand.vmem [shape: bf16[32,384], index: 0, kind: input, shape index: {}]   ;;  %s720_s3 = inlined_call_operand.vmem [shape: f32[1,128], index: 3, kind: output, shape index: {1}]   ;;  %s721_s4 = inlined_call_operand.vmem [shape: f32[1,128], index: 4, kind: output, shape index: {2}]   ;;  %s722_s2 = inlined_call_operand.vmem [shape: bf16[32,128], index: 2, kind: output, shape index: {0}]  }
   0x1   :  { %v546_v0 = vld [vmem:[%s718_s1 + $0x40] sm:$0xff]   ;;  %v549_v3 = vld [vmem:[%s718_s1 + $0x48] sm:$0xff]   ;;  %v552_v6 = vld [vmem:[%s718_s1 + $0x50] sm:$0xff]   ;;  %396 = vst [vmem:[%s720_s3] sm:$0x1] %v578_v30 }
   0x2   :  { %v547_v1 = vld [vmem:[%s718_s1] sm:$0xff]   ;;  %487 = vmatprep.subr.bf16.mxu0 %v546_v0  ;;  %v550_v4 = vld [vmem:[%s718_s1 + $0x8] sm:$0xff]   ;;  %v553_v7 = vld [vmem:[%s718_s1 + $0x10] sm:$0xff]   ;;  %397 = vst [vmem:[%s721_s4] sm:$0x1] %v578_v30 }
   0x3   :  { %v548_v2 = vld [vmem:[%s718_s1 + $0x80] sm:$0xff]   ;;  %488 = vmatpush3.bf16.msra.mxu0 %v547_v1  ;;  %v551_v5 = vld [vmem:[%s718_s1 + $0x88] sm:$0xff]   ;;  %v554_v8 = vld [vmem:[%s718_s1 + $0x90] sm:$0xff]  }
   0x4   :  { %525 = vmatprep.subr.bf16.mxu1 %v548_v2  ;;  %489 = vmatprep.subr.bf16.mxu0 %v549_v3  ;;  %v555_v9 = vld [vmem:[%s718_s1 + $0x58] sm:$0xff]   ;;  %v558_v12 = vld [vmem:[%s718_s1 + $0x60] sm:$0xff]   ;;  %v561_v15 = vld [vmem:[%s718_s1 + $0x68] sm:$0xff]  }
   0x5   :  { %526 = vmatpush3.bf16.msra.mxu1 %v548_v2  ;;  %v556_v10 = vld [vmem:[%s718_s1 + $0x18] sm:$0xff]   ;;  %v560_v13 = vld [vmem:[%s718_s1 + $0xa0] sm:$0xff]   ;;  %v563_v16 = vld [vmem:[%s718_s1 + $0xa8] sm:$0xff]  }
   0x6   :  { %527 = vmatprep.subr.bf16.mxu1 %v551_v5  ;;  %v557_v11 = vld [vmem:[%s718_s1 + $0x98] sm:$0xff]   ;;  %v559_v14 = vld [vmem:[%s718_s1 + $0x20] sm:$0xff]   ;;  %v562_v17 = vld [vmem:[%s718_s1 + $0x28] sm:$0xff]  }
   0x7   :  { %490 = vmatpush3.bf16.msra.mxu0 %v550_v4  ;;  %v564_v18 = vld [vmem:[%s718_s1 + $0x70] sm:$0xff]   ;;  %v567_v21 = vld [vmem:[%s718_s1 + $0x78] sm:$0xff]   ;;  %v570_v26 = vld [vmem:[%s719_s0] ss:$12 sps:$4 sm:$0xff]  }
   0x8   :  { %491 = vmatprep.subr.bf16.mxu0 %v552_v6  ;;  %v565_v19 = vld [vmem:[%s718_s1 + $0x30] sm:$0xff]   ;;  %v569_v22 = vld [vmem:[%s718_s1 + $0xb8] sm:$0xff]   ;;  %v574_v28 = vld [vmem:[%s719_s0 + $0x20] ss:$12 sps:$4 sm:$0xff]  }
   0x9   :  { %528 = vmatpush3.bf16.msra.mxu1 %v551_v5  ;;  %v566_v20 = vld [vmem:[%s718_s1 + $0xb0] sm:$0xff]   ;;  %v568_v25 = vld [vmem:[%s718_s1 + $0x38] sm:$0xff]  }
   0xa   :  { %529 = vmatprep.subr.bf16.mxu1 %v554_v8  ;;  %v572_v23 = vld [vmem:[%s719_s0 + $0x4] ss:$12 sps:$4 sm:$0xff]   ;;  %v573_v24 = vld [vmem:[%s719_s0 + $0x8] ss:$12 sps:$4 sm:$0xff]  }
   0xb   :  { %492 = vmatpush3.bf16.msra.mxu0 %v553_v7  ;;  %291 = vmatprep.mubr.bf16.mxu0 %v572_v23  ;;  %v575_v27 = vld [vmem:[%s719_s0 + $0x1c] ss:$12 sps:$4 sm:$0xff]   ;;  %v577_v29 = vld [vmem:[%s719_s0 + $0x18] ss:$12 sps:$4 sm:$0xff]  }
   0xc   :  { %493 = vmatprep.subr.bf16.mxu0 %v555_v9  ;;  %541 = vmatprep.mubr.bf16.mxu1 %v573_v24 }
   0xd   :  { %530 = vmatpush3.bf16.msra.mxu1 %v554_v8  ;;  %v398_v8 = vld [vmem:[%s720_s3] sm:$0x1] }
   0xe   :  { %531 = vmatprep.subr.bf16.mxu1 %v557_v11 }
   0xf   :  { %494 = vmatpush3.bf16.msra.mxu0 %v556_v10 }
  0x10   :  { %495 = vmatprep.subr.bf16.mxu0 %v558_v12 }
  0x11   :  { %532 = vmatpush3.bf16.msra.mxu1 %v557_v11  ;;  %v410_v11 = vld [vmem:[%s721_s4] sm:$0x1] }
  0x12   :  { %533 = vmatprep.subr.bf16.mxu1 %v560_v13 }
  0x13   :  { %496 = vmatpush3.bf16.msra.mxu0 %v559_v14 }
  0x14   :  { %497 = vmatprep.subr.bf16.mxu0 %v561_v15 }
  0x15   :  { %534 = vmatpush3.bf16.msra.mxu1 %v560_v13 }
  0x16   :  { %535 = vmatprep.subr.bf16.mxu1 %v563_v16 }
  0x17   :  { %498 = vmatpush3.bf16.msra.mxu0 %v562_v17 }
  0x18   :  { %499 = vmatprep.subr.bf16.mxu0 %v564_v18 }
  0x19   :  { %536 = vmatpush3.bf16.msra.mxu1 %v563_v16 }
  0x1a   :  { %537 = vmatprep.subr.bf16.mxu1 %v566_v20 }
  0x1b   :  { %500 = vmatpush3.bf16.msra.mxu0 %v565_v19 }
  0x1c   :  { %501 = vmatprep.subr.bf16.mxu0 %v567_v21 }
  0x1d   :  { %538 = vmatpush3.bf16.msra.mxu1 %v566_v20 }
  0x1e   :  { %539 = vmatprep.subr.bf16.mxu1 %v569_v22 }
  0x1f   :  { %502 = vmatpush3.bf16.msra.mxu0 %v568_v25 }
  0x21   :  { %540 = vmatpush3.bf16.msra.mxu1 %v569_v22 }
  0x22   :  { %292 = vmatmul.mubr.bf16.vlgmr.msra.gmra.mrb[0].mxu0 %v570_v26 }
  0x23   :  { %299 = vmatprep.mubr.bf16.mxu0 %v575_v27 }
  0x24   :  { %542 = vmatmul.mubr.bf16.vlgmr.msra.gmra.mrb[0].mxu1 %v574_v28 }
  0x2a   :  { %300 = vmatmul.mubr.bf16.gmra.mrb[4].mxu0 %v577_v29 }
  0xf5   :  { %v503_v31 = vpop.f32.mrb[0].mxu0 }
  0xf6   :  { %v504_v32 = vpop.f32.mrb[1].mxu0 }
  0xf7   :  { %v505_v33 = vadd.f32 %v504_v32, %v503_v31  ;;  %v506_v34 = vpop.f32.mrb[2].mxu0  ;;  %v543_v35 = vpop.f32.mrb[0].mxu1 }
  0xf8   :  { %v507_v36 = vpop.f32.mrb[3].mxu0  ;;  %v342_v37 = vpop.f32.mrb[1].mxu1 }
  0xf9   :  { %v508_v38 = vadd.f32 %v507_v36, %v506_v34  ;;  %v343_v39 = vadd.f32 %v505_v33, %v342_v37  ;;  %v544_v40 = vpop.f32.mrb[2].mxu1 }
  0xfa   :  { %v345_v41 = vpop.f32.mrb[3].mxu1 }
  0xfb   :  { %v346_v42 = vadd.f32 %v508_v38, %v345_v41  ;;  %v411_v43 = vmul.f32 %v343_v39, %v343_v39 }
  0xfd   :  { %v479_v44 = vpack.c.bf16 %v346_v42, %v343_v39  ;;  %v399_v45 = vadd.f32 %v346_v42, %v343_v39  ;;  %v412_v46 = vmul.f32 %v346_v42, %v346_v42  ;;  %v509_v47 = vpop.f32.mrb[4].mxu0 }
  0xfe   :  { %v510_v48 = vpop.f32.mrb[5].mxu0 }
  0xff   :  { %480 = vst [vmem:[%s722_s2] sm:$0xff] %v479_v44   ;;  %v415_v49 = vadd.f32 %v412_v46, %v411_v43  ;;  %v511_v50 = vadd.f32 %v510_v48, %v509_v47  ;;  %v512_v51 = vpop.f32.mrb[6].mxu0 }
 0x100   :  { %v513_v52 = vpop.f32.mrb[7].mxu0 }
 0x101   :  { %v351_v53 = vadd.f32 %v543_v35, %v511_v50  ;;  %v514_v54 = vadd.f32 %v513_v52, %v512_v51 }
 0x103   :  { %v400_v55 = vadd.f32 %v399_v45, %v351_v53  ;;  %v413_v56 = vmul.f32 %v351_v53, %v351_v53  ;;  %v354_v57 = vadd.f32 %v544_v40, %v514_v54 }
 0x105   :  { %v416_v58 = vadd.f32 %v415_v49, %v413_v56  ;;  %v484_v59 = vpack.c.bf16 %v354_v57, %v351_v53  ;;  %v401_v60 = vadd.f32 %v400_v55, %v354_v57  ;;  %v414_v61 = vmul.f32 %v354_v57, %v354_v57 }
 0x107   :  { %486 = vst [vmem:[%s722_s2 + $0x8] sm:$0xff] %v484_v59   ;;  %v402_v62 = vrot.slane %v401_v60, 4  ;;  %v417_v63 = vadd.f32 %v416_v58, %v414_v61 }
 0x109   :  { %v403_v0 = vadd.f32 %v402_v62, %v401_v60  ;;  %v418_v1 = vrot.slane %v417_v63, 4 }
 0x10b   :  { %v404_v2 = vrot.slane %v403_v0, 2  ;;  %v419_v3 = vadd.f32 %v418_v1, %v417_v63 }
 0x10d   :  { %v405_v4 = vadd.f32 %v404_v2, %v403_v0  ;;  %v420_v5 = vrot.slane %v419_v3, 2 }
 0x10f   :  { %v406_v6 = vrot.slane %v405_v4, 1  ;;  %v421_v7 = vadd.f32 %v420_v5, %v419_v3 }
 0x111   :  { %v407_v9 = vadd.f32 %v406_v6, %v405_v4  ;;  %v422_v10 = vrot.slane %v421_v7, 1 }
 0x113   :  { %v408_v12 = vadd.f32 %v407_v9, %v398_v8  ;;  %v423_v13 = vadd.f32 %v422_v10, %v421_v7 }
 0x115   :  { %409 = vst [vmem:[%s720_s3] sm:$0x1] %v408_v12  ;;  %v424_v14 = vadd.f32 %v423_v13, %v410_v11 }
 0x117   :  { %425 = vst [vmem:[%s721_s4] sm:$0x1] %v424_v14 }

// kernel: resnet_generator_forward.52
= control target key start
LH: loop header
LB: loop body
LE: loop exit
PB: predicated region body
PF: predicated region fallthrough
CT: control target
= control target key end

     0   :  { %s140_s0 = inlined_call_operand.vmem [shape: bf16[32,128], index: 0, kind: input, shape index: {}]   ;;  %s141_s1 = inlined_call_operand.vmem [shape: f32[1,128], index: 1, kind: input, shape index: {}]   ;;  %s142_s2 = inlined_call_operand.vmem [shape: f32[1,128], index: 2, kind: input, shape index: {}]   ;;  %s143_s3 = inlined_call_operand.vmem [shape: bf16[32,128], index: 3, kind: output, shape index: {}]  }
   0x1   :  { %v83_v0 = vld [vmem:[%s140_s0] sm:$0xff]   ;;  %v100_v4 = vld [vmem:[%s140_s0 + $0x8] sm:$0xff]  }
   0x2   :  { %v72_v1 = vld [vmem:[%s141_s1] ss:$0 sm:$0xff]  ;;  %v84_v2 = vunpack.c.l.bf16 %v83_v0  ;;  %v85_v3 = vunpack.c.h.bf16 %v83_v0  ;;  %v88_v6 = vunpack.c.l.bf16 %v100_v4  ;;  %v89_v7 = vunpack.c.h.bf16 %v100_v4 }
   0x3   :  { %v73_v5 = vld [vmem:[%s142_s2] ss:$0 sm:$0xff] }
   0x4   :  { %v29_v8 = vmul.f32 %v84_v2, %v72_v1  ;;  %v30_v9 = vmul.f32 %v85_v3, %v72_v1  ;;  %v31_v10 = vmul.f32 %v88_v6, %v72_v1  ;;  %v32_v11 = vmul.f32 %v89_v7, %v72_v1 }
   0x6   :  { %v40_v12 = vadd.f32 %v73_v5, %v29_v8  ;;  %v41_v13 = vadd.f32 %v73_v5, %v30_v9  ;;  %v42_v14 = vadd.f32 %v73_v5, %v31_v10  ;;  %v43_v15 = vadd.f32 %v73_v5, %v32_v11 }
   0x8   :  { %v44_v16 = vmax.f32 %v40_v12, 0.0  ;;  %v45_v17 = vmax.f32 %v41_v13, 0.0  ;;  %v46_v18 = vmax.f32 %v42_v14, 0.0  ;;  %v47_v19 = vmax.f32 %v43_v15, 0.0 }
   0xa   :  { %v93_v20 = vpack.c.bf16 %v45_v17, %v44_v16  ;;  %v98_v21 = vpack.c.bf16 %v47_v19, %v46_v18 }
   0xc   :  { %94 = vst [vmem:[%s143_s3] sm:$0xff] %v93_v20   ;;  %101 = vst [vmem:[%s143_s3 + $0x8] sm:$0xff] %v98_v21  }

// kernel: resnet_generator_forward.56
= control target key start
LH: loop header
LB: loop body
LE: loop exit
PB: predicated region body
PF: predicated region fallthrough
CT: control target
= control target key end

     0   :  { %s171_s0 = inlined_call_operand.vmem [shape: bf16[32,128], index: 0, kind: input, shape index: {}]   ;;  %s172_s1 = inlined_call_operand.vmem [shape: f32[1,128], index: 1, kind: input, shape index: {}]   ;;  %s173_s2 = inlined_call_operand.vmem [shape: f32[1,128], index: 2, kind: input, shape index: {}]   ;;  %s174_s3 = inlined_call_operand.vmem [shape: bf16[32,128], index: 3, kind: input, shape index: {}]   ;;  %s175_s4 = inlined_call_operand.vmem [shape: bf16[32,128], index: 4, kind: output, shape index: {}]  }
   0x1   :  { %v94_v0 = vld [vmem:[%s171_s0] sm:$0xff]   ;;  %v119_v5 = vld [vmem:[%s171_s0 + $0x8] sm:$0xff]  }
   0x2   :  { %v83_v1 = vld [vmem:[%s172_s1] ss:$0 sm:$0xff]  ;;  %v95_v2 = vunpack.c.l.bf16 %v94_v0  ;;  %v96_v3 = vunpack.c.h.bf16 %v94_v0  ;;  %v120_v6 = vld [vmem:[%s174_s3 + $0x8] sm:$0xff]   ;;  %v99_v8 = vunpack.c.l.bf16 %v119_v5  ;;  %v100_v9 = vunpack.c.h.bf16 %v119_v5 }
   0x3   :  { %v102_v4 = vld [vmem:[%s174_s3] sm:$0xff]   ;;  %v107_v16 = vunpack.c.l.bf16 %v120_v6  ;;  %v108_v17 = vunpack.c.h.bf16 %v120_v6 }
   0x4   :  { %v84_v7 = vld [vmem:[%s173_s2] ss:$0 sm:$0xff]  ;;  %v32_v10 = vmul.f32 %v95_v2, %v83_v1  ;;  %v33_v11 = vmul.f32 %v96_v3, %v83_v1  ;;  %v103_v12 = vunpack.c.l.bf16 %v102_v4  ;;  %v104_v13 = vunpack.c.h.bf16 %v102_v4 }
   0x5   :  { %v34_v14 = vmul.f32 %v99_v8, %v83_v1  ;;  %v35_v15 = vmul.f32 %v100_v9, %v83_v1 }
   0x6   :  { %v43_v18 = vadd.f32 %v84_v7, %v32_v10  ;;  %v44_v19 = vadd.f32 %v84_v7, %v33_v11 }
   0x7   :  { %v45_v20 = vadd.f32 %v84_v7, %v34_v14  ;;  %v46_v21 = vadd.f32 %v84_v7, %v35_v15 }
   0x8   :  { %v55_v22 = vadd.f32 %v103_v12, %v43_v18  ;;  %v56_v23 = vadd.f32 %v104_v13, %v44_v19 }
   0x9   :  { %v57_v24 = vadd.f32 %v107_v16, %v45_v20  ;;  %v58_v25 = vadd.f32 %v108_v17, %v46_v21 }
   0xa   :  { %v112_v26 = vpack.c.bf16 %v56_v23, %v55_v22 }
   0xb   :  { %v117_v27 = vpack.c.bf16 %v58_v25, %v57_v24 }
   0xc   :  { %113 = vst [vmem:[%s175_s4] sm:$0xff] %v112_v26  }
   0xd   :  { %121 = vst [vmem:[%s175_s4 + $0x8] sm:$0xff] %v117_v27  }

// kernel: resnet_generator_forward.53
= control target key start
LH: loop header
LB: loop body
LE: loop exit
PB: predicated region body
PF: predicated region fallthrough
CT: control target
= control target key end

     0   :  { %v849_v50 = vmov 0.0   ;;  %s1049_s1 = inlined_call_operand.vmem [shape: bf16[640,128], index: 1, kind: input, shape index: {}]   ;;  %s1050_s0 = inlined_call_operand.vmem [shape: bf16[32,640], index: 0, kind: input, shape index: {}]   ;;  %s1051_s3 = inlined_call_operand.vmem [shape: f32[1,128], index: 3, kind: output, shape index: {1}]   ;;  %s1052_s4 = inlined_call_operand.vmem [shape: f32[1,128], index: 4, kind: output, shape index: {2}]   ;;  %s1053_s2 = inlined_call_operand.vmem [shape: bf16[32,128], index: 2, kind: output, shape index: {0}]  }
   0x1   :  { %v795_v0 = vld [vmem:[%s1049_s1 + $0x40] sm:$0xff]   ;;  %v799_v4 = vld [vmem:[%s1049_s1 + $0x48] sm:$0xff]   ;;  %v803_v8 = vld [vmem:[%s1049_s1 + $0x50] sm:$0xff]   ;;  %597 = vst [vmem:[%s1051_s3] sm:$0x1] %v849_v50 }
   0x2   :  { %v796_v1 = vld [vmem:[%s1049_s1 + $0xc0] sm:$0xff]   ;;  %708 = vmatprep.subr.bf16.mxu0 %v795_v0  ;;  %v800_v5 = vld [vmem:[%s1049_s1 + $0xc8] sm:$0xff]   ;;  %v804_v9 = vld [vmem:[%s1049_s1 + $0xd0] sm:$0xff]   ;;  %598 = vst [vmem:[%s1052_s4] sm:$0x1] %v849_v50 }
   0x3   :  { %v797_v2 = vld [vmem:[%s1049_s1] sm:$0xff]   ;;  %736 = vmatprep.subr.bf16.mxu1 %v796_v1  ;;  %v801_v6 = vld [vmem:[%s1049_s1 + $0x8] sm:$0xff]   ;;  %v805_v10 = vld [vmem:[%s1049_s1 + $0x10] sm:$0xff]  }
   0x4   :  { %v798_v3 = vld [vmem:[%s1049_s1 + $0x80] sm:$0xff]   ;;  %709 = vmatpush3.bf16.msra.mxu0 %v797_v2  ;;  %v802_v7 = vld [vmem:[%s1049_s1 + $0x88] sm:$0xff]   ;;  %v806_v11 = vld [vmem:[%s1049_s1 + $0x90] sm:$0xff]  }
   0x5   :  { %737 = vmatpush3.bf16.msra.mxu1 %v798_v3  ;;  %710 = vmatprep.subr.bf16.mxu0 %v799_v4  ;;  %v807_v12 = vld [vmem:[%s1049_s1 + $0x58] sm:$0xff]   ;;  %v811_v16 = vld [vmem:[%s1049_s1 + $0x60] sm:$0xff]   ;;  %v815_v20 = vld [vmem:[%s1049_s1 + $0x68] sm:$0xff]  }
   0x6   :  { %738 = vmatprep.subr.bf16.mxu1 %v800_v5  ;;  %v808_v13 = vld [vmem:[%s1049_s1 + $0xd8] sm:$0xff]   ;;  %v812_v17 = vld [vmem:[%s1049_s1 + $0xe0] sm:$0xff]   ;;  %v816_v21 = vld [vmem:[%s1049_s1 + $0xe8] sm:$0xff]  }
   0x7   :  { %v809_v14 = vld [vmem:[%s1049_s1 + $0x18] sm:$0xff]   ;;  %v813_v18 = vld [vmem:[%s1049_s1 + $0x20] sm:$0xff]   ;;  %v817_v22 = vld [vmem:[%s1049_s1 + $0x28] sm:$0xff]  }
   0x8   :  { %711 = vmatpush3.bf16.msra.mxu0 %v801_v6  ;;  %v810_v15 = vld [vmem:[%s1049_s1 + $0x98] sm:$0xff]   ;;  %v814_v19 = vld [vmem:[%s1049_s1 + $0xa0] sm:$0xff]   ;;  %v818_v23 = vld [vmem:[%s1049_s1 + $0xa8] sm:$0xff]  }
   0x9   :  { %739 = vmatpush3.bf16.msra.mxu1 %v802_v7  ;;  %712 = vmatprep.subr.bf16.mxu0 %v803_v8  ;;  %v819_v24 = vld [vmem:[%s1049_s1 + $0x70] sm:$0xff]   ;;  %v823_v28 = vld [vmem:[%s1049_s1 + $0x78] sm:$0xff]   ;;  %v832_v35 = vld [vmem:[%s1050_s0 + $0xc] ss:$20 sps:$4 sm:$0xff]  }
   0xa   :  { %740 = vmatprep.subr.bf16.mxu1 %v804_v9  ;;  %v820_v25 = vld [vmem:[%s1049_s1 + $0xf0] sm:$0xff]   ;;  %v824_v29 = vld [vmem:[%s1049_s1 + $0xf8] sm:$0xff]   ;;  %v833_v36 = vld [vmem:[%s1049_s1 + $0x100] sm:$0xff]   ;;  %492 = vmatprep.mubr.bf16.mxu1 %v832_v35 }
   0xb   :  { %v821_v26 = vld [vmem:[%s1049_s1 + $0x30] sm:$0xff]   ;;  %v825_v30 = vld [vmem:[%s1049_s1 + $0x38] sm:$0xff]   ;;  %v834_v37 = vld [vmem:[%s1049_s1 + $0x108] sm:$0xff]  }
   0xc   :  { %713 = vmatpush3.bf16.msra.mxu0 %v805_v10  ;;  %v822_v27 = vld [vmem:[%s1049_s1 + $0xb0] sm:$0xff]   ;;  %v826_v31 = vld [vmem:[%s1049_s1 + $0xb8] sm:$0xff]   ;;  %v838_v39 = vld [vmem:[%s1050_s0 + $0x2c] ss:$20 sps:$4 sm:$0xff]  }
   0xd   :  { %741 = vmatpush3.bf16.msra.mxu1 %v806_v11  ;;  %714 = vmatprep.subr.bf16.mxu0 %v807_v12  ;;  %v827_v32 = vld [vmem:[%s1050_s0] ss:$20 sps:$4 sm:$0xff]   ;;  %v829_v33 = vld [vmem:[%s1050_s0 + $0x4] ss:$20 sps:$4 sm:$0xff]   ;;  %v830_v34 = vld [vmem:[%s1050_s0 + $0x8] ss:$20 sps:$4 sm:$0xff]  }
   0xe   :  { %742 = vmatprep.subr.bf16.mxu1 %v808_v13  ;;  %443 = vmatprep.mubr.bf16.mxu0 %v829_v33  ;;  %v835_v38 = vld [vmem:[%s1049_s1 + $0x110] sm:$0xff]   ;;  %v836_v41 = vld [vmem:[%s1049_s1 + $0x118] sm:$0xff]   ;;  %v837_v45 = vld [vmem:[%s1049_s1 + $0x120] sm:$0xff]  }
   0xf   :  { %v840_v40 = vld [vmem:[%s1050_s0 + $0x34] ss:$20 sps:$4 sm:$0xff]   ;;  %v844_v43 = vld [vmem:[%s1050_s0 + $0x30] ss:$20 sps:$4 sm:$0xff]   ;;  %v846_v48 = vld [vmem:[%s1049_s1 + $0x138] sm:$0xff]  }
  0x10   :  { %715 = vmatpush3.bf16.msra.mxu0 %v809_v14  ;;  %v843_v42 = vld [vmem:[%s1050_s0 + $0x28] ss:$20 sps:$4 sm:$0xff]   ;;  %v847_v44 = vld [vmem:[%s1050_s0 + $0x10] ss:$20 sps:$4 sm:$0xff]   ;;  %v848_v49 = vld [vmem:[%s1050_s0 + $0x38] ss:$20 sps:$4 sm:$0xff]  }
  0x11   :  { %743 = vmatpush3.bf16.msra.mxu1 %v810_v15  ;;  %716 = vmatprep.subr.bf16.mxu0 %v811_v16  ;;  %v842_v46 = vld [vmem:[%s1049_s1 + $0x128] sm:$0xff]   ;;  %v845_v47 = vld [vmem:[%s1049_s1 + $0x130] sm:$0xff]  }
  0x12   :  { %744 = vmatprep.subr.bf16.mxu1 %v812_v17 }
  0x14   :  { %717 = vmatpush3.bf16.msra.mxu0 %v813_v18 }
  0x15   :  { %745 = vmatpush3.bf16.msra.mxu1 %v814_v19  ;;  %718 = vmatprep.subr.bf16.mxu0 %v815_v20 }
  0x16   :  { %746 = vmatprep.subr.bf16.mxu1 %v816_v21 }
  0x18   :  { %719 = vmatpush3.bf16.msra.mxu0 %v817_v22 }
  0x19   :  { %747 = vmatpush3.bf16.msra.mxu1 %v818_v23  ;;  %720 = vmatprep.subr.bf16.mxu0 %v819_v24 }
  0x1a   :  { %748 = vmatprep.subr.bf16.mxu1 %v820_v25 }
  0x1c   :  { %721 = vmatpush3.bf16.msra.mxu0 %v821_v26 }
  0x1d   :  { %749 = vmatpush3.bf16.msra.mxu1 %v822_v27  ;;  %722 = vmatprep.subr.bf16.mxu0 %v823_v28 }
  0x1e   :  { %750 = vmatprep.subr.bf16.mxu1 %v824_v29 }
  0x20   :  { %723 = vmatpush3.bf16.msra.mxu0 %v825_v30 }
  0x21   :  { %751 = vmatpush3.bf16.msra.mxu1 %v826_v31  ;;  %774 = vmatprep.subr.bf16.mxu0 %v833_v36 }
  0x23   :  { %444 = vmatmul.mubr.bf16.vlgmr.msra.gmra.mrb[0].mxu0 %v827_v32 }
  0x24   :  { %493 = vmatmul.mubr.bf16.vlgmr.msra.gmra.mrb[0].mxu1 %v830_v34  ;;  %775 = vmatpush3.bf16.msra.mxu0 %v833_v36 }
  0x25   :  { %776 = vmatprep.subr.bf16.mxu0 %v834_v37  ;;  %451 = vmatprep.mubr.bf16.mxu0 %v838_v39 }
  0x26   :  { %500 = vmatprep.mubr.bf16.mxu1 %v840_v40 }
  0x28   :  { %777 = vmatpush3.bf16.msra.mxu0 %v834_v37 }
  0x29   :  { %778 = vmatprep.subr.bf16.mxu0 %v835_v38 }
  0x2b   :  { %452 = vmatmul.mubr.bf16.gmra.mrb[4].mxu0 %v843_v42 }
  0x2c   :  { %501 = vmatmul.mubr.bf16.gmra.mrb[4].mxu1 %v844_v43  ;;  %779 = vmatpush3.bf16.msra.mxu0 %v835_v38 }
  0x2d   :  { %780 = vmatprep.subr.bf16.mxu0 %v836_v41  ;;  %790 = vmatprep.mubr.bf16.mxu0 %v847_v44  ;;  %v599_v44 = vld [vmem:[%s1051_s3] sm:$0x1] }
  0x30   :  { %781 = vmatpush3.bf16.msra.mxu0 %v836_v41 }
  0x31   :  { %782 = vmatprep.subr.bf16.mxu0 %v837_v45 }
  0x34   :  { %783 = vmatpush3.bf16.msra.mxu0 %v837_v45 }
  0x35   :  { %784 = vmatprep.subr.bf16.mxu0 %v842_v46 }
  0x38   :  { %785 = vmatpush3.bf16.msra.mxu0 %v842_v46 }
  0x39   :  { %786 = vmatprep.subr.bf16.mxu0 %v845_v47 }
  0x3c   :  { %787 = vmatpush3.bf16.msra.mxu0 %v845_v47  ;;  %v611_v47 = vld [vmem:[%s1052_s4] sm:$0x1] }
  0x3d   :  { %788 = vmatprep.subr.bf16.mxu0 %v846_v48 }
  0x40   :  { %789 = vmatpush3.bf16.msra.mxu0 %v846_v48 }
  0x43   :  { %791 = vmatmul.mubr.bf16.vlgmr.msra.gmra.mrb[8].mxu0 %v848_v49 }
  0xf6   :  { %v724_v51 = vpop.f32.mrb[0].mxu0 }
  0xf7   :  { %v752_v52 = vpop.f32.mrb[0].mxu1  ;;  %v725_v53 = vpop.f32.mrb[1].mxu0 }
  0xf8   :  { %v726_v54 = vadd.f32 %v725_v53, %v724_v51  ;;  %v753_v55 = vpop.f32.mrb[1].mxu1  ;;  %v727_v56 = vpop.f32.mrb[2].mxu0 }
  0xf9   :  { %v754_v57 = vadd.f32 %v753_v55, %v752_v52  ;;  %v755_v58 = vpop.f32.mrb[2].mxu1  ;;  %v728_v59 = vpop.f32.mrb[3].mxu0 }
  0xfa   :  { %v729_v60 = vadd.f32 %v728_v59, %v727_v56  ;;  %v756_v61 = vpop.f32.mrb[3].mxu1 }
  0xfb   :  { %v757_v62 = vadd.f32 %v756_v61, %v755_v58  ;;  %v495_v63 = vadd.f32 %v754_v57, %v726_v54 }
  0xfd   :  { %v498_v0 = vadd.f32 %v757_v62, %v729_v60 }
  0xfe   :  { %v730_v1 = vpop.f32.mrb[4].mxu0 }
  0xff   :  { %v758_v2 = vpop.f32.mrb[4].mxu1  ;;  %v731_v3 = vpop.f32.mrb[5].mxu0 }
 0x100   :  { %v732_v4 = vadd.f32 %v731_v3, %v730_v1  ;;  %v759_v5 = vpop.f32.mrb[5].mxu1  ;;  %v733_v6 = vpop.f32.mrb[6].mxu0 }
 0x101   :  { %v760_v7 = vadd.f32 %v759_v5, %v758_v2  ;;  %v761_v8 = vpop.f32.mrb[6].mxu1  ;;  %v734_v9 = vpop.f32.mrb[7].mxu0 }
 0x102   :  { %v735_v10 = vadd.f32 %v734_v9, %v733_v6  ;;  %v762_v11 = vpop.f32.mrb[7].mxu1 }
 0x103   :  { %v763_v12 = vadd.f32 %v762_v11, %v761_v8  ;;  %v503_v13 = vadd.f32 %v760_v7, %v732_v4 }
 0x105   :  { %v506_v14 = vadd.f32 %v763_v12, %v735_v10 }
 0x116   :  { %v792_v15 = vpop.f32.mrb[8].mxu0 }
 0x117   :  { %v552_v16 = vadd.f32 %v792_v15, %v503_v13  ;;  %v543_v17 = vpop.f32.mrb[9].mxu0 }
 0x118   :  { %v544_v18 = vadd.f32 %v543_v17, %v495_v63  ;;  %v793_v19 = vpop.f32.mrb[10].mxu0 }
 0x119   :  { %v555_v20 = vadd.f32 %v793_v19, %v506_v14  ;;  %v546_v21 = vpop.f32.mrb[11].mxu0  ;;  %v614_v28 = vmul.f32 %v552_v16, %v552_v16 }
 0x11a   :  { %v547_v22 = vadd.f32 %v546_v21, %v498_v0  ;;  %v612_v24 = vmul.f32 %v544_v18, %v544_v18 }
 0x11b   :  { %v705_v23 = vpack.c.bf16 %v555_v20, %v552_v16  ;;  %v615_v31 = vmul.f32 %v555_v20, %v555_v20 }
 0x11c   :  { %v700_v25 = vpack.c.bf16 %v547_v22, %v544_v18  ;;  %v600_v26 = vadd.f32 %v547_v22, %v544_v18  ;;  %v613_v27 = vmul.f32 %v547_v22, %v547_v22 }
 0x11d   :  { %707 = vst [vmem:[%s1053_s2 + $0x8] sm:$0xff] %v705_v23  }
 0x11e   :  { %701 = vst [vmem:[%s1053_s2] sm:$0xff] %v700_v25   ;;  %v601_v29 = vadd.f32 %v600_v26, %v552_v16  ;;  %v616_v30 = vadd.f32 %v613_v27, %v612_v24 }
 0x120   :  { %v602_v32 = vadd.f32 %v601_v29, %v555_v20  ;;  %v617_v33 = vadd.f32 %v616_v30, %v614_v28 }
 0x122   :  { %v603_v34 = vrot.slane %v602_v32, 4  ;;  %v618_v35 = vadd.f32 %v617_v33, %v615_v31 }
 0x124   :  { %v604_v36 = vadd.f32 %v603_v34, %v602_v32  ;;  %v619_v37 = vrot.slane %v618_v35, 4 }
 0x126   :  { %v605_v38 = vrot.slane %v604_v36, 2  ;;  %v620_v39 = vadd.f32 %v619_v37, %v618_v35 }
 0x128   :  { %v606_v40 = vadd.f32 %v605_v38, %v604_v36  ;;  %v621_v41 = vrot.slane %v620_v39, 2 }
 0x12a   :  { %v607_v42 = vrot.slane %v606_v40, 1  ;;  %v622_v43 = vadd.f32 %v621_v41, %v620_v39 }
 0x12c   :  { %v608_v45 = vadd.f32 %v607_v42, %v606_v40  ;;  %v623_v46 = vrot.slane %v622_v43, 1 }
 0x12e   :  { %v609_v48 = vadd.f32 %v608_v45, %v599_v44  ;;  %v624_v49 = vadd.f32 %v623_v46, %v622_v43 }
 0x130   :  { %610 = vst [vmem:[%s1051_s3] sm:$0x1] %v609_v48  ;;  %v625_v50 = vadd.f32 %v624_v49, %v611_v47 }
 0x132   :  { %626 = vst [vmem:[%s1052_s4] sm:$0x1] %v625_v50 }

// kernel: resnet_generator_forward.80
= control target key start
LH: loop header
LB: loop body
LE: loop exit
PB: predicated region body
PF: predicated region fallthrough
CT: control target
= control target key end

     0   :  { %v415_v20 = vmov 0.0   ;;  %s525_s1 = inlined_call_operand.vmem [shape: bf16[256,128], index: 1, kind: input, shape index: {}]   ;;  %s526_s0 = inlined_call_operand.vmem [shape: bf16[32,256], index: 0, kind: input, shape index: {}]   ;;  %s527_s3 = inlined_call_operand.vmem [shape: f32[1,128], index: 3, kind: output, shape index: {1}]   ;;  %s528_s4 = inlined_call_operand.vmem [shape: f32[1,128], index: 4, kind: output, shape index: {2}]   ;;  %s529_s2 = inlined_call_operand.vmem [shape: bf16[32,128], index: 2, kind: output, shape index: {0}]  }
   0x1   :  { %v393_v0 = vld [vmem:[%s525_s1 + $0x40] sm:$0xff]   ;;  %v395_v2 = vld [vmem:[%s525_s1 + $0x48] sm:$0xff]   ;;  %v397_v4 = vld [vmem:[%s525_s1 + $0x50] sm:$0xff]   ;;  %267 = vst [vmem:[%s527_s3] sm:$0x1] %v415_v20 }
   0x2   :  { %v394_v1 = vld [vmem:[%s525_s1] sm:$0xff]   ;;  %348 = vmatprep.subr.bf16.mxu0 %v393_v0  ;;  %376 = vmatprep.subr.bf16.mxu1 %v393_v0  ;;  %v396_v3 = vld [vmem:[%s525_s1 + $0x8] sm:$0xff]   ;;  %v398_v5 = vld [vmem:[%s525_s1 + $0x10] sm:$0xff]   ;;  %268 = vst [vmem:[%s528_s4] sm:$0x1] %v415_v20 }
   0x3   :  { %349 = vmatpush3.bf16.msra.mxu0 %v394_v1  ;;  %384 = vmatpush3.bf16.msra.mxu1 %v394_v1  ;;  %v399_v6 = vld [vmem:[%s525_s1 + $0x58] sm:$0xff]   ;;  %v401_v8 = vld [vmem:[%s525_s1 + $0x60] sm:$0xff]   ;;  %v403_v10 = vld [vmem:[%s525_s1 + $0x68] sm:$0xff]  }
   0x4   :  { %350 = vmatprep.subr.bf16.mxu0 %v395_v2  ;;  %377 = vmatprep.subr.bf16.mxu1 %v395_v2  ;;  %v400_v7 = vld [vmem:[%s525_s1 + $0x18] sm:$0xff]   ;;  %v402_v9 = vld [vmem:[%s525_s1 + $0x20] sm:$0xff]   ;;  %v404_v13 = vld [vmem:[%s525_s1 + $0x28] sm:$0xff]  }
   0x5   :  { %v411_v11 = vld [vmem:[%s526_s0 + $0x4] ss:$8 sps:$4 sm:$0xff]   ;;  %v414_v12 = vld [vmem:[%s526_s0 + $0x14] ss:$8 sps:$4 sm:$0xff]   ;;  %v409_v18 = vld [vmem:[%s526_s0] ss:$8 sps:$4 sm:$0xff]  }
   0x6   :  { %v405_v14 = vld [vmem:[%s525_s1 + $0x70] sm:$0xff]   ;;  %211 = vmatprep.mubr.bf16.mxu0 %v411_v11  ;;  %219 = vmatprep.mubr.bf16.mxu1 %v414_v12  ;;  %v407_v16 = vld [vmem:[%s525_s1 + $0x78] sm:$0xff]  }
   0x7   :  { %351 = vmatpush3.bf16.msra.mxu0 %v396_v3  ;;  %385 = vmatpush3.bf16.msra.mxu1 %v396_v3  ;;  %v406_v15 = vld [vmem:[%s525_s1 + $0x30] sm:$0xff]   ;;  %v408_v17 = vld [vmem:[%s525_s1 + $0x38] sm:$0xff]  }
   0x8   :  { %352 = vmatprep.subr.bf16.mxu0 %v397_v4  ;;  %378 = vmatprep.subr.bf16.mxu1 %v397_v4  ;;  %v412_v19 = vld [vmem:[%s526_s0 + $0x10] ss:$8 sps:$4 sm:$0xff]   ;;  %v269_v54 = vld [vmem:[%s527_s3] sm:$0x1] }
   0x9   :  { %v281_v57 = vld [vmem:[%s528_s4] sm:$0x1] }
   0xb   :  { %353 = vmatpush3.bf16.msra.mxu0 %v398_v5  ;;  %386 = vmatpush3.bf16.msra.mxu1 %v398_v5 }
   0xc   :  { %354 = vmatprep.subr.bf16.mxu0 %v399_v6  ;;  %379 = vmatprep.subr.bf16.mxu1 %v399_v6 }
   0xf   :  { %355 = vmatpush3.bf16.msra.mxu0 %v400_v7  ;;  %387 = vmatpush3.bf16.msra.mxu1 %v400_v7 }
  0x10   :  { %356 = vmatprep.subr.bf16.mxu0 %v401_v8  ;;  %380 = vmatprep.subr.bf16.mxu1 %v401_v8 }
  0x13   :  { %357 = vmatpush3.bf16.msra.mxu0 %v402_v9  ;;  %388 = vmatpush3.bf16.msra.mxu1 %v402_v9 }
  0x14   :  { %358 = vmatprep.subr.bf16.mxu0 %v403_v10  ;;  %381 = vmatprep.subr.bf16.mxu1 %v403_v10 }
  0x17   :  { %359 = vmatpush3.bf16.msra.mxu0 %v404_v13  ;;  %389 = vmatpush3.bf16.msra.mxu1 %v404_v13 }
  0x18   :  { %360 = vmatprep.subr.bf16.mxu0 %v405_v14  ;;  %382 = vmatprep.subr.bf16.mxu1 %v405_v14 }
  0x1b   :  { %361 = vmatpush3.bf16.msra.mxu0 %v406_v15  ;;  %390 = vmatpush3.bf16.msra.mxu1 %v406_v15 }
  0x1c   :  { %362 = vmatprep.subr.bf16.mxu0 %v407_v16  ;;  %383 = vmatprep.subr.bf16.mxu1 %v407_v16 }
  0x1f   :  { %363 = vmatpush3.bf16.msra.mxu0 %v408_v17  ;;  %391 = vmatpush3.bf16.msra.mxu1 %v408_v17 }
  0x22   :  { %212 = vmatmul.mubr.bf16.vlgmr.msra.gmra.mrb[0].mxu0 %v409_v18  ;;  %220 = vmatmul.mubr.bf16.vlgmr.msra.gmra.mrb[0].mxu1 %v412_v19 }
  0xf5   :  { %v364_v21 = vpop.f32.mrb[0].mxu0  ;;  %v370_v22 = vpop.f32.mrb[0].mxu1 }
  0xf6   :  { %v365_v23 = vpop.f32.mrb[1].mxu0  ;;  %v371_v24 = vpop.f32.mrb[1].mxu1 }
  0xf7   :  { %v366_v25 = vadd.f32 %v365_v23, %v364_v21  ;;  %v367_v26 = vpop.f32.mrb[2].mxu0  ;;  %v372_v27 = vadd.f32 %v371_v24, %v370_v22  ;;  %v373_v28 = vpop.f32.mrb[2].mxu1 }
  0xf8   :  { %v368_v29 = vpop.f32.mrb[3].mxu0  ;;  %v374_v30 = vpop.f32.mrb[3].mxu1 }
  0xf9   :  { %v369_v31 = vadd.f32 %v368_v29, %v367_v26  ;;  %v375_v32 = vadd.f32 %v374_v30, %v373_v28  ;;  %v282_v33 = vmul.f32 %v366_v25, %v366_v25  ;;  %v284_v34 = vmul.f32 %v372_v27, %v372_v27 }
  0xfb   :  { %v340_v35 = vpack.c.bf16 %v369_v31, %v366_v25  ;;  %v270_v36 = vadd.f32 %v369_v31, %v366_v25  ;;  %v283_v37 = vmul.f32 %v369_v31, %v369_v31  ;;  %v345_v38 = vpack.c.bf16 %v375_v32, %v372_v27 }
  0xfc   :  { %v285_v42 = vmul.f32 %v375_v32, %v375_v32 }
  0xfd   :  { %341 = vst [vmem:[%s529_s2] sm:$0xff] %v340_v35   ;;  %v286_v39 = vadd.f32 %v283_v37, %v282_v33  ;;  %347 = vst [vmem:[%s529_s2 + $0x8] sm:$0xff] %v345_v38   ;;  %v271_v40 = vadd.f32 %v372_v27, %v270_v36 }
  0xff   :  { %v272_v41 = vadd.f32 %v375_v32, %v271_v40  ;;  %v287_v43 = vadd.f32 %v286_v39, %v284_v34 }
 0x101   :  { %v273_v44 = vrot.slane %v272_v41, 4  ;;  %v288_v45 = vadd.f32 %v287_v43, %v285_v42 }
 0x103   :  { %v274_v46 = vadd.f32 %v273_v44, %v272_v41  ;;  %v289_v47 = vrot.slane %v288_v45, 4 }
 0x105   :  { %v275_v48 = vrot.slane %v274_v46, 2  ;;  %v290_v49 = vadd.f32 %v289_v47, %v288_v45 }
 0x107   :  { %v276_v50 = vadd.f32 %v275_v48, %v274_v46  ;;  %v291_v51 = vrot.slane %v290_v49, 2 }
 0x109   :  { %v277_v52 = vrot.slane %v276_v50, 1  ;;  %v292_v53 = vadd.f32 %v291_v51, %v290_v49 }
 0x10b   :  { %v278_v55 = vadd.f32 %v277_v52, %v276_v50  ;;  %v293_v56 = vrot.slane %v292_v53, 1 }
 0x10d   :  { %v279_v58 = vadd.f32 %v278_v55, %v269_v54  ;;  %v294_v59 = vadd.f32 %v293_v56, %v292_v53 }
 0x10f   :  { %280 = vst [vmem:[%s527_s3] sm:$0x1] %v279_v58  ;;  %v295_v60 = vadd.f32 %v294_v59, %v281_v57 }
 0x111   :  { %296 = vst [vmem:[%s528_s4] sm:$0x1] %v295_v60 }

// kernel: resnet_generator_forward.79
= control target key start
LH: loop header
LB: loop body
LE: loop exit
PB: predicated region body
PF: predicated region fallthrough
CT: control target
= control target key end

     0   :  { %v307_v10 = vmov 0.0   ;;  %s387_s1 = inlined_call_operand.vmem [shape: bf16[128,128], index: 1, kind: input, shape index: {}]   ;;  %s388_s0 = inlined_call_operand.vmem [shape: bf16[32,128], index: 0, kind: input, shape index: {}]   ;;  %s389_s3 = inlined_call_operand.vmem [shape: f32[1,128], index: 3, kind: output, shape index: {1}]   ;;  %s390_s4 = inlined_call_operand.vmem [shape: f32[1,128], index: 4, kind: output, shape index: {2}]   ;;  %s391_s2 = inlined_call_operand.vmem [shape: bf16[32,128], index: 2, kind: output, shape index: {0}]  }
   0x1   :  { %v297_v0 = vld [vmem:[%s387_s1] sm:$0xff]   ;;  %v298_v1 = vld [vmem:[%s387_s1 + $0x8] sm:$0xff]   ;;  %v299_v2 = vld [vmem:[%s387_s1 + $0x10] sm:$0xff]   ;;  %195 = vst [vmem:[%s389_s3] sm:$0x1] %v307_v10 }
   0x2   :  { %276 = vmatprep.subr.bf16.mxu0 %v297_v0  ;;  %v300_v3 = vld [vmem:[%s387_s1 + $0x18] sm:$0xff]   ;;  %v305_v4 = vld [vmem:[%s388_s0] sm:$0xff]   ;;  %v302_v6 = vld [vmem:[%s387_s1 + $0x28] sm:$0xff]   ;;  %196 = vst [vmem:[%s390_s4] sm:$0x1] %v307_v10 }
   0x3   :  { %277 = vmatpush3.bf16.msra.mxu0 %v297_v0  ;;  %292 = vmatprep.mubr.bf16.mxu0 %v305_v4  ;;  %v301_v5 = vld [vmem:[%s387_s1 + $0x20] sm:$0xff]   ;;  %v303_v7 = vld [vmem:[%s387_s1 + $0x30] sm:$0xff]   ;;  %v304_v8 = vld [vmem:[%s387_s1 + $0x38] sm:$0xff]  }
   0x4   :  { %278 = vmatprep.subr.bf16.mxu0 %v298_v1  ;;  %v306_v9 = vld [vmem:[%s388_s0 + $0x8] sm:$0xff]  }
   0x7   :  { %279 = vmatpush3.bf16.msra.mxu0 %v298_v1 }
   0x8   :  { %280 = vmatprep.subr.bf16.mxu0 %v299_v2  ;;  %v197_v36 = vld [vmem:[%s389_s3] sm:$0x1] }
   0x9   :  { %v209_v39 = vld [vmem:[%s390_s4] sm:$0x1] }
   0xb   :  { %281 = vmatpush3.bf16.msra.mxu0 %v299_v2 }
   0xc   :  { %282 = vmatprep.subr.bf16.mxu0 %v300_v3 }
   0xf   :  { %283 = vmatpush3.bf16.msra.mxu0 %v300_v3 }
  0x10   :  { %284 = vmatprep.subr.bf16.mxu0 %v301_v5 }
  0x13   :  { %285 = vmatpush3.bf16.msra.mxu0 %v301_v5 }
  0x14   :  { %286 = vmatprep.subr.bf16.mxu0 %v302_v6 }
  0x17   :  { %287 = vmatpush3.bf16.msra.mxu0 %v302_v6 }
  0x18   :  { %288 = vmatprep.subr.bf16.mxu0 %v303_v7 }
  0x1b   :  { %289 = vmatpush3.bf16.msra.mxu0 %v303_v7 }
  0x1c   :  { %290 = vmatprep.subr.bf16.mxu0 %v304_v8 }
  0x1f   :  { %291 = vmatpush3.bf16.msra.mxu0 %v304_v8 }
  0x22   :  { %293 = vmatmul.mubr.bf16.vlgmr.msra.gmra.mrb[0].mxu0 %v306_v9 }
  0xf5   :  { %v294_v11 = vpop.f32.mrb[0].mxu0 }
  0xf6   :  { %v141_v12 = vpop.f32.mrb[1].mxu0  ;;  %v212_v20 = vmul.f32 %v294_v11, %v294_v11 }
  0xf7   :  { %v295_v13 = vpop.f32.mrb[2].mxu0  ;;  %v210_v16 = vmul.f32 %v141_v12, %v141_v12 }
  0xf8   :  { %v263_v14 = vpack.c.bf16 %v295_v13, %v294_v11  ;;  %v144_v15 = vpop.f32.mrb[3].mxu0  ;;  %v213_v23 = vmul.f32 %v295_v13, %v295_v13 }
  0xf9   :  { %v258_v17 = vpack.c.bf16 %v144_v15, %v141_v12  ;;  %v198_v18 = vadd.f32 %v144_v15, %v141_v12  ;;  %v211_v19 = vmul.f32 %v144_v15, %v144_v15 }
  0xfa   :  { %265 = vst [vmem:[%s391_s2 + $0x8] sm:$0xff] %v263_v14  }
  0xfb   :  { %259 = vst [vmem:[%s391_s2] sm:$0xff] %v258_v17   ;;  %v199_v21 = vadd.f32 %v294_v11, %v198_v18  ;;  %v214_v22 = vadd.f32 %v211_v19, %v210_v16 }
  0xfd   :  { %v200_v24 = vadd.f32 %v295_v13, %v199_v21  ;;  %v215_v25 = vadd.f32 %v214_v22, %v212_v20 }
  0xff   :  { %v201_v26 = vrot.slane %v200_v24, 4  ;;  %v216_v27 = vadd.f32 %v215_v25, %v213_v23 }
 0x101   :  { %v202_v28 = vadd.f32 %v201_v26, %v200_v24  ;;  %v217_v29 = vrot.slane %v216_v27, 4 }
 0x103   :  { %v203_v30 = vrot.slane %v202_v28, 2  ;;  %v218_v31 = vadd.f32 %v217_v29, %v216_v27 }
 0x105   :  { %v204_v32 = vadd.f32 %v203_v30, %v202_v28  ;;  %v219_v33 = vrot.slane %v218_v31, 2 }
 0x107   :  { %v205_v34 = vrot.slane %v204_v32, 1  ;;  %v220_v35 = vadd.f32 %v219_v33, %v218_v31 }
 0x109   :  { %v206_v37 = vadd.f32 %v205_v34, %v204_v32  ;;  %v221_v38 = vrot.slane %v220_v35, 1 }
 0x10b   :  { %v207_v40 = vadd.f32 %v206_v37, %v197_v36  ;;  %v222_v41 = vadd.f32 %v221_v38, %v220_v35 }
 0x10d   :  { %208 = vst [vmem:[%s389_s3] sm:$0x1] %v207_v40  ;;  %v223_v42 = vadd.f32 %v222_v41, %v209_v39 }
 0x10f   :  { %224 = vst [vmem:[%s390_s4] sm:$0x1] %v223_v42 }

// kernel: resnet_generator_forward.88
= control target key start
LH: loop header
LB: loop body
LE: loop exit
PB: predicated region body
PF: predicated region fallthrough
CT: control target
= control target key end

     0   :  { %v665_v16 = vmov 0.0   ;;  %s781_s1 = inlined_call_operand.vmem [shape: bf16[128,128], index: 1, kind: input, shape index: {}]   ;;  %s782_s0 = inlined_call_operand.vmem [shape: bf16[128,128], index: 0, kind: input, shape index: {}]   ;;  %s783_s3 = inlined_call_operand.vmem [shape: f32[1,128], index: 3, kind: output, shape index: {1}]   ;;  %s784_s4 = inlined_call_operand.vmem [shape: f32[1,128], index: 4, kind: output, shape index: {2}]   ;;  %s785_s2 = inlined_call_operand.vmem [shape: bf16[128,128], index: 2, kind: output, shape index: {0}]  }
   0x1   :  { %v649_v0 = vld [vmem:[%s781_s1] sm:$0xff]   ;;  %v650_v1 = vld [vmem:[%s781_s1 + $0x8] sm:$0xff]   ;;  %v651_v2 = vld [vmem:[%s781_s1 + $0x10] sm:$0xff]   ;;  %411 = vst [vmem:[%s783_s3] sm:$0x1] %v665_v16 }
   0x2   :  { %600 = vmatprep.subr.bf16.mxu0 %v649_v0  ;;  %632 = vmatprep.subr.bf16.mxu1 %v649_v0  ;;  %v652_v3 = vld [vmem:[%s781_s1 + $0x18] sm:$0xff]   ;;  %v657_v4 = vld [vmem:[%s782_s0] sm:$0xff]   ;;  %v654_v7 = vld [vmem:[%s781_s1 + $0x28] sm:$0xff]   ;;  %412 = vst [vmem:[%s784_s4] sm:$0x1] %v665_v16 }
   0x3   :  { %601 = vmatpush3.bf16.msra.mxu0 %v649_v0  ;;  %640 = vmatpush3.bf16.msra.mxu1 %v649_v0  ;;  %v653_v5 = vld [vmem:[%s781_s1 + $0x20] sm:$0xff]   ;;  %v655_v8 = vld [vmem:[%s781_s1 + $0x30] sm:$0xff]   ;;  %v656_v9 = vld [vmem:[%s781_s1 + $0x38] sm:$0xff]  }
   0x4   :  { %602 = vmatprep.subr.bf16.mxu0 %v650_v1  ;;  %633 = vmatprep.subr.bf16.mxu1 %v650_v1  ;;  %v661_v6 = vld [vmem:[%s782_s0 + $0x20] sm:$0xff]   ;;  %v658_v10 = vld [vmem:[%s782_s0 + $0x8] sm:$0xff]   ;;  %v659_v12 = vld [vmem:[%s782_s0 + $0x10] sm:$0xff]  }
   0x5   :  { %616 = vmatprep.mubr.bf16.mxu0 %v657_v4  ;;  %624 = vmatprep.mubr.bf16.mxu1 %v661_v6  ;;  %v662_v11 = vld [vmem:[%s782_s0 + $0x28] sm:$0xff]   ;;  %v663_v13 = vld [vmem:[%s782_s0 + $0x30] sm:$0xff]   ;;  %v660_v14 = vld [vmem:[%s782_s0 + $0x18] sm:$0xff]  }
   0x6   :  { %v664_v15 = vld [vmem:[%s782_s0 + $0x38] sm:$0xff]  }
   0x7   :  { %603 = vmatpush3.bf16.msra.mxu0 %v650_v1  ;;  %641 = vmatpush3.bf16.msra.mxu1 %v650_v1 }
   0x8   :  { %604 = vmatprep.subr.bf16.mxu0 %v651_v2  ;;  %634 = vmatprep.subr.bf16.mxu1 %v651_v2 }
   0xb   :  { %605 = vmatpush3.bf16.msra.mxu0 %v651_v2  ;;  %642 = vmatpush3.bf16.msra.mxu1 %v651_v2 }
   0xc   :  { %606 = vmatprep.subr.bf16.mxu0 %v652_v3  ;;  %635 = vmatprep.subr.bf16.mxu1 %v652_v3 }
   0xf   :  { %607 = vmatpush3.bf16.msra.mxu0 %v652_v3  ;;  %643 = vmatpush3.bf16.msra.mxu1 %v652_v3 }
  0x10   :  { %608 = vmatprep.subr.bf16.mxu0 %v653_v5  ;;  %636 = vmatprep.subr.bf16.mxu1 %v653_v5 }
  0x13   :  { %609 = vmatpush3.bf16.msra.mxu0 %v653_v5  ;;  %644 = vmatpush3.bf16.msra.mxu1 %v653_v5 }
  0x14   :  { %610 = vmatprep.subr.bf16.mxu0 %v654_v7  ;;  %637 = vmatprep.subr.bf16.mxu1 %v654_v7 }
  0x17   :  { %611 = vmatpush3.bf16.msra.mxu0 %v654_v7  ;;  %645 = vmatpush3.bf16.msra.mxu1 %v654_v7 }
  0x18   :  { %612 = vmatprep.subr.bf16.mxu0 %v655_v8  ;;  %638 = vmatprep.subr.bf16.mxu1 %v655_v8 }
  0x1b   :  { %613 = vmatpush3.bf16.msra.mxu0 %v655_v8  ;;  %646 = vmatpush3.bf16.msra.mxu1 %v655_v8 }
  0x1c   :  { %614 = vmatprep.subr.bf16.mxu0 %v656_v9  ;;  %639 = vmatprep.subr.bf16.mxu1 %v656_v9 }
  0x1f   :  { %615 = vmatpush3.bf16.msra.mxu0 %v656_v9  ;;  %647 = vmatpush3.bf16.msra.mxu1 %v656_v9 }
  0x22   :  { %617 = vmatmul.mubr.bf16.vlgmr.msra.gmra.mrb[0].mxu0 %v658_v10  ;;  %625 = vmatmul.mubr.bf16.vlgmr.msra.gmra.mrb[0].mxu1 %v662_v11 }
  0x23   :  { %620 = vmatprep.mubr.bf16.mxu0 %v659_v12  ;;  %628 = vmatprep.mubr.bf16.mxu1 %v663_v13 }
  0x2a   :  { %621 = vmatmul.mubr.bf16.gmra.mrb[4].mxu0 %v660_v14  ;;  %629 = vmatmul.mubr.bf16.gmra.mrb[4].mxu1 %v664_v15 }
  0xf5   :  { %v618_v17 = vpop.f32.mrb[0].mxu0  ;;  %v626_v18 = vpop.f32.mrb[0].mxu1 }
  0xf6   :  { %v213_v19 = vpop.f32.mrb[1].mxu0  ;;  %v245_v20 = vpop.f32.mrb[1].mxu1  ;;  %v440_v32 = vmul.f32 %v618_v17, %v618_v17  ;;  %v448_v4 = vmul.f32 %v626_v18, %v626_v18 }
  0xf7   :  { %v619_v21 = vpop.f32.mrb[2].mxu0  ;;  %v627_v22 = vpop.f32.mrb[2].mxu1  ;;  %v438_v23 = vmul.f32 %v213_v19, %v213_v19  ;;  %v446_v62 = vmul.f32 %v245_v20, %v245_v20 }
  0xf8   :  { %v545_v24 = vpack.c.bf16 %v619_v21, %v618_v17  ;;  %v216_v25 = vpop.f32.mrb[3].mxu0  ;;  %v565_v26 = vpack.c.bf16 %v627_v22, %v626_v18  ;;  %v248_v27 = vpop.f32.mrb[3].mxu1  ;;  %v441_v35 = vmul.f32 %v619_v21, %v619_v21  ;;  %v449_v7 = vmul.f32 %v627_v22, %v627_v22 }
  0xf9   :  { %v540_v28 = vpack.c.bf16 %v216_v25, %v213_v19  ;;  %v414_v29 = vadd.f32 %v216_v25, %v213_v19  ;;  %v439_v30 = vmul.f32 %v216_v25, %v216_v25  ;;  %v560_v31 = vpack.c.bf16 %v248_v27, %v245_v20 }
  0xfa   :  { %577 = vst [vmem:[%s785_s2 + $0x8] sm:$0xff] %v545_v24   ;;  %581 = vst [vmem:[%s785_s2 + $0x28] sm:$0xff] %v565_v26   ;;  %v447_v3 = vmul.f32 %v248_v27, %v248_v27 }
  0xfb   :  { %541 = vst [vmem:[%s785_s2] sm:$0xff] %v540_v28   ;;  %v415_v33 = vadd.f32 %v618_v17, %v414_v29  ;;  %v454_v34 = vadd.f32 %v439_v30, %v438_v23  ;;  %580 = vst [vmem:[%s785_s2 + $0x20] sm:$0xff] %v560_v31  }
  0xfd   :  { %v455_v36 = vadd.f32 %v454_v34, %v440_v32  ;;  %v622_v37 = vpop.f32.mrb[4].mxu0  ;;  %v416_v38 = vadd.f32 %v619_v21, %v415_v33  ;;  %v630_v39 = vpop.f32.mrb[4].mxu1  ;;  %v413_v32 = vld [vmem:[%s783_s3] sm:$0x1] }
  0xfe   :  { %v229_v40 = vpop.f32.mrb[5].mxu0  ;;  %v261_v41 = vpop.f32.mrb[5].mxu1  ;;  %v444_v56 = vmul.f32 %v622_v37, %v622_v37  ;;  %v452_v16 = vmul.f32 %v630_v39, %v630_v39 }
  0xff   :  { %v417_v42 = vadd.f32 %v416_v38, %v229_v40  ;;  %v442_v43 = vmul.f32 %v229_v40, %v229_v40  ;;  %v456_v44 = vadd.f32 %v455_v36, %v441_v35  ;;  %v623_v45 = vpop.f32.mrb[6].mxu0  ;;  %v631_v46 = vpop.f32.mrb[6].mxu1  ;;  %v450_v10 = vmul.f32 %v261_v41, %v261_v41  ;;  %v437_v35 = vld [vmem:[%s784_s4] sm:$0x1] }
 0x100   :  { %v555_v47 = vpack.c.bf16 %v623_v45, %v622_v37  ;;  %v232_v48 = vpop.f32.mrb[7].mxu0  ;;  %v575_v49 = vpack.c.bf16 %v631_v46, %v630_v39  ;;  %v264_v50 = vpop.f32.mrb[7].mxu1  ;;  %v445_v59 = vmul.f32 %v623_v45, %v623_v45 }
 0x101   :  { %v457_v51 = vadd.f32 %v456_v44, %v442_v43  ;;  %v550_v52 = vpack.c.bf16 %v232_v48, %v229_v40  ;;  %v418_v53 = vadd.f32 %v417_v42, %v232_v48  ;;  %v443_v54 = vmul.f32 %v232_v48, %v232_v48 }
 0x102   :  { %579 = vst [vmem:[%s785_s2 + $0x18] sm:$0xff] %v555_v47   ;;  %583 = vst [vmem:[%s785_s2 + $0x38] sm:$0xff] %v575_v49   ;;  %v570_v55 = vpack.c.bf16 %v264_v50, %v261_v41  ;;  %v451_v15 = vmul.f32 %v264_v50, %v264_v50 }
 0x103   :  { %578 = vst [vmem:[%s785_s2 + $0x10] sm:$0xff] %v550_v52   ;;  %v419_v57 = vadd.f32 %v622_v37, %v418_v53  ;;  %v458_v58 = vadd.f32 %v457_v51, %v443_v54 }
 0x104   :  { %582 = vst [vmem:[%s785_s2 + $0x30] sm:$0xff] %v570_v55  }
 0x105   :  { %v459_v60 = vadd.f32 %v458_v58, %v444_v56  ;;  %v420_v61 = vadd.f32 %v623_v45, %v419_v57 }
 0x107   :  { %v421_v63 = vadd.f32 %v420_v61, %v245_v20  ;;  %v460_v0 = vadd.f32 %v459_v60, %v445_v59  ;;  %v453_v20 = vmul.f32 %v631_v46, %v631_v46 }
 0x109   :  { %v461_v1 = vadd.f32 %v460_v0, %v446_v62  ;;  %v422_v2 = vadd.f32 %v421_v63, %v248_v27 }
 0x10b   :  { %v423_v5 = vadd.f32 %v626_v18, %v422_v2  ;;  %v462_v6 = vadd.f32 %v461_v1, %v447_v3 }
 0x10d   :  { %v463_v8 = vadd.f32 %v462_v6, %v448_v4  ;;  %v424_v9 = vadd.f32 %v627_v22, %v423_v5 }
 0x10f   :  { %v425_v11 = vadd.f32 %v424_v9, %v261_v41  ;;  %v464_v12 = vadd.f32 %v463_v8, %v449_v7 }
 0x111   :  { %v465_v13 = vadd.f32 %v464_v12, %v450_v10  ;;  %v426_v14 = vadd.f32 %v425_v11, %v264_v50 }
 0x113   :  { %v427_v17 = vadd.f32 %v630_v39, %v426_v14  ;;  %v466_v19 = vadd.f32 %v465_v13, %v451_v15 }
 0x115   :  { %v428_v21 = vadd.f32 %v631_v46, %v427_v17  ;;  %v467_v23 = vadd.f32 %v466_v19, %v452_v16 }
 0x117   :  { %v429_v24 = vrot.slane %v428_v21, 4  ;;  %v468_v25 = vadd.f32 %v467_v23, %v453_v20 }
 0x119   :  { %v430_v26 = vadd.f32 %v429_v24, %v428_v21  ;;  %v469_v18 = vrot.slane %v468_v25, 4 }
 0x11b   :  { %v431_v27 = vrot.slane %v430_v26, 2  ;;  %v470_v28 = vadd.f32 %v469_v18, %v468_v25 }
 0x11d   :  { %v432_v29 = vadd.f32 %v431_v27, %v430_v26  ;;  %v471_v22 = vrot.slane %v470_v28, 2 }
 0x11f   :  { %v433_v30 = vrot.slane %v432_v29, 1  ;;  %v472_v31 = vadd.f32 %v471_v22, %v470_v28 }
 0x121   :  { %v434_v33 = vadd.f32 %v433_v30, %v432_v29  ;;  %v473_v34 = vrot.slane %v472_v31, 1 }
 0x123   :  { %v435_v36 = vadd.f32 %v434_v33, %v413_v32  ;;  %v474_v37 = vadd.f32 %v473_v34, %v472_v31 }
 0x125   :  { %436 = vst [vmem:[%s783_s3] sm:$0x1] %v435_v36  ;;  %v475_v38 = vadd.f32 %v474_v37, %v437_v35 }
 0x127   :  { %476 = vst [vmem:[%s784_s4] sm:$0x1] %v475_v38 }

// kernel: resnet_generator_forward.93
= control target key start
LH: loop header
LB: loop body
LE: loop exit
PB: predicated region body
PF: predicated region fallthrough
CT: control target
= control target key end

     0   :  { %v4687_v0 = vmov 0   ;;  %s6295_s1 = inlined_call_operand.vmem [shape: bf16[896,128], index: 1, kind: input, shape index: {}]   ;;  %s6296_s0 = inlined_call_operand.vmem [shape: bf16[512,896], index: 0, kind: input, shape index: {}]   ;;  %s6297_s2 = inlined_call_operand.vmem [shape: f32[1,128], index: 2, kind: input, shape index: {}]   ;;  %s6298_s3 = inlined_call_operand.vmem [shape: f32[512,128], index: 3, kind: output, shape index: {}]  }
   0x1   :  { %2003 = vmatprep.subr.bf16.mxu1 %v4687_v0  ;;  %2292 = vmatprep.subr.bf16.mxu0 %v4687_v0  ;;  %v4183_v1 = vld [vmem:[%s6295_s1] sm:$0xff]   ;;  %v4185_v3 = vld [vmem:[%s6295_s1 + $0x8] sm:$0xff]   ;;  %v4187_v5 = vld [vmem:[%s6295_s1 + $0x10] sm:$0xff]  }
   0x2   :  { %v4716_v2 = vld [vmem:[%s6295_s1 + $0x80] sm:$0xff]   ;;  %2004 = vmatpush1.bf16.msra.mxu1 %v4183_v1  ;;  %v4726_v4 = vld [vmem:[%s6295_s1 + $0x88] sm:$0xff]   ;;  %v4737_v6 = vld [vmem:[%s6295_s1 + $0x90] sm:$0xff]  }
   0x3   :  { %2293 = vmatpush1.bf16.msra.mxu0 %v4716_v2  ;;  %2005 = vmatprep.subr.bf16.mxu1 %v4687_v0  ;;  %v4189_v7 = vld [vmem:[%s6295_s1 + $0x18] sm:$0xff]   ;;  %v4191_v9 = vld [vmem:[%s6295_s1 + $0x20] sm:$0xff]   ;;  %v4193_v11 = vld [vmem:[%s6295_s1 + $0x28] sm:$0xff]  }
   0x4   :  { %2294 = vmatprep.subr.bf16.mxu0 %v4687_v0  ;;  %v4748_v8 = vld [vmem:[%s6295_s1 + $0x98] sm:$0xff]   ;;  %v4759_v10 = vld [vmem:[%s6295_s1 + $0xa0] sm:$0xff]   ;;  %v4770_v12 = vld [vmem:[%s6295_s1 + $0xa8] sm:$0xff]  }
   0x5   :  { %v4195_v13 = vld [vmem:[%s6295_s1 + $0x30] sm:$0xff]   ;;  %v4197_v15 = vld [vmem:[%s6295_s1 + $0x38] sm:$0xff]   ;;  %v4199_v17 = vld [vmem:[%s6295_s1 + $0x40] sm:$0xff]  }
   0x6   :  { %2006 = vmatpush1.bf16.msra.mxu1 %v4185_v3  ;;  %v4781_v14 = vld [vmem:[%s6295_s1 + $0xb0] sm:$0xff]   ;;  %v4792_v16 = vld [vmem:[%s6295_s1 + $0xb8] sm:$0xff]   ;;  %v4803_v18 = vld [vmem:[%s6295_s1 + $0xc0] sm:$0xff]  }
   0x7   :  { %2295 = vmatpush1.bf16.msra.mxu0 %v4726_v4  ;;  %2007 = vmatprep.subr.bf16.mxu1 %v4687_v0  ;;  %v4217_v19 = vld [vmem:[%s6296_s0 + $0x4] ss:$28 sps:$4 sm:$0xff]   ;;  %v4201_v20 = vld [vmem:[%s6295_s1 + $0x48] sm:$0xff]   ;;  %v4203_v23 = vld [vmem:[%s6295_s1 + $0x50] sm:$0xff]  }
   0x8   :  { %2296 = vmatprep.subr.bf16.mxu0 %v4687_v0  ;;  %v4220_v21 = vld [vmem:[%s6296_s0 + $0xc] ss:$28 sps:$4 sm:$0xff]   ;;  %2035 = vmatprep.mubr.bf16.mxu1 %v4217_v19  ;;  %v4831_v24 = vld [vmem:[%s6295_s1 + $0xd0] sm:$0xff]   ;;  %v4205_v25 = vld [vmem:[%s6295_s1 + $0x58] sm:$0xff]  }
   0x9   :  { %v4820_v22 = vld [vmem:[%s6295_s1 + $0xc8] sm:$0xff]   ;;  %2324 = vmatprep.mubr.bf16.mxu0 %v4220_v21  ;;  %v4842_v26 = vld [vmem:[%s6295_s1 + $0xd8] sm:$0xff]   ;;  %v4207_v27 = vld [vmem:[%s6295_s1 + $0x60] sm:$0xff]  }
   0xa   :  { %2008 = vmatpush1.bf16.msra.mxu1 %v4187_v5  ;;  %v4853_v28 = vld [vmem:[%s6295_s1 + $0xe0] sm:$0xff]   ;;  %v4209_v29 = vld [vmem:[%s6295_s1 + $0x68] sm:$0xff]   ;;  %v4211_v31 = vld [vmem:[%s6295_s1 + $0x70] sm:$0xff]  }
   0xb   :  { %2297 = vmatpush1.bf16.msra.mxu0 %v4737_v6  ;;  %2009 = vmatprep.subr.bf16.mxu1 %v4687_v0  ;;  %v4864_v30 = vld [vmem:[%s6295_s1 + $0xe8] sm:$0xff]   ;;  %v4875_v32 = vld [vmem:[%s6295_s1 + $0xf0] sm:$0xff]   ;;  %v4213_v33 = vld [vmem:[%s6295_s1 + $0x78] sm:$0xff]  }
   0xc   :  { %2298 = vmatprep.subr.bf16.mxu0 %v4687_v0  ;;  %v4886_v34 = vld [vmem:[%s6295_s1 + $0xf8] sm:$0xff]   ;;  %v4218_v36 = vld [vmem:[%s6296_s0 + $0x8] ss:$28 sps:$4 sm:$0xff]   ;;  %v4229_v43 = vld [vmem:[%s6296_s0 + $0x74] ss:$28 sps:$4 sm:$0xff]  }
   0xd   :  { %v4215_v35 = vld [vmem:[%s6296_s0] ss:$28 sps:$4 sm:$0xff]   ;;  %v4228_v40 = vld [vmem:[%s6295_s1 + $0x108] sm:$0xff]   ;;  %v4226_v41 = vld [vmem:[%s6296_s0 + $0x38] ss:$28 sps:$4 sm:$0xff]  }
   0xe   :  { %2010 = vmatpush1.bf16.msra.mxu1 %v4189_v7  ;;  %v4221_v37 = vld [vmem:[%s6295_s1 + $0x100] sm:$0xff]   ;;  %v4222_v38 = vld [vmem:[%s6296_s0 + $0x3c] ss:$28 sps:$4 sm:$0xff]   ;;  %v4241_v45 = vld [vmem:[%s6295_s1 + $0x110] sm:$0xff]  }
   0xf   :  { %2299 = vmatpush1.bf16.msra.mxu0 %v4748_v8  ;;  %2011 = vmatprep.subr.bf16.mxu1 %v4687_v0  ;;  %v4224_v39 = vld [vmem:[%s6296_s0 + $0x44] ss:$28 sps:$4 sm:$0xff]   ;;  %v4231_v44 = vld [vmem:[%s6296_s0 + $0x7c] ss:$28 sps:$4 sm:$0xff]   ;;  %v4233_v47 = vld [vmem:[%s6296_s0 + $0x70] ss:$28 sps:$4 sm:$0xff]  }
  0x10   :  { %2300 = vmatprep.subr.bf16.mxu0 %v4687_v0  ;;  %v4227_v42 = vld [vmem:[%s6296_s0 + $0x40] ss:$28 sps:$4 sm:$0xff]   ;;  %v4234_v48 = vld [vmem:[%s6296_s0 + $0x78] ss:$28 sps:$4 sm:$0xff]   ;;  %v4235_v49 = vld [vmem:[%s6296_s0 + $0xac] ss:$28 sps:$4 sm:$0xff]  }
  0x11   :  { %v4248_v46 = vld [vmem:[%s6295_s1 + $0x118] sm:$0xff]   ;;  %v4237_v50 = vld [vmem:[%s6296_s0 + $0xb4] ss:$28 sps:$4 sm:$0xff]   ;;  %v4261_v51 = vld [vmem:[%s6295_s1 + $0x120] sm:$0xff]  }
  0x12   :  { %2012 = vmatpush1.bf16.msra.mxu1 %v4191_v9  ;;  %v4268_v52 = vld [vmem:[%s6295_s1 + $0x128] sm:$0xff]   ;;  %v4242_v55 = vld [vmem:[%s6296_s0 + $0xe4] ss:$28 sps:$4 sm:$0xff]   ;;  %v4281_v57 = vld [vmem:[%s6295_s1 + $0x130] sm:$0xff]  }
  0x13   :  { %2301 = vmatpush1.bf16.msra.mxu0 %v4759_v10  ;;  %2013 = vmatprep.subr.bf16.mxu1 %v4687_v0  ;;  %v4239_v53 = vld [vmem:[%s6296_s0 + $0xa8] ss:$28 sps:$4 sm:$0xff]   ;;  %v4240_v54 = vld [vmem:[%s6296_s0 + $0xb0] ss:$28 sps:$4 sm:$0xff]   ;;  %v4288_v58 = vld [vmem:[%s6295_s1 + $0x138] sm:$0xff]  }
  0x14   :  { %2302 = vmatprep.subr.bf16.mxu0 %v4687_v0  ;;  %v4244_v56 = vld [vmem:[%s6296_s0 + $0xec] ss:$28 sps:$4 sm:$0xff]   ;;  %v4246_v59 = vld [vmem:[%s6296_s0 + $0xe0] ss:$28 sps:$4 sm:$0xff]   ;;  %v4260_v9 = vld [vmem:[%s6296_s0 + $0x158] ss:$28 sps:$4 sm:$0xff]  }
  0x15   :  { %v4247_v60 = vld [vmem:[%s6296_s0 + $0xe8] ss:$28 sps:$4 sm:$0xff]   ;;  %v4249_v61 = vld [vmem:[%s6296_s0 + $0x11c] ss:$28 sps:$4 sm:$0xff]   ;;  %v4259_v7 = vld [vmem:[%s6296_s0 + $0x150] ss:$28 sps:$4 sm:$0xff]  }
  0x16   :  { %2014 = vmatpush1.bf16.msra.mxu1 %v4193_v11  ;;  %v4251_v62 = vld [vmem:[%s6296_s0 + $0x124] ss:$28 sps:$4 sm:$0xff]   ;;  %v4308_v1 = vld [vmem:[%s6295_s1 + $0x148] sm:$0xff]   ;;  %v4257_v5 = vld [vmem:[%s6296_s0 + $0x15c] ss:$28 sps:$4 sm:$0xff]  }
  0x17   :  { %2303 = vmatpush1.bf16.msra.mxu0 %v4770_v12  ;;  %2015 = vmatprep.subr.bf16.mxu1 %v4687_v0  ;;  %v4301_v63 = vld [vmem:[%s6295_s1 + $0x140] sm:$0xff]   ;;  %v4264_v11 = vld [vmem:[%s6296_s0 + $0x194] ss:$28 sps:$4 sm:$0xff]  }
  0x18   :  { %2304 = vmatprep.subr.bf16.mxu0 %v4687_v0  ;;  %v4254_v3 = vld [vmem:[%s6296_s0 + $0x120] ss:$28 sps:$4 sm:$0xff]   ;;  %v4274_v21 = vld [vmem:[%s6296_s0 + $0x1c8] ss:$28 sps:$4 sm:$0xff]  }
  0x19   :  { %v4273_v19 = vld [vmem:[%s6296_s0 + $0x1c0] ss:$28 sps:$4 sm:$0xff]  }
  0x1a   :  { %2016 = vmatpush1.bf16.msra.mxu1 %v4195_v13  ;;  %v4266_v13 = vld [vmem:[%s6296_s0 + $0x188] ss:$28 sps:$4 sm:$0xff]  }
  0x1b   :  { %2305 = vmatpush1.bf16.msra.mxu0 %v4781_v14  ;;  %2017 = vmatprep.subr.bf16.mxu1 %v4687_v0 }
  0x1c   :  { %2306 = vmatprep.subr.bf16.mxu0 %v4687_v0 }
  0x1e   :  { %2018 = vmatpush1.bf16.msra.mxu1 %v4197_v15  ;;  %v4267_v15 = vld [vmem:[%s6296_s0 + $0x190] ss:$28 sps:$4 sm:$0xff]  }
  0x1f   :  { %2307 = vmatpush1.bf16.msra.mxu0 %v4792_v16  ;;  %2019 = vmatprep.subr.bf16.mxu1 %v4687_v0 }
  0x20   :  { %2308 = vmatprep.subr.bf16.mxu0 %v4687_v0 }
  0x22   :  { %2020 = vmatpush1.bf16.msra.mxu1 %v4199_v17  ;;  %v4271_v17 = vld [vmem:[%s6296_s0 + $0x1cc] ss:$28 sps:$4 sm:$0xff]  }
  0x23   :  { %2309 = vmatpush1.bf16.msra.mxu0 %v4803_v18  ;;  %2021 = vmatprep.subr.bf16.mxu1 %v4687_v0 }
  0x24   :  { %2310 = vmatprep.subr.bf16.mxu0 %v4687_v0 }
  0x26   :  { %2022 = vmatpush1.bf16.msra.mxu1 %v4201_v20  ;;  %v4368_v20 = vld [vmem:[%s6295_s1 + $0x178] sm:$0xff]  }
  0x27   :  { %2311 = vmatpush1.bf16.msra.mxu0 %v4820_v22  ;;  %2023 = vmatprep.subr.bf16.mxu1 %v4687_v0 }
  0x28   :  { %2312 = vmatprep.subr.bf16.mxu0 %v4687_v0 }
  0x2a   :  { %2024 = vmatpush1.bf16.msra.mxu1 %v4203_v23  ;;  %v4277_v23 = vld [vmem:[%s6296_s0 + $0x204] ss:$28 sps:$4 sm:$0xff]  }
  0x2b   :  { %2313 = vmatpush1.bf16.msra.mxu0 %v4831_v24  ;;  %2025 = vmatprep.subr.bf16.mxu1 %v4687_v0 }
  0x2c   :  { %2314 = vmatprep.subr.bf16.mxu0 %v4687_v0 }
  0x2e   :  { %2026 = vmatpush1.bf16.msra.mxu1 %v4205_v25  ;;  %v4280_v25 = vld [vmem:[%s6296_s0 + $0x200] ss:$28 sps:$4 sm:$0xff]  }
  0x2f   :  { %2315 = vmatpush1.bf16.msra.mxu0 %v4842_v26  ;;  %2027 = vmatprep.subr.bf16.mxu1 %v4687_v0 }
  0x30   :  { %2316 = vmatprep.subr.bf16.mxu0 %v4687_v0 }
  0x32   :  { %2028 = vmatpush1.bf16.msra.mxu1 %v4207_v27  ;;  %v4286_v27 = vld [vmem:[%s6296_s0 + $0x230] ss:$28 sps:$4 sm:$0xff]  }
  0x33   :  { %2317 = vmatpush1.bf16.msra.mxu0 %v4853_v28  ;;  %2029 = vmatprep.subr.bf16.mxu1 %v4687_v0 }
  0x34   :  { %2318 = vmatprep.subr.bf16.mxu0 %v4687_v0 }
  0x36   :  { %2030 = vmatpush1.bf16.msra.mxu1 %v4209_v29  ;;  %v4289_v29 = vld [vmem:[%s6296_s0 + $0x26c] ss:$28 sps:$4 sm:$0xff]  }
  0x37   :  { %2319 = vmatpush1.bf16.msra.mxu0 %v4864_v30  ;;  %2031 = vmatprep.subr.bf16.mxu1 %v4687_v0 }
  0x38   :  { %2320 = vmatprep.subr.bf16.mxu0 %v4687_v0 }
  0x3a   :  { %2032 = vmatpush1.bf16.msra.mxu1 %v4211_v31  ;;  %v4293_v31 = vld [vmem:[%s6296_s0 + $0x268] ss:$28 sps:$4 sm:$0xff]  }
  0x3b   :  { %2321 = vmatpush1.bf16.msra.mxu0 %v4875_v32  ;;  %2033 = vmatprep.subr.bf16.mxu1 %v4687_v0 }
  0x3c   :  { %2322 = vmatprep.subr.bf16.mxu0 %v4687_v0 }
  0x3e   :  { %2034 = vmatpush1.bf16.msra.mxu1 %v4213_v33  ;;  %v4295_v33 = vld [vmem:[%s6296_s0 + $0x2a4] ss:$28 sps:$4 sm:$0xff]  }
  0x3f   :  { %2323 = vmatpush1.bf16.msra.mxu0 %v4886_v34  ;;  %3958 = vmatprep.subr.bf16.mxu1 %v4687_v0 }
  0x40   :  { %2581 = vmatprep.subr.bf16.mxu0 %v4687_v0 }
  0x41   :  { %2036 = vmatmul.mubr.bf16.vlgmr.msra.gmra.mrb[0].mxu1 %v4215_v35  ;;  %v4299_v35 = vld [vmem:[%s6296_s0 + $0x2a0] ss:$28 sps:$4 sm:$0xff]  }
  0x42   :  { %2325 = vmatmul.mubr.bf16.vlgmr.msra.gmra.mrb[0].mxu0 %v4218_v36  ;;  %3974 = vmatpush1.bf16.msra.mxu1 %v4716_v2  ;;  %v4253_v2 = vld [vmem:[%s6296_s0 + $0x118] ss:$28 sps:$4 sm:$0xff]   ;;  %v4300_v36 = vld [vmem:[%s6296_s0 + $0x2a8] ss:$28 sps:$4 sm:$0xff]  }
  0x43   :  { %2582 = vmatpush1.bf16.msra.mxu0 %v4221_v37  ;;  %2043 = vmatprep.mubr.bf16.mxu1 %v4222_v38  ;;  %v4302_v37 = vld [vmem:[%s6296_s0 + $0x2dc] ss:$28 sps:$4 sm:$0xff]   ;;  %v4304_v38 = vld [vmem:[%s6296_s0 + $0x2e4] ss:$28 sps:$4 sm:$0xff]  }
  0x44   :  { %2332 = vmatprep.mubr.bf16.mxu0 %v4224_v39  ;;  %2583 = vmatprep.subr.bf16.mxu0 %v4687_v0  ;;  %v4306_v39 = vld [vmem:[%s6296_s0 + $0x2d8] ss:$28 sps:$4 sm:$0xff]  }
  0x45   :  { %3959 = vmatprep.subr.bf16.mxu1 %v4687_v0 }
  0x46   :  { %3975 = vmatpush1.bf16.msra.mxu1 %v4726_v4  ;;  %v4255_v4 = vld [vmem:[%s6296_s0 + $0x154] ss:$28 sps:$4 sm:$0xff]  }
  0x47   :  { %2584 = vmatpush1.bf16.msra.mxu0 %v4228_v40  ;;  %3960 = vmatprep.subr.bf16.mxu1 %v4687_v0  ;;  %v4307_v40 = vld [vmem:[%s6296_s0 + $0x2e0] ss:$28 sps:$4 sm:$0xff]  }
  0x48   :  { %2585 = vmatprep.subr.bf16.mxu0 %v4687_v0 }
  0x49   :  { %2044 = vmatmul.mubr.bf16.gmra.mrb[4].mxu1 %v4226_v41  ;;  %v4309_v41 = vld [vmem:[%s6296_s0 + $0x314] ss:$28 sps:$4 sm:$0xff]  }
  0x4a   :  { %2333 = vmatmul.mubr.bf16.gmra.mrb[4].mxu0 %v4227_v42  ;;  %2051 = vmatprep.mubr.bf16.mxu1 %v4229_v43  ;;  %v4311_v42 = vld [vmem:[%s6296_s0 + $0x31c] ss:$28 sps:$4 sm:$0xff]   ;;  %v4313_v43 = vld [vmem:[%s6296_s0 + $0x310] ss:$28 sps:$4 sm:$0xff]  }
  0x4b   :  { %2340 = vmatprep.mubr.bf16.mxu0 %v4231_v44  ;;  %2586 = vmatpush1.bf16.msra.mxu0 %v4241_v45  ;;  %v4314_v44 = vld [vmem:[%s6296_s0 + $0x318] ss:$28 sps:$4 sm:$0xff]   ;;  %v4315_v45 = vld [vmem:[%s6296_s0 + $0x34c] ss:$28 sps:$4 sm:$0xff]  }
  0x4c   :  { %3976 = vmatpush1.bf16.msra.mxu1 %v4737_v6  ;;  %2587 = vmatprep.subr.bf16.mxu0 %v4687_v0  ;;  %v4321_v6 = vld [vmem:[%s6295_s1 + $0x150] sm:$0xff]  }
  0x4d   :  { %3961 = vmatprep.subr.bf16.mxu1 %v4687_v0 }
  0x4f   :  { %2588 = vmatpush1.bf16.msra.mxu0 %v4248_v46  ;;  %v4317_v46 = vld [vmem:[%s6296_s0 + $0x354] ss:$28 sps:$4 sm:$0xff]  }
  0x50   :  { %2589 = vmatprep.subr.bf16.mxu0 %v4687_v0  ;;  %3977 = vmatpush1.bf16.msra.mxu1 %v4748_v8  ;;  %v4328_v8 = vld [vmem:[%s6295_s1 + $0x158] sm:$0xff]  }
  0x51   :  { %2052 = vmatmul.mubr.bf16.gmra.mrb[8].mxu1 %v4233_v47  ;;  %3962 = vmatprep.subr.bf16.mxu1 %v4687_v0  ;;  %v4319_v47 = vld [vmem:[%s6296_s0 + $0x348] ss:$28 sps:$4 sm:$0xff]  }
  0x52   :  { %2341 = vmatmul.mubr.bf16.gmra.mrb[8].mxu0 %v4234_v48  ;;  %2059 = vmatprep.mubr.bf16.mxu1 %v4235_v49  ;;  %v4320_v48 = vld [vmem:[%s6296_s0 + $0x350] ss:$28 sps:$4 sm:$0xff]   ;;  %v4322_v49 = vld [vmem:[%s6296_s0 + $0x384] ss:$28 sps:$4 sm:$0xff]  }
  0x53   :  { %2348 = vmatprep.mubr.bf16.mxu0 %v4237_v50  ;;  %2590 = vmatpush1.bf16.msra.mxu0 %v4261_v51  ;;  %v4324_v50 = vld [vmem:[%s6296_s0 + $0x38c] ss:$28 sps:$4 sm:$0xff]   ;;  %v4326_v51 = vld [vmem:[%s6296_s0 + $0x380] ss:$28 sps:$4 sm:$0xff]  }
  0x54   :  { %2591 = vmatprep.subr.bf16.mxu0 %v4687_v0  ;;  %3978 = vmatpush1.bf16.msra.mxu1 %v4759_v10  ;;  %v4262_v10 = vld [vmem:[%s6296_s0 + $0x18c] ss:$28 sps:$4 sm:$0xff]  }
  0x55   :  { %3963 = vmatprep.subr.bf16.mxu1 %v4687_v0 }
  0x57   :  { %2592 = vmatpush1.bf16.msra.mxu0 %v4268_v52  ;;  %v4327_v52 = vld [vmem:[%s6296_s0 + $0x388] ss:$28 sps:$4 sm:$0xff]  }
  0x58   :  { %2593 = vmatprep.subr.bf16.mxu0 %v4687_v0  ;;  %3979 = vmatpush1.bf16.msra.mxu1 %v4770_v12  ;;  %v4341_v12 = vld [vmem:[%s6295_s1 + $0x160] sm:$0xff]  }
  0x59   :  { %2060 = vmatmul.mubr.bf16.gmra.mrb[12].mxu1 %v4239_v53  ;;  %3964 = vmatprep.subr.bf16.mxu1 %v4687_v0  ;;  %v4329_v53 = vld [vmem:[%s6296_s0 + $0x3bc] ss:$28 sps:$4 sm:$0xff]  }
  0x5a   :  { %2349 = vmatmul.mubr.bf16.gmra.mrb[12].mxu0 %v4240_v54  ;;  %2067 = vmatprep.mubr.bf16.mxu1 %v4242_v55  ;;  %v4331_v54 = vld [vmem:[%s6296_s0 + $0x3c4] ss:$28 sps:$4 sm:$0xff]  }
  0x5b   :  { %2356 = vmatprep.mubr.bf16.mxu0 %v4244_v56  ;;  %2594 = vmatpush1.bf16.msra.mxu0 %v4281_v57  ;;  %v5193_v55 = vld [vmem:[%s6295_s1 + $0x180] sm:$0xff]   ;;  %v4333_v56 = vld [vmem:[%s6296_s0 + $0x3b8] ss:$28 sps:$4 sm:$0xff]  }
  0x5c   :  { %2595 = vmatprep.subr.bf16.mxu0 %v4687_v0  ;;  %3980 = vmatpush1.bf16.msra.mxu1 %v4781_v14  ;;  %v4348_v14 = vld [vmem:[%s6295_s1 + $0x168] sm:$0xff]   ;;  %v4334_v57 = vld [vmem:[%s6296_s0 + $0x3c0] ss:$28 sps:$4 sm:$0xff]  }
  0x5d   :  { %3965 = vmatprep.subr.bf16.mxu1 %v4687_v0 }
  0x5f   :  { %2596 = vmatpush1.bf16.msra.mxu0 %v4288_v58  ;;  %v4335_v58 = vld [vmem:[%s6296_s0 + $0x3f4] ss:$28 sps:$4 sm:$0xff]  }
  0x60   :  { %2597 = vmatprep.subr.bf16.mxu0 %v4687_v0  ;;  %3981 = vmatpush1.bf16.msra.mxu1 %v4792_v16  ;;  %v4269_v16 = vld [vmem:[%s6296_s0 + $0x1c4] ss:$28 sps:$4 sm:$0xff]  }
  0x61   :  { %2068 = vmatmul.mubr.bf16.gmra.mrb[16].mxu1 %v4246_v59  ;;  %3966 = vmatprep.subr.bf16.mxu1 %v4687_v0  ;;  %v4337_v59 = vld [vmem:[%s6296_s0 + $0x3fc] ss:$28 sps:$4 sm:$0xff]  }
  0x62   :  { %2357 = vmatmul.mubr.bf16.gmra.mrb[16].mxu0 %v4247_v60  ;;  %2075 = vmatprep.mubr.bf16.mxu1 %v4249_v61  ;;  %v4339_v60 = vld [vmem:[%s6296_s0 + $0x3f0] ss:$28 sps:$4 sm:$0xff]   ;;  %v4340_v61 = vld [vmem:[%s6296_s0 + $0x3f8] ss:$28 sps:$4 sm:$0xff]  }
  0x63   :  { %2364 = vmatprep.mubr.bf16.mxu0 %v4251_v62  ;;  %2598 = vmatpush1.bf16.msra.mxu0 %v4301_v63  ;;  %v4342_v62 = vld [vmem:[%s6296_s0 + $0x42c] ss:$28 sps:$4 sm:$0xff]   ;;  %v4344_v63 = vld [vmem:[%s6296_s0 + $0x434] ss:$28 sps:$4 sm:$0xff]  }
  0x64   :  { %2599 = vmatprep.subr.bf16.mxu0 %v4687_v0  ;;  %3982 = vmatpush1.bf16.msra.mxu1 %v4803_v18  ;;  %v4361_v18 = vld [vmem:[%s6295_s1 + $0x170] sm:$0xff]  }
  0x65   :  { %3967 = vmatprep.subr.bf16.mxu1 %v4687_v0 }
  0x67   :  { %2600 = vmatpush1.bf16.msra.mxu0 %v4308_v1  ;;  %v4346_v1 = vld [vmem:[%s6296_s0 + $0x428] ss:$28 sps:$4 sm:$0xff]  }
  0x68   :  { %2601 = vmatprep.subr.bf16.mxu0 %v4687_v0  ;;  %3983 = vmatpush1.bf16.msra.mxu1 %v4820_v22  ;;  %v4275_v22 = vld [vmem:[%s6296_s0 + $0x1fc] ss:$28 sps:$4 sm:$0xff]  }
  0x69   :  { %2076 = vmatmul.mubr.bf16.gmra.mrb[20].mxu1 %v4253_v2  ;;  %3968 = vmatprep.subr.bf16.mxu1 %v4687_v0  ;;  %v4347_v2 = vld [vmem:[%s6296_s0 + $0x430] ss:$28 sps:$4 sm:$0xff]  }
  0x6a   :  { %2365 = vmatmul.mubr.bf16.gmra.mrb[20].mxu0 %v4254_v3  ;;  %2083 = vmatprep.mubr.bf16.mxu1 %v4255_v4  ;;  %v4349_v3 = vld [vmem:[%s6296_s0 + $0x464] ss:$28 sps:$4 sm:$0xff]   ;;  %v4351_v4 = vld [vmem:[%s6296_s0 + $0x46c] ss:$28 sps:$4 sm:$0xff]  }
  0x6b   :  { %2372 = vmatprep.mubr.bf16.mxu0 %v4257_v5  ;;  %2602 = vmatpush1.bf16.msra.mxu0 %v4321_v6  ;;  %v4353_v5 = vld [vmem:[%s6296_s0 + $0x460] ss:$28 sps:$4 sm:$0xff]   ;;  %v4354_v6 = vld [vmem:[%s6296_s0 + $0x468] ss:$28 sps:$4 sm:$0xff]  }
  0x6c   :  { %2603 = vmatprep.subr.bf16.mxu0 %v4687_v0  ;;  %3984 = vmatpush1.bf16.msra.mxu1 %v4831_v24  ;;  %v4279_v24 = vld [vmem:[%s6296_s0 + $0x1f8] ss:$28 sps:$4 sm:$0xff]  }
  0x6d   :  { %3969 = vmatprep.subr.bf16.mxu1 %v4687_v0 }
  0x6f   :  { %2604 = vmatpush1.bf16.msra.mxu0 %v4328_v8  ;;  %v4357_v8 = vld [vmem:[%s6296_s0 + $0x4a4] ss:$28 sps:$4 sm:$0xff]  }
  0x70   :  { %2605 = vmatprep.subr.bf16.mxu0 %v4687_v0  ;;  %3985 = vmatpush1.bf16.msra.mxu1 %v4842_v26  ;;  %v4282_v26 = vld [vmem:[%s6296_s0 + $0x234] ss:$28 sps:$4 sm:$0xff]  }
  0x71   :  { %2084 = vmatmul.mubr.bf16.gmra.mrb[24].mxu1 %v4259_v7  ;;  %3970 = vmatprep.subr.bf16.mxu1 %v4687_v0  ;;  %v4355_v7 = vld [vmem:[%s6296_s0 + $0x49c] ss:$28 sps:$4 sm:$0xff]  }
  0x72   :  { %2373 = vmatmul.mubr.bf16.gmra.mrb[24].mxu0 %v4260_v9  ;;  %2091 = vmatprep.mubr.bf16.mxu1 %v4262_v10  ;;  %v4359_v9 = vld [vmem:[%s6296_s0 + $0x498] ss:$28 sps:$4 sm:$0xff]   ;;  %v4360_v10 = vld [vmem:[%s6296_s0 + $0x4a0] ss:$28 sps:$4 sm:$0xff]  }
  0x73   :  { %2380 = vmatprep.mubr.bf16.mxu0 %v4264_v11  ;;  %2606 = vmatpush1.bf16.msra.mxu0 %v4341_v12  ;;  %v4362_v11 = vld [vmem:[%s6296_s0 + $0x4d4] ss:$28 sps:$4 sm:$0xff]   ;;  %v4364_v12 = vld [vmem:[%s6296_s0 + $0x4dc] ss:$28 sps:$4 sm:$0xff]  }
  0x74   :  { %2607 = vmatprep.subr.bf16.mxu0 %v4687_v0  ;;  %3986 = vmatpush1.bf16.msra.mxu1 %v4853_v28  ;;  %v4287_v28 = vld [vmem:[%s6296_s0 + $0x238] ss:$28 sps:$4 sm:$0xff]  }
  0x75   :  { %3971 = vmatprep.subr.bf16.mxu1 %v4687_v0 }
  0x77   :  { %2608 = vmatpush1.bf16.msra.mxu0 %v4348_v14  ;;  %v4367_v14 = vld [vmem:[%s6296_s0 + $0x4d8] ss:$28 sps:$4 sm:$0xff]  }
  0x78   :  { %2609 = vmatprep.subr.bf16.mxu0 %v4687_v0  ;;  %3987 = vmatpush1.bf16.msra.mxu1 %v4864_v30  ;;  %v4291_v30 = vld [vmem:[%s6296_s0 + $0x274] ss:$28 sps:$4 sm:$0xff]  }
  0x79   :  { %2092 = vmatmul.mubr.bf16.gmra.mrb[28].mxu1 %v4266_v13  ;;  %3972 = vmatprep.subr.bf16.mxu1 %v4687_v0  ;;  %v4366_v13 = vld [vmem:[%s6296_s0 + $0x4d0] ss:$28 sps:$4 sm:$0xff]  }
  0x7a   :  { %2381 = vmatmul.mubr.bf16.gmra.mrb[28].mxu0 %v4267_v15  ;;  %2099 = vmatprep.mubr.bf16.mxu1 %v4269_v16  ;;  %v4369_v15 = vld [vmem:[%s6296_s0 + $0x50c] ss:$28 sps:$4 sm:$0xff]   ;;  %v4371_v16 = vld [vmem:[%s6296_s0 + $0x514] ss:$28 sps:$4 sm:$0xff]  }
  0x7b   :  { %2388 = vmatprep.mubr.bf16.mxu0 %v4271_v17  ;;  %2610 = vmatpush1.bf16.msra.mxu0 %v4361_v18  ;;  %v4373_v17 = vld [vmem:[%s6296_s0 + $0x508] ss:$28 sps:$4 sm:$0xff]   ;;  %v4374_v18 = vld [vmem:[%s6296_s0 + $0x510] ss:$28 sps:$4 sm:$0xff]  }
  0x7c   :  { %2611 = vmatprep.subr.bf16.mxu0 %v4687_v0  ;;  %3988 = vmatpush1.bf16.msra.mxu1 %v4875_v32  ;;  %v4294_v32 = vld [vmem:[%s6296_s0 + $0x270] ss:$28 sps:$4 sm:$0xff]  }
  0x7d   :  { %3973 = vmatprep.subr.bf16.mxu1 %v4687_v0  ;;  %v4284_v0 = vld [vmem:[%s6296_s0 + $0x23c] ss:$28 sps:$4 sm:$0xff]  }
  0x7f   :  { %2612 = vmatpush1.bf16.msra.mxu0 %v4368_v20  ;;  %v4379_v20 = vld [vmem:[%s6296_s0 + $0x14] ss:$28 sps:$4 sm:$0xff]  }
  0x80   :  { %3989 = vmatpush1.bf16.msra.mxu1 %v4886_v34  ;;  %v4297_v34 = vld [vmem:[%s6296_s0 + $0x2ac] ss:$28 sps:$4 sm:$0xff]  }
  0x81   :  { %2100 = vmatmul.mubr.bf16.gmra.mrb[32].mxu1 %v4273_v19  ;;  %3878 = vmatprep.subr.bf16.mxu1 %v5193_v55  ;;  %v4375_v19 = vld [vmem:[%s6296_s0 + $0x544] ss:$28 sps:$4 sm:$0xff]  }
  0x82   :  { %2389 = vmatmul.mubr.bf16.gmra.mrb[32].mxu0 %v4274_v21  ;;  %2107 = vmatprep.mubr.bf16.mxu1 %v4275_v22  ;;  %v4380_v21 = vld [vmem:[%s6296_s0 + $0x540] ss:$28 sps:$4 sm:$0xff]   ;;  %v4377_v22 = vld [vmem:[%s6296_s0 + $0x10] ss:$28 sps:$4 sm:$0xff]  }
  0x83   :  { %2396 = vmatprep.mubr.bf16.mxu0 %v4277_v23  ;;  %v4381_v23 = vld [vmem:[%s6296_s0 + $0x57c] ss:$28 sps:$4 sm:$0xff]  }
  0x89   :  { %2108 = vmatmul.mubr.bf16.gmra.mrb[36].mxu1 %v4279_v24  ;;  %v4383_v24 = vld [vmem:[%s6296_s0 + $0x4c] ss:$28 sps:$4 sm:$0xff]  }
  0x8a   :  { %2397 = vmatmul.mubr.bf16.gmra.mrb[36].mxu0 %v4280_v25  ;;  %2115 = vmatprep.mubr.bf16.mxu1 %v4282_v26  ;;  %v4385_v25 = vld [vmem:[%s6296_s0 + $0x578] ss:$28 sps:$4 sm:$0xff]   ;;  %v4386_v26 = vld [vmem:[%s6296_s0 + $0x48] ss:$28 sps:$4 sm:$0xff]  }
  0x8b   :  { %2404 = vmatprep.mubr.bf16.mxu0 %v4284_v0  ;;  %v4387_v0 = vld [vmem:[%s6296_s0 + $0x5b4] ss:$28 sps:$4 sm:$0xff]  }
  0x91   :  { %2116 = vmatmul.mubr.bf16.gmra.mrb[40].mxu1 %v4286_v27  ;;  %v4389_v27 = vld [vmem:[%s6296_s0 + $0x84] ss:$28 sps:$4 sm:$0xff]  }
  0x92   :  { %2405 = vmatmul.mubr.bf16.gmra.mrb[40].mxu0 %v4287_v28  ;;  %2123 = vmatprep.mubr.bf16.mxu1 %v4289_v29  ;;  %v4391_v28 = vld [vmem:[%s6296_s0 + $0x5b0] ss:$28 sps:$4 sm:$0xff]   ;;  %v4392_v29 = vld [vmem:[%s6296_s0 + $0x80] ss:$28 sps:$4 sm:$0xff]  }
  0x93   :  { %2412 = vmatprep.mubr.bf16.mxu0 %v4291_v30  ;;  %v4393_v30 = vld [vmem:[%s6296_s0 + $0x5ec] ss:$28 sps:$4 sm:$0xff]  }
  0x99   :  { %2124 = vmatmul.mubr.bf16.gmra.mrb[44].mxu1 %v4293_v31  ;;  %v4395_v31 = vld [vmem:[%s6296_s0 + $0xbc] ss:$28 sps:$4 sm:$0xff]  }
  0x9a   :  { %2413 = vmatmul.mubr.bf16.gmra.mrb[44].mxu0 %v4294_v32  ;;  %2131 = vmatprep.mubr.bf16.mxu1 %v4295_v33 }
  0x9b   :  { %2420 = vmatprep.mubr.bf16.mxu0 %v4297_v34  ;;  %v4397_v34 = vld [vmem:[%s6296_s0 + $0x5e8] ss:$28 sps:$4 sm:$0xff]  }
  0xa1   :  { %2132 = vmatmul.mubr.bf16.gmra.mrb[48].mxu1 %v4299_v35 }
  0xa2   :  { %2421 = vmatmul.mubr.bf16.gmra.mrb[48].mxu0 %v4300_v36  ;;  %2139 = vmatprep.mubr.bf16.mxu1 %v4302_v37  ;;  %v4398_v36 = vld [vmem:[%s6296_s0 + $0xb8] ss:$28 sps:$4 sm:$0xff]   ;;  %v4399_v37 = vld [vmem:[%s6296_s0 + $0x624] ss:$28 sps:$4 sm:$0xff]  }
  0xa3   :  { %2428 = vmatprep.mubr.bf16.mxu0 %v4304_v38 }
  0xa9   :  { %2140 = vmatmul.mubr.bf16.gmra.mrb[52].mxu1 %v4306_v39  ;;  %v4401_v39 = vld [vmem:[%s6296_s0 + $0xf4] ss:$28 sps:$4 sm:$0xff]  }
  0xaa   :  { %2429 = vmatmul.mubr.bf16.gmra.mrb[52].mxu0 %v4307_v40  ;;  %2147 = vmatprep.mubr.bf16.mxu1 %v4309_v41 }
  0xab   :  { %2436 = vmatprep.mubr.bf16.mxu0 %v4311_v42  ;;  %v4403_v42 = vld [vmem:[%s6296_s0 + $0x620] ss:$28 sps:$4 sm:$0xff]  }
  0xb1   :  { %2148 = vmatmul.mubr.bf16.gmra.mrb[56].mxu1 %v4313_v43 }
  0xb2   :  { %2437 = vmatmul.mubr.bf16.gmra.mrb[56].mxu0 %v4314_v44  ;;  %2155 = vmatprep.mubr.bf16.mxu1 %v4315_v45  ;;  %v4404_v44 = vld [vmem:[%s6296_s0 + $0xf0] ss:$28 sps:$4 sm:$0xff]   ;;  %v4405_v45 = vld [vmem:[%s6296_s0 + $0x65c] ss:$28 sps:$4 sm:$0xff]  }
  0xb3   :  { %2444 = vmatprep.mubr.bf16.mxu0 %v4317_v46 }
  0xb9   :  { %2156 = vmatmul.mubr.bf16.gmra.mrb[60].mxu1 %v4319_v47  ;;  %v4407_v47 = vld [vmem:[%s6296_s0 + $0x12c] ss:$28 sps:$4 sm:$0xff]  }
  0xba   :  { %2445 = vmatmul.mubr.bf16.gmra.mrb[60].mxu0 %v4320_v48  ;;  %2163 = vmatprep.mubr.bf16.mxu1 %v4322_v49 }
  0xbb   :  { %2452 = vmatprep.mubr.bf16.mxu0 %v4324_v50  ;;  %v4409_v50 = vld [vmem:[%s6296_s0 + $0x658] ss:$28 sps:$4 sm:$0xff]  }
  0xc1   :  { %2164 = vmatmul.mubr.bf16.gmra.mrb[64].mxu1 %v4326_v51 }
  0xc2   :  { %2453 = vmatmul.mubr.bf16.gmra.mrb[64].mxu0 %v4327_v52  ;;  %2171 = vmatprep.mubr.bf16.mxu1 %v4329_v53  ;;  %v4410_v52 = vld [vmem:[%s6296_s0 + $0x128] ss:$28 sps:$4 sm:$0xff]   ;;  %v4411_v53 = vld [vmem:[%s6296_s0 + $0x694] ss:$28 sps:$4 sm:$0xff]  }
  0xc3   :  { %2460 = vmatprep.mubr.bf16.mxu0 %v4331_v54 }
  0xc9   :  { %2172 = vmatmul.mubr.bf16.gmra.mrb[68].mxu1 %v4333_v56  ;;  %v4413_v56 = vld [vmem:[%s6296_s0 + $0x164] ss:$28 sps:$4 sm:$0xff]  }
  0xca   :  { %2461 = vmatmul.mubr.bf16.gmra.mrb[68].mxu0 %v4334_v57  ;;  %2179 = vmatprep.mubr.bf16.mxu1 %v4335_v58 }
  0xcb   :  { %2468 = vmatprep.mubr.bf16.mxu0 %v4337_v59  ;;  %v4415_v59 = vld [vmem:[%s6296_s0 + $0x690] ss:$28 sps:$4 sm:$0xff]  }
  0xd1   :  { %2180 = vmatmul.mubr.bf16.gmra.mrb[72].mxu1 %v4339_v60 }
  0xd2   :  { %2469 = vmatmul.mubr.bf16.gmra.mrb[72].mxu0 %v4340_v61  ;;  %2187 = vmatprep.mubr.bf16.mxu1 %v4342_v62  ;;  %v4416_v61 = vld [vmem:[%s6296_s0 + $0x160] ss:$28 sps:$4 sm:$0xff]   ;;  %v4417_v62 = vld [vmem:[%s6296_s0 + $0x6cc] ss:$28 sps:$4 sm:$0xff]  }
  0xd3   :  { %2476 = vmatprep.mubr.bf16.mxu0 %v4344_v63 }
  0xd9   :  { %2188 = vmatmul.mubr.bf16.gmra.mrb[76].mxu1 %v4346_v1  ;;  %v4419_v1 = vld [vmem:[%s6296_s0 + $0x19c] ss:$28 sps:$4 sm:$0xff]  }
  0xda   :  { %2477 = vmatmul.mubr.bf16.gmra.mrb[76].mxu0 %v4347_v2  ;;  %2195 = vmatprep.mubr.bf16.mxu1 %v4349_v3 }
  0xdb   :  { %2484 = vmatprep.mubr.bf16.mxu0 %v4351_v4  ;;  %v4421_v4 = vld [vmem:[%s6296_s0 + $0x6c8] ss:$28 sps:$4 sm:$0xff]  }
  0xe1   :  { %2196 = vmatmul.mubr.bf16.gmra.mrb[80].mxu1 %v4353_v5 }
  0xe2   :  { %2485 = vmatmul.mubr.bf16.gmra.mrb[80].mxu0 %v4354_v6  ;;  %2203 = vmatprep.mubr.bf16.mxu1 %v4355_v7  ;;  %v4422_v6 = vld [vmem:[%s6296_s0 + $0x198] ss:$28 sps:$4 sm:$0xff]   ;;  %v4425_v7 = vld [vmem:[%s6296_s0 + $0x54c] ss:$28 sps:$4 sm:$0xff]  }
  0xe3   :  { %2492 = vmatprep.mubr.bf16.mxu0 %v4357_v8 }
  0xe9   :  { %2204 = vmatmul.mubr.bf16.gmra.mrb[84].mxu1 %v4359_v9  ;;  %v4426_v9 = vld [vmem:[%s6296_s0 + $0x1d4] ss:$28 sps:$4 sm:$0xff]  }
  0xea   :  { %2493 = vmatmul.mubr.bf16.gmra.mrb[84].mxu0 %v4360_v10  ;;  %2211 = vmatprep.mubr.bf16.mxu1 %v4362_v11 }
  0xeb   :  { %2500 = vmatprep.mubr.bf16.mxu0 %v4364_v12  ;;  %v4423_v12 = vld [vmem:[%s6296_s0 + $0x548] ss:$28 sps:$4 sm:$0xff]  }
  0xf1   :  { %2212 = vmatmul.mubr.bf16.gmra.mrb[88].mxu1 %v4366_v13 }
  0xf2   :  { %2501 = vmatmul.mubr.bf16.gmra.mrb[88].mxu0 %v4367_v14  ;;  %2219 = vmatprep.mubr.bf16.mxu1 %v4369_v15  ;;  %v4428_v14 = vld [vmem:[%s6296_s0 + $0x1d0] ss:$28 sps:$4 sm:$0xff]  }
  0xf3   :  { %2508 = vmatprep.mubr.bf16.mxu0 %v4371_v16  ;;  %v4430_v16 = vld [vmem:[%s6296_s0 + $0x584] ss:$28 sps:$4 sm:$0xff]  }
  0xf9   :  { %2220 = vmatmul.mubr.bf16.gmra.mrb[92].mxu1 %v4373_v17  ;;  %v4432_v17 = vld [vmem:[%s6296_s0 + $0x20c] ss:$28 sps:$4 sm:$0xff]  }
  0xfa   :  { %2509 = vmatmul.mubr.bf16.gmra.mrb[92].mxu0 %v4374_v18  ;;  %2227 = vmatprep.mubr.bf16.mxu1 %v4375_v19  ;;  %v4436_v18 = vld [vmem:[%s6295_s1 + $0x188] sm:$0xff]   ;;  %v4443_v19 = vld [vmem:[%s6295_s1 + $0x190] sm:$0xff]  }
  0xfb   :  { %2613 = vmatprep.mubr.bf16.mxu0 %v4379_v20 }
 0x101   :  { %2228 = vmatmul.mubr.bf16.gmra.mrb[96].mxu1 %v4380_v21 }
 0x102   :  { %2614 = vmatmul.mubr.bf16.vlgmr.msra.gmra.mrb[0].mxu0 %v4377_v22  ;;  %2235 = vmatprep.mubr.bf16.mxu1 %v4381_v23  ;;  %v4434_v22 = vld [vmem:[%s6296_s0 + $0x580] ss:$28 sps:$4 sm:$0xff]  }
 0x103   :  { %2621 = vmatprep.mubr.bf16.mxu0 %v4383_v24  ;;  %v4437_v24 = vld [vmem:[%s6296_s0 + $0x5bc] ss:$28 sps:$4 sm:$0xff]  }
 0x109   :  { %2236 = vmatmul.mubr.bf16.gmra.mrb[100].mxu1 %v4385_v25 }
 0x10a   :  { %2622 = vmatmul.mubr.bf16.gmra.mrb[4].mxu0 %v4386_v26  ;;  %2243 = vmatprep.mubr.bf16.mxu1 %v4387_v0  ;;  %v4439_v26 = vld [vmem:[%s6296_s0 + $0x244] ss:$28 sps:$4 sm:$0xff]   ;;  %v4450_v0 = vld [vmem:[%s6295_s1 + $0x198] sm:$0xff]  }
 0x10b   :  { %2629 = vmatprep.mubr.bf16.mxu0 %v4389_v27 }
 0x111   :  { %2244 = vmatmul.mubr.bf16.gmra.mrb[104].mxu1 %v4391_v28  ;;  %v4457_v28 = vld [vmem:[%s6295_s1 + $0x1a0] sm:$0xff]  }
 0x112   :  { %2630 = vmatmul.mubr.bf16.gmra.mrb[8].mxu0 %v4392_v29  ;;  %2251 = vmatprep.mubr.bf16.mxu1 %v4393_v30  ;;  %v4441_v30 = vld [vmem:[%s6296_s0 + $0x5b8] ss:$28 sps:$4 sm:$0xff]  }
 0x113   :  { %2637 = vmatprep.mubr.bf16.mxu0 %v4395_v31 }
 0x114   :  { %v5316_v32 = vpop.f32.mrb[0].mxu1 }
 0x115   :  { %v2039_v33 = vpop.f32.mrb[1].mxu1 }
 0x116   :  { %v5321_v35 = vpop.f32.mrb[2].mxu1  ;;  %v4442_v33 = vld [vmem:[%s6296_s0 + $0x240] ss:$28 sps:$4 sm:$0xff]  }
 0x117   :  { %v2042_v38 = vpop.f32.mrb[3].mxu1 }
 0x118   :  { %v4464_v38 = vld [vmem:[%s6295_s1 + $0x1a8] sm:$0xff]  }
 0x119   :  { %2252 = vmatmul.mubr.bf16.gmra.mrb[108].mxu1 %v4397_v34  ;;  %v4444_v34 = vld [vmem:[%s6296_s0 + $0x5f4] ss:$28 sps:$4 sm:$0xff]  }
 0x11a   :  { %2638 = vmatmul.mubr.bf16.gmra.mrb[12].mxu0 %v4398_v36  ;;  %2259 = vmatprep.mubr.bf16.mxu1 %v4399_v37  ;;  %v4446_v37 = vld [vmem:[%s6296_s0 + $0x27c] ss:$28 sps:$4 sm:$0xff]  }
 0x11b   :  { %2645 = vmatprep.mubr.bf16.mxu0 %v4401_v39 }
 0x11c   :  { %v5332_v40 = vpop.f32.mrb[4].mxu1 }
 0x11d   :  { %v2047_v41 = vpop.f32.mrb[5].mxu1 }
 0x11e   :  { %v5337_v43 = vpop.f32.mrb[6].mxu1  ;;  %v4471_v41 = vld [vmem:[%s6295_s1 + $0x1b0] sm:$0xff]  }
 0x11f   :  { %v2050_v46 = vpop.f32.mrb[7].mxu1 }
 0x120   :  { %v4449_v46 = vld [vmem:[%s6296_s0 + $0x278] ss:$28 sps:$4 sm:$0xff]  }
 0x121   :  { %2260 = vmatmul.mubr.bf16.gmra.mrb[112].mxu1 %v4403_v42 }
 0x122   :  { %2646 = vmatmul.mubr.bf16.gmra.mrb[16].mxu0 %v4404_v44  ;;  %2267 = vmatprep.mubr.bf16.mxu1 %v4405_v45  ;;  %v4448_v44 = vld [vmem:[%s6296_s0 + $0x5f0] ss:$28 sps:$4 sm:$0xff]  }
 0x123   :  { %2653 = vmatprep.mubr.bf16.mxu0 %v4407_v47  ;;  %v4451_v47 = vld [vmem:[%s6296_s0 + $0x62c] ss:$28 sps:$4 sm:$0xff]  }
 0x124   :  { %v5348_v48 = vpop.f32.mrb[8].mxu1 }
 0x125   :  { %v2055_v49 = vpop.f32.mrb[9].mxu1 }
 0x126   :  { %v5353_v51 = vpop.f32.mrb[10].mxu1 }
 0x127   :  { %v2058_v54 = vpop.f32.mrb[11].mxu1 }
 0x129   :  { %2268 = vmatmul.mubr.bf16.gmra.mrb[116].mxu1 %v4409_v50  ;;  %v4453_v50 = vld [vmem:[%s6296_s0 + $0x2b4] ss:$28 sps:$4 sm:$0xff]  }
 0x12a   :  { %2654 = vmatmul.mubr.bf16.gmra.mrb[20].mxu0 %v4410_v52  ;;  %2275 = vmatprep.mubr.bf16.mxu1 %v4411_v53  ;;  %v4478_v52 = vld [vmem:[%s6295_s1 + $0x1b8] sm:$0xff]  }
 0x12b   :  { %2661 = vmatprep.mubr.bf16.mxu0 %v4413_v56  ;;  %v4455_v56 = vld [vmem:[%s6296_s0 + $0x628] ss:$28 sps:$4 sm:$0xff]  }
 0x12c   :  { %v5364_v57 = vpop.f32.mrb[12].mxu1 }
 0x12d   :  { %v2063_v58 = vpop.f32.mrb[13].mxu1 }
 0x12e   :  { %v5369_v60 = vpop.f32.mrb[14].mxu1 }
 0x12f   :  { %v2066_v63 = vpop.f32.mrb[15].mxu1 }
 0x130   :  { %v4460_v63 = vld [vmem:[%s6296_s0 + $0x2ec] ss:$28 sps:$4 sm:$0xff]  }
 0x131   :  { %2276 = vmatmul.mubr.bf16.gmra.mrb[120].mxu1 %v4415_v59  ;;  %v4456_v59 = vld [vmem:[%s6296_s0 + $0x2b0] ss:$28 sps:$4 sm:$0xff]  }
 0x132   :  { %2662 = vmatmul.mubr.bf16.gmra.mrb[24].mxu0 %v4416_v61  ;;  %2283 = vmatprep.mubr.bf16.mxu1 %v4417_v62  ;;  %v4458_v61 = vld [vmem:[%s6296_s0 + $0x664] ss:$28 sps:$4 sm:$0xff]  }
 0x133   :  { %2669 = vmatprep.mubr.bf16.mxu0 %v4419_v1 }
 0x134   :  { %v5380_v2 = vpop.f32.mrb[16].mxu1 }
 0x135   :  { %v2071_v3 = vpop.f32.mrb[17].mxu1 }
 0x136   :  { %v5385_v5 = vpop.f32.mrb[18].mxu1 }
 0x137   :  { %v2074_v8 = vpop.f32.mrb[19].mxu1 }
 0x138   :  { %v4465_v8 = vld [vmem:[%s6296_s0 + $0x69c] ss:$28 sps:$4 sm:$0xff]  }
 0x139   :  { %2284 = vmatmul.mubr.bf16.gmra.mrb[124].mxu1 %v4421_v4  ;;  %v4462_v4 = vld [vmem:[%s6296_s0 + $0x660] ss:$28 sps:$4 sm:$0xff]  }
 0x13a   :  { %2670 = vmatmul.mubr.bf16.gmra.mrb[28].mxu0 %v4422_v6  ;;  %2516 = vmatprep.mubr.bf16.mxu1 %v4425_v7  ;;  %v4463_v7 = vld [vmem:[%s6296_s0 + $0x2e8] ss:$28 sps:$4 sm:$0xff]  }
 0x13b   :  { %2677 = vmatprep.mubr.bf16.mxu0 %v4426_v9 }
 0x13c   :  { %v5396_v10 = vpop.f32.mrb[20].mxu1 }
 0x13d   :  { %v2079_v11 = vpop.f32.mrb[21].mxu1 }
 0x13e   :  { %v5401_v13 = vpop.f32.mrb[22].mxu1  ;;  %v4467_v11 = vld [vmem:[%s6296_s0 + $0x324] ss:$28 sps:$4 sm:$0xff]  }
 0x13f   :  { %v2082_v15 = vpop.f32.mrb[23].mxu1 }
 0x140   :  { %v4469_v15 = vld [vmem:[%s6296_s0 + $0x698] ss:$28 sps:$4 sm:$0xff]  }
 0x141   :  { %2517 = vmatmul.mubr.bf16.vlgmr.msra.gmra.mrb[96].mxu1 %v4423_v12 }
 0x142   :  { %2678 = vmatmul.mubr.bf16.gmra.mrb[32].mxu0 %v4428_v14  ;;  %3879 = vmatpush3.bf16.msra.mxu1 %v5193_v55  ;;  %v4435_v55 = vld [vmem:[%s6296_s0 + $0x208] ss:$28 sps:$4 sm:$0xff]  }
 0x143   :  { %2524 = vmatprep.mubr.bf16.mxu1 %v4430_v16  ;;  %2685 = vmatprep.mubr.bf16.mxu0 %v4432_v17  ;;  %v4470_v17 = vld [vmem:[%s6296_s0 + $0x320] ss:$28 sps:$4 sm:$0xff]  }
 0x144   :  { %v5419_v20 = vpop.f32.mrb[24].mxu1  ;;  %3880 = vmatprep.subr.bf16.mxu1 %v4436_v18 }
 0x145   :  { %v2087_v21 = vpop.f32.mrb[25].mxu1 }
 0x146   :  { %v5424_v23 = vpop.f32.mrb[26].mxu1  ;;  %3881 = vmatpush3.bf16.msra.mxu1 %v4436_v18  ;;  %v4472_v18 = vld [vmem:[%s6296_s0 + $0x6d4] ss:$28 sps:$4 sm:$0xff]   ;;  %v4474_v21 = vld [vmem:[%s6296_s0 + $0x35c] ss:$28 sps:$4 sm:$0xff]  }
 0x147   :  { %v2090_v25 = vpop.f32.mrb[27].mxu1  ;;  %3882 = vmatprep.subr.bf16.mxu1 %v4443_v19 }
 0x149   :  { %2525 = vmatmul.mubr.bf16.gmra.mrb[100].mxu1 %v4434_v22 }
 0x14a   :  { %2686 = vmatmul.mubr.bf16.gmra.mrb[36].mxu0 %v4435_v55  ;;  %2532 = vmatprep.mubr.bf16.mxu1 %v4437_v24  ;;  %v4476_v24 = vld [vmem:[%s6296_s0 + $0x6d0] ss:$28 sps:$4 sm:$0xff]  }
 0x14b   :  { %2693 = vmatprep.mubr.bf16.mxu0 %v4439_v26  ;;  %3883 = vmatpush3.bf16.msra.mxu1 %v4443_v19  ;;  %v4477_v26 = vld [vmem:[%s6296_s0 + $0x358] ss:$28 sps:$4 sm:$0xff]  }
 0x14c   :  { %v5438_v27 = vpop.f32.mrb[28].mxu1  ;;  %3884 = vmatprep.subr.bf16.mxu1 %v4450_v0 }
 0x14d   :  { %v2095_v29 = vpop.f32.mrb[29].mxu1 }
 0x14e   :  { %v5446_v31 = vpop.f32.mrb[30].mxu1  ;;  %v4479_v29 = vld [vmem:[%s6296_s0 + $0x394] ss:$28 sps:$4 sm:$0xff]  }
 0x14f   :  { %v2098_v36 = vpop.f32.mrb[31].mxu1  ;;  %3885 = vmatpush3.bf16.msra.mxu1 %v4450_v0  ;;  %v4481_v0 = vld [vmem:[%s6296_s0 + $0x18] ss:$28 sps:$4 sm:$0xff]  }
 0x150   :  { %3886 = vmatprep.subr.bf16.mxu1 %v4457_v28 }
 0x151   :  { %2533 = vmatmul.mubr.bf16.gmra.mrb[104].mxu1 %v4441_v30 }
 0x152   :  { %2694 = vmatmul.mubr.bf16.gmra.mrb[40].mxu0 %v4442_v33  ;;  %2540 = vmatprep.mubr.bf16.mxu1 %v4444_v34  ;;  %v4483_v34 = vld [vmem:[%s6296_s0 + $0x50] ss:$28 sps:$4 sm:$0xff]  }
 0x153   :  { %2701 = vmatprep.mubr.bf16.mxu0 %v4446_v37  ;;  %3887 = vmatpush3.bf16.msra.mxu1 %v4457_v28  ;;  %v4482_v37 = vld [vmem:[%s6296_s0 + $0x390] ss:$28 sps:$4 sm:$0xff]  }
 0x154   :  { %v5460_v39 = vpop.f32.mrb[32].mxu1  ;;  %3888 = vmatprep.subr.bf16.mxu1 %v4464_v38 }
 0x155   :  { %v2103_v42 = vpop.f32.mrb[33].mxu1 }
 0x156   :  { %v5468_v45 = vpop.f32.mrb[34].mxu1  ;;  %v4484_v42 = vld [vmem:[%s6296_s0 + $0x3cc] ss:$28 sps:$4 sm:$0xff]  }
 0x157   :  { %v2106_v49 = vpop.f32.mrb[35].mxu1  ;;  %3889 = vmatpush3.bf16.msra.mxu1 %v4464_v38  ;;  %v4486_v38 = vld [vmem:[%s6296_s0 + $0x88] ss:$28 sps:$4 sm:$0xff]  }
 0x158   :  { %3890 = vmatprep.subr.bf16.mxu1 %v4471_v41 }
 0x159   :  { %2541 = vmatmul.mubr.bf16.gmra.mrb[108].mxu1 %v4448_v44 }
 0x15a   :  { %2702 = vmatmul.mubr.bf16.gmra.mrb[44].mxu0 %v4449_v46  ;;  %2548 = vmatprep.mubr.bf16.mxu1 %v4451_v47  ;;  %v4488_v47 = vld [vmem:[%s6296_s0 + $0xc0] ss:$28 sps:$4 sm:$0xff]  }
 0x15b   :  { %2709 = vmatprep.mubr.bf16.mxu0 %v4453_v50  ;;  %3891 = vmatpush3.bf16.msra.mxu1 %v4471_v41  ;;  %v4487_v50 = vld [vmem:[%s6296_s0 + $0x3c8] ss:$28 sps:$4 sm:$0xff]  }
 0x15c   :  { %v5482_v53 = vpop.f32.mrb[36].mxu1  ;;  %3892 = vmatprep.subr.bf16.mxu1 %v4478_v52 }
 0x15d   :  { %v2111_v54 = vpop.f32.mrb[37].mxu1 }
 0x15e   :  { %v5487_v58 = vpop.f32.mrb[38].mxu1 }
 0x15f   :  { %v2114_v62 = vpop.f32.mrb[39].mxu1  ;;  %3893 = vmatpush3.bf16.msra.mxu1 %v4478_v52  ;;  %v4491_v52 = vld [vmem:[%s6296_s0 + $0xf8] ss:$28 sps:$4 sm:$0xff]  }
 0x160   :  { %v4493_v62 = vld [vmem:[%s6296_s0 + $0x130] ss:$28 sps:$4 sm:$0xff]  }
 0x161   :  { %2549 = vmatmul.mubr.bf16.gmra.mrb[112].mxu1 %v4455_v56  ;;  %v4489_v56 = vld [vmem:[%s6296_s0 + $0x404] ss:$28 sps:$4 sm:$0xff]  }
 0x162   :  { %2710 = vmatmul.mubr.bf16.gmra.mrb[48].mxu0 %v4456_v59  ;;  %2556 = vmatprep.mubr.bf16.mxu1 %v4458_v61 }
 0x163   :  { %2717 = vmatprep.mubr.bf16.mxu0 %v4460_v63 }
 0x164   :  { %v5498_v1 = vpop.f32.mrb[40].mxu1 }
 0x165   :  { %v2119_v3 = vpop.f32.mrb[41].mxu1 }
 0x166   :  { %v5503_v6 = vpop.f32.mrb[42].mxu1  ;;  %v4492_v3 = vld [vmem:[%s6296_s0 + $0x400] ss:$28 sps:$4 sm:$0xff]  }
 0x167   :  { %v2122_v9 = vpop.f32.mrb[43].mxu1 }
 0x169   :  { %2557 = vmatmul.mubr.bf16.gmra.mrb[116].mxu1 %v4462_v4  ;;  %v4496_v4 = vld [vmem:[%s6296_s0 + $0x168] ss:$28 sps:$4 sm:$0xff]  }
 0x16a   :  { %2718 = vmatmul.mubr.bf16.gmra.mrb[52].mxu0 %v4463_v7  ;;  %2564 = vmatprep.mubr.bf16.mxu1 %v4465_v8  ;;  %v4494_v8 = vld [vmem:[%s6296_s0 + $0x43c] ss:$28 sps:$4 sm:$0xff]  }
 0x16b   :  { %2725 = vmatprep.mubr.bf16.mxu0 %v4467_v11 }
 0x16c   :  { %v5514_v12 = vpop.f32.mrb[44].mxu1 }
 0x16d   :  { %v2127_v14 = vpop.f32.mrb[45].mxu1 }
 0x16e   :  { %v5519_v16 = vpop.f32.mrb[46].mxu1  ;;  %v4498_v14 = vld [vmem:[%s6296_s0 + $0x1a0] ss:$28 sps:$4 sm:$0xff]  }
 0x16f   :  { %v2130_v19 = vpop.f32.mrb[47].mxu1 }
 0x171   :  { %2565 = vmatmul.mubr.bf16.gmra.mrb[120].mxu1 %v4469_v15 }
 0x172   :  { %2726 = vmatmul.mubr.bf16.gmra.mrb[56].mxu0 %v4470_v17  ;;  %2572 = vmatprep.mubr.bf16.mxu1 %v4472_v18  ;;  %v4497_v17 = vld [vmem:[%s6296_s0 + $0x438] ss:$28 sps:$4 sm:$0xff]  }
 0x173   :  { %2733 = vmatprep.mubr.bf16.mxu0 %v4474_v21  ;;  %v4501_v18 = vld [vmem:[%s6296_s0 + $0x1d8] ss:$28 sps:$4 sm:$0xff]  }
 0x174   :  { %v5530_v22 = vpop.f32.mrb[48].mxu1  ;;  %v4499_v21 = vld [vmem:[%s6296_s0 + $0x474] ss:$28 sps:$4 sm:$0xff]  }
 0x175   :  { %v2135_v55 = vpop.f32.mrb[49].mxu1 }
 0x176   :  { %v5535_v25 = vpop.f32.mrb[50].mxu1 }
 0x177   :  { %v2138_v28 = vpop.f32.mrb[51].mxu1 }
 0x178   :  { %v4502_v28 = vld [vmem:[%s6296_s0 + $0x470] ss:$28 sps:$4 sm:$0xff]  }
 0x179   :  { %2573 = vmatmul.mubr.bf16.gmra.mrb[124].mxu1 %v4476_v24 }
 0x17a   :  { %2734 = vmatmul.mubr.bf16.gmra.mrb[60].mxu0 %v4477_v26  ;;  %3894 = vmatprep.mubr.bf16.mxu1 %v4481_v0  ;;  %v4503_v26 = vld [vmem:[%s6296_s0 + $0x210] ss:$28 sps:$4 sm:$0xff]  }
 0x17b   :  { %2741 = vmatprep.mubr.bf16.mxu0 %v4479_v29  ;;  %v4506_v29 = vld [vmem:[%s6296_s0 + $0x248] ss:$28 sps:$4 sm:$0xff]  }
 0x17c   :  { %v5546_v30 = vpop.f32.mrb[52].mxu1 }
 0x17d   :  { %v2143_v33 = vpop.f32.mrb[53].mxu1 }
 0x17e   :  { %v5551_v36 = vpop.f32.mrb[54].mxu1 }
 0x17f   :  { %v2146_v41 = vpop.f32.mrb[55].mxu1 }
 0x180   :  { %v4508_v41 = vld [vmem:[%s6296_s0 + $0x280] ss:$28 sps:$4 sm:$0xff]  }
 0x181   :  { %3895 = vmatmul.mubr.bf16.vlgmr.msra.gmra.mrb[128].mxu1 %v4483_v34  ;;  %v4504_v34 = vld [vmem:[%s6296_s0 + $0x4ac] ss:$28 sps:$4 sm:$0xff]  }
 0x182   :  { %2742 = vmatmul.mubr.bf16.gmra.mrb[64].mxu0 %v4482_v37  ;;  %3898 = vmatprep.mubr.bf16.mxu1 %v4486_v38 }
 0x183   :  { %2749 = vmatprep.mubr.bf16.mxu0 %v4484_v42 }
 0x184   :  { %v5562_v44 = vpop.f32.mrb[56].mxu1 }
 0x185   :  { %v2151_v46 = vpop.f32.mrb[57].mxu1 }
 0x186   :  { %v5567_v49 = vpop.f32.mrb[58].mxu1  ;;  %v4507_v46 = vld [vmem:[%s6296_s0 + $0x4a8] ss:$28 sps:$4 sm:$0xff]  }
 0x187   :  { %v2154_v54 = vpop.f32.mrb[59].mxu1 }
 0x189   :  { %3899 = vmatmul.mubr.bf16.gmra.mrb[132].mxu1 %v4488_v47  ;;  %v4511_v47 = vld [vmem:[%s6296_s0 + $0x2b8] ss:$28 sps:$4 sm:$0xff]  }
 0x18a   :  { %2750 = vmatmul.mubr.bf16.gmra.mrb[68].mxu0 %v4487_v50  ;;  %3902 = vmatprep.mubr.bf16.mxu1 %v4491_v52  ;;  %v4509_v52 = vld [vmem:[%s6296_s0 + $0x4e4] ss:$28 sps:$4 sm:$0xff]  }
 0x18b   :  { %2757 = vmatprep.mubr.bf16.mxu0 %v4489_v56 }
 0x18c   :  { %v5578_v59 = vpop.f32.mrb[60].mxu1 }
 0x18d   :  { %v2159_v61 = vpop.f32.mrb[61].mxu1 }
 0x18e   :  { %v5583_v63 = vpop.f32.mrb[62].mxu1  ;;  %v4513_v61 = vld [vmem:[%s6296_s0 + $0x2f0] ss:$28 sps:$4 sm:$0xff]  }
 0x18f   :  { %v2162_v7 = vpop.f32.mrb[63].mxu1 }
 0x191   :  { %3903 = vmatmul.mubr.bf16.gmra.mrb[136].mxu1 %v4493_v62 }
 0x192   :  { %2758 = vmatmul.mubr.bf16.gmra.mrb[72].mxu0 %v4492_v3  ;;  %3906 = vmatprep.mubr.bf16.mxu1 %v4496_v4  ;;  %v4512_v3 = vld [vmem:[%s6296_s0 + $0x4e0] ss:$28 sps:$4 sm:$0xff]   ;;  %v4516_v4 = vld [vmem:[%s6296_s0 + $0x328] ss:$28 sps:$4 sm:$0xff]  }
 0x193   :  { %2765 = vmatprep.mubr.bf16.mxu0 %v4494_v8  ;;  %v4514_v8 = vld [vmem:[%s6296_s0 + $0x51c] ss:$28 sps:$4 sm:$0xff]  }
 0x194   :  { %v5594_v9 = vpop.f32.mrb[64].mxu1 }
 0x195   :  { %v2167_v11 = vpop.f32.mrb[65].mxu1 }
 0x196   :  { %v5599_v15 = vpop.f32.mrb[66].mxu1 }
 0x197   :  { %v2170_v19 = vpop.f32.mrb[67].mxu1 }
 0x198   :  { %v4517_v19 = vld [vmem:[%s6296_s0 + $0x518] ss:$28 sps:$4 sm:$0xff]  }
 0x199   :  { %3907 = vmatmul.mubr.bf16.gmra.mrb[140].mxu1 %v4498_v14 }
 0x19a   :  { %2766 = vmatmul.mubr.bf16.gmra.mrb[76].mxu0 %v4497_v17  ;;  %3910 = vmatprep.mubr.bf16.mxu1 %v4501_v18  ;;  %v4518_v17 = vld [vmem:[%s6296_s0 + $0x360] ss:$28 sps:$4 sm:$0xff]  }
 0x19b   :  { %2773 = vmatprep.mubr.bf16.mxu0 %v4499_v21  ;;  %v4521_v21 = vld [vmem:[%s6296_s0 + $0x398] ss:$28 sps:$4 sm:$0xff]  }
 0x19c   :  { %v5610_v55 = vpop.f32.mrb[68].mxu1 }
 0x19d   :  { %v2175_v24 = vpop.f32.mrb[69].mxu1 }
 0x19e   :  { %v5615_v0 = vpop.f32.mrb[70].mxu1 }
 0x19f   :  { %v2178_v33 = vpop.f32.mrb[71].mxu1 }
 0x1a0   :  { %v4523_v33 = vld [vmem:[%s6296_s0 + $0x3d0] ss:$28 sps:$4 sm:$0xff]  }
 0x1a1   :  { %3911 = vmatmul.mubr.bf16.gmra.mrb[144].mxu1 %v4503_v26  ;;  %v4519_v26 = vld [vmem:[%s6296_s0 + $0x554] ss:$28 sps:$4 sm:$0xff]  }
 0x1a2   :  { %2774 = vmatmul.mubr.bf16.gmra.mrb[80].mxu0 %v4502_v28  ;;  %3914 = vmatprep.mubr.bf16.mxu1 %v4506_v29 }
 0x1a3   :  { %2781 = vmatprep.mubr.bf16.mxu0 %v4504_v34 }
 0x1a4   :  { %v5626_v37 = vpop.f32.mrb[72].mxu1 }
 0x1a5   :  { %v2183_v38 = vpop.f32.mrb[73].mxu1 }
 0x1a6   :  { %v5631_v42 = vpop.f32.mrb[74].mxu1  ;;  %v4522_v38 = vld [vmem:[%s6296_s0 + $0x550] ss:$28 sps:$4 sm:$0xff]  }
 0x1a7   :  { %v2186_v50 = vpop.f32.mrb[75].mxu1 }
 0x1a9   :  { %3915 = vmatmul.mubr.bf16.gmra.mrb[148].mxu1 %v4508_v41  ;;  %v4526_v41 = vld [vmem:[%s6296_s0 + $0x408] ss:$28 sps:$4 sm:$0xff]  }
 0x1aa   :  { %2782 = vmatmul.mubr.bf16.gmra.mrb[84].mxu0 %v4507_v46  ;;  %3918 = vmatprep.mubr.bf16.mxu1 %v4511_v47  ;;  %v4524_v47 = vld [vmem:[%s6296_s0 + $0x58c] ss:$28 sps:$4 sm:$0xff]  }
 0x1ab   :  { %2789 = vmatprep.mubr.bf16.mxu0 %v4509_v52 }
 0x1ac   :  { %v5642_v54 = vpop.f32.mrb[76].mxu1 }
 0x1ad   :  { %v2191_v56 = vpop.f32.mrb[77].mxu1 }
 0x1ae   :  { %v5647_v62 = vpop.f32.mrb[78].mxu1  ;;  %v4528_v56 = vld [vmem:[%s6296_s0 + $0x440] ss:$28 sps:$4 sm:$0xff]  }
 0x1af   :  { %v2194_v7 = vpop.f32.mrb[79].mxu1 }
 0x1b1   :  { %3919 = vmatmul.mubr.bf16.gmra.mrb[152].mxu1 %v4513_v61 }
 0x1b2   :  { %2790 = vmatmul.mubr.bf16.gmra.mrb[88].mxu0 %v4512_v3  ;;  %3922 = vmatprep.mubr.bf16.mxu1 %v4516_v4  ;;  %v4527_v3 = vld [vmem:[%s6296_s0 + $0x588] ss:$28 sps:$4 sm:$0xff]   ;;  %v4531_v4 = vld [vmem:[%s6296_s0 + $0x478] ss:$28 sps:$4 sm:$0xff]  }
 0x1b3   :  { %2797 = vmatprep.mubr.bf16.mxu0 %v4514_v8  ;;  %v4529_v8 = vld [vmem:[%s6296_s0 + $0x5c4] ss:$28 sps:$4 sm:$0xff]  }
 0x1b4   :  { %v5658_v11 = vpop.f32.mrb[80].mxu1 }
 0x1b5   :  { %v2199_v14 = vpop.f32.mrb[81].mxu1 }
 0x1b6   :  { %v5663_v18 = vpop.f32.mrb[82].mxu1 }
 0x1b7   :  { %v2202_v24 = vpop.f32.mrb[83].mxu1 }
 0x1b8   :  { %v4532_v24 = vld [vmem:[%s6296_s0 + $0x5c0] ss:$28 sps:$4 sm:$0xff]  }
 0x1b9   :  { %3923 = vmatmul.mubr.bf16.gmra.mrb[156].mxu1 %v4518_v17 }
 0x1ba   :  { %2798 = vmatmul.mubr.bf16.gmra.mrb[92].mxu0 %v4517_v19  ;;  %3926 = vmatprep.mubr.bf16.mxu1 %v4521_v21  ;;  %v4533_v19 = vld [vmem:[%s6296_s0 + $0x4b0] ss:$28 sps:$4 sm:$0xff]  }
 0x1bb   :  { %2805 = vmatprep.mubr.bf16.mxu0 %v4519_v26  ;;  %v4536_v26 = vld [vmem:[%s6296_s0 + $0x4e8] ss:$28 sps:$4 sm:$0xff]  }
 0x1bc   :  { %v5674_v28 = vpop.f32.mrb[84].mxu1 }
 0x1bd   :  { %v2207_v29 = vpop.f32.mrb[85].mxu1 }
 0x1be   :  { %v5679_v34 = vpop.f32.mrb[86].mxu1 }
 0x1bf   :  { %v2210_v46 = vpop.f32.mrb[87].mxu1 }
 0x1c1   :  { %3927 = vmatmul.mubr.bf16.gmra.mrb[160].mxu1 %v4523_v33  ;;  %v4534_v33 = vld [vmem:[%s6296_s0 + $0x5fc] ss:$28 sps:$4 sm:$0xff]  }
 0x1c2   :  { %2806 = vmatmul.mubr.bf16.gmra.mrb[96].mxu0 %v4522_v38  ;;  %3930 = vmatprep.mubr.bf16.mxu1 %v4526_v41  ;;  %v4538_v41 = vld [vmem:[%s6296_s0 + $0x520] ss:$28 sps:$4 sm:$0xff]  }
 0x1c3   :  { %2813 = vmatprep.mubr.bf16.mxu0 %v4524_v47 }
 0x1c4   :  { %v5690_v50 = vpop.f32.mrb[88].mxu1 }
 0x1c5   :  { %v2215_v52 = vpop.f32.mrb[89].mxu1 }
 0x1c6   :  { %v5695_v61 = vpop.f32.mrb[90].mxu1  ;;  %v4537_v52 = vld [vmem:[%s6296_s0 + $0x5f8] ss:$28 sps:$4 sm:$0xff]  }
 0x1c7   :  { %v2218_v7 = vpop.f32.mrb[91].mxu1 }
 0x1c9   :  { %3931 = vmatmul.mubr.bf16.gmra.mrb[164].mxu1 %v4528_v56  ;;  %v4541_v56 = vld [vmem:[%s6296_s0 + $0x558] ss:$28 sps:$4 sm:$0xff]  }
 0x1ca   :  { %2814 = vmatmul.mubr.bf16.gmra.mrb[100].mxu0 %v4527_v3  ;;  %3934 = vmatprep.mubr.bf16.mxu1 %v4531_v4  ;;  %v4539_v4 = vld [vmem:[%s6296_s0 + $0x634] ss:$28 sps:$4 sm:$0xff]  }
 0x1cb   :  { %2821 = vmatprep.mubr.bf16.mxu0 %v4529_v8 }
 0x1cc   :  { %v5706_v14 = vpop.f32.mrb[92].mxu1 }
 0x1cd   :  { %v2223_v17 = vpop.f32.mrb[93].mxu1 }
 0x1ce   :  { %v5711_v21 = vpop.f32.mrb[94].mxu1  ;;  %v4543_v17 = vld [vmem:[%s6296_s0 + $0x590] ss:$28 sps:$4 sm:$0xff]  }
 0x1cf   :  { %v2226_v29 = vpop.f32.mrb[95].mxu1 }
 0x1d1   :  { %3935 = vmatmul.mubr.bf16.gmra.mrb[168].mxu1 %v4533_v19 }
 0x1d2   :  { %2822 = vmatmul.mubr.bf16.gmra.mrb[104].mxu0 %v4532_v24  ;;  %3938 = vmatprep.mubr.bf16.mxu1 %v4536_v26  ;;  %v4542_v26 = vld [vmem:[%s6296_s0 + $0x630] ss:$28 sps:$4 sm:$0xff]  }
 0x1d3   :  { %2829 = vmatprep.mubr.bf16.mxu0 %v4534_v33  ;;  %v4544_v33 = vld [vmem:[%s6296_s0 + $0x66c] ss:$28 sps:$4 sm:$0xff]  }
 0x1d5   :  { %v2615_v38 = vpop.f32.mrb[0].mxu0 }
 0x1d6   :  { %v5726_v46 = vadd.f32 %v2615_v38, %v5316_v32  ;;  %v2617_v47 = vpop.f32.mrb[1].mxu0 }
 0x1d7   :  { %v2618_v3 = vpop.f32.mrb[2].mxu0  ;;  %v4548_v47 = vld [vmem:[%s6296_s0 + $0x600] ss:$28 sps:$4 sm:$0xff]  }
 0x1d8   :  { %v5738_v7 = vadd.f32 %v2618_v3, %v5321_v35  ;;  %v2620_v8 = vpop.f32.mrb[3].mxu0  ;;  %v4546_v35 = vld [vmem:[%s6296_s0 + $0x5c8] ss:$28 sps:$4 sm:$0xff]  }
 0x1d9   :  { %3939 = vmatmul.mubr.bf16.gmra.mrb[172].mxu1 %v4538_v41  ;;  %v4547_v3 = vld [vmem:[%s6296_s0 + $0x668] ss:$28 sps:$4 sm:$0xff]  }
 0x1da   :  { %2830 = vmatmul.mubr.bf16.gmra.mrb[108].mxu0 %v4537_v52  ;;  %3942 = vmatprep.mubr.bf16.mxu1 %v4541_v56  ;;  %v4549_v8 = vld [vmem:[%s6296_s0 + $0x6a4] ss:$28 sps:$4 sm:$0xff]  }
 0x1db   :  { %2837 = vmatprep.mubr.bf16.mxu0 %v4539_v4 }
 0x1dd   :  { %v2623_v32 = vpop.f32.mrb[4].mxu0 }
 0x1de   :  { %v5744_v19 = vadd.f32 %v2623_v32, %v5332_v40  ;;  %v2625_v24 = vpop.f32.mrb[5].mxu0 }
 0x1df   :  { %v2626_v29 = vpop.f32.mrb[6].mxu0  ;;  %v4553_v24 = vld [vmem:[%s6296_s0 + $0x670] ss:$28 sps:$4 sm:$0xff]  }
 0x1e0   :  { %v5756_v38 = vadd.f32 %v2626_v29, %v5337_v43  ;;  %v2628_v41 = vpop.f32.mrb[7].mxu0  ;;  %v4551_v43 = vld [vmem:[%s6296_s0 + $0x638] ss:$28 sps:$4 sm:$0xff]   ;;  %v4552_v29 = vld [vmem:[%s6296_s0 + $0x6a0] ss:$28 sps:$4 sm:$0xff]  }
 0x1e1   :  { %3943 = vmatmul.mubr.bf16.gmra.mrb[176].mxu1 %v4543_v17  ;;  %v4554_v41 = vld [vmem:[%s6296_s0 + $0x6dc] ss:$28 sps:$4 sm:$0xff]  }
 0x1e2   :  { %2838 = vmatmul.mubr.bf16.gmra.mrb[112].mxu0 %v4542_v26  ;;  %3946 = vmatprep.mubr.bf16.mxu1 %v4546_v35 }
 0x1e3   :  { %2845 = vmatprep.mubr.bf16.mxu0 %v4544_v33 }
 0x1e5   :  { %v2631_v40 = vpop.f32.mrb[8].mxu0 }
 0x1e6   :  { %v5762_v52 = vadd.f32 %v2631_v40, %v5348_v48  ;;  %v2633_v56 = vpop.f32.mrb[9].mxu0 }
 0x1e7   :  { %v2634_v4 = vpop.f32.mrb[10].mxu0  ;;  %v4558_v56 = vld [vmem:[%s6296_s0 + $0x6e0] ss:$28 sps:$4 sm:$0xff]  }
 0x1e8   :  { %v5774_v32 = vadd.f32 %v2634_v4, %v5353_v51  ;;  %v2636_v17 = vpop.f32.mrb[11].mxu0  ;;  %v4556_v51 = vld [vmem:[%s6296_s0 + $0x6a8] ss:$28 sps:$4 sm:$0xff]   ;;  %v4557_v4 = vld [vmem:[%s6296_s0 + $0x6d8] ss:$28 sps:$4 sm:$0xff]  }
 0x1e9   :  { %3947 = vmatmul.mubr.bf16.gmra.mrb[180].mxu1 %v4548_v47 }
 0x1ea   :  { %2846 = vmatmul.mubr.bf16.gmra.mrb[116].mxu0 %v4547_v3  ;;  %3950 = vmatprep.mubr.bf16.mxu1 %v4551_v43 }
 0x1eb   :  { %2853 = vmatprep.mubr.bf16.mxu0 %v4549_v8 }
 0x1ed   :  { %v2639_v48 = vpop.f32.mrb[12].mxu0 }
 0x1ee   :  { %v5780_v26 = vadd.f32 %v2639_v48, %v5364_v57  ;;  %v2641_v35 = vpop.f32.mrb[13].mxu0 }
 0x1ef   :  { %v2642_v33 = vpop.f32.mrb[14].mxu0 }
 0x1f0   :  { %v5792_v40 = vadd.f32 %v2642_v33, %v5369_v60  ;;  %v2644_v47 = vpop.f32.mrb[15].mxu0 }
 0x1f1   :  { %3951 = vmatmul.mubr.bf16.gmra.mrb[184].mxu1 %v4553_v24 }
 0x1f2   :  { %2854 = vmatmul.mubr.bf16.gmra.mrb[120].mxu0 %v4552_v29  ;;  %3954 = vmatprep.mubr.bf16.mxu1 %v4556_v51 }
 0x1f3   :  { %2861 = vmatprep.mubr.bf16.mxu0 %v4554_v41 }
 0x1f5   :  { %v2647_v57 = vpop.f32.mrb[16].mxu0 }
 0x1f6   :  { %v5798_v3 = vadd.f32 %v2647_v57, %v5380_v2  ;;  %v2649_v43 = vpop.f32.mrb[17].mxu0 }
 0x1f7   :  { %v2650_v60 = vpop.f32.mrb[18].mxu0 }
 0x1f8   :  { %v5804_v8 = vadd.f32 %v2650_v60, %v5385_v5  ;;  %v2652_v17 = vpop.f32.mrb[19].mxu0 }
 0x1f9   :  { %3955 = vmatmul.mubr.bf16.gmra.mrb[188].mxu1 %v4558_v56 }
 0x1fa   :  { %2862 = vmatmul.mubr.bf16.gmra.mrb[124].mxu0 %v4557_v4 }
 0x1fd   :  { %v2655_v48 = vpop.f32.mrb[20].mxu0 }
 0x1fe   :  { %v5807_v24 = vadd.f32 %v2655_v48, %v5396_v10  ;;  %v2657_v35 = vpop.f32.mrb[21].mxu0 }
 0x1ff   :  { %v2658_v29 = vpop.f32.mrb[22].mxu0 }
 0x200   :  { %v5810_v2 = vadd.f32 %v2658_v29, %v5401_v13  ;;  %v2660_v51 = vpop.f32.mrb[23].mxu0 }
 0x205   :  { %v2663_v33 = vpop.f32.mrb[24].mxu0 }
 0x206   :  { %v5813_v41 = vadd.f32 %v2663_v33, %v5419_v20  ;;  %v2665_v47 = vpop.f32.mrb[25].mxu0 }
 0x207   :  { %v2666_v5 = vpop.f32.mrb[26].mxu0 }
 0x208   :  { %v5816_v57 = vadd.f32 %v2666_v5, %v5424_v23  ;;  %v2668_v56 = vpop.f32.mrb[27].mxu0 }
 0x20d   :  { %v2671_v43 = vpop.f32.mrb[28].mxu0 }
 0x20e   :  { %v5819_v10 = vadd.f32 %v2671_v43, %v5438_v27  ;;  %v2673_v4 = vpop.f32.mrb[29].mxu0 }
 0x20f   :  { %v2674_v60 = vpop.f32.mrb[30].mxu0 }
 0x210   :  { %v5822_v13 = vadd.f32 %v2674_v60, %v5446_v31  ;;  %v2676_v17 = vpop.f32.mrb[31].mxu0 }
 0x214   :  { %v5824_v48 = vpop.f32.mrb[96].mxu1 }
 0x215   :  { %v2679_v20 = vpop.f32.mrb[32].mxu0  ;;  %v2520_v35 = vpop.f32.mrb[97].mxu1 }
 0x216   :  { %v5827_v29 = vadd.f32 %v2679_v20, %v5460_v39  ;;  %v2681_v23 = vpop.f32.mrb[33].mxu0  ;;  %v5829_v51 = vpop.f32.mrb[98].mxu1 }
 0x217   :  { %6299 = vst [vmem:[#allocation3_spill] sm:$0xff] %v5829_v51  ;;  %v2682_v33 = vpop.f32.mrb[34].mxu0  ;;  %v2523_v47 = vpop.f32.mrb[99].mxu1 }
 0x218   :  { %v5832_v27 = vadd.f32 %v2682_v33, %v5468_v45  ;;  %v2684_v5 = vpop.f32.mrb[35].mxu0 }
 0x21c   :  { %v5834_v56 = vpop.f32.mrb[100].mxu1 }
 0x21d   :  { %6300 = vst [vmem:[#allocation4_spill] sm:$0xff] %v5834_v56  ;;  %v2687_v31 = vpop.f32.mrb[36].mxu0  ;;  %v2528_v43 = vpop.f32.mrb[101].mxu1 }
 0x21e   :  { %v5837_v4 = vadd.f32 %v2687_v31, %v5482_v53  ;;  %v2689_v60 = vpop.f32.mrb[37].mxu0  ;;  %v5839_v17 = vpop.f32.mrb[102].mxu1 }
 0x21f   :  { %6301 = vst [vmem:[#allocation5_spill] sm:$0xff] %v5839_v17  ;;  %v2690_v39 = vpop.f32.mrb[38].mxu0  ;;  %v2531_v20 = vpop.f32.mrb[103].mxu1 }
 0x220   :  { %v5842_v35 = vadd.f32 %v2690_v39, %v5487_v58  ;;  %v2692_v23 = vpop.f32.mrb[39].mxu0 }
 0x224   :  { %v5844_v47 = vpop.f32.mrb[104].mxu1 }
 0x225   :  { %6302 = vst [vmem:[#allocation6_spill] sm:$0xff] %v5844_v47  ;;  %v2695_v45 = vpop.f32.mrb[40].mxu0  ;;  %v2536_v33 = vpop.f32.mrb[105].mxu1 }
 0x226   :  { %v5847_v5 = vadd.f32 %v2695_v45, %v5498_v1  ;;  %v2697_v43 = vpop.f32.mrb[41].mxu0  ;;  %v5849_v56 = vpop.f32.mrb[106].mxu1 }
 0x227   :  { %6303 = vst [vmem:[#allocation7_spill] sm:$0xff] %v5849_v56  ;;  %v2698_v53 = vpop.f32.mrb[42].mxu0  ;;  %v2539_v31 = vpop.f32.mrb[107].mxu1 }
 0x228   :  { %v5852_v60 = vadd.f32 %v2698_v53, %v5503_v6  ;;  %v2700_v20 = vpop.f32.mrb[43].mxu0 }
 0x22c   :  { %v5854_v17 = vpop.f32.mrb[108].mxu1 }
 0x22d   :  { %6304 = vst [vmem:[#allocation8_spill] sm:$0xff] %v5854_v17  ;;  %v2703_v58 = vpop.f32.mrb[44].mxu0  ;;  %v2544_v39 = vpop.f32.mrb[109].mxu1 }
 0x22e   :  { %v5857_v23 = vadd.f32 %v2703_v58, %v5514_v12  ;;  %v2705_v33 = vpop.f32.mrb[45].mxu0  ;;  %v5859_v47 = vpop.f32.mrb[110].mxu1 }
 0x22f   :  { %6305 = vst [vmem:[#allocation9_spill] sm:$0xff] %v5859_v47  ;;  %v2706_v1 = vpop.f32.mrb[46].mxu0  ;;  %v2547_v45 = vpop.f32.mrb[111].mxu1 }
 0x230   :  { %v5862_v43 = vadd.f32 %v2706_v1, %v5519_v16  ;;  %v2708_v31 = vpop.f32.mrb[47].mxu0 }
 0x234   :  { %v5864_v56 = vpop.f32.mrb[112].mxu1 }
 0x235   :  { %6306 = vst [vmem:[#allocation10_spill] sm:$0xff] %v5864_v56  ;;  %v2711_v6 = vpop.f32.mrb[48].mxu0  ;;  %v2552_v53 = vpop.f32.mrb[113].mxu1 }
 0x236   :  { %v5867_v20 = vadd.f32 %v2711_v6, %v5530_v22  ;;  %v2713_v39 = vpop.f32.mrb[49].mxu0  ;;  %v5869_v17 = vpop.f32.mrb[114].mxu1 }
 0x237   :  { %6307 = vst [vmem:[#allocation11_spill] sm:$0xff] %v5869_v17  ;;  %v2714_v12 = vpop.f32.mrb[50].mxu0  ;;  %v2555_v58 = vpop.f32.mrb[115].mxu1 }
 0x238   :  { %v5872_v33 = vadd.f32 %v2714_v12, %v5535_v25  ;;  %v2716_v45 = vpop.f32.mrb[51].mxu0 }
 0x23c   :  { %v5874_v47 = vpop.f32.mrb[116].mxu1 }
 0x23d   :  { %6308 = vst [vmem:[#allocation12_spill] sm:$0xff] %v5874_v47  ;;  %v2719_v16 = vpop.f32.mrb[52].mxu0  ;;  %v2560_v1 = vpop.f32.mrb[117].mxu1 }
 0x23e   :  { %v5877_v31 = vadd.f32 %v2719_v16, %v5546_v30  ;;  %v2721_v53 = vpop.f32.mrb[53].mxu0  ;;  %v5879_v56 = vpop.f32.mrb[118].mxu1 }
 0x23f   :  { %6309 = vst [vmem:[#allocation13_spill] sm:$0xff] %v5879_v56  ;;  %v2722_v22 = vpop.f32.mrb[54].mxu0  ;;  %v2563_v6 = vpop.f32.mrb[119].mxu1 }
 0x240   :  { %v5882_v39 = vadd.f32 %v2722_v22, %v5551_v36  ;;  %v2724_v58 = vpop.f32.mrb[55].mxu0 }
 0x244   :  { %v5884_v17 = vpop.f32.mrb[120].mxu1 }
 0x245   :  { %6310 = vst [vmem:[#allocation14_spill] sm:$0xff] %v5884_v17  ;;  %v2727_v25 = vpop.f32.mrb[56].mxu0  ;;  %v2568_v12 = vpop.f32.mrb[121].mxu1 }
 0x246   :  { %v5887_v45 = vadd.f32 %v2727_v25, %v5562_v44  ;;  %v2729_v1 = vpop.f32.mrb[57].mxu0  ;;  %v5889_v47 = vpop.f32.mrb[122].mxu1 }
 0x247   :  { %6311 = vst [vmem:[#allocation15_spill] sm:$0xff] %v5889_v47  ;;  %v2730_v30 = vpop.f32.mrb[58].mxu0  ;;  %v2571_v16 = vpop.f32.mrb[123].mxu1 }
 0x248   :  { %v5892_v53 = vadd.f32 %v2730_v30, %v5567_v49  ;;  %v2732_v6 = vpop.f32.mrb[59].mxu0  ;;  %v5907_v49 = vld [vmem:[%s6297_s2] ss:$0 sm:$0xff] }
 0x24c   :  { %v5894_v56 = vpop.f32.mrb[124].mxu1 }
 0x24d   :  { %6312 = vst [vmem:[#allocation16_spill] sm:$0xff] %v5894_v56  ;;  %v2735_v36 = vpop.f32.mrb[60].mxu0  ;;  %v2576_v22 = vpop.f32.mrb[125].mxu1 }
 0x24e   :  { %v5897_v58 = vadd.f32 %v2735_v36, %v5578_v59  ;;  %v2737_v12 = vpop.f32.mrb[61].mxu0  ;;  %v5899_v17 = vpop.f32.mrb[126].mxu1 }
 0x24f   :  { %6313 = vst [vmem:[#allocation17_spill] sm:$0xff] %v5899_v17  ;;  %v2738_v44 = vpop.f32.mrb[62].mxu0  ;;  %v2579_v25 = vpop.f32.mrb[127].mxu1 }
 0x250   :  { %v5902_v1 = vadd.f32 %v2738_v44, %v5583_v63  ;;  %v2740_v16 = vpop.f32.mrb[63].mxu0 }
 0x254   :  { %v3896_v47 = vpop.f32.mrb[128].mxu1 }
 0x255   :  { %v2743_v30 = vpop.f32.mrb[64].mxu0  ;;  %v2913_v6 = vadd.f32 %v5744_v19, %v3896_v47  ;;  %v2904_v59 = vpop.f32.mrb[129].mxu1 }
 0x256   :  { %v5911_v36 = vadd.f32 %v2743_v30, %v5594_v9  ;;  %v2745_v22 = vpop.f32.mrb[65].mxu0  ;;  %v2905_v12 = vadd.f32 %v5726_v46, %v2904_v59  ;;  %v3897_v25 = vpop.f32.mrb[130].mxu1 }
 0x257   :  { %v3363_v63 = vadd.f32 %v5907_v49, %v2913_v6  ;;  %v2746_v44 = vpop.f32.mrb[66].mxu0  ;;  %v2916_v16 = vadd.f32 %v5756_v38, %v3897_v25  ;;  %v2907_v17 = vpop.f32.mrb[131].mxu1 }
 0x258   :  { %v3361_v56 = vadd.f32 %v5907_v49, %v2905_v12  ;;  %v5918_v51 = vadd.f32 %v2746_v44, %v5599_v15  ;;  %v2748_v19 = vpop.f32.mrb[67].mxu0  ;;  %v2908_v47 = vadd.f32 %v5738_v7, %v2907_v17 }
 0x259   :  { %4559 = vtanh.f32 %v3363_v63  ;;  %v3364_v9 = vadd.f32 %v5907_v49, %v2916_v16 }
 0x25a   :  { %4561 = vtanh.f32 %v3361_v56  ;;  %v3362_v46 = vadd.f32 %v5907_v49, %v2908_v47 }
 0x25b   :  { %4563 = vtanh.f32 %v3364_v9 }
 0x25c   :  { %4565 = vtanh.f32 %v3362_v46  ;;  %v3900_v30 = vpop.f32.mrb[132].mxu1 }
 0x25d   :  { %v2751_v6 = vpop.f32.mrb[68].mxu0  ;;  %v2929_v38 = vadd.f32 %v5780_v26, %v3900_v30  ;;  %v2920_v59 = vpop.f32.mrb[133].mxu1 }
 0x25e   :  { %v5925_v22 = vadd.f32 %v2751_v6, %v5610_v55  ;;  %v2753_v15 = vpop.f32.mrb[69].mxu0  ;;  %v2921_v12 = vadd.f32 %v5762_v52, %v2920_v59  ;;  %v3901_v7 = vpop.f32.mrb[134].mxu1 }
 0x25f   :  { %v3367_v17 = vadd.f32 %v5907_v49, %v2929_v38  ;;  %v2754_v25 = vpop.f32.mrb[70].mxu0  ;;  %v2932_v56 = vadd.f32 %v5792_v40, %v3901_v7  ;;  %v2923_v63 = vpop.f32.mrb[135].mxu1 }
 0x260   :  { %v3365_v44 = vadd.f32 %v5907_v49, %v2921_v12  ;;  %v5932_v16 = vadd.f32 %v2754_v25, %v5615_v0  ;;  %v2756_v26 = vpop.f32.mrb[71].mxu0  ;;  %v2924_v19 = vadd.f32 %v5774_v32, %v2923_v63 }
 0x261   :  { %4567 = vtanh.f32 %v3367_v17  ;;  %v3368_v55 = vadd.f32 %v5907_v49, %v2932_v56 }
 0x262   :  { %4569 = vtanh.f32 %v3365_v44  ;;  %v3366_v52 = vadd.f32 %v5907_v49, %v2924_v19 }
 0x263   :  { %v4560_v47 = vpop.eup %4559  ;;  %4571 = vtanh.f32 %v3368_v55 }
 0x264   :  { %v4562_v9 = vpop.eup %4561  ;;  %3491 = vst [vmem:[%s6298_s3 + $0x10] sm:$0xff] %v4560_v47  ;;  %4573 = vtanh.f32 %v3366_v52  ;;  %v3904_v40 = vpop.f32.mrb[136].mxu1 }
 0x265   :  { %v4564_v0 = vpop.eup %4563  ;;  %3489 = vst [vmem:[%s6298_s3] sm:$0xff] %v4562_v9  ;;  %v2759_v32 = vpop.f32.mrb[72].mxu0  ;;  %v2945_v46 = vadd.f32 %v5807_v24, %v3904_v40 }
 0x266   :  { %v2936_v30 = vpop.f32.mrb[137].mxu1  ;;  %v4566_v6 = vpop.eup %4565  ;;  %3492 = vst [vmem:[%s6298_s3 + $0x18] sm:$0xff] %v4564_v0  ;;  %v5948_v38 = vadd.f32 %v2759_v32, %v5626_v37 }
 0x267   :  { %v2761_v59 = vpop.f32.mrb[73].mxu0  ;;  %v2937_v15 = vadd.f32 %v5798_v3, %v2936_v30  ;;  %v3905_v12 = vpop.f32.mrb[138].mxu1  ;;  %3490 = vst [vmem:[%s6298_s3 + $0x8] sm:$0xff] %v4566_v6  ;;  %v3371_v7 = vadd.f32 %v5907_v49, %v2945_v46 }
 0x268   :  { %v2762_v24 = vpop.f32.mrb[74].mxu0  ;;  %v2948_v17 = vadd.f32 %v5810_v2, %v3905_v12  ;;  %v2939_v25 = vpop.f32.mrb[139].mxu1 }
 0x269   :  { %v3369_v56 = vadd.f32 %v5907_v49, %v2937_v15  ;;  %v5958_v63 = vadd.f32 %v2762_v24, %v5631_v42  ;;  %v2764_v37 = vpop.f32.mrb[75].mxu0  ;;  %v2940_v44 = vadd.f32 %v5804_v8, %v2939_v25  ;;  %4575 = vtanh.f32 %v3371_v7 }
 0x26a   :  { %v3372_v3 = vadd.f32 %v5907_v49, %v2948_v17 }
 0x26b   :  { %4577 = vtanh.f32 %v3369_v56  ;;  %v3370_v26 = vadd.f32 %v5907_v49, %v2940_v44  ;;  %v4568_v19 = vpop.eup %4567 }
 0x26c   :  { %4579 = vtanh.f32 %v3372_v3  ;;  %v4570_v55 = vpop.eup %4569  ;;  %3495 = vst [vmem:[%s6298_s3 + $0x30] sm:$0xff] %v4568_v19  ;;  %v3908_v2 = vpop.f32.mrb[140].mxu1 }
 0x26d   :  { %4581 = vtanh.f32 %v3370_v26  ;;  %v4572_v42 = vpop.eup %4571  ;;  %3493 = vst [vmem:[%s6298_s3 + $0x20] sm:$0xff] %v4570_v55  ;;  %v2767_v8 = vpop.f32.mrb[76].mxu0  ;;  %v2961_v52 = vadd.f32 %v5819_v10, %v3908_v2 }
 0x26e   :  { %v2952_v47 = vpop.f32.mrb[141].mxu1  ;;  %v4574_v9 = vpop.eup %4573  ;;  %3496 = vst [vmem:[%s6298_s3 + $0x38] sm:$0xff] %v4572_v42  ;;  %v5974_v40 = vadd.f32 %v2767_v8, %v5642_v54 }
 0x26f   :  { %v2769_v0 = vpop.f32.mrb[77].mxu0  ;;  %v2953_v32 = vadd.f32 %v5813_v41, %v2952_v47  ;;  %v3909_v46 = vpop.f32.mrb[142].mxu1  ;;  %3494 = vst [vmem:[%s6298_s3 + $0x28] sm:$0xff] %v4574_v9  ;;  %v3375_v30 = vadd.f32 %v5907_v49, %v2961_v52 }
 0x270   :  { %v2770_v10 = vpop.f32.mrb[78].mxu0  ;;  %v2964_v6 = vadd.f32 %v5822_v13, %v3909_v46  ;;  %v2955_v59 = vpop.f32.mrb[143].mxu1 }
 0x271   :  { %v3373_v15 = vadd.f32 %v5907_v49, %v2953_v32  ;;  %v5984_v12 = vadd.f32 %v2770_v10, %v5647_v62  ;;  %v2772_v54 = vpop.f32.mrb[79].mxu0  ;;  %v2956_v7 = vadd.f32 %v5816_v57, %v2955_v59  ;;  %4583 = vtanh.f32 %v3375_v30 }
 0x272   :  { %v3376_v41 = vadd.f32 %v5907_v49, %v2964_v6 }
 0x273   :  { %4585 = vtanh.f32 %v3373_v15  ;;  %v3374_v24 = vadd.f32 %v5907_v49, %v2956_v7  ;;  %v4576_v17 = vpop.eup %4575 }
 0x274   :  { %4587 = vtanh.f32 %v3376_v41  ;;  %3499 = vst [vmem:[%s6298_s3 + $0x50] sm:$0xff] %v4576_v17  ;;  %v3912_v13 = vpop.f32.mrb[144].mxu1 }
 0x275   :  { %v4578_v25 = vpop.eup %4577  ;;  %4589 = vtanh.f32 %v3374_v24  ;;  %v2775_v57 = vpop.f32.mrb[80].mxu0  ;;  %v2977_v56 = vadd.f32 %v5837_v4, %v3912_v13 }
 0x276   :  { %v4580_v62 = vpop.eup %4579  ;;  %3497 = vst [vmem:[%s6298_s3 + $0x40] sm:$0xff] %v4578_v25  ;;  %v2968_v37 = vpop.f32.mrb[145].mxu1  ;;  %v6000_v3 = vadd.f32 %v2775_v57, %v5658_v11 }
 0x277   :  { %v4582_v44 = vpop.eup %4581  ;;  %3500 = vst [vmem:[%s6298_s3 + $0x58] sm:$0xff] %v4580_v62  ;;  %v2777_v26 = vpop.f32.mrb[81].mxu0  ;;  %v2969_v19 = vadd.f32 %v5827_v29, %v2968_v37  ;;  %v3379_v2 = vadd.f32 %v5907_v49, %v2977_v56 }
 0x278   :  { %v3913_v55 = vpop.f32.mrb[146].mxu1  ;;  %3498 = vst [vmem:[%s6298_s3 + $0x48] sm:$0xff] %v4582_v44  ;;  %v2778_v4 = vpop.f32.mrb[82].mxu0 }
 0x279   :  { %v2980_v42 = vadd.f32 %v5842_v35, %v3913_v55  ;;  %v2971_v8 = vpop.f32.mrb[147].mxu1  ;;  %v3377_v52 = vadd.f32 %v5907_v49, %v2969_v19  ;;  %v6010_v47 = vadd.f32 %v2778_v4, %v5663_v18  ;;  %v2780_v11 = vpop.f32.mrb[83].mxu0  ;;  %4591 = vtanh.f32 %v3379_v2 }
 0x27a   :  { %v2972_v9 = vadd.f32 %v5832_v27, %v2971_v8 }
 0x27b   :  { %v3380_v29 = vadd.f32 %v5907_v49, %v2980_v42  ;;  %4593 = vtanh.f32 %v3377_v52  ;;  %v4584_v32 = vpop.eup %4583 }
 0x27c   :  { %v3378_v0 = vadd.f32 %v5907_v49, %v2972_v9  ;;  %3503 = vst [vmem:[%s6298_s3 + $0x70] sm:$0xff] %v4584_v32  ;;  %v3916_v35 = vpop.f32.mrb[148].mxu1 }
 0x27d   :  { %4595 = vtanh.f32 %v3380_v29  ;;  %v4586_v46 = vpop.eup %4585  ;;  %v2783_v27 = vpop.f32.mrb[84].mxu0  ;;  %v2993_v30 = vadd.f32 %v5857_v23, %v3916_v35 }
 0x27e   :  { %4597 = vtanh.f32 %v3378_v0  ;;  %v4588_v18 = vpop.eup %4587  ;;  %3501 = vst [vmem:[%s6298_s3 + $0x60] sm:$0xff] %v4586_v46  ;;  %v2984_v10 = vpop.f32.mrb[149].mxu1  ;;  %v6026_v59 = vadd.f32 %v2783_v27, %v5674_v28 }
 0x27f   :  { %v4590_v6 = vpop.eup %4589  ;;  %3504 = vst [vmem:[%s6298_s3 + $0x78] sm:$0xff] %v4588_v18  ;;  %v2785_v15 = vpop.f32.mrb[85].mxu0  ;;  %v2985_v54 = vadd.f32 %v5847_v5, %v2984_v10  ;;  %v3383_v41 = vadd.f32 %v5907_v49, %v2993_v30 }
 0x280   :  { %v3917_v7 = vpop.f32.mrb[150].mxu1  ;;  %3502 = vst [vmem:[%s6298_s3 + $0x68] sm:$0xff] %v4590_v6  ;;  %v2786_v23 = vpop.f32.mrb[86].mxu0 }
 0x281   :  { %v2996_v24 = vadd.f32 %v5862_v43, %v3917_v7  ;;  %v2987_v17 = vpop.f32.mrb[151].mxu1  ;;  %v3381_v25 = vadd.f32 %v5907_v49, %v2985_v54  ;;  %v6036_v13 = vadd.f32 %v2786_v23, %v5679_v34  ;;  %v2788_v28 = vpop.f32.mrb[87].mxu0  ;;  %4599 = vtanh.f32 %v3383_v41 }
 0x282   :  { %v2988_v62 = vadd.f32 %v5852_v60, %v2987_v17 }
 0x283   :  { %v3384_v5 = vadd.f32 %v5907_v49, %v2996_v24  ;;  %4601 = vtanh.f32 %v3381_v25  ;;  %v4592_v56 = vpop.eup %4591 }
 0x284   :  { %v3382_v57 = vadd.f32 %v5907_v49, %v2988_v62  ;;  %3507 = vst [vmem:[%s6298_s3 + $0x90] sm:$0xff] %v4592_v56  ;;  %v3920_v43 = vpop.f32.mrb[152].mxu1 }
 0x285   :  { %4603 = vtanh.f32 %v3384_v5  ;;  %v4594_v37 = vpop.eup %4593  ;;  %v2791_v60 = vpop.f32.mrb[88].mxu0  ;;  %v3009_v44 = vadd.f32 %v5877_v31, %v3920_v43 }
 0x286   :  { %4605 = vtanh.f32 %v3382_v57  ;;  %3505 = vst [vmem:[%s6298_s3 + $0x80] sm:$0xff] %v4594_v37  ;;  %v3000_v26 = vpop.f32.mrb[153].mxu1  ;;  %v6052_v55 = vadd.f32 %v2791_v60, %v5690_v50  ;;  %v2793_v2 = vpop.f32.mrb[89].mxu0 }
 0x287   :  { %v4596_v34 = vpop.eup %4595  ;;  %v3001_v4 = vadd.f32 %v5867_v20, %v3000_v26  ;;  %v3921_v42 = vpop.f32.mrb[154].mxu1  ;;  %v3387_v8 = vadd.f32 %v5907_v49, %v3009_v44 }
 0x288   :  { %v4598_v19 = vpop.eup %4597  ;;  %3508 = vst [vmem:[%s6298_s3 + $0x98] sm:$0xff] %v4596_v34  ;;  %v2794_v31 = vpop.f32.mrb[90].mxu0  ;;  %v3012_v52 = vadd.f32 %v5882_v39, %v3921_v42  ;;  %v6314_v42 = vld [vmem:[#allocation3_spill] sm:$0xff] }
 0x289   :  { %3506 = vst [vmem:[%s6298_s3 + $0x88] sm:$0xff] %v4598_v19  ;;  %v3003_v11 = vpop.f32.mrb[155].mxu1  ;;  %v3385_v9 = vadd.f32 %v5907_v49, %v3001_v4  ;;  %v6062_v29 = vadd.f32 %v2794_v31, %v5695_v61  ;;  %v2796_v50 = vpop.f32.mrb[91].mxu0  ;;  %4607 = vtanh.f32 %v3387_v8 }
 0x28a   :  { %v3004_v0 = vadd.f32 %v5872_v33, %v3003_v11  ;;  %v3388_v20 = vadd.f32 %v5907_v49, %v3012_v52 }
 0x28b   :  { %4609 = vtanh.f32 %v3385_v9  ;;  %v4600_v46 = vpop.eup %4599 }
 0x28c   :  { %v3386_v32 = vadd.f32 %v5907_v49, %v3004_v0  ;;  %4611 = vtanh.f32 %v3388_v20  ;;  %3511 = vst [vmem:[%s6298_s3 + $0xb0] sm:$0xff] %v4600_v46  ;;  %v3924_v39 = vpop.f32.mrb[156].mxu1  ;;  %v6315_v46 = vld [vmem:[#allocation4_spill] sm:$0xff] }
 0x28d   :  { %v4602_v35 = vpop.eup %4601  ;;  %v2799_v33 = vpop.f32.mrb[92].mxu0  ;;  %v3025_v18 = vadd.f32 %v5897_v58, %v3924_v39 }
 0x28e   :  { %4613 = vtanh.f32 %v3386_v32  ;;  %3509 = vst [vmem:[%s6298_s3 + $0xa0] sm:$0xff] %v4602_v35  ;;  %v3016_v27 = vpop.f32.mrb[157].mxu1  ;;  %v6078_v10 = vadd.f32 %v2799_v33, %v5706_v14  ;;  %v2801_v6 = vpop.f32.mrb[93].mxu0 }
 0x28f   :  { %v4604_v61 = vpop.eup %4603  ;;  %v3017_v15 = vadd.f32 %v5887_v45, %v3016_v27  ;;  %v3925_v54 = vpop.f32.mrb[158].mxu1  ;;  %v3391_v7 = vadd.f32 %v5907_v49, %v3025_v18 }
 0x290   :  { %v4606_v30 = vpop.eup %4605  ;;  %3512 = vst [vmem:[%s6298_s3 + $0xb8] sm:$0xff] %v4604_v61  ;;  %v2802_v58 = vpop.f32.mrb[94].mxu0  ;;  %v3028_v41 = vadd.f32 %v5902_v1, %v3925_v54 }
 0x291   :  { %3510 = vst [vmem:[%s6298_s3 + $0xa8] sm:$0xff] %v4606_v30  ;;  %v3019_v23 = vpop.f32.mrb[159].mxu1  ;;  %v3389_v24 = vadd.f32 %v5907_v49, %v3017_v15  ;;  %v6088_v17 = vadd.f32 %v2802_v58, %v5711_v21  ;;  %v2804_v14 = vpop.f32.mrb[95].mxu0  ;;  %4615 = vtanh.f32 %v3391_v7  ;;  %v6316_v15 = vld [vmem:[#allocation5_spill] sm:$0xff] }
 0x292   :  { %v3020_v25 = vadd.f32 %v5892_v53, %v3019_v23  ;;  %v3392_v45 = vadd.f32 %v5907_v49, %v3028_v41 }
 0x293   :  { %4617 = vtanh.f32 %v3389_v24  ;;  %v4608_v62 = vpop.eup %4607 }
 0x294   :  { %v3390_v28 = vadd.f32 %v5907_v49, %v3020_v25  ;;  %4619 = vtanh.f32 %v3392_v45  ;;  %3515 = vst [vmem:[%s6298_s3 + $0xd0] sm:$0xff] %v4608_v62  ;;  %v3928_v1 = vpop.f32.mrb[160].mxu1  ;;  %v6317_v62 = vld [vmem:[#allocation6_spill] sm:$0xff] }
 0x295   :  { %v4610_v5 = vpop.eup %4609  ;;  %v2807_v53 = vpop.f32.mrb[96].mxu0  ;;  %v3041_v57 = vadd.f32 %v5925_v22, %v3928_v1 }
 0x296   :  { %4621 = vtanh.f32 %v3390_v28  ;;  %v4612_v21 = vpop.eup %4611  ;;  %3513 = vst [vmem:[%s6298_s3 + $0xc0] sm:$0xff] %v4610_v5  ;;  %v3032_v56 = vpop.f32.mrb[161].mxu1  ;;  %v6104_v43 = vadd.f32 %v2807_v53, %v5824_v48 }
 0x297   :  { %3516 = vst [vmem:[%s6298_s3 + $0xd8] sm:$0xff] %v4612_v21  ;;  %v2809_v34 = vpop.f32.mrb[97].mxu0  ;;  %v3033_v60 = vadd.f32 %v5911_v36, %v3032_v56  ;;  %v3929_v44 = vpop.f32.mrb[162].mxu1  ;;  %v3395_v26 = vadd.f32 %v5907_v49, %v3041_v57 }
 0x298   :  { %v4614_v37 = vpop.eup %4613  ;;  %v2810_v22 = vpop.f32.mrb[98].mxu0  ;;  %v3044_v19 = vadd.f32 %v5932_v16, %v3929_v44 }
 0x299   :  { %3514 = vst [vmem:[%s6298_s3 + $0xc8] sm:$0xff] %v4614_v37  ;;  %v3035_v2 = vpop.f32.mrb[163].mxu1  ;;  %v3393_v4 = vadd.f32 %v5907_v49, %v3033_v60  ;;  %v6114_v8 = vadd.f32 %v2810_v22, %v6314_v42  ;;  %v2812_v48 = vpop.f32.mrb[99].mxu0  ;;  %4623 = vtanh.f32 %v3395_v26  ;;  %v6318_v60 = vld [vmem:[#allocation7_spill] sm:$0xff] }
 0x29a   :  { %v3036_v31 = vadd.f32 %v5918_v51, %v3035_v2  ;;  %v3396_v36 = vadd.f32 %v5907_v49, %v3044_v19 }
 0x29b   :  { %4625 = vtanh.f32 %v3393_v4  ;;  %v4616_v11 = vpop.eup %4615 }
 0x29c   :  { %v3394_v52 = vadd.f32 %v5907_v49, %v3036_v31  ;;  %4627 = vtanh.f32 %v3396_v36  ;;  %3519 = vst [vmem:[%s6298_s3 + $0xf0] sm:$0xff] %v4616_v11  ;;  %v3932_v16 = vpop.f32.mrb[164].mxu1 }
 0x29d   :  { %v4618_v9 = vpop.eup %4617  ;;  %v2815_v51 = vpop.f32.mrb[100].mxu0  ;;  %v3057_v0 = vadd.f32 %v5974_v40, %v3932_v16 }
 0x29e   :  { %4629 = vtanh.f32 %v3394_v52  ;;  %v4620_v50 = vpop.eup %4619  ;;  %3517 = vst [vmem:[%s6298_s3 + $0xe0] sm:$0xff] %v4618_v9  ;;  %v3048_v20 = vpop.f32.mrb[165].mxu1  ;;  %v6130_v35 = vadd.f32 %v2815_v51, %v6315_v46  ;;  %v6319_v52 = vld [vmem:[#allocation8_spill] sm:$0xff]  ;;  %v6320_v46 = vld [vmem:[#allocation9_spill] sm:$0xff] }
 0x29f   :  { %3520 = vst [vmem:[%s6298_s3 + $0xf8] sm:$0xff] %v4620_v50  ;;  %v2817_v39 = vpop.f32.mrb[101].mxu0  ;;  %v3049_v61 = vadd.f32 %v5948_v38, %v3048_v20  ;;  %v3933_v33 = vpop.f32.mrb[166].mxu1  ;;  %v3399_v18 = vadd.f32 %v5907_v49, %v3057_v0 }
 0x2a0   :  { %v4622_v32 = vpop.eup %4621  ;;  %v2818_v40 = vpop.f32.mrb[102].mxu0  ;;  %v3060_v27 = vadd.f32 %v5984_v12, %v3933_v33 }
 0x2a1   :  { %3518 = vst [vmem:[%s6298_s3 + $0xe8] sm:$0xff] %v4622_v32  ;;  %v3051_v30 = vpop.f32.mrb[167].mxu1  ;;  %v3397_v6 = vadd.f32 %v5907_v49, %v3049_v61  ;;  %v6140_v54 = vadd.f32 %v2818_v40, %v6316_v15  ;;  %v2820_v7 = vpop.f32.mrb[103].mxu0  ;;  %4631 = vtanh.f32 %v3399_v18 }
 0x2a2   :  { %v3052_v58 = vadd.f32 %v5958_v63, %v3051_v30  ;;  %v3400_v38 = vadd.f32 %v5907_v49, %v3060_v27 }
 0x2a3   :  { %4633 = vtanh.f32 %v3397_v6  ;;  %v4624_v23 = vpop.eup %4623 }
 0x2a4   :  { %v3398_v41 = vadd.f32 %v5907_v49, %v3052_v58  ;;  %4635 = vtanh.f32 %v3400_v38  ;;  %3523 = vst [vmem:[%s6298_s3 + $0x110] sm:$0xff] %v4624_v23  ;;  %v3936_v12 = vpop.f32.mrb[168].mxu1  ;;  %v6321_v58 = vld [vmem:[#allocation10_spill] sm:$0xff] }
 0x2a5   :  { %v4626_v24 = vpop.eup %4625  ;;  %v2823_v63 = vpop.f32.mrb[104].mxu0  ;;  %v3073_v25 = vadd.f32 %v6026_v59, %v3936_v12 }
 0x2a6   :  { %4637 = vtanh.f32 %v3398_v41  ;;  %v4628_v14 = vpop.eup %4627  ;;  %3521 = vst [vmem:[%s6298_s3 + $0x100] sm:$0xff] %v4626_v24  ;;  %v3064_v45 = vpop.f32.mrb[169].mxu1  ;;  %v6156_v5 = vadd.f32 %v2823_v63, %v6317_v62 }
 0x2a7   :  { %3524 = vst [vmem:[%s6298_s3 + $0x118] sm:$0xff] %v4628_v14  ;;  %v2825_v1 = vpop.f32.mrb[105].mxu0  ;;  %v3065_v21 = vadd.f32 %v6000_v3, %v3064_v45  ;;  %v3937_v53 = vpop.f32.mrb[170].mxu1  ;;  %v3403_v57 = vadd.f32 %v5907_v49, %v3073_v25  ;;  %v6322_v45 = vld [vmem:[#allocation11_spill] sm:$0xff] }
 0x2a8   :  { %v4630_v28 = vpop.eup %4629  ;;  %v2826_v59 = vpop.f32.mrb[106].mxu0  ;;  %v3076_v56 = vadd.f32 %v6036_v13, %v3937_v53 }
 0x2a9   :  { %3522 = vst [vmem:[%s6298_s3 + $0x108] sm:$0xff] %v4630_v28  ;;  %v3067_v37 = vpop.f32.mrb[171].mxu1  ;;  %v3401_v34 = vadd.f32 %v5907_v49, %v3065_v21  ;;  %v6166_v44 = vadd.f32 %v2826_v59, %v6318_v60  ;;  %v2828_v26 = vpop.f32.mrb[107].mxu0  ;;  %4639 = vtanh.f32 %v3403_v57  ;;  %v6323_v60 = vld [vmem:[#allocation12_spill] sm:$0xff] }
 0x2aa   :  { %v3068_v22 = vadd.f32 %v6010_v47, %v3067_v37  ;;  %v3404_v3 = vadd.f32 %v5907_v49, %v3076_v56 }
 0x2ab   :  { %4641 = vtanh.f32 %v3401_v34  ;;  %v4632_v2 = vpop.eup %4631 }
 0x2ac   :  { %v3402_v19 = vadd.f32 %v5907_v49, %v3068_v22  ;;  %4643 = vtanh.f32 %v3404_v3  ;;  %3527 = vst [vmem:[%s6298_s3 + $0x130] sm:$0xff] %v4632_v2  ;;  %v3940_v13 = vpop.f32.mrb[172].mxu1 }
 0x2ad   :  { %v4634_v4 = vpop.eup %4633  ;;  %v2831_v47 = vpop.f32.mrb[108].mxu0  ;;  %v3089_v48 = vadd.f32 %v6078_v10, %v3940_v13 }
 0x2ae   :  { %4645 = vtanh.f32 %v3402_v19  ;;  %v4636_v42 = vpop.eup %4635  ;;  %3525 = vst [vmem:[%s6298_s3 + $0x120] sm:$0xff] %v4634_v4  ;;  %v3080_v31 = vpop.f32.mrb[173].mxu1  ;;  %v4044_v11 = vadd.f32 %v2831_v47, %v6319_v52 }
 0x2af   :  { %3528 = vst [vmem:[%s6298_s3 + $0x138] sm:$0xff] %v4636_v42  ;;  %v2833_v9 = vpop.f32.mrb[109].mxu0  ;;  %v3081_v16 = vadd.f32 %v6052_v55, %v3080_v31  ;;  %v3941_v50 = vpop.f32.mrb[174].mxu1  ;;  %v3407_v51 = vadd.f32 %v5907_v49, %v3089_v48  ;;  %v6324_v48 = vld [vmem:[#allocation13_spill] sm:$0xff] }
 0x2b0   :  { %v4638_v36 = vpop.eup %4637  ;;  %v2834_v0 = vpop.f32.mrb[110].mxu0  ;;  %v3092_v10 = vadd.f32 %v6088_v17, %v3941_v50 }
 0x2b1   :  { %3526 = vst [vmem:[%s6298_s3 + $0x128] sm:$0xff] %v4638_v36  ;;  %v3083_v20 = vpop.f32.mrb[175].mxu1  ;;  %v3405_v32 = vadd.f32 %v5907_v49, %v3081_v16  ;;  %v4045_v39 = vadd.f32 %v2834_v0, %v6320_v46  ;;  %v2836_v61 = vpop.f32.mrb[111].mxu0  ;;  %4647 = vtanh.f32 %v3407_v51 }
 0x2b2   :  { %v3084_v33 = vadd.f32 %v6062_v29, %v3083_v20  ;;  %v3408_v55 = vadd.f32 %v5907_v49, %v3092_v10 }
 0x2b3   :  { %4649 = vtanh.f32 %v3405_v32  ;;  %v4640_v40 = vpop.eup %4639  ;;  %v6325_v32 = vld [vmem:[#allocation14_spill] sm:$0xff] }
 0x2b4   :  { %v3406_v18 = vadd.f32 %v5907_v49, %v3084_v33  ;;  %4651 = vtanh.f32 %v3408_v55  ;;  %3531 = vst [vmem:[%s6298_s3 + $0x150] sm:$0xff] %v4640_v40  ;;  %v3944_v17 = vpop.f32.mrb[176].mxu1 }
 0x2b5   :  { %v4642_v27 = vpop.eup %4641  ;;  %v2839_v29 = vpop.f32.mrb[112].mxu0  ;;  %v3105_v6 = vadd.f32 %v6130_v35, %v3944_v17 }
 0x2b6   :  { %4653 = vtanh.f32 %v3406_v18  ;;  %v4644_v30 = vpop.eup %4643  ;;  %3529 = vst [vmem:[%s6298_s3 + $0x140] sm:$0xff] %v4642_v27  ;;  %v3096_v15 = vpop.f32.mrb[177].mxu1  ;;  %v4046_v38 = vadd.f32 %v2839_v29, %v6321_v58 }
 0x2b7   :  { %3532 = vst [vmem:[%s6298_s3 + $0x158] sm:$0xff] %v4644_v30  ;;  %v2841_v41 = vpop.f32.mrb[113].mxu0  ;;  %v3097_v23 = vadd.f32 %v6104_v43, %v3096_v15  ;;  %v3945_v24 = vpop.f32.mrb[178].mxu1  ;;  %v3411_v12 = vadd.f32 %v5907_v49, %v3105_v6  ;;  %v6326_v30 = vld [vmem:[#allocation15_spill] sm:$0xff] }
 0x2b8   :  { %v4646_v7 = vpop.eup %4645  ;;  %v2842_v14 = vpop.f32.mrb[114].mxu0  ;;  %v3108_v35 = vadd.f32 %v6140_v54, %v3945_v24 }
 0x2b9   :  { %3530 = vst [vmem:[%s6298_s3 + $0x148] sm:$0xff] %v4646_v7  ;;  %v3099_v63 = vpop.f32.mrb[179].mxu1  ;;  %v3409_v25 = vadd.f32 %v5907_v49, %v3097_v23  ;;  %v4047_v28 = vadd.f32 %v2842_v14, %v6322_v45  ;;  %v2844_v62 = vpop.f32.mrb[115].mxu0  ;;  %4655 = vtanh.f32 %v3411_v12 }
 0x2ba   :  { %v3100_v1 = vadd.f32 %v6114_v8, %v3099_v63  ;;  %v3412_v43 = vadd.f32 %v5907_v49, %v3108_v35  ;;  %v6327_v63 = vld [vmem:[#allocation16_spill] sm:$0xff] }
 0x2bb   :  { %4657 = vtanh.f32 %v3409_v25  ;;  %v4648_v53 = vpop.eup %4647 }
 0x2bc   :  { %v3410_v21 = vadd.f32 %v5907_v49, %v3100_v1  ;;  %4659 = vtanh.f32 %v3412_v43  ;;  %3535 = vst [vmem:[%s6298_s3 + $0x170] sm:$0xff] %v4648_v53  ;;  %v3948_v54 = vpop.f32.mrb[180].mxu1 }
 0x2bd   :  { %v4650_v57 = vpop.eup %4649  ;;  %v2847_v8 = vpop.f32.mrb[116].mxu0  ;;  %v3121_v56 = vadd.f32 %v4044_v11, %v3948_v54 }
 0x2be   :  { %4661 = vtanh.f32 %v3410_v21  ;;  %v4652_v59 = vpop.eup %4651  ;;  %3533 = vst [vmem:[%s6298_s3 + $0x160] sm:$0xff] %v4650_v57  ;;  %v3112_v37 = vpop.f32.mrb[181].mxu1  ;;  %v4048_v26 = vadd.f32 %v2847_v8, %v6323_v60  ;;  %v6328_v57 = vld [vmem:[#allocation17_spill] sm:$0xff] }
 0x2bf   :  { %3536 = vst [vmem:[%s6298_s3 + $0x178] sm:$0xff] %v4652_v59  ;;  %v2849_v22 = vpop.f32.mrb[117].mxu0  ;;  %v3113_v3 = vadd.f32 %v6156_v5, %v3112_v37  ;;  %v3949_v19 = vpop.f32.mrb[182].mxu1  ;;  %v3415_v2 = vadd.f32 %v5907_v49, %v3121_v56 }
 0x2c0   :  { %v4654_v34 = vpop.eup %4653  ;;  %v2850_v4 = vpop.f32.mrb[118].mxu0  ;;  %v3124_v13 = vadd.f32 %v4045_v39, %v3949_v19 }
 0x2c1   :  { %3534 = vst [vmem:[%s6298_s3 + $0x168] sm:$0xff] %v4654_v34  ;;  %v3115_v42 = vpop.f32.mrb[183].mxu1  ;;  %v3413_v47 = vadd.f32 %v5907_v49, %v3113_v3  ;;  %v4049_v31 = vadd.f32 %v2850_v4, %v6324_v48  ;;  %v2852_v36 = vpop.f32.mrb[119].mxu0  ;;  %4663 = vtanh.f32 %v3415_v2 }
 0x2c2   :  { %v3116_v52 = vadd.f32 %v6166_v44, %v3115_v42  ;;  %v3416_v5 = vadd.f32 %v5907_v49, %v3124_v13 }
 0x2c3   :  { %4665 = vtanh.f32 %v3413_v47  ;;  %v4656_v9 = vpop.eup %4655 }
 0x2c4   :  { %v3414_v11 = vadd.f32 %v5907_v49, %v3116_v52  ;;  %4667 = vtanh.f32 %v3416_v5  ;;  %3539 = vst [vmem:[%s6298_s3 + $0x190] sm:$0xff] %v4656_v9  ;;  %v3952_v50 = vpop.f32.mrb[184].mxu1 }
 0x2c5   :  { %v4658_v16 = vpop.eup %4657  ;;  %v2855_v44 = vpop.f32.mrb[120].mxu0  ;;  %v3137_v0 = vadd.f32 %v4048_v26, %v3952_v50 }
 0x2c6   :  { %4669 = vtanh.f32 %v3414_v11  ;;  %v4660_v51 = vpop.eup %4659  ;;  %3537 = vst [vmem:[%s6298_s3 + $0x180] sm:$0xff] %v4658_v16  ;;  %v3128_v10 = vpop.f32.mrb[185].mxu1  ;;  %v4050_v46 = vadd.f32 %v2855_v44, %v6325_v32 }
 0x2c7   :  { %3540 = vst [vmem:[%s6298_s3 + $0x198] sm:$0xff] %v4660_v51  ;;  %v2857_v39 = vpop.f32.mrb[121].mxu0  ;;  %v3129_v61 = vadd.f32 %v4046_v38, %v3128_v10  ;;  %v3953_v33 = vpop.f32.mrb[186].mxu1  ;;  %v3419_v55 = vadd.f32 %v5907_v49, %v3137_v0 }
 0x2c8   :  { %v4662_v20 = vpop.eup %4661  ;;  %v2858_v18 = vpop.f32.mrb[122].mxu0  ;;  %v3140_v40 = vadd.f32 %v4049_v31, %v3953_v33 }
 0x2c9   :  { %3538 = vst [vmem:[%s6298_s3 + $0x188] sm:$0xff] %v4662_v20  ;;  %v3131_v27 = vpop.f32.mrb[187].mxu1  ;;  %v3417_v17 = vadd.f32 %v5907_v49, %v3129_v61  ;;  %v4051_v29 = vadd.f32 %v2858_v18, %v6326_v30  ;;  %v2860_v6 = vpop.f32.mrb[123].mxu0  ;;  %4671 = vtanh.f32 %v3419_v55 }
 0x2ca   :  { %v3132_v15 = vadd.f32 %v4047_v28, %v3131_v27  ;;  %v3420_v7 = vadd.f32 %v5907_v49, %v3140_v40 }
 0x2cb   :  { %4673 = vtanh.f32 %v3417_v17  ;;  %v4664_v38 = vpop.eup %4663 }
 0x2cc   :  { %v3418_v58 = vadd.f32 %v5907_v49, %v3132_v15  ;;  %4675 = vtanh.f32 %v3420_v7  ;;  %3543 = vst [vmem:[%s6298_s3 + $0x1b0] sm:$0xff] %v4664_v38  ;;  %v3956_v23 = vpop.f32.mrb[188].mxu1 }
 0x2cd   :  { %v4666_v41 = vpop.eup %4665  ;;  %v2863_v12 = vpop.f32.mrb[124].mxu0 }
 0x2ce   :  { %4677 = vtanh.f32 %v3418_v58  ;;  %v4668_v24 = vpop.eup %4667  ;;  %3541 = vst [vmem:[%s6298_s3 + $0x1a0] sm:$0xff] %v4666_v41  ;;  %v3144_v14 = vpop.f32.mrb[189].mxu1  ;;  %v4052_v25 = vadd.f32 %v2863_v12, %v6327_v63 }
 0x2cf   :  { %3544 = vst [vmem:[%s6298_s3 + $0x1b8] sm:$0xff] %v4668_v24  ;;  %v2865_v45 = vpop.f32.mrb[125].mxu0  ;;  %v3145_v28 = vadd.f32 %v4050_v46, %v3144_v14  ;;  %v3957_v62 = vpop.f32.mrb[190].mxu1 }
 0x2d0   :  { %v4670_v35 = vpop.eup %4669  ;;  %v2866_v1 = vpop.f32.mrb[126].mxu0  ;;  %v3153_v21 = vadd.f32 %v4052_v25, %v3956_v23 }
 0x2d1   :  { %3542 = vst [vmem:[%s6298_s3 + $0x1a8] sm:$0xff] %v4670_v35  ;;  %v3147_v43 = vpop.f32.mrb[191].mxu1  ;;  %v3421_v53 = vadd.f32 %v5907_v49, %v3145_v28  ;;  %v4053_v54 = vadd.f32 %v2866_v1, %v6328_v57  ;;  %v2868_v59 = vpop.f32.mrb[127].mxu0 }
 0x2d2   :  { %v3148_v8 = vadd.f32 %v4051_v29, %v3147_v43  ;;  %v3423_v56 = vadd.f32 %v5907_v49, %v3153_v21 }
 0x2d3   :  { %4679 = vtanh.f32 %v3421_v53  ;;  %v3156_v37 = vadd.f32 %v4053_v54, %v3957_v62  ;;  %v4672_v60 = vpop.eup %4671 }
 0x2d4   :  { %v3422_v34 = vadd.f32 %v5907_v49, %v3148_v8  ;;  %3547 = vst [vmem:[%s6298_s3 + $0x1d0] sm:$0xff] %v4672_v60  ;;  %4681 = vtanh.f32 %v3423_v56 }
 0x2d5   :  { %v4674_v26 = vpop.eup %4673  ;;  %v3424_v22 = vadd.f32 %v5907_v49, %v3156_v37 }
 0x2d6   :  { %v4676_v3 = vpop.eup %4675  ;;  %3545 = vst [vmem:[%s6298_s3 + $0x1c0] sm:$0xff] %v4674_v26  ;;  %4683 = vtanh.f32 %v3422_v34 }
 0x2d7   :  { %3548 = vst [vmem:[%s6298_s3 + $0x1d8] sm:$0xff] %v4676_v3  ;;  %4685 = vtanh.f32 %v3424_v22 }
 0x2d8   :  { %v4678_v19 = vpop.eup %4677 }
 0x2d9   :  { %3546 = vst [vmem:[%s6298_s3 + $0x1c8] sm:$0xff] %v4678_v19 }
 0x2dd   :  { %v4680_v2 = vpop.eup %4679 }
 0x2de   :  { %3549 = vst [vmem:[%s6298_s3 + $0x1e0] sm:$0xff] %v4680_v2  ;;  %v4682_v49 = vpop.eup %4681 }
 0x2df   :  { %3551 = vst [vmem:[%s6298_s3 + $0x1f0] sm:$0xff] %v4682_v49 }
 0x2e0   :  { %v4684_v4 = vpop.eup %4683 }
 0x2e1   :  { %v4686_v13 = vpop.eup %4685  ;;  %3550 = vst [vmem:[%s6298_s3 + $0x1e8] sm:$0xff] %v4684_v4 }
 0x2e2   :  { %3552 = vst [vmem:[%s6298_s3 + $0x1f8] sm:$0xff] %v4686_v13 }

</bundles_post_ra>
